<compile_context>
chip_gen: v7x
topology: tpu7x:2x2x1
jax: 0.10.0
libtpu: 0.0.40
codegen_flags: <defaults>
</compile_context>

<pallas_src>
import math

import numpy as np
import jax
import jax.numpy as jnp
from jax import lax
from jax.experimental import pallas as pl
from jax.experimental.pallas import tpu as pltpu


def upsample_conv_kernel(x_ref, sh_ref, sw_ref, w_ref, b_ref, o_ref,
                         xpad_ref, xcol_ref):
    # x_ref   : (1, C, H_in, W_in)  original (small) input block
    # sh_ref  : (H+4, H_in)         row upsample + pad(2) selection matrix (0/1)
    # sw_ref  : (W_in, W+4)         col upsample + pad(2) selection matrix (0/1)
    # w_ref   : (C, 25*C)           folded conv weights, [cout, (kh*5+kw)*C + cin]
    # b_ref   : (C, 1)              combined bias (b1 + b2)
    # o_ref   : (1, C, H*W)         lane-dense output block
    # xpad_ref: (C, H+4, W+4)       VMEM scratch: upsampled + zero-padded image
    # xcol_ref: (25*C, H*W)         VMEM scratch: im2col matrix
    C = x_ref.shape[1]
    Hp = sh_ref.shape[0]
    Wp = sw_ref.shape[1]
    H, W = Hp - 4, Wp - 4

    # 1) Fused nearest-neighbor upsample + zero pad(2), per channel, with two
    #    plain 2-D matmuls against static 0/1 selection matrices.
    for c in range(C):
        yc = jnp.dot(x_ref[0, c], sw_ref[...],
                     preferred_element_type=jnp.float32)          # (H_in, Wp)
        xpad_ref[c] = jnp.dot(sh_ref[...], yc,
                              preferred_element_type=jnp.float32)  # (Hp, Wp)

    # 2) im2col: xcol[(kh*5+kw)*C + cin, h*W + w] = xpad[cin, h+kh, w+kw].
    #    Built with small static-window stores (one padded row load per (h, kh),
    #    five shifted lane-windows stored per row) so the (h, w) flattening never
    #    requires a sublane->lane merging reshape.
    for h in range(H):
        for kh in range(5):
            row = xpad_ref[:, h + kh, :]                          # (C, Wp)
            for kw in range(5):
                t = kh * 5 + kw
                xcol_ref[t * C:(t + 1) * C, h * W:(h + 1) * W] = row[:, kw:kw + W]

    # 3) Single channel-mixing matmul (K = 25*C) + bias, lane-dense store.
    acc = jnp.dot(w_ref[...], xcol_ref[...],
                  preferred_element_type=jnp.float32)              # (C, H*W)
    o_ref[0] = (acc + b_ref[...]).astype(o_ref.dtype)


def upsample_forward(x_nchw, w1, b1, w2, b2, size):
    """Pallas implementation of UpSample.forward(x, size).

    x_nchw: (N, C, H_in, W_in) float32
    w1: (C, C, 3, 3), b1: (C,)   -- PyTorch OIHW layout
    w2: (C, C, 5, 5), b2: (C,)
    size: (H_out, W_out)
    returns: (N, C, H_out, W_out) float32
    """
    N, C, H_in, W_in = x_nchw.shape
    H, W = size
    Hp, Wp = H + 4, W + 4

    w1 = jnp.asarray(w1, jnp.float32)
    w2 = jnp.asarray(w2, jnp.float32)
    # Fold the 3x3 conv (pad=1) into the 5x5 conv (pad=2): the 3x3 taps coincide
    # with the centre of the 5x5 window on the same input.
    w_folded = w2 + jnp.pad(w1, ((0, 0), (0, 0), (1, 1), (1, 1)))
    # Pack to the matmul layout used in the kernel: (cout, kh, kw, cin) -> (C, 25*C).
    w_packed = jnp.transpose(w_folded, (0, 2, 3, 1)).reshape(C, 25 * C)
    b_packed = (jnp.asarray(b1, jnp.float32)
                + jnp.asarray(b2, jnp.float32)).reshape(C, 1)

    # Static 0/1 selection matrices implementing PyTorch mode='nearest'
    # (src = floor(dst * in / out)) plus the pad-2 zero border:
    #   xpad[c] = SH @ x[c] @ SW.
    hi = (np.arange(H) * H_in) // H
    wi = (np.arange(W) * W_in) // W
    sh = np.zeros((Hp, H_in), np.float32)
    sh[np.arange(H) + 2, hi] = 1.0
    sw = np.zeros((W_in, Wp), np.float32)
    sw[wi, np.arange(W) + 2] = 1.0

    out_flat = pl.pallas_call(
        upsample_conv_kernel,
        out_shape=jax.ShapeDtypeStruct((N, C, H * W), jnp.float32),
        grid_spec=pltpu.PrefetchScalarGridSpec(
            num_scalar_prefetch=0,
            grid=(N,),
            in_specs=[
                pl.BlockSpec((1, C, H_in, W_in), lambda n: (n, 0, 0, 0)),
                pl.BlockSpec((Hp, H_in), lambda n: (0, 0)),
                pl.BlockSpec((W_in, Wp), lambda n: (0, 0)),
                pl.BlockSpec((C, 25 * C), lambda n: (0, 0)),
                pl.BlockSpec((C, 1), lambda n: (0, 0)),
            ],
            out_specs=pl.BlockSpec((1, C, H * W), lambda n: (n, 0, 0)),
            scratch_shapes=[
                pltpu.VMEM((C, Hp, Wp), jnp.float32),
                pltpu.VMEM((25 * C, H * W), jnp.float32),
            ],
        ),
        compiler_params=pltpu.CompilerParams(
            dimension_semantics=("parallel",)),
    )(x_nchw.astype(jnp.float32), jnp.asarray(sh), jnp.asarray(sw),
      w_packed, b_packed)

    # (N, C, H*W) -> (N, C, H, W): pure metadata reshape, already NCHW.
    return out_flat.reshape(N, C, H, W)


def _reference(x_nchw, w1, b1, w2, b2, size):
    """Pure-JAX reference (nearest interp + two convs) for verification."""
    N, C, H_in, W_in = x_nchw.shape
    H, W = size
    hi = (jnp.arange(H) * H_in) // H
    wi = (jnp.arange(W) * W_in) // W
    x_up = x_nchw[:, :, hi[:, None], wi[None, :]]
    dn = ('NCHW', 'OIHW', 'NCHW')
    y1 = lax.conv_general_dilated(x_up, w1, (1, 1), [(1, 1), (1, 1)],
                                  dimension_numbers=dn) + b1[None, :, None, None]
    y2 = lax.conv_general_dilated(x_up, w2, (1, 1), [(2, 2), (2, 2)],
                                  dimension_numbers=dn) + b2[None, :, None, None]
    return y1 + y2


if __name__ == "__main__":
    C = 4
    key = jax.random.PRNGKey(0)
    k1, k2, k3, kx = jax.random.split(key, 4)

    # c1: xavier_uniform weight, zero bias (as in UpSample.initialize()).
    fan1 = C * 3 * 3
    bound1 = math.sqrt(6.0 / (fan1 + fan1))
    w1 = jax.random.uniform(k1, (C, C, 3, 3), jnp.float32, -bound1, bound1)
    b1 = jnp.zeros((C,), jnp.float32)

    # c2: PyTorch default init (kaiming-uniform-style bounds), deterministic here.
    fan2 = C * 5 * 5
    bound2 = 1.0 / math.sqrt(fan2)
    w2 = jax.random.uniform(k2, (C, C, 5, 5), jnp.float32, -bound2, bound2)
    b2 = jax.random.uniform(k3, (C,), jnp.float32, -bound2, bound2)

    x = jax.random.normal(kx, (2, C, 8, 8), jnp.float32)
    size = (16, 16)

    out = upsample_forward(x, w1, b1, w2, b2, size)
    out = jax.block_until_ready(out)

    ref = _reference(x, w1, b1, w2, b2, size)
    assert out.shape == (2, C, 16, 16)
    assert jnp.max(jnp.abs(out - ref)) < 2e-4

    print("KERNEL_OK")
</pallas_src>

<mosaic_0001>
module attributes {stable_mosaic.version = 11 : i64} {
  func.func @upsample_conv_kernel(%arg0: i32, %arg1: memref<1x4x8x8xf32, #tpu.memory_space<vmem>>, %arg2: memref<20x8xf32, #tpu.memory_space<vmem>>, %arg3: memref<8x20xf32, #tpu.memory_space<vmem>>, %arg4: memref<4x100xf32, #tpu.memory_space<vmem>>, %arg5: memref<4x1xf32, #tpu.memory_space<vmem>>, %arg6: memref<1x4x256xf32, #tpu.memory_space<vmem>>, %arg7: memref<4x20x20xf32, #tpu.memory_space<vmem>>, %arg8: memref<100x256xf32, #tpu.memory_space<vmem>>) attributes {dimension_semantics = [#tpu.dimension_semantics<parallel>], iteration_bounds = array<i64: 2>, scalar_prefetch = 0 : i64, scratch_operands = 2 : i64, tpu.core_type = #tpu.core_type<tc>, window_params = [{transform_indices = @transform_0, window_bounds = array<i64: 1, 4, 8, 8>}, {pipeline_mode = #tpu.pipeline_mode<synchronous>, transform_indices = @transform_1, window_bounds = array<i64: 20, 8>}, {pipeline_mode = #tpu.pipeline_mode<synchronous>, transform_indices = @transform_2, window_bounds = array<i64: 8, 20>}, {pipeline_mode = #tpu.pipeline_mode<synchronous>, transform_indices = @transform_3, window_bounds = array<i64: 4, 100>}, {pipeline_mode = #tpu.pipeline_mode<synchronous>, transform_indices = @transform_4, window_bounds = array<i64: 4, 1>}, {transform_indices = @transform_5, window_bounds = array<i64: 1, 4, 256>}]} {
    %c0 = arith.constant 0 : index
    %c0_0 = arith.constant 0 : index
    %c0_1 = arith.constant 0 : index
    %c0_2 = arith.constant 0 : index
    %0 = vector.load %arg1[%c0, %c0_0, %c0_1, %c0_2] : memref<1x4x8x8xf32, #tpu.memory_space<vmem>>, vector<1x1x8x8xf32>
    %1 = vector.shape_cast %0 : vector<1x1x8x8xf32> to vector<8x8xf32>
    %c0_3 = arith.constant 0 : index
    %c0_4 = arith.constant 0 : index
    %2 = vector.load %arg3[%c0_3, %c0_4] : memref<8x20xf32, #tpu.memory_space<vmem>>, vector<8x20xf32>
    %cst = arith.constant dense<0.000000e+00> : vector<8x20xf32>
    %3 = tpu.matmul %1, %2, %cst {dimension_numbers = #tpu.dot_dimension_numbers<[1], [0], [0], [1], [0, 0, 1, 1], [], []>} : vector<8x8xf32>, vector<8x20xf32>, vector<8x20xf32> -> vector<8x20xf32>
    %c0_5 = arith.constant 0 : index
    %c0_6 = arith.constant 0 : index
    %4 = vector.load %arg2[%c0_5, %c0_6] : memref<20x8xf32, #tpu.memory_space<vmem>>, vector<20x8xf32>
    %cst_7 = arith.constant dense<0.000000e+00> : vector<20x20xf32>
    %5 = tpu.matmul %4, %3, %cst_7 {dimension_numbers = #tpu.dot_dimension_numbers<[1], [0], [0], [1], [0, 0, 1, 1], [], []>} : vector<20x8xf32>, vector<8x20xf32>, vector<20x20xf32> -> vector<20x20xf32>
    %c0_8 = arith.constant 0 : index
    %c0_9 = arith.constant 0 : index
    %c0_10 = arith.constant 0 : index
    %6 = vector.load %arg7[%c0_8, %c0_9, %c0_10] : memref<4x20x20xf32, #tpu.memory_space<vmem>>, vector<1x20x20xf32>
    %7 = vector.shape_cast %6 : vector<1x20x20xf32> to vector<20x20xf32>
    %8 = vector.shape_cast %5 : vector<20x20xf32> to vector<1x20x20xf32>
    tpu.vector_store %arg7[%c0_8, %c0_9, %c0_10], %8 {strides = array<i32>} : memref<4x20x20xf32, #tpu.memory_space<vmem>>, vector<1x20x20xf32>,
    %c0_11 = arith.constant 0 : index
    %c1 = arith.constant 1 : index
    %c0_12 = arith.constant 0 : index
    %c0_13 = arith.constant 0 : index
    %9 = vector.load %arg1[%c0_11, %c1, %c0_12, %c0_13] : memref<1x4x8x8xf32, #tpu.memory_space<vmem>>, vector<1x1x8x8xf32>
    %10 = vector.shape_cast %9 : vector<1x1x8x8xf32> to vector<8x8xf32>
    %c0_14 = arith.constant 0 : index
    %c0_15 = arith.constant 0 : index
    %11 = vector.load %arg3[%c0_14, %c0_15] : memref<8x20xf32, #tpu.memory_space<vmem>>, vector<8x20xf32>
    %cst_16 = arith.constant dense<0.000000e+00> : vector<8x20xf32>
    %12 = tpu.matmul %10, %11, %cst_16 {dimension_numbers = #tpu.dot_dimension_numbers<[1], [0], [0], [1], [0, 0, 1, 1], [], []>} : vector<8x8xf32>, vector<8x20xf32>, vector<8x20xf32> -> vector<8x20xf32>
    %c0_17 = arith.constant 0 : index
    %c0_18 = arith.constant 0 : index
    %13 = vector.load %arg2[%c0_17, %c0_18] : memref<20x8xf32, #tpu.memory_space<vmem>>, vector<20x8xf32>
    %cst_19 = arith.constant dense<0.000000e+00> : vector<20x20xf32>
    %14 = tpu.matmul %13, %12, %cst_19 {dimension_numbers = #tpu.dot_dimension_numbers<[1], [0], [0], [1], [0, 0, 1, 1], [], []>} : vector<20x8xf32>, vector<8x20xf32>, vector<20x20xf32> -> vector<20x20xf32>
    %c1_20 = arith.constant 1 : index
    %c0_21 = arith.constant 0 : index
    %c0_22 = arith.constant 0 : index
    %15 = vector.load %arg7[%c1_20, %c0_21, %c0_22] : memref<4x20x20xf32, #tpu.memory_space<vmem>>, vector<1x20x20xf32>
    %16 = vector.shape_cast %15 : vector<1x20x20xf32> to vector<20x20xf32>
    %17 = vector.shape_cast %14 : vector<20x20xf32> to vector<1x20x20xf32>
    tpu.vector_store %arg7[%c1_20, %c0_21, %c0_22], %17 {strides = array<i32>} : memref<4x20x20xf32, #tpu.memory_space<vmem>>, vector<1x20x20xf32>,
    %c0_23 = arith.constant 0 : index
    %c2 = arith.constant 2 : index
    %c0_24 = arith.constant 0 : index
    %c0_25 = arith.constant 0 : index
    %18 = vector.load %arg1[%c0_23, %c2, %c0_24, %c0_25] : memref<1x4x8x8xf32, #tpu.memory_space<vmem>>, vector<1x1x8x8xf32>
    %19 = vector.shape_cast %18 : vector<1x1x8x8xf32> to vector<8x8xf32>
    %c0_26 = arith.constant 0 : index
    %c0_27 = arith.constant 0 : index
    %20 = vector.load %arg3[%c0_26, %c0_27] : memref<8x20xf32, #tpu.memory_space<vmem>>, vector<8x20xf32>
    %cst_28 = arith.constant dense<0.000000e+00> : vector<8x20xf32>
    %21 = tpu.matmul %19, %20, %cst_28 {dimension_numbers = #tpu.dot_dimension_numbers<[1], [0], [0], [1], [0, 0, 1, 1], [], []>} : vector<8x8xf32>, vector<8x20xf32>, vector<8x20xf32> -> vector<8x20xf32>
    %c0_29 = arith.constant 0 : index
    %c0_30 = arith.constant 0 : index
    %22 = vector.load %arg2[%c0_29, %c0_30] : memref<20x8xf32, #tpu.memory_space<vmem>>, vector<20x8xf32>
    %cst_31 = arith.constant dense<0.000000e+00> : vector<20x20xf32>
    %23 = tpu.matmul %22, %21, %cst_31 {dimension_numbers = #tpu.dot_dimension_numbers<[1], [0], [0], [1], [0, 0, 1, 1], [], []>} : vector<20x8xf32>, vector<8x20xf32>, vector<20x20xf32> -> vector<20x20xf32>
    %c2_32 = arith.constant 2 : index
    %c0_33 = arith.constant 0 : index
    %c0_34 = arith.constant 0 : index
    %24 = vector.load %arg7[%c2_32, %c0_33, %c0_34] : memref<4x20x20xf32, #tpu.memory_space<vmem>>, vector<1x20x20xf32>
    %25 = vector.shape_cast %24 : vector<1x20x20xf32> to vector<20x20xf32>
    %26 = vector.shape_cast %23 : vector<20x20xf32> to vector<1x20x20xf32>
    tpu.vector_store %arg7[%c2_32, %c0_33, %c0_34], %26 {strides = array<i32>} : memref<4x20x20xf32, #tpu.memory_space<vmem>>, vector<1x20x20xf32>,
    %c0_35 = arith.constant 0 : index
    %c3 = arith.constant 3 : index
    %c0_36 = arith.constant 0 : index
    %c0_37 = arith.constant 0 : index
    %27 = vector.load %arg1[%c0_35, %c3, %c0_36, %c0_37] : memref<1x4x8x8xf32, #tpu.memory_space<vmem>>, vector<1x1x8x8xf32>
    %28 = vector.shape_cast %27 : vector<1x1x8x8xf32> to vector<8x8xf32>
    %c0_38 = arith.constant 0 : index
    %c0_39 = arith.constant 0 : index
    %29 = vector.load %arg3[%c0_38, %c0_39] : memref<8x20xf32, #tpu.memory_space<vmem>>, vector<8x20xf32>
    %cst_40 = arith.constant dense<0.000000e+00> : vector<8x20xf32>
    %30 = tpu.matmul %28, %29, %cst_40 {dimension_numbers = #tpu.dot_dimension_numbers<[1], [0], [0], [1], [0, 0, 1, 1], [], []>} : vector<8x8xf32>, vector<8x20xf32>, vector<8x20xf32> -> vector<8x20xf32>
    %c0_41 = arith.constant 0 : index
    %c0_42 = arith.constant 0 : index
    %31 = vector.load %arg2[%c0_41, %c0_42] : memref<20x8xf32, #tpu.memory_space<vmem>>, vector<20x8xf32>
    %cst_43 = arith.constant dense<0.000000e+00> : vector<20x20xf32>
    %32 = tpu.matmul %31, %30, %cst_43 {dimension_numbers = #tpu.dot_dimension_numbers<[1], [0], [0], [1], [0, 0, 1, 1], [], []>} : vector<20x8xf32>, vector<8x20xf32>, vector<20x20xf32> -> vector<20x20xf32>
    %c3_44 = arith.constant 3 : index
    %c0_45 = arith.constant 0 : index
    %c0_46 = arith.constant 0 : index
    %33 = vector.load %arg7[%c3_44, %c0_45, %c0_46] : memref<4x20x20xf32, #tpu.memory_space<vmem>>, vector<1x20x20xf32>
    %34 = vector.shape_cast %33 : vector<1x20x20xf32> to vector<20x20xf32>
    %35 = vector.shape_cast %32 : vector<20x20xf32> to vector<1x20x20xf32>
    tpu.vector_store %arg7[%c3_44, %c0_45, %c0_46], %35 {strides = array<i32>} : memref<4x20x20xf32, #tpu.memory_space<vmem>>, vector<1x20x20xf32>,
    %c0_47 = arith.constant 0 : index
    %c0_48 = arith.constant 0 : index
    %c0_49 = arith.constant 0 : index
    %36 = vector.load %arg7[%c0_47, %c0_48, %c0_49] : memref<4x20x20xf32, #tpu.memory_space<vmem>>, vector<4x1x20xf32>
    %37 = vector.shape_cast %36 : vector<4x1x20xf32> to vector<4x20xf32>
    %38 = vector.extract_strided_slice %37 {offsets = [0, 0], sizes = [4, 16], strides = [1, 1]} : vector<4x20xf32> to vector<4x16xf32>
    %c0_50 = arith.constant 0 : index
    %c0_51 = arith.constant 0 : index
    %39 = vector.load %arg8[%c0_50, %c0_51] : memref<100x256xf32, #tpu.memory_space<vmem>>, vector<4x16xf32>
    tpu.vector_store %arg8[%c0_50, %c0_51], %38 {strides = array<i32>} : memref<100x256xf32, #tpu.memory_space<vmem>>, vector<4x16xf32>,
    %40 = vector.extract_strided_slice %37 {offsets = [0, 1], sizes = [4, 16], strides = [1, 1]} : vector<4x20xf32> to vector<4x16xf32>
    %c4 = arith.constant 4 : index
    %c0_52 = arith.constant 0 : index
    %41 = vector.load %arg8[%c4, %c0_52] : memref<100x256xf32, #tpu.memory_space<vmem>>, vector<4x16xf32>
    tpu.vector_store %arg8[%c4, %c0_52], %40 {strides = array<i32>} : memref<100x256xf32, #tpu.memory_space<vmem>>, vector<4x16xf32>,
    %42 = vector.extract_strided_slice %37 {offsets = [0, 2], sizes = [4, 16], strides = [1, 1]} : vector<4x20xf32> to vector<4x16xf32>
    %c8 = arith.constant 8 : index
    %c0_53 = arith.constant 0 : index
    %43 = vector.load %arg8[%c8, %c0_53] : memref<100x256xf32, #tpu.memory_space<vmem>>, vector<4x16xf32>
    tpu.vector_store %arg8[%c8, %c0_53], %42 {strides = array<i32>} : memref<100x256xf32, #tpu.memory_space<vmem>>, vector<4x16xf32>,
    %44 = vector.extract_strided_slice %37 {offsets = [0, 3], sizes = [4, 16], strides = [1, 1]} : vector<4x20xf32> to vector<4x16xf32>
    %c12 = arith.constant 12 : index
    %c0_54 = arith.constant 0 : index
    %45 = vector.load %arg8[%c12, %c0_54] : memref<100x256xf32, #tpu.memory_space<vmem>>, vector<4x16xf32>
    tpu.vector_store %arg8[%c12, %c0_54], %44 {strides = array<i32>} : memref<100x256xf32, #tpu.memory_space<vmem>>, vector<4x16xf32>,
    %46 = vector.extract_strided_slice %37 {offsets = [0, 4], sizes = [4, 16], strides = [1, 1]} : vector<4x20xf32> to vector<4x16xf32>
    %c16 = arith.constant 16 : index
    %c0_55 = arith.constant 0 : index
    %47 = vector.load %arg8[%c16, %c0_55] : memref<100x256xf32, #tpu.memory_space<vmem>>, vector<4x16xf32>
    tpu.vector_store %arg8[%c16, %c0_55], %46 {strides = array<i32>} : memref<100x256xf32, #tpu.memory_space<vmem>>, vector<4x16xf32>,
    %c0_56 = arith.constant 0 : index
    %c1_57 = arith.constant 1 : index
    %c0_58 = arith.constant 0 : index
    %48 = vector.load %arg7[%c0_56, %c1_57, %c0_58] : memref<4x20x20xf32, #tpu.memory_space<vmem>>, vector<4x1x20xf32>
    %49 = vector.shape_cast %48 : vector<4x1x20xf32> to vector<4x20xf32>
    %50 = vector.extract_strided_slice %49 {offsets = [0, 0], sizes = [4, 16], strides = [1, 1]} : vector<4x20xf32> to vector<4x16xf32>
    %c20 = arith.constant 20 : index
    %c0_59 = arith.constant 0 : index
    %51 = vector.load %arg8[%c20, %c0_59] : memref<100x256xf32, #tpu.memory_space<vmem>>, vector<4x16xf32>
    tpu.vector_store %arg8[%c20, %c0_59], %50 {strides = array<i32>} : memref<100x256xf32, #tpu.memory_space<vmem>>, vector<4x16xf32>,
    %52 = vector.extract_strided_slice %49 {offsets = [0, 1], sizes = [4, 16], strides = [1, 1]} : vector<4x20xf32> to vector<4x16xf32>
    %c24 = arith.constant 24 : index
    %c0_60 = arith.constant 0 : index
    %53 = vector.load %arg8[%c24, %c0_60] : memref<100x256xf32, #tpu.memory_space<vmem>>, vector<4x16xf32>
    tpu.vector_store %arg8[%c24, %c0_60], %52 {strides = array<i32>} : memref<100x256xf32, #tpu.memory_space<vmem>>, vector<4x16xf32>,
    %54 = vector.extract_strided_slice %49 {offsets = [0, 2], sizes = [4, 16], strides = [1, 1]} : vector<4x20xf32> to vector<4x16xf32>
    %c28 = arith.constant 28 : index
    %c0_61 = arith.constant 0 : index
    %55 = vector.load %arg8[%c28, %c0_61] : memref<100x256xf32, #tpu.memory_space<vmem>>, vector<4x16xf32>
    tpu.vector_store %arg8[%c28, %c0_61], %54 {strides = array<i32>} : memref<100x256xf32, #tpu.memory_space<vmem>>, vector<4x16xf32>,
    %56 = vector.extract_strided_slice %49 {offsets = [0, 3], sizes = [4, 16], strides = [1, 1]} : vector<4x20xf32> to vector<4x16xf32>
    %c32 = arith.constant 32 : index
    %c0_62 = arith.constant 0 : index
    %57 = vector.load %arg8[%c32, %c0_62] : memref<100x256xf32, #tpu.memory_space<vmem>>, vector<4x16xf32>
    tpu.vector_store %arg8[%c32, %c0_62], %56 {strides = array<i32>} : memref<100x256xf32, #tpu.memory_space<vmem>>, vector<4x16xf32>,
    %58 = vector.extract_strided_slice %49 {offsets = [0, 4], sizes = [4, 16], strides = [1, 1]} : vector<4x20xf32> to vector<4x16xf32>
    %c36 = arith.constant 36 : index
    %c0_63 = arith.constant 0 : index
    %59 = vector.load %arg8[%c36, %c0_63] : memref<100x256xf32, #tpu.memory_space<vmem>>, vector<4x16xf32>
    tpu.vector_store %arg8[%c36, %c0_63], %58 {strides = array<i32>} : memref<100x256xf32, #tpu.memory_space<vmem>>, vector<4x16xf32>,
    %c0_64 = arith.constant 0 : index
    %c2_65 = arith.constant 2 : index
    %c0_66 = arith.constant 0 : index
    %60 = vector.load %arg7[%c0_64, %c2_65, %c0_66] : memref<4x20x20xf32, #tpu.memory_space<vmem>>, vector<4x1x20xf32>
    %61 = vector.shape_cast %60 : vector<4x1x20xf32> to vector<4x20xf32>
    %62 = vector.extract_strided_slice %61 {offsets = [0, 0], sizes = [4, 16], strides = [1, 1]} : vector<4x20xf32> to vector<4x16xf32>
    %c40 = arith.constant 40 : index
    %c0_67 = arith.constant 0 : index
    %63 = vector.load %arg8[%c40, %c0_67] : memref<100x256xf32, #tpu.memory_space<vmem>>, vector<4x16xf32>
    tpu.vector_store %arg8[%c40, %c0_67], %62 {strides = array<i32>} : memref<100x256xf32, #tpu.memory_space<vmem>>, vector<4x16xf32>,
    %64 = vector.extract_strided_slice %61 {offsets = [0, 1], sizes = [4, 16], strides = [1, 1]} : vector<4x20xf32> to vector<4x16xf32>
    %c44 = arith.constant 44 : index
    %c0_68 = arith.constant 0 : index
    %65 = vector.load %arg8[%c44, %c0_68] : memref<100x256xf32, #tpu.memory_space<vmem>>, vector<4x16xf32>
    tpu.vector_store %arg8[%c44, %c0_68], %64 {strides = array<i32>} : memref<100x256xf32, #tpu.memory_space<vmem>>, vector<4x16xf32>,
    %66 = vector.extract_strided_slice %61 {offsets = [0, 2], sizes = [4, 16], strides = [1, 1]} : vector<4x20xf32> to vector<4x16xf32>
    %c48 = arith.constant 48 : index
    %c0_69 = arith.constant 0 : index
    %67 = vector.load %arg8[%c48, %c0_69] : memref<100x256xf32, #tpu.memory_space<vmem>>, vector<4x16xf32>
    tpu.vector_store %arg8[%c48, %c0_69], %66 {strides = array<i32>} : memref<100x256xf32, #tpu.memory_space<vmem>>, vector<4x16xf32>,
    %68 = vector.extract_strided_slice %61 {offsets = [0, 3], sizes = [4, 16], strides = [1, 1]} : vector<4x20xf32> to vector<4x16xf32>
    %c52 = arith.constant 52 : index
    %c0_70 = arith.constant 0 : index
    %69 = vector.load %arg8[%c52, %c0_70] : memref<100x256xf32, #tpu.memory_space<vmem>>, vector<4x16xf32>
    tpu.vector_store %arg8[%c52, %c0_70], %68 {strides = array<i32>} : memref<100x256xf32, #tpu.memory_space<vmem>>, vector<4x16xf32>,
    %70 = vector.extract_strided_slice %61 {offsets = [0, 4], sizes = [4, 16], strides = [1, 1]} : vector<4x20xf32> to vector<4x16xf32>
    %c56 = arith.constant 56 : index
    %c0_71 = arith.constant 0 : index
    %71 = vector.load %arg8[%c56, %c0_71] : memref<100x256xf32, #tpu.memory_space<vmem>>, vector<4x16xf32>
    tpu.vector_store %arg8[%c56, %c0_71], %70 {strides = array<i32>} : memref<100x256xf32, #tpu.memory_space<vmem>>, vector<4x16xf32>,
    %c0_72 = arith.constant 0 : index
    %c3_73 = arith.constant 3 : index
    %c0_74 = arith.constant 0 : index
    %72 = vector.load %arg7[%c0_72, %c3_73, %c0_74] : memref<4x20x20xf32, #tpu.memory_space<vmem>>, vector<4x1x20xf32>
    %73 = vector.shape_cast %72 : vector<4x1x20xf32> to vector<4x20xf32>
    %74 = vector.extract_strided_slice %73 {offsets = [0, 0], sizes = [4, 16], strides = [1, 1]} : vector<4x20xf32> to vector<4x16xf32>
    %c60 = arith.constant 60 : index
    %c0_75 = arith.constant 0 : index
    %75 = vector.load %arg8[%c60, %c0_75] : memref<100x256xf32, #tpu.memory_space<vmem>>, vector<4x16xf32>
    tpu.vector_store %arg8[%c60, %c0_75], %74 {strides = array<i32>} : memref<100x256xf32, #tpu.memory_space<vmem>>, vector<4x16xf32>,
    %76 = vector.extract_strided_slice %73 {offsets = [0, 1], sizes = [4, 16], strides = [1, 1]} : vector<4x20xf32> to vector<4x16xf32>
    %c64 = arith.constant 64 : index
    %c0_76 = arith.constant 0 : index
    %77 = vector.load %arg8[%c64, %c0_76] : memref<100x256xf32, #tpu.memory_space<vmem>>, vector<4x16xf32>
    tpu.vector_store %arg8[%c64, %c0_76], %76 {strides = array<i32>} : memref<100x256xf32, #tpu.memory_space<vmem>>, vector<4x16xf32>,
    %78 = vector.extract_strided_slice %73 {offsets = [0, 2], sizes = [4, 16], strides = [1, 1]} : vector<4x20xf32> to vector<4x16xf32>
    %c68 = arith.constant 68 : index
    %c0_77 = arith.constant 0 : index
    %79 = vector.load %arg8[%c68, %c0_77] : memref<100x256xf32, #tpu.memory_space<vmem>>, vector<4x16xf32>
    tpu.vector_store %arg8[%c68, %c0_77], %78 {strides = array<i32>} : memref<100x256xf32, #tpu.memory_space<vmem>>, vector<4x16xf32>,
    %80 = vector.extract_strided_slice %73 {offsets = [0, 3], sizes = [4, 16], strides = [1, 1]} : vector<4x20xf32> to vector<4x16xf32>
    %c72 = arith.constant 72 : index
    %c0_78 = arith.constant 0 : index
    %81 = vector.load %arg8[%c72, %c0_78] : memref<100x256xf32, #tpu.memory_space<vmem>>, vector<4x16xf32>
    tpu.vector_store %arg8[%c72, %c0_78], %80 {strides = array<i32>} : memref<100x256xf32, #tpu.memory_space<vmem>>, vector<4x16xf32>,
    %82 = vector.extract_strided_slice %73 {offsets = [0, 4], sizes = [4, 16], strides = [1, 1]} : vector<4x20xf32> to vector<4x16xf32>
    %c76 = arith.constant 76 : index
    %c0_79 = arith.constant 0 : index
    %83 = vector.load %arg8[%c76, %c0_79] : memref<100x256xf32, #tpu.memory_space<vmem>>, vector<4x16xf32>
    tpu.vector_store %arg8[%c76, %c0_79], %82 {strides = array<i32>} : memref<100x256xf32, #tpu.memory_space<vmem>>, vector<4x16xf32>,
    %c0_80 = arith.constant 0 : index
    %c4_81 = arith.constant 4 : index
    %c0_82 = arith.constant 0 : index
    %84 = vector.load %arg7[%c0_80, %c4_81, %c0_82] : memref<4x20x20xf32, #tpu.memory_space<vmem>>, vector<4x1x20xf32>
    %85 = vector.shape_cast %84 : vector<4x1x20xf32> to vector<4x20xf32>
    %86 = vector.extract_strided_slice %85 {offsets = [0, 0], sizes = [4, 16], strides = [1, 1]} : vector<4x20xf32> to vector<4x16xf32>
    %c80 = arith.constant 80 : index
    %c0_83 = arith.constant 0 : index
    %87 = vector.load %arg8[%c80, %c0_83] : memref<100x256xf32, #tpu.memory_space<vmem>>, vector<4x16xf32>
    tpu.vector_store %arg8[%c80, %c0_83], %86 {strides = array<i32>} : memref<100x256xf32, #tpu.memory_space<vmem>>, vector<4x16xf32>,
    %88 = vector.extract_strided_slice %85 {offsets = [0, 1], sizes = [4, 16], strides = [1, 1]} : vector<4x20xf32> to vector<4x16xf32>
    %c84 = arith.constant 84 : index
    %c0_84 = arith.constant 0 : index
    %89 = vector.load %arg8[%c84, %c0_84] : memref<100x256xf32, #tpu.memory_space<vmem>>, vector<4x16xf32>
    tpu.vector_store %arg8[%c84, %c0_84], %88 {strides = array<i32>} : memref<100x256xf32, #tpu.memory_space<vmem>>, vector<4x16xf32>,
    %90 = vector.extract_strided_slice %85 {offsets = [0, 2], sizes = [4, 16], strides = [1, 1]} : vector<4x20xf32> to vector<4x16xf32>
    %c88 = arith.constant 88 : index
    %c0_85 = arith.constant 0 : index
    %91 = vector.load %arg8[%c88, %c0_85] : memref<100x256xf32, #tpu.memory_space<vmem>>, vector<4x16xf32>
    tpu.vector_store %arg8[%c88, %c0_85], %90 {strides = array<i32>} : memref<100x256xf32, #tpu.memory_space<vmem>>, vector<4x16xf32>,
    %92 = vector.extract_strided_slice %85 {offsets = [0, 3], sizes = [4, 16], strides = [1, 1]} : vector<4x20xf32> to vector<4x16xf32>
    %c92 = arith.constant 92 : index
    %c0_86 = arith.constant 0 : index
    %93 = vector.load %arg8[%c92, %c0_86] : memref<100x256xf32, #tpu.memory_space<vmem>>, vector<4x16xf32>
    tpu.vector_store %arg8[%c92, %c0_86], %92 {strides = array<i32>} : memref<100x256xf32, #tpu.memory_space<vmem>>, vector<4x16xf32>,
    %94 = vector.extract_strided_slice %85 {offsets = [0, 4], sizes = [4, 16], strides = [1, 1]} : vector<4x20xf32> to vector<4x16xf32>
    %c96 = arith.constant 96 : index
    %c0_87 = arith.constant 0 : index
    %95 = vector.load %arg8[%c96, %c0_87] : memref<100x256xf32, #tpu.memory_space<vmem>>, vector<4x16xf32>
    tpu.vector_store %arg8[%c96, %c0_87], %94 {strides = array<i32>} : memref<100x256xf32, #tpu.memory_space<vmem>>, vector<4x16xf32>,
    %c0_88 = arith.constant 0 : index
    %c1_89 = arith.constant 1 : index
    %c0_90 = arith.constant 0 : index
    %96 = vector.load %arg7[%c0_88, %c1_89, %c0_90] : memref<4x20x20xf32, #tpu.memory_space<vmem>>, vector<4x1x20xf32>
    %97 = vector.shape_cast %96 : vector<4x1x20xf32> to vector<4x20xf32>
    %98 = vector.extract_strided_slice %97 {offsets = [0, 0], sizes = [4, 16], strides = [1, 1]} : vector<4x20xf32> to vector<4x16xf32>
    %c0_91 = arith.constant 0 : index
    %c16_92 = arith.constant 16 : index
    %99 = vector.load %arg8[%c0_91, %c16_92] : memref<100x256xf32, #tpu.memory_space<vmem>>, vector<4x16xf32>
    tpu.vector_store %arg8[%c0_91, %c16_92], %98 {strides = array<i32>} : memref<100x256xf32, #tpu.memory_space<vmem>>, vector<4x16xf32>,
    %100 = vector.extract_strided_slice %97 {offsets = [0, 1], sizes = [4, 16], strides = [1, 1]} : vector<4x20xf32> to vector<4x16xf32>
    %c4_93 = arith.constant 4 : index
    %c16_94 = arith.constant 16 : index
    %101 = vector.load %arg8[%c4_93, %c16_94] : memref<100x256xf32, #tpu.memory_space<vmem>>, vector<4x16xf32>
    tpu.vector_store %arg8[%c4_93, %c16_94], %100 {strides = array<i32>} : memref<100x256xf32, #tpu.memory_space<vmem>>, vector<4x16xf32>,
    %102 = vector.extract_strided_slice %97 {offsets = [0, 2], sizes = [4, 16], strides = [1, 1]} : vector<4x20xf32> to vector<4x16xf32>
    %c8_95 = arith.constant 8 : index
    %c16_96 = arith.constant 16 : index
    %103 = vector.load %arg8[%c8_95, %c16_96] : memref<100x256xf32, #tpu.memory_space<vmem>>, vector<4x16xf32>
    tpu.vector_store %arg8[%c8_95, %c16_96], %102 {strides = array<i32>} : memref<100x256xf32, #tpu.memory_space<vmem>>, vector<4x16xf32>,
    %104 = vector.extract_strided_slice %97 {offsets = [0, 3], sizes = [4, 16], strides = [1, 1]} : vector<4x20xf32> to vector<4x16xf32>
    %c12_97 = arith.constant 12 : index
    %c16_98 = arith.constant 16 : index
    %105 = vector.load %arg8[%c12_97, %c16_98] : memref<100x256xf32, #tpu.memory_space<vmem>>, vector<4x16xf32>
    tpu.vector_store %arg8[%c12_97, %c16_98], %104 {strides = array<i32>} : memref<100x256xf32, #tpu.memory_space<vmem>>, vector<4x16xf32>,
    %106 = vector.extract_strided_slice %97 {offsets = [0, 4], sizes = [4, 16], strides = [1, 1]} : vector<4x20xf32> to vector<4x16xf32>
    %c16_99 = arith.constant 16 : index
    %c16_100 = arith.constant 16 : index
    %107 = vector.load %arg8[%c16_99, %c16_100] : memref<100x256xf32, #tpu.memory_space<vmem>>, vector<4x16xf32>
    tpu.vector_store %arg8[%c16_99, %c16_100], %106 {strides = array<i32>} : memref<100x256xf32, #tpu.memory_space<vmem>>, vector<4x16xf32>,
    %c0_101 = arith.constant 0 : index
    %c2_102 = arith.constant 2 : index
    %c0_103 = arith.constant 0 : index
    %108 = vector.load %arg7[%c0_101, %c2_102, %c0_103] : memref<4x20x20xf32, #tpu.memory_space<vmem>>, vector<4x1x20xf32>
    %109 = vector.shape_cast %108 : vector<4x1x20xf32> to vector<4x20xf32>
    %110 = vector.extract_strided_slice %109 {offsets = [0, 0], sizes = [4, 16], strides = [1, 1]} : vector<4x20xf32> to vector<4x16xf32>
    %c20_104 = arith.constant 20 : index
    %c16_105 = arith.constant 16 : index
    %111 = vector.load %arg8[%c20_104, %c16_105] : memref<100x256xf32, #tpu.memory_space<vmem>>, vector<4x16xf32>
    tpu.vector_store %arg8[%c20_104, %c16_105], %110 {strides = array<i32>} : memref<100x256xf32, #tpu.memory_space<vmem>>, vector<4x16xf32>,
    %112 = vector.extract_strided_slice %109 {offsets = [0, 1], sizes = [4, 16], strides = [1, 1]} : vector<4x20xf32> to vector<4x16xf32>
    %c24_106 = arith.constant 24 : index
    %c16_107 = arith.constant 16 : index
    %113 = vector.load %arg8[%c24_106, %c16_107] : memref<100x256xf32, #tpu.memory_space<vmem>>, vector<4x16xf32>
    tpu.vector_store %arg8[%c24_106, %c16_107], %112 {strides = array<i32>} : memref<100x256xf32, #tpu.memory_space<vmem>>, vector<4x16xf32>,
    %114 = vector.extract_strided_slice %109 {offsets = [0, 2], sizes = [4, 16], strides = [1, 1]} : vector<4x20xf32> to vector<4x16xf32>
    %c28_108 = arith.constant 28 : index
    %c16_109 = arith.constant 16 : index
    %115 = vector.load %arg8[%c28_108, %c16_109] : memref<100x256xf32, #tpu.memory_space<vmem>>, vector<4x16xf32>
    tpu.vector_store %arg8[%c28_108, %c16_109], %114 {strides = array<i32>} : memref<100x256xf32, #tpu.memory_space<vmem>>, vector<4x16xf32>,
    %116 = vector.extract_strided_slice %109 {offsets = [0, 3], sizes = [4, 16], strides = [1, 1]} : vector<4x20xf32> to vector<4x16xf32>
    %c32_110 = arith.constant 32 : index
    %c16_111 = arith.constant 16 : index
    %117 = vector.load %arg8[%c32_110, %c16_111] : memref<100x256xf32, #tpu.memory_space<vmem>>, vector<4x16xf32>
    tpu.vector_store %arg8[%c32_110, %c16_111], %116 {strides = array<i32>} : memref<100x256xf32, #tpu.memory_space<vmem>>, vector<4x16xf32>,
    %118 = vector.extract_strided_slice %109 {offsets = [0, 4], sizes = [4, 16], strides = [1, 1]} : vector<4x20xf32> to vector<4x16xf32>
    %c36_112 = arith.constant 36 : index
    %c16_113 = arith.constant 16 : index
    %119 = vector.load %arg8[%c36_112, %c16_113] : memref<100x256xf32, #tpu.memory_space<vmem>>, vector<4x16xf32>
    tpu.vector_store %arg8[%c36_112, %c16_113], %118 {strides = array<i32>} : memref<100x256xf32, #tpu.memory_space<vmem>>, vector<4x16xf32>,
    %c0_114 = arith.constant 0 : index
    %c3_115 = arith.constant 3 : index
    %c0_116 = arith.constant 0 : index
    %120 = vector.load %arg7[%c0_114, %c3_115, %c0_116] : memref<4x20x20xf32, #tpu.memory_space<vmem>>, vector<4x1x20xf32>
    %121 = vector.shape_cast %120 : vector<4x1x20xf32> to vector<4x20xf32>
    %122 = vector.extract_strided_slice %121 {offsets = [0, 0], sizes = [4, 16], strides = [1, 1]} : vector<4x20xf32> to vector<4x16xf32>
    %c40_117 = arith.constant 40 : index
    %c16_118 = arith.constant 16 : index
    %123 = vector.load %arg8[%c40_117, %c16_118] : memref<100x256xf32, #tpu.memory_space<vmem>>, vector<4x16xf32>
    tpu.vector_store %arg8[%c40_117, %c16_118], %122 {strides = array<i32>} : memref<100x256xf32, #tpu.memory_space<vmem>>, vector<4x16xf32>,
    %124 = vector.extract_strided_slice %121 {offsets = [0, 1], sizes = [4, 16], strides = [1, 1]} : vector<4x20xf32> to vector<4x16xf32>
    %c44_119 = arith.constant 44 : index
    %c16_120 = arith.constant 16 : index
    %125 = vector.load %arg8[%c44_119, %c16_120] : memref<100x256xf32, #tpu.memory_space<vmem>>, vector<4x16xf32>
    tpu.vector_store %arg8[%c44_119, %c16_120], %124 {strides = array<i32>} : memref<100x256xf32, #tpu.memory_space<vmem>>, vector<4x16xf32>,
    %126 = vector.extract_strided_slice %121 {offsets = [0, 2], sizes = [4, 16], strides = [1, 1]} : vector<4x20xf32> to vector<4x16xf32>
    %c48_121 = arith.constant 48 : index
    %c16_122 = arith.constant 16 : index
    %127 = vector.load %arg8[%c48_121, %c16_122] : memref<100x256xf32, #tpu.memory_space<vmem>>, vector<4x16xf32>
    tpu.vector_store %arg8[%c48_121, %c16_122], %126 {strides = array<i32>} : memref<100x256xf32, #tpu.memory_space<vmem>>, vector<4x16xf32>,
    %128 = vector.extract_strided_slice %121 {offsets = [0, 3], sizes = [4, 16], strides = [1, 1]} : vector<4x20xf32> to vector<4x16xf32>
    %c52_123 = arith.constant 52 : index
    %c16_124 = arith.constant 16 : index
    %129 = vector.load %arg8[%c52_123, %c16_124] : memref<100x256xf32, #tpu.memory_space<vmem>>, vector<4x16xf32>
    tpu.vector_store %arg8[%c52_123, %c16_124], %128 {strides = array<i32>} : memref<100x256xf32, #tpu.memory_space<vmem>>, vector<4x16xf32>,
    %130 = vector.extract_strided_slice %121 {offsets = [0, 4], sizes = [4, 16], strides = [1, 1]} : vector<4x20xf32> to vector<4x16xf32>
    %c56_125 = arith.constant 56 : index
    %c16_126 = arith.constant 16 : index
    %131 = vector.load %arg8[%c56_125, %c16_126] : memref<100x256xf32, #tpu.memory_space<vmem>>, vector<4x16xf32>
    tpu.vector_store %arg8[%c56_125, %c16_126], %130 {strides = array<i32>} : memref<100x256xf32, #tpu.memory_space<vmem>>, vector<4x16xf32>,
    %c0_127 = arith.constant 0 : index
    %c4_128 = arith.constant 4 : index
    %c0_129 = arith.constant 0 : index
    %132 = vector.load %arg7[%c0_127, %c4_128, %c0_129] : memref<4x20x20xf32, #tpu.memory_space<vmem>>, vector<4x1x20xf32>
    %133 = vector.shape_cast %132 : vector<4x1x20xf32> to vector<4x20xf32>
    %134 = vector.extract_strided_slice %133 {offsets = [0, 0], sizes = [4, 16], strides = [1, 1]} : vector<4x20xf32> to vector<4x16xf32>
    %c60_130 = arith.constant 60 : index
    %c16_131 = arith.constant 16 : index
    %135 = vector.load %arg8[%c60_130, %c16_131] : memref<100x256xf32, #tpu.memory_space<vmem>>, vector<4x16xf32>
    tpu.vector_store %arg8[%c60_130, %c16_131], %134 {strides = array<i32>} : memref<100x256xf32, #tpu.memory_space<vmem>>, vector<4x16xf32>,
    %136 = vector.extract_strided_slice %133 {offsets = [0, 1], sizes = [4, 16], strides = [1, 1]} : vector<4x20xf32> to vector<4x16xf32>
    %c64_132 = arith.constant 64 : index
    %c16_133 = arith.constant 16 : index
    %137 = vector.load %arg8[%c64_132, %c16_133] : memref<100x256xf32, #tpu.memory_space<vmem>>, vector<4x16xf32>
    tpu.vector_store %arg8[%c64_132, %c16_133], %136 {strides = array<i32>} : memref<100x256xf32, #tpu.memory_space<vmem>>, vector<4x16xf32>,
    %138 = vector.extract_strided_slice %133 {offsets = [0, 2], sizes = [4, 16], strides = [1, 1]} : vector<4x20xf32> to vector<4x16xf32>
    %c68_134 = arith.constant 68 : index
    %c16_135 = arith.constant 16 : index
    %139 = vector.load %arg8[%c68_134, %c16_135] : memref<100x256xf32, #tpu.memory_space<vmem>>, vector<4x16xf32>
    tpu.vector_store %arg8[%c68_134, %c16_135], %138 {strides = array<i32>} : memref<100x256xf32, #tpu.memory_space<vmem>>, vector<4x16xf32>,
    %140 = vector.extract_strided_slice %133 {offsets = [0, 3], sizes = [4, 16], strides = [1, 1]} : vector<4x20xf32> to vector<4x16xf32>
    %c72_136 = arith.constant 72 : index
    %c16_137 = arith.constant 16 : index
    %141 = vector.load %arg8[%c72_136, %c16_137] : memref<100x256xf32, #tpu.memory_space<vmem>>, vector<4x16xf32>
    tpu.vector_store %arg8[%c72_136, %c16_137], %140 {strides = array<i32>} : memref<100x256xf32, #tpu.memory_space<vmem>>, vector<4x16xf32>,
    %142 = vector.extract_strided_slice %133 {offsets = [0, 4], sizes = [4, 16], strides = [1, 1]} : vector<4x20xf32> to vector<4x16xf32>
    %c76_138 = arith.constant 76 : index
    %c16_139 = arith.constant 16 : index
    %143 = vector.load %arg8[%c76_138, %c16_139] : memref<100x256xf32, #tpu.memory_space<vmem>>, vector<4x16xf32>
    tpu.vector_store %arg8[%c76_138, %c16_139], %142 {strides = array<i32>} : memref<100x256xf32, #tpu.memory_space<vmem>>, vector<4x16xf32>,
    %c0_140 = arith.constant 0 : index
    %c5 = arith.constant 5 : index
    %c0_141 = arith.constant 0 : index
    %144 = vector.load %arg7[%c0_140, %c5, %c0_141] : memref<4x20x20xf32, #tpu.memory_space<vmem>>, vector<4x1x20xf32>
    %145 = vector.shape_cast %144 : vector<4x1x20xf32> to vector<4x20xf32>
    %146 = vector.extract_strided_slice %145 {offsets = [0, 0], sizes = [4, 16], strides = [1, 1]} : vector<4x20xf32> to vector<4x16xf32>
    %c80_142 = arith.constant 80 : index
    %c16_143 = arith.constant 16 : index
    %147 = vector.load %arg8[%c80_142, %c16_143] : memref<100x256xf32, #tpu.memory_space<vmem>>, vector<4x16xf32>
    tpu.vector_store %arg8[%c80_142, %c16_143], %146 {strides = array<i32>} : memref<100x256xf32, #tpu.memory_space<vmem>>, vector<4x16xf32>,
    %148 = vector.extract_strided_slice %145 {offsets = [0, 1], sizes = [4, 16], strides = [1, 1]} : vector<4x20xf32> to vector<4x16xf32>
    %c84_144 = arith.constant 84 : index
    %c16_145 = arith.constant 16 : index
    %149 = vector.load %arg8[%c84_144, %c16_145] : memref<100x256xf32, #tpu.memory_space<vmem>>, vector<4x16xf32>
    tpu.vector_store %arg8[%c84_144, %c16_145], %148 {strides = array<i32>} : memref<100x256xf32, #tpu.memory_space<vmem>>, vector<4x16xf32>,
    %150 = vector.extract_strided_slice %145 {offsets = [0, 2], sizes = [4, 16], strides = [1, 1]} : vector<4x20xf32> to vector<4x16xf32>
    %c88_146 = arith.constant 88 : index
    %c16_147 = arith.constant 16 : index
    %151 = vector.load %arg8[%c88_146, %c16_147] : memref<100x256xf32, #tpu.memory_space<vmem>>, vector<4x16xf32>
    tpu.vector_store %arg8[%c88_146, %c16_147], %150 {strides = array<i32>} : memref<100x256xf32, #tpu.memory_space<vmem>>, vector<4x16xf32>,
    %152 = vector.extract_strided_slice %145 {offsets = [0, 3], sizes = [4, 16], strides = [1, 1]} : vector<4x20xf32> to vector<4x16xf32>
    %c92_148 = arith.constant 92 : index
    %c16_149 = arith.constant 16 : index
    %153 = vector.load %arg8[%c92_148, %c16_149] : memref<100x256xf32, #tpu.memory_space<vmem>>, vector<4x16xf32>
    tpu.vector_store %arg8[%c92_148, %c16_149], %152 {strides = array<i32>} : memref<100x256xf32, #tpu.memory_space<vmem>>, vector<4x16xf32>,
    %154 = vector.extract_strided_slice %145 {offsets = [0, 4], sizes = [4, 16], strides = [1, 1]} : vector<4x20xf32> to vector<4x16xf32>
    %c96_150 = arith.constant 96 : index
    %c16_151 = arith.constant 16 : index
    %155 = vector.load %arg8[%c96_150, %c16_151] : memref<100x256xf32, #tpu.memory_space<vmem>>, vector<4x16xf32>
    tpu.vector_store %arg8[%c96_150, %c16_151], %154 {strides = array<i32>} : memref<100x256xf32, #tpu.memory_space<vmem>>, vector<4x16xf32>,
    %c0_152 = arith.constant 0 : index
    %c2_153 = arith.constant 2 : index
    %c0_154 = arith.constant 0 : index
    %156 = vector.load %arg7[%c0_152, %c2_153, %c0_154] : memref<4x20x20xf32, #tpu.memory_space<vmem>>, vector<4x1x20xf32>
    %157 = vector.shape_cast %156 : vector<4x1x20xf32> to vector<4x20xf32>
    %158 = vector.extract_strided_slice %157 {offsets = [0, 0], sizes = [4, 16], strides = [1, 1]} : vector<4x20xf32> to vector<4x16xf32>
    %c0_155 = arith.constant 0 : index
    %c32_156 = arith.constant 32 : index
    %159 = vector.load %arg8[%c0_155, %c32_156] : memref<100x256xf32, #tpu.memory_space<vmem>>, vector<4x16xf32>
    tpu.vector_store %arg8[%c0_155, %c32_156], %158 {strides = array<i32>} : memref<100x256xf32, #tpu.memory_space<vmem>>, vector<4x16xf32>,
    %160 = vector.extract_strided_slice %157 {offsets = [0, 1], sizes = [4, 16], strides = [1, 1]} : vector<4x20xf32> to vector<4x16xf32>
    %c4_157 = arith.constant 4 : index
    %c32_158 = arith.constant 32 : index
    %161 = vector.load %arg8[%c4_157, %c32_158] : memref<100x256xf32, #tpu.memory_space<vmem>>, vector<4x16xf32>
    tpu.vector_store %arg8[%c4_157, %c32_158], %160 {strides = array<i32>} : memref<100x256xf32, #tpu.memory_space<vmem>>, vector<4x16xf32>,
    %162 = vector.extract_strided_slice %157 {offsets = [0, 2], sizes = [4, 16], strides = [1, 1]} : vector<4x20xf32> to vector<4x16xf32>
    %c8_159 = arith.constant 8 : index
    %c32_160 = arith.constant 32 : index
    %163 = vector.load %arg8[%c8_159, %c32_160] : memref<100x256xf32, #tpu.memory_space<vmem>>, vector<4x16xf32>
    tpu.vector_store %arg8[%c8_159, %c32_160], %162 {strides = array<i32>} : memref<100x256xf32, #tpu.memory_space<vmem>>, vector<4x16xf32>,
    %164 = vector.extract_strided_slice %157 {offsets = [0, 3], sizes = [4, 16], strides = [1, 1]} : vector<4x20xf32> to vector<4x16xf32>
    %c12_161 = arith.constant 12 : index
    %c32_162 = arith.constant 32 : index
    %165 = vector.load %arg8[%c12_161, %c32_162] : memref<100x256xf32, #tpu.memory_space<vmem>>, vector<4x16xf32>
    tpu.vector_store %arg8[%c12_161, %c32_162], %164 {strides = array<i32>} : memref<100x256xf32, #tpu.memory_space<vmem>>, vector<4x16xf32>,
    %166 = vector.extract_strided_slice %157 {offsets = [0, 4], sizes = [4, 16], strides = [1, 1]} : vector<4x20xf32> to vector<4x16xf32>
    %c16_163 = arith.constant 16 : index
    %c32_164 = arith.constant 32 : index
    %167 = vector.load %arg8[%c16_163, %c32_164] : memref<100x256xf32, #tpu.memory_space<vmem>>, vector<4x16xf32>
    tpu.vector_store %arg8[%c16_163, %c32_164], %166 {strides = array<i32>} : memref<100x256xf32, #tpu.memory_space<vmem>>, vector<4x16xf32>,
    %c0_165 = arith.constant 0 : index
    %c3_166 = arith.constant 3 : index
    %c0_167 = arith.constant 0 : index
    %168 = vector.load %arg7[%c0_165, %c3_166, %c0_167] : memref<4x20x20xf32, #tpu.memory_space<vmem>>, vector<4x1x20xf32>
    %169 = vector.shape_cast %168 : vector<4x1x20xf32> to vector<4x20xf32>
    %170 = vector.extract_strided_slice %169 {offsets = [0, 0], sizes = [4, 16], strides = [1, 1]} : vector<4x20xf32> to vector<4x16xf32>
    %c20_168 = arith.constant 20 : index
    %c32_169 = arith.constant 32 : index
    %171 = vector.load %arg8[%c20_168, %c32_169] : memref<100x256xf32, #tpu.memory_space<vmem>>, vector<4x16xf32>
    tpu.vector_store %arg8[%c20_168, %c32_169], %170 {strides = array<i32>} : memref<100x256xf32, #tpu.memory_space<vmem>>, vector<4x16xf32>,
    %172 = vector.extract_strided_slice %169 {offsets = [0, 1], sizes = [4, 16], strides = [1, 1]} : vector<4x20xf32> to vector<4x16xf32>
    %c24_170 = arith.constant 24 : index
    %c32_171 = arith.constant 32 : index
    %173 = vector.load %arg8[%c24_170, %c32_171] : memref<100x256xf32, #tpu.memory_space<vmem>>, vector<4x16xf32>
    tpu.vector_store %arg8[%c24_170, %c32_171], %172 {strides = array<i32>} : memref<100x256xf32, #tpu.memory_space<vmem>>, vector<4x16xf32>,
    %174 = vector.extract_strided_slice %169 {offsets = [0, 2], sizes = [4, 16], strides = [1, 1]} : vector<4x20xf32> to vector<4x16xf32>
    %c28_172 = arith.constant 28 : index
    %c32_173 = arith.constant 32 : index
    %175 = vector.load %arg8[%c28_172, %c32_173] : memref<100x256xf32, #tpu.memory_space<vmem>>, vector<4x16xf32>
    tpu.vector_store %arg8[%c28_172, %c32_173], %174 {strides = array<i32>} : memref<100x256xf32, #tpu.memory_space<vmem>>, vector<4x16xf32>,
    %176 = vector.extract_strided_slice %169 {offsets = [0, 3], sizes = [4, 16], strides = [1, 1]} : vector<4x20xf32> to vector<4x16xf32>
    %c32_174 = arith.constant 32 : index
    %c32_175 = arith.constant 32 : index
    %177 = vector.load %arg8[%c32_174, %c32_175] : memref<100x256xf32, #tpu.memory_space<vmem>>, vector<4x16xf32>
    tpu.vector_store %arg8[%c32_174, %c32_175], %176 {strides = array<i32>} : memref<100x256xf32, #tpu.memory_space<vmem>>, vector<4x16xf32>,
    %178 = vector.extract_strided_slice %169 {offsets = [0, 4], sizes = [4, 16], strides = [1, 1]} : vector<4x20xf32> to vector<4x16xf32>
    %c36_176 = arith.constant 36 : index
    %c32_177 = arith.constant 32 : index
    %179 = vector.load %arg8[%c36_176, %c32_177] : memref<100x256xf32, #tpu.memory_space<vmem>>, vector<4x16xf32>
    tpu.vector_store %arg8[%c36_176, %c32_177], %178 {strides = array<i32>} : memref<100x256xf32, #tpu.memory_space<vmem>>, vector<4x16xf32>,
    %c0_178 = arith.constant 0 : index
    %c4_179 = arith.constant 4 : index
    %c0_180 = arith.constant 0 : index
    %180 = vector.load %arg7[%c0_178, %c4_179, %c0_180] : memref<4x20x20xf32, #tpu.memory_space<vmem>>, vector<4x1x20xf32>
    %181 = vector.shape_cast %180 : vector<4x1x20xf32> to vector<4x20xf32>
    %182 = vector.extract_strided_slice %181 {offsets = [0, 0], sizes = [4, 16], strides = [1, 1]} : vector<4x20xf32> to vector<4x16xf32>
    %c40_181 = arith.constant 40 : index
    %c32_182 = arith.constant 32 : index
    %183 = vector.load %arg8[%c40_181, %c32_182] : memref<100x256xf32, #tpu.memory_space<vmem>>, vector<4x16xf32>
    tpu.vector_store %arg8[%c40_181, %c32_182], %182 {strides = array<i32>} : memref<100x256xf32, #tpu.memory_space<vmem>>, vector<4x16xf32>,
    %184 = vector.extract_strided_slice %181 {offsets = [0, 1], sizes = [4, 16], strides = [1, 1]} : vector<4x20xf32> to vector<4x16xf32>
    %c44_183 = arith.constant 44 : index
    %c32_184 = arith.constant 32 : index
    %185 = vector.load %arg8[%c44_183, %c32_184] : memref<100x256xf32, #tpu.memory_space<vmem>>, vector<4x16xf32>
    tpu.vector_store %arg8[%c44_183, %c32_184], %184 {strides = array<i32>} : memref<100x256xf32, #tpu.memory_space<vmem>>, vector<4x16xf32>,
    %186 = vector.extract_strided_slice %181 {offsets = [0, 2], sizes = [4, 16], strides = [1, 1]} : vector<4x20xf32> to vector<4x16xf32>
    %c48_185 = arith.constant 48 : index
    %c32_186 = arith.constant 32 : index
    %187 = vector.load %arg8[%c48_185, %c32_186] : memref<100x256xf32, #tpu.memory_space<vmem>>, vector<4x16xf32>
    tpu.vector_store %arg8[%c48_185, %c32_186], %186 {strides = array<i32>} : memref<100x256xf32, #tpu.memory_space<vmem>>, vector<4x16xf32>,
    %188 = vector.extract_strided_slice %181 {offsets = [0, 3], sizes = [4, 16], strides = [1, 1]} : vector<4x20xf32> to vector<4x16xf32>
    %c52_187 = arith.constant 52 : index
    %c32_188 = arith.constant 32 : index
    %189 = vector.load %arg8[%c52_187, %c32_188] : memref<100x256xf32, #tpu.memory_space<vmem>>, vector<4x16xf32>
    tpu.vector_store %arg8[%c52_187, %c32_188], %188 {strides = array<i32>} : memref<100x256xf32, #tpu.memory_space<vmem>>, vector<4x16xf32>,
    %190 = vector.extract_strided_slice %181 {offsets = [0, 4], sizes = [4, 16], strides = [1, 1]} : vector<4x20xf32> to vector<4x16xf32>
    %c56_189 = arith.constant 56 : index
    %c32_190 = arith.constant 32 : index
    %191 = vector.load %arg8[%c56_189, %c32_190] : memref<100x256xf32, #tpu.memory_space<vmem>>, vector<4x16xf32>
    tpu.vector_store %arg8[%c56_189, %c32_190], %190 {strides = array<i32>} : memref<100x256xf32, #tpu.memory_space<vmem>>, vector<4x16xf32>,
    %c0_191 = arith.constant 0 : index
    %c5_192 = arith.constant 5 : index
    %c0_193 = arith.constant 0 : index
    %192 = vector.load %arg7[%c0_191, %c5_192, %c0_193] : memref<4x20x20xf32, #tpu.memory_space<vmem>>, vector<4x1x20xf32>
    %193 = vector.shape_cast %192 : vector<4x1x20xf32> to vector<4x20xf32>
    %194 = vector.extract_strided_slice %193 {offsets = [0, 0], sizes = [4, 16], strides = [1, 1]} : vector<4x20xf32> to vector<4x16xf32>
    %c60_194 = arith.constant 60 : index
    %c32_195 = arith.constant 32 : index
    %195 = vector.load %arg8[%c60_194, %c32_195] : memref<100x256xf32, #tpu.memory_space<vmem>>, vector<4x16xf32>
    tpu.vector_store %arg8[%c60_194, %c32_195], %194 {strides = array<i32>} : memref<100x256xf32, #tpu.memory_space<vmem>>, vector<4x16xf32>,
    %196 = vector.extract_strided_slice %193 {offsets = [0, 1], sizes = [4, 16], strides = [1, 1]} : vector<4x20xf32> to vector<4x16xf32>
    %c64_196 = arith.constant 64 : index
    %c32_197 = arith.constant 32 : index
    %197 = vector.load %arg8[%c64_196, %c32_197] : memref<100x256xf32, #tpu.memory_space<vmem>>, vector<4x16xf32>
    tpu.vector_store %arg8[%c64_196, %c32_197], %196 {strides = array<i32>} : memref<100x256xf32, #tpu.memory_space<vmem>>, vector<4x16xf32>,
    %198 = vector.extract_strided_slice %193 {offsets = [0, 2], sizes = [4, 16], strides = [1, 1]} : vector<4x20xf32> to vector<4x16xf32>
    %c68_198 = arith.constant 68 : index
    %c32_199 = arith.constant 32 : index
    %199 = vector.load %arg8[%c68_198, %c32_199] : memref<100x256xf32, #tpu.memory_space<vmem>>, vector<4x16xf32>
    tpu.vector_store %arg8[%c68_198, %c32_199], %198 {strides = array<i32>} : memref<100x256xf32, #tpu.memory_space<vmem>>, vector<4x16xf32>,
    %200 = vector.extract_strided_slice %193 {offsets = [0, 3], sizes = [4, 16], strides = [1, 1]} : vector<4x20xf32> to vector<4x16xf32>
    %c72_200 = arith.constant 72 : index
    %c32_201 = arith.constant 32 : index
    %201 = vector.load %arg8[%c72_200, %c32_201] : memref<100x256xf32, #tpu.memory_space<vmem>>, vector<4x16xf32>
    tpu.vector_store %arg8[%c72_200, %c32_201], %200 {strides = array<i32>} : memref<100x256xf32, #tpu.memory_space<vmem>>, vector<4x16xf32>,
    %202 = vector.extract_strided_slice %193 {offsets = [0, 4], sizes = [4, 16], strides = [1, 1]} : vector<4x20xf32> to vector<4x16xf32>
    %c76_202 = arith.constant 76 : index
    %c32_203 = arith.constant 32 : index
    %203 = vector.load %arg8[%c76_202, %c32_203] : memref<100x256xf32, #tpu.memory_space<vmem>>, vector<4x16xf32>
    tpu.vector_store %arg8[%c76_202, %c32_203], %202 {strides = array<i32>} : memref<100x256xf32, #tpu.memory_space<vmem>>, vector<4x16xf32>,
    %c0_204 = arith.constant 0 : index
    %c6 = arith.constant 6 : index
    %c0_205 = arith.constant 0 : index
    %204 = vector.load %arg7[%c0_204, %c6, %c0_205] : memref<4x20x20xf32, #tpu.memory_space<vmem>>, vector<4x1x20xf32>
    %205 = vector.shape_cast %204 : vector<4x1x20xf32> to vector<4x20xf32>
    %206 = vector.extract_strided_slice %205 {offsets = [0, 0], sizes = [4, 16], strides = [1, 1]} : vector<4x20xf32> to vector<4x16xf32>
    %c80_206 = arith.constant 80 : index
    %c32_207 = arith.constant 32 : index
    %207 = vector.load %arg8[%c80_206, %c32_207] : memref<100x256xf32, #tpu.memory_space<vmem>>, vector<4x16xf32>
    tpu.vector_store %arg8[%c80_206, %c32_207], %206 {strides = array<i32>} : memref<100x256xf32, #tpu.memory_space<vmem>>, vector<4x16xf32>,
    %208 = vector.extract_strided_slice %205 {offsets = [0, 1], sizes = [4, 16], strides = [1, 1]} : vector<4x20xf32> to vector<4x16xf32>
    %c84_208 = arith.constant 84 : index
    %c32_209 = arith.constant 32 : index
    %209 = vector.load %arg8[%c84_208, %c32_209] : memref<100x256xf32, #tpu.memory_space<vmem>>, vector<4x16xf32>
    tpu.vector_store %arg8[%c84_208, %c32_209], %208 {strides = array<i32>} : memref<100x256xf32, #tpu.memory_space<vmem>>, vector<4x16xf32>,
    %210 = vector.extract_strided_slice %205 {offsets = [0, 2], sizes = [4, 16], strides = [1, 1]} : vector<4x20xf32> to vector<4x16xf32>
    %c88_210 = arith.constant 88 : index
    %c32_211 = arith.constant 32 : index
    %211 = vector.load %arg8[%c88_210, %c32_211] : memref<100x256xf32, #tpu.memory_space<vmem>>, vector<4x16xf32>
    tpu.vector_store %arg8[%c88_210, %c32_211], %210 {strides = array<i32>} : memref<100x256xf32, #tpu.memory_space<vmem>>, vector<4x16xf32>,
    %212 = vector.extract_strided_slice %205 {offsets = [0, 3], sizes = [4, 16], strides = [1, 1]} : vector<4x20xf32> to vector<4x16xf32>
    %c92_212 = arith.constant 92 : index
    %c32_213 = arith.constant 32 : index
    %213 = vector.load %arg8[%c92_212, %c32_213] : memref<100x256xf32, #tpu.memory_space<vmem>>, vector<4x16xf32>
    tpu.vector_store %arg8[%c92_212, %c32_213], %212 {strides = array<i32>} : memref<100x256xf32, #tpu.memory_space<vmem>>, vector<4x16xf32>,
    %214 = vector.extract_strided_slice %205 {offsets = [0, 4], sizes = [4, 16], strides = [1, 1]} : vector<4x20xf32> to vector<4x16xf32>
    %c96_214 = arith.constant 96 : index
    %c32_215 = arith.constant 32 : index
    %215 = vector.load %arg8[%c96_214, %c32_215] : memref<100x256xf32, #tpu.memory_space<vmem>>, vector<4x16xf32>
    tpu.vector_store %arg8[%c96_214, %c32_215], %214 {strides = array<i32>} : memref<100x256xf32, #tpu.memory_space<vmem>>, vector<4x16xf32>,
    %c0_216 = arith.constant 0 : index
    %c3_217 = arith.constant 3 : index
    %c0_218 = arith.constant 0 : index
    %216 = vector.load %arg7[%c0_216, %c3_217, %c0_218] : memref<4x20x20xf32, #tpu.memory_space<vmem>>, vector<4x1x20xf32>
    %217 = vector.shape_cast %216 : vector<4x1x20xf32> to vector<4x20xf32>
    %218 = vector.extract_strided_slice %217 {offsets = [0, 0], sizes = [4, 16], strides = [1, 1]} : vector<4x20xf32> to vector<4x16xf32>
    %c0_219 = arith.constant 0 : index
    %c48_220 = arith.constant 48 : index
    %219 = vector.load %arg8[%c0_219, %c48_220] : memref<100x256xf32, #tpu.memory_space<vmem>>, vector<4x16xf32>
    tpu.vector_store %arg8[%c0_219, %c48_220], %218 {strides = array<i32>} : memref<100x256xf32, #tpu.memory_space<vmem>>, vector<4x16xf32>,
    %220 = vector.extract_strided_slice %217 {offsets = [0, 1], sizes = [4, 16], strides = [1, 1]} : vector<4x20xf32> to vector<4x16xf32>
    %c4_221 = arith.constant 4 : index
    %c48_222 = arith.constant 48 : index
    %221 = vector.load %arg8[%c4_221, %c48_222] : memref<100x256xf32, #tpu.memory_space<vmem>>, vector<4x16xf32>
    tpu.vector_store %arg8[%c4_221, %c48_222], %220 {strides = array<i32>} : memref<100x256xf32, #tpu.memory_space<vmem>>, vector<4x16xf32>,
    %222 = vector.extract_strided_slice %217 {offsets = [0, 2], sizes = [4, 16], strides = [1, 1]} : vector<4x20xf32> to vector<4x16xf32>
    %c8_223 = arith.constant 8 : index
    %c48_224 = arith.constant 48 : index
    %223 = vector.load %arg8[%c8_223, %c48_224] : memref<100x256xf32, #tpu.memory_space<vmem>>, vector<4x16xf32>
    tpu.vector_store %arg8[%c8_223, %c48_224], %222 {strides = array<i32>} : memref<100x256xf32, #tpu.memory_space<vmem>>, vector<4x16xf32>,
    %224 = vector.extract_strided_slice %217 {offsets = [0, 3], sizes = [4, 16], strides = [1, 1]} : vector<4x20xf32> to vector<4x16xf32>
    %c12_225 = arith.constant 12 : index
    %c48_226 = arith.constant 48 : index
    %225 = vector.load %arg8[%c12_225, %c48_226] : memref<100x256xf32, #tpu.memory_space<vmem>>, vector<4x16xf32>
    tpu.vector_store %arg8[%c12_225, %c48_226], %224 {strides = array<i32>} : memref<100x256xf32, #tpu.memory_space<vmem>>, vector<4x16xf32>,
    %226 = vector.extract_strided_slice %217 {offsets = [0, 4], sizes = [4, 16], strides = [1, 1]} : vector<4x20xf32> to vector<4x16xf32>
    %c16_227 = arith.constant 16 : index
    %c48_228 = arith.constant 48 : index
    %227 = vector.load %arg8[%c16_227, %c48_228] : memref<100x256xf32, #tpu.memory_space<vmem>>, vector<4x16xf32>
    tpu.vector_store %arg8[%c16_227, %c48_228], %226 {strides = array<i32>} : memref<100x256xf32, #tpu.memory_space<vmem>>, vector<4x16xf32>,
    %c0_229 = arith.constant 0 : index
    %c4_230 = arith.constant 4 : index
    %c0_231 = arith.constant 0 : index
    %228 = vector.load %arg7[%c0_229, %c4_230, %c0_231] : memref<4x20x20xf32, #tpu.memory_space<vmem>>, vector<4x1x20xf32>
    %229 = vector.shape_cast %228 : vector<4x1x20xf32> to vector<4x20xf32>
    %230 = vector.extract_strided_slice %229 {offsets = [0, 0], sizes = [4, 16], strides = [1, 1]} : vector<4x20xf32> to vector<4x16xf32>
    %c20_232 = arith.constant 20 : index
    %c48_233 = arith.constant 48 : index
    %231 = vector.load %arg8[%c20_232, %c48_233] : memref<100x256xf32, #tpu.memory_space<vmem>>, vector<4x16xf32>
    tpu.vector_store %arg8[%c20_232, %c48_233], %230 {strides = array<i32>} : memref<100x256xf32, #tpu.memory_space<vmem>>, vector<4x16xf32>,
    %232 = vector.extract_strided_slice %229 {offsets = [0, 1], sizes = [4, 16], strides = [1, 1]} : vector<4x20xf32> to vector<4x16xf32>
    %c24_234 = arith.constant 24 : index
    %c48_235 = arith.constant 48 : index
    %233 = vector.load %arg8[%c24_234, %c48_235] : memref<100x256xf32, #tpu.memory_space<vmem>>, vector<4x16xf32>
    tpu.vector_store %arg8[%c24_234, %c48_235], %232 {strides = array<i32>} : memref<100x256xf32, #tpu.memory_space<vmem>>, vector<4x16xf32>,
    %234 = vector.extract_strided_slice %229 {offsets = [0, 2], sizes = [4, 16], strides = [1, 1]} : vector<4x20xf32> to vector<4x16xf32>
    %c28_236 = arith.constant 28 : index
    %c48_237 = arith.constant 48 : index
    %235 = vector.load %arg8[%c28_236, %c48_237] : memref<100x256xf32, #tpu.memory_space<vmem>>, vector<4x16xf32>
    tpu.vector_store %arg8[%c28_236, %c48_237], %234 {strides = array<i32>} : memref<100x256xf32, #tpu.memory_space<vmem>>, vector<4x16xf32>,
    %236 = vector.extract_strided_slice %229 {offsets = [0, 3], sizes = [4, 16], strides = [1, 1]} : vector<4x20xf32> to vector<4x16xf32>
    %c32_238 = arith.constant 32 : index
    %c48_239 = arith.constant 48 : index
    %237 = vector.load %arg8[%c32_238, %c48_239] : memref<100x256xf32, #tpu.memory_space<vmem>>, vector<4x16xf32>
    tpu.vector_store %arg8[%c32_238, %c48_239], %236 {strides = array<i32>} : memref<100x256xf32, #tpu.memory_space<vmem>>, vector<4x16xf32>,
    %238 = vector.extract_strided_slice %229 {offsets = [0, 4], sizes = [4, 16], strides = [1, 1]} : vector<4x20xf32> to vector<4x16xf32>
    %c36_240 = arith.constant 36 : index
    %c48_241 = arith.constant 48 : index
    %239 = vector.load %arg8[%c36_240, %c48_241] : memref<100x256xf32, #tpu.memory_space<vmem>>, vector<4x16xf32>
    tpu.vector_store %arg8[%c36_240, %c48_241], %238 {strides = array<i32>} : memref<100x256xf32, #tpu.memory_space<vmem>>, vector<4x16xf32>,
    %c0_242 = arith.constant 0 : index
    %c5_243 = arith.constant 5 : index
    %c0_244 = arith.constant 0 : index
    %240 = vector.load %arg7[%c0_242, %c5_243, %c0_244] : memref<4x20x20xf32, #tpu.memory_space<vmem>>, vector<4x1x20xf32>
    %241 = vector.shape_cast %240 : vector<4x1x20xf32> to vector<4x20xf32>
    %242 = vector.extract_strided_slice %241 {offsets = [0, 0], sizes = [4, 16], strides = [1, 1]} : vector<4x20xf32> to vector<4x16xf32>
    %c40_245 = arith.constant 40 : index
    %c48_246 = arith.constant 48 : index
    %243 = vector.load %arg8[%c40_245, %c48_246] : memref<100x256xf32, #tpu.memory_space<vmem>>, vector<4x16xf32>
    tpu.vector_store %arg8[%c40_245, %c48_246], %242 {strides = array<i32>} : memref<100x256xf32, #tpu.memory_space<vmem>>, vector<4x16xf32>,
    %244 = vector.extract_strided_slice %241 {offsets = [0, 1], sizes = [4, 16], strides = [1, 1]} : vector<4x20xf32> to vector<4x16xf32>
    %c44_247 = arith.constant 44 : index
    %c48_248 = arith.constant 48 : index
    %245 = vector.load %arg8[%c44_247, %c48_248] : memref<100x256xf32, #tpu.memory_space<vmem>>, vector<4x16xf32>
    tpu.vector_store %arg8[%c44_247, %c48_248], %244 {strides = array<i32>} : memref<100x256xf32, #tpu.memory_space<vmem>>, vector<4x16xf32>,
    %246 = vector.extract_strided_slice %241 {offsets = [0, 2], sizes = [4, 16], strides = [1, 1]} : vector<4x20xf32> to vector<4x16xf32>
    %c48_249 = arith.constant 48 : index
    %c48_250 = arith.constant 48 : index
    %247 = vector.load %arg8[%c48_249, %c48_250] : memref<100x256xf32, #tpu.memory_space<vmem>>, vector<4x16xf32>
    tpu.vector_store %arg8[%c48_249, %c48_250], %246 {strides = array<i32>} : memref<100x256xf32, #tpu.memory_space<vmem>>, vector<4x16xf32>,
    %248 = vector.extract_strided_slice %241 {offsets = [0, 3], sizes = [4, 16], strides = [1, 1]} : vector<4x20xf32> to vector<4x16xf32>
    %c52_251 = arith.constant 52 : index
    %c48_252 = arith.constant 48 : index
    %249 = vector.load %arg8[%c52_251, %c48_252] : memref<100x256xf32, #tpu.memory_space<vmem>>, vector<4x16xf32>
    tpu.vector_store %arg8[%c52_251, %c48_252], %248 {strides = array<i32>} : memref<100x256xf32, #tpu.memory_space<vmem>>, vector<4x16xf32>,
    %250 = vector.extract_strided_slice %241 {offsets = [0, 4], sizes = [4, 16], strides = [1, 1]} : vector<4x20xf32> to vector<4x16xf32>
    %c56_253 = arith.constant 56 : index
    %c48_254 = arith.constant 48 : index
    %251 = vector.load %arg8[%c56_253, %c48_254] : memref<100x256xf32, #tpu.memory_space<vmem>>, vector<4x16xf32>
    tpu.vector_store %arg8[%c56_253, %c48_254], %250 {strides = array<i32>} : memref<100x256xf32, #tpu.memory_space<vmem>>, vector<4x16xf32>,
    %c0_255 = arith.constant 0 : index
    %c6_256 = arith.constant 6 : index
    %c0_257 = arith.constant 0 : index
    %252 = vector.load %arg7[%c0_255, %c6_256, %c0_257] : memref<4x20x20xf32, #tpu.memory_space<vmem>>, vector<4x1x20xf32>
    %253 = vector.shape_cast %252 : vector<4x1x20xf32> to vector<4x20xf32>
    %254 = vector.extract_strided_slice %253 {offsets = [0, 0], sizes = [4, 16], strides = [1, 1]} : vector<4x20xf32> to vector<4x16xf32>
    %c60_258 = arith.constant 60 : index
    %c48_259 = arith.constant 48 : index
    %255 = vector.load %arg8[%c60_258, %c48_259] : memref<100x256xf32, #tpu.memory_space<vmem>>, vector<4x16xf32>
    tpu.vector_store %arg8[%c60_258, %c48_259], %254 {strides = array<i32>} : memref<100x256xf32, #tpu.memory_space<vmem>>, vector<4x16xf32>,
    %256 = vector.extract_strided_slice %253 {offsets = [0, 1], sizes = [4, 16], strides = [1, 1]} : vector<4x20xf32> to vector<4x16xf32>
    %c64_260 = arith.constant 64 : index
    %c48_261 = arith.constant 48 : index
    %257 = vector.load %arg8[%c64_260, %c48_261] : memref<100x256xf32, #tpu.memory_space<vmem>>, vector<4x16xf32>
    tpu.vector_store %arg8[%c64_260, %c48_261], %256 {strides = array<i32>} : memref<100x256xf32, #tpu.memory_space<vmem>>, vector<4x16xf32>,
    %258 = vector.extract_strided_slice %253 {offsets = [0, 2], sizes = [4, 16], strides = [1, 1]} : vector<4x20xf32> to vector<4x16xf32>
    %c68_262 = arith.constant 68 : index
    %c48_263 = arith.constant 48 : index
    %259 = vector.load %arg8[%c68_262, %c48_263] : memref<100x256xf32, #tpu.memory_space<vmem>>, vector<4x16xf32>
    tpu.vector_store %arg8[%c68_262, %c48_263], %258 {strides = array<i32>} : memref<100x256xf32, #tpu.memory_space<vmem>>, vector<4x16xf32>,
    %260 = vector.extract_strided_slice %253 {offsets = [0, 3], sizes = [4, 16], strides = [1, 1]} : vector<4x20xf32> to vector<4x16xf32>
    %c72_264 = arith.constant 72 : index
    %c48_265 = arith.constant 48 : index
    %261 = vector.load %arg8[%c72_264, %c48_265] : memref<100x256xf32, #tpu.memory_space<vmem>>, vector<4x16xf32>
    tpu.vector_store %arg8[%c72_264, %c48_265], %260 {strides = array<i32>} : memref<100x256xf32, #tpu.memory_space<vmem>>, vector<4x16xf32>,
    %262 = vector.extract_strided_slice %253 {offsets = [0, 4], sizes = [4, 16], strides = [1, 1]} : vector<4x20xf32> to vector<4x16xf32>
    %c76_266 = arith.constant 76 : index
    %c48_267 = arith.constant 48 : index
    %263 = vector.load %arg8[%c76_266, %c48_267] : memref<100x256xf32, #tpu.memory_space<vmem>>, vector<4x16xf32>
    tpu.vector_store %arg8[%c76_266, %c48_267], %262 {strides = array<i32>} : memref<100x256xf32, #tpu.memory_space<vmem>>, vector<4x16xf32>,
    %c0_268 = arith.constant 0 : index
    %c7 = arith.constant 7 : index
    %c0_269 = arith.constant 0 : index
    %264 = vector.load %arg7[%c0_268, %c7, %c0_269] : memref<4x20x20xf32, #tpu.memory_space<vmem>>, vector<4x1x20xf32>
    %265 = vector.shape_cast %264 : vector<4x1x20xf32> to vector<4x20xf32>
    %266 = vector.extract_strided_slice %265 {offsets = [0, 0], sizes = [4, 16], strides = [1, 1]} : vector<4x20xf32> to vector<4x16xf32>
    %c80_270 = arith.constant 80 : index
    %c48_271 = arith.constant 48 : index
    %267 = vector.load %arg8[%c80_270, %c48_271] : memref<100x256xf32, #tpu.memory_space<vmem>>, vector<4x16xf32>
    tpu.vector_store %arg8[%c80_270, %c48_271], %266 {strides = array<i32>} : memref<100x256xf32, #tpu.memory_space<vmem>>, vector<4x16xf32>,
    %268 = vector.extract_strided_slice %265 {offsets = [0, 1], sizes = [4, 16], strides = [1, 1]} : vector<4x20xf32> to vector<4x16xf32>
    %c84_272 = arith.constant 84 : index
    %c48_273 = arith.constant 48 : index
    %269 = vector.load %arg8[%c84_272, %c48_273] : memref<100x256xf32, #tpu.memory_space<vmem>>, vector<4x16xf32>
    tpu.vector_store %arg8[%c84_272, %c48_273], %268 {strides = array<i32>} : memref<100x256xf32, #tpu.memory_space<vmem>>, vector<4x16xf32>,
    %270 = vector.extract_strided_slice %265 {offsets = [0, 2], sizes = [4, 16], strides = [1, 1]} : vector<4x20xf32> to vector<4x16xf32>
    %c88_274 = arith.constant 88 : index
    %c48_275 = arith.constant 48 : index
    %271 = vector.load %arg8[%c88_274, %c48_275] : memref<100x256xf32, #tpu.memory_space<vmem>>, vector<4x16xf32>
    tpu.vector_store %arg8[%c88_274, %c48_275], %270 {strides = array<i32>} : memref<100x256xf32, #tpu.memory_space<vmem>>, vector<4x16xf32>,
    %272 = vector.extract_strided_slice %265 {offsets = [0, 3], sizes = [4, 16], strides = [1, 1]} : vector<4x20xf32> to vector<4x16xf32>
    %c92_276 = arith.constant 92 : index
    %c48_277 = arith.constant 48 : index
    %273 = vector.load %arg8[%c92_276, %c48_277] : memref<100x256xf32, #tpu.memory_space<vmem>>, vector<4x16xf32>
    tpu.vector_store %arg8[%c92_276, %c48_277], %272 {strides = array<i32>} : memref<100x256xf32, #tpu.memory_space<vmem>>, vector<4x16xf32>,
    %274 = vector.extract_strided_slice %265 {offsets = [0, 4], sizes = [4, 16], strides = [1, 1]} : vector<4x20xf32> to vector<4x16xf32>
    %c96_278 = arith.constant 96 : index
    %c48_279 = arith.constant 48 : index
    %275 = vector.load %arg8[%c96_278, %c48_279] : memref<100x256xf32, #tpu.memory_space<vmem>>, vector<4x16xf32>
    tpu.vector_store %arg8[%c96_278, %c48_279], %274 {strides = array<i32>} : memref<100x256xf32, #tpu.memory_space<vmem>>, vector<4x16xf32>,
    %c0_280 = arith.constant 0 : index
    %c4_281 = arith.constant 4 : index
    %c0_282 = arith.constant 0 : index
    %276 = vector.load %arg7[%c0_280, %c4_281, %c0_282] : memref<4x20x20xf32, #tpu.memory_space<vmem>>, vector<4x1x20xf32>
    %277 = vector.shape_cast %276 : vector<4x1x20xf32> to vector<4x20xf32>
    %278 = vector.extract_strided_slice %277 {offsets = [0, 0], sizes = [4, 16], strides = [1, 1]} : vector<4x20xf32> to vector<4x16xf32>
    %c0_283 = arith.constant 0 : index
    %c64_284 = arith.constant 64 : index
    %279 = vector.load %arg8[%c0_283, %c64_284] : memref<100x256xf32, #tpu.memory_space<vmem>>, vector<4x16xf32>
    tpu.vector_store %arg8[%c0_283, %c64_284], %278 {strides = array<i32>} : memref<100x256xf32, #tpu.memory_space<vmem>>, vector<4x16xf32>,
    %280 = vector.extract_strided_slice %277 {offsets = [0, 1], sizes = [4, 16], strides = [1, 1]} : vector<4x20xf32> to vector<4x16xf32>
    %c4_285 = arith.constant 4 : index
    %c64_286 = arith.constant 64 : index
    %281 = vector.load %arg8[%c4_285, %c64_286] : memref<100x256xf32, #tpu.memory_space<vmem>>, vector<4x16xf32>
    tpu.vector_store %arg8[%c4_285, %c64_286], %280 {strides = array<i32>} : memref<100x256xf32, #tpu.memory_space<vmem>>, vector<4x16xf32>,
    %282 = vector.extract_strided_slice %277 {offsets = [0, 2], sizes = [4, 16], strides = [1, 1]} : vector<4x20xf32> to vector<4x16xf32>
    %c8_287 = arith.constant 8 : index
    %c64_288 = arith.constant 64 : index
    %283 = vector.load %arg8[%c8_287, %c64_288] : memref<100x256xf32, #tpu.memory_space<vmem>>, vector<4x16xf32>
    tpu.vector_store %arg8[%c8_287, %c64_288], %282 {strides = array<i32>} : memref<100x256xf32, #tpu.memory_space<vmem>>, vector<4x16xf32>,
    %284 = vector.extract_strided_slice %277 {offsets = [0, 3], sizes = [4, 16], strides = [1, 1]} : vector<4x20xf32> to vector<4x16xf32>
    %c12_289 = arith.constant 12 : index
    %c64_290 = arith.constant 64 : index
    %285 = vector.load %arg8[%c12_289, %c64_290] : memref<100x256xf32, #tpu.memory_space<vmem>>, vector<4x16xf32>
    tpu.vector_store %arg8[%c12_289, %c64_290], %284 {strides = array<i32>} : memref<100x256xf32, #tpu.memory_space<vmem>>, vector<4x16xf32>,
    %286 = vector.extract_strided_slice %277 {offsets = [0, 4], sizes = [4, 16], strides = [1, 1]} : vector<4x20xf32> to vector<4x16xf32>
    %c16_291 = arith.constant 16 : index
    %c64_292 = arith.constant 64 : index
    %287 = vector.load %arg8[%c16_291, %c64_292] : memref<100x256xf32, #tpu.memory_space<vmem>>, vector<4x16xf32>
    tpu.vector_store %arg8[%c16_291, %c64_292], %286 {strides = array<i32>} : memref<100x256xf32, #tpu.memory_space<vmem>>, vector<4x16xf32>,
    %c0_293 = arith.constant 0 : index
    %c5_294 = arith.constant 5 : index
    %c0_295 = arith.constant 0 : index
    %288 = vector.load %arg7[%c0_293, %c5_294, %c0_295] : memref<4x20x20xf32, #tpu.memory_space<vmem>>, vector<4x1x20xf32>
    %289 = vector.shape_cast %288 : vector<4x1x20xf32> to vector<4x20xf32>
    %290 = vector.extract_strided_slice %289 {offsets = [0, 0], sizes = [4, 16], strides = [1, 1]} : vector<4x20xf32> to vector<4x16xf32>
    %c20_296 = arith.constant 20 : index
    %c64_297 = arith.constant 64 : index
    %291 = vector.load %arg8[%c20_296, %c64_297] : memref<100x256xf32, #tpu.memory_space<vmem>>, vector<4x16xf32>
    tpu.vector_store %arg8[%c20_296, %c64_297], %290 {strides = array<i32>} : memref<100x256xf32, #tpu.memory_space<vmem>>, vector<4x16xf32>,
    %292 = vector.extract_strided_slice %289 {offsets = [0, 1], sizes = [4, 16], strides = [1, 1]} : vector<4x20xf32> to vector<4x16xf32>
    %c24_298 = arith.constant 24 : index
    %c64_299 = arith.constant 64 : index
    %293 = vector.load %arg8[%c24_298, %c64_299] : memref<100x256xf32, #tpu.memory_space<vmem>>, vector<4x16xf32>
    tpu.vector_store %arg8[%c24_298, %c64_299], %292 {strides = array<i32>} : memref<100x256xf32, #tpu.memory_space<vmem>>, vector<4x16xf32>,
    %294 = vector.extract_strided_slice %289 {offsets = [0, 2], sizes = [4, 16], strides = [1, 1]} : vector<4x20xf32> to vector<4x16xf32>
    %c28_300 = arith.constant 28 : index
    %c64_301 = arith.constant 64 : index
    %295 = vector.load %arg8[%c28_300, %c64_301] : memref<100x256xf32, #tpu.memory_space<vmem>>, vector<4x16xf32>
    tpu.vector_store %arg8[%c28_300, %c64_301], %294 {strides = array<i32>} : memref<100x256xf32, #tpu.memory_space<vmem>>, vector<4x16xf32>,
    %296 = vector.extract_strided_slice %289 {offsets = [0, 3], sizes = [4, 16], strides = [1, 1]} : vector<4x20xf32> to vector<4x16xf32>
    %c32_302 = arith.constant 32 : index
    %c64_303 = arith.constant 64 : index
    %297 = vector.load %arg8[%c32_302, %c64_303] : memref<100x256xf32, #tpu.memory_space<vmem>>, vector<4x16xf32>
    tpu.vector_store %arg8[%c32_302, %c64_303], %296 {strides = array<i32>} : memref<100x256xf32, #tpu.memory_space<vmem>>, vector<4x16xf32>,
    %298 = vector.extract_strided_slice %289 {offsets = [0, 4], sizes = [4, 16], strides = [1, 1]} : vector<4x20xf32> to vector<4x16xf32>
    %c36_304 = arith.constant 36 : index
    %c64_305 = arith.constant 64 : index
    %299 = vector.load %arg8[%c36_304, %c64_305] : memref<100x256xf32, #tpu.memory_space<vmem>>, vector<4x16xf32>
    tpu.vector_store %arg8[%c36_304, %c64_305], %298 {strides = array<i32>} : memref<100x256xf32, #tpu.memory_space<vmem>>, vector<4x16xf32>,
    %c0_306 = arith.constant 0 : index
    %c6_307 = arith.constant 6 : index
    %c0_308 = arith.constant 0 : index
    %300 = vector.load %arg7[%c0_306, %c6_307, %c0_308] : memref<4x20x20xf32, #tpu.memory_space<vmem>>, vector<4x1x20xf32>
    %301 = vector.shape_cast %300 : vector<4x1x20xf32> to vector<4x20xf32>
    %302 = vector.extract_strided_slice %301 {offsets = [0, 0], sizes = [4, 16], strides = [1, 1]} : vector<4x20xf32> to vector<4x16xf32>
    %c40_309 = arith.constant 40 : index
    %c64_310 = arith.constant 64 : index
    %303 = vector.load %arg8[%c40_309, %c64_310] : memref<100x256xf32, #tpu.memory_space<vmem>>, vector<4x16xf32>
    tpu.vector_store %arg8[%c40_309, %c64_310], %302 {strides = array<i32>} : memref<100x256xf32, #tpu.memory_space<vmem>>, vector<4x16xf32>,
    %304 = vector.extract_strided_slice %301 {offsets = [0, 1], sizes = [4, 16], strides = [1, 1]} : vector<4x20xf32> to vector<4x16xf32>
    %c44_311 = arith.constant 44 : index
    %c64_312 = arith.constant 64 : index
    %305 = vector.load %arg8[%c44_311, %c64_312] : memref<100x256xf32, #tpu.memory_space<vmem>>, vector<4x16xf32>
    tpu.vector_store %arg8[%c44_311, %c64_312], %304 {strides = array<i32>} : memref<100x256xf32, #tpu.memory_space<vmem>>, vector<4x16xf32>,
    %306 = vector.extract_strided_slice %301 {offsets = [0, 2], sizes = [4, 16], strides = [1, 1]} : vector<4x20xf32> to vector<4x16xf32>
    %c48_313 = arith.constant 48 : index
    %c64_314 = arith.constant 64 : index
    %307 = vector.load %arg8[%c48_313, %c64_314] : memref<100x256xf32, #tpu.memory_space<vmem>>, vector<4x16xf32>
    tpu.vector_store %arg8[%c48_313, %c64_314], %306 {strides = array<i32>} : memref<100x256xf32, #tpu.memory_space<vmem>>, vector<4x16xf32>,
    %308 = vector.extract_strided_slice %301 {offsets = [0, 3], sizes = [4, 16], strides = [1, 1]} : vector<4x20xf32> to vector<4x16xf32>
    %c52_315 = arith.constant 52 : index
    %c64_316 = arith.constant 64 : index
    %309 = vector.load %arg8[%c52_315, %c64_316] : memref<100x256xf32, #tpu.memory_space<vmem>>, vector<4x16xf32>
    tpu.vector_store %arg8[%c52_315, %c64_316], %308 {strides = array<i32>} : memref<100x256xf32, #tpu.memory_space<vmem>>, vector<4x16xf32>,
    %310 = vector.extract_strided_slice %301 {offsets = [0, 4], sizes = [4, 16], strides = [1, 1]} : vector<4x20xf32> to vector<4x16xf32>
    %c56_317 = arith.constant 56 : index
    %c64_318 = arith.constant 64 : index
    %311 = vector.load %arg8[%c56_317, %c64_318] : memref<100x256xf32, #tpu.memory_space<vmem>>, vector<4x16xf32>
    tpu.vector_store %arg8[%c56_317, %c64_318], %310 {strides = array<i32>} : memref<100x256xf32, #tpu.memory_space<vmem>>, vector<4x16xf32>,
    %c0_319 = arith.constant 0 : index
    %c7_320 = arith.constant 7 : index
    %c0_321 = arith.constant 0 : index
    %312 = vector.load %arg7[%c0_319, %c7_320, %c0_321] : memref<4x20x20xf32, #tpu.memory_space<vmem>>, vector<4x1x20xf32>
    %313 = vector.shape_cast %312 : vector<4x1x20xf32> to vector<4x20xf32>
    %314 = vector.extract_strided_slice %313 {offsets = [0, 0], sizes = [4, 16], strides = [1, 1]} : vector<4x20xf32> to vector<4x16xf32>
    %c60_322 = arith.constant 60 : index
    %c64_323 = arith.constant 64 : index
    %315 = vector.load %arg8[%c60_322, %c64_323] : memref<100x256xf32, #tpu.memory_space<vmem>>, vector<4x16xf32>
    tpu.vector_store %arg8[%c60_322, %c64_323], %314 {strides = array<i32>} : memref<100x256xf32, #tpu.memory_space<vmem>>, vector<4x16xf32>,
    %316 = vector.extract_strided_slice %313 {offsets = [0, 1], sizes = [4, 16], strides = [1, 1]} : vector<4x20xf32> to vector<4x16xf32>
    %c64_324 = arith.constant 64 : index
    %c64_325 = arith.constant 64 : index
    %317 = vector.load %arg8[%c64_324, %c64_325] : memref<100x256xf32, #tpu.memory_space<vmem>>, vector<4x16xf32>
    tpu.vector_store %arg8[%c64_324, %c64_325], %316 {strides = array<i32>} : memref<100x256xf32, #tpu.memory_space<vmem>>, vector<4x16xf32>,
    %318 = vector.extract_strided_slice %313 {offsets = [0, 2], sizes = [4, 16], strides = [1, 1]} : vector<4x20xf32> to vector<4x16xf32>
    %c68_326 = arith.constant 68 : index
    %c64_327 = arith.constant 64 : index
    %319 = vector.load %arg8[%c68_326, %c64_327] : memref<100x256xf32, #tpu.memory_space<vmem>>, vector<4x16xf32>
    tpu.vector_store %arg8[%c68_326, %c64_327], %318 {strides = array<i32>} : memref<100x256xf32, #tpu.memory_space<vmem>>, vector<4x16xf32>,
    %320 = vector.extract_strided_slice %313 {offsets = [0, 3], sizes = [4, 16], strides = [1, 1]} : vector<4x20xf32> to vector<4x16xf32>
    %c72_328 = arith.constant 72 : index
    %c64_329 = arith.constant 64 : index
    %321 = vector.load %arg8[%c72_328, %c64_329] : memref<100x256xf32, #tpu.memory_space<vmem>>, vector<4x16xf32>
    tpu.vector_store %arg8[%c72_328, %c64_329], %320 {strides = array<i32>} : memref<100x256xf32, #tpu.memory_space<vmem>>, vector<4x16xf32>,
    %322 = vector.extract_strided_slice %313 {offsets = [0, 4], sizes = [4, 16], strides = [1, 1]} : vector<4x20xf32> to vector<4x16xf32>
    %c76_330 = arith.constant 76 : index
    %c64_331 = arith.constant 64 : index
    %323 = vector.load %arg8[%c76_330, %c64_331] : memref<100x256xf32, #tpu.memory_space<vmem>>, vector<4x16xf32>
    tpu.vector_store %arg8[%c76_330, %c64_331], %322 {strides = array<i32>} : memref<100x256xf32, #tpu.memory_space<vmem>>, vector<4x16xf32>,
    %c0_332 = arith.constant 0 : index
    %c8_333 = arith.constant 8 : index
    %c0_334 = arith.constant 0 : index
    %324 = vector.load %arg7[%c0_332, %c8_333, %c0_334] : memref<4x20x20xf32, #tpu.memory_space<vmem>>, vector<4x1x20xf32>
    %325 = vector.shape_cast %324 : vector<4x1x20xf32> to vector<4x20xf32>
    %326 = vector.extract_strided_slice %325 {offsets = [0, 0], sizes = [4, 16], strides = [1, 1]} : vector<4x20xf32> to vector<4x16xf32>
    %c80_335 = arith.constant 80 : index
    %c64_336 = arith.constant 64 : index
    %327 = vector.load %arg8[%c80_335, %c64_336] : memref<100x256xf32, #tpu.memory_space<vmem>>, vector<4x16xf32>
    tpu.vector_store %arg8[%c80_335, %c64_336], %326 {strides = array<i32>} : memref<100x256xf32, #tpu.memory_space<vmem>>, vector<4x16xf32>,
    %328 = vector.extract_strided_slice %325 {offsets = [0, 1], sizes = [4, 16], strides = [1, 1]} : vector<4x20xf32> to vector<4x16xf32>
    %c84_337 = arith.constant 84 : index
    %c64_338 = arith.constant 64 : index
    %329 = vector.load %arg8[%c84_337, %c64_338] : memref<100x256xf32, #tpu.memory_space<vmem>>, vector<4x16xf32>
    tpu.vector_store %arg8[%c84_337, %c64_338], %328 {strides = array<i32>} : memref<100x256xf32, #tpu.memory_space<vmem>>, vector<4x16xf32>,
    %330 = vector.extract_strided_slice %325 {offsets = [0, 2], sizes = [4, 16], strides = [1, 1]} : vector<4x20xf32> to vector<4x16xf32>
    %c88_339 = arith.constant 88 : index
    %c64_340 = arith.constant 64 : index
    %331 = vector.load %arg8[%c88_339, %c64_340] : memref<100x256xf32, #tpu.memory_space<vmem>>, vector<4x16xf32>
    tpu.vector_store %arg8[%c88_339, %c64_340], %330 {strides = array<i32>} : memref<100x256xf32, #tpu.memory_space<vmem>>, vector<4x16xf32>,
    %332 = vector.extract_strided_slice %325 {offsets = [0, 3], sizes = [4, 16], strides = [1, 1]} : vector<4x20xf32> to vector<4x16xf32>
    %c92_341 = arith.constant 92 : index
    %c64_342 = arith.constant 64 : index
    %333 = vector.load %arg8[%c92_341, %c64_342] : memref<100x256xf32, #tpu.memory_space<vmem>>, vector<4x16xf32>
    tpu.vector_store %arg8[%c92_341, %c64_342], %332 {strides = array<i32>} : memref<100x256xf32, #tpu.memory_space<vmem>>, vector<4x16xf32>,
    %334 = vector.extract_strided_slice %325 {offsets = [0, 4], sizes = [4, 16], strides = [1, 1]} : vector<4x20xf32> to vector<4x16xf32>
    %c96_343 = arith.constant 96 : index
    %c64_344 = arith.constant 64 : index
    %335 = vector.load %arg8[%c96_343, %c64_344] : memref<100x256xf32, #tpu.memory_space<vmem>>, vector<4x16xf32>
    tpu.vector_store %arg8[%c96_343, %c64_344], %334 {strides = array<i32>} : memref<100x256xf32, #tpu.memory_space<vmem>>, vector<4x16xf32>,
    %c0_345 = arith.constant 0 : index
    %c5_346 = arith.constant 5 : index
    %c0_347 = arith.constant 0 : index
    %336 = vector.load %arg7[%c0_345, %c5_346, %c0_347] : memref<4x20x20xf32, #tpu.memory_space<vmem>>, vector<4x1x20xf32>
    %337 = vector.shape_cast %336 : vector<4x1x20xf32> to vector<4x20xf32>
    %338 = vector.extract_strided_slice %337 {offsets = [0, 0], sizes = [4, 16], strides = [1, 1]} : vector<4x20xf32> to vector<4x16xf32>
    %c0_348 = arith.constant 0 : index
    %c80_349 = arith.constant 80 : index
    %339 = vector.load %arg8[%c0_348, %c80_349] : memref<100x256xf32, #tpu.memory_space<vmem>>, vector<4x16xf32>
    tpu.vector_store %arg8[%c0_348, %c80_349], %338 {strides = array<i32>} : memref<100x256xf32, #tpu.memory_space<vmem>>, vector<4x16xf32>,
    %340 = vector.extract_strided_slice %337 {offsets = [0, 1], sizes = [4, 16], strides = [1, 1]} : vector<4x20xf32> to vector<4x16xf32>
    %c4_350 = arith.constant 4 : index
    %c80_351 = arith.constant 80 : index
    %341 = vector.load %arg8[%c4_350, %c80_351] : memref<100x256xf32, #tpu.memory_space<vmem>>, vector<4x16xf32>
    tpu.vector_store %arg8[%c4_350, %c80_351], %340 {strides = array<i32>} : memref<100x256xf32, #tpu.memory_space<vmem>>, vector<4x16xf32>,
    %342 = vector.extract_strided_slice %337 {offsets = [0, 2], sizes = [4, 16], strides = [1, 1]} : vector<4x20xf32> to vector<4x16xf32>
    %c8_352 = arith.constant 8 : index
    %c80_353 = arith.constant 80 : index
    %343 = vector.load %arg8[%c8_352, %c80_353] : memref<100x256xf32, #tpu.memory_space<vmem>>, vector<4x16xf32>
    tpu.vector_store %arg8[%c8_352, %c80_353], %342 {strides = array<i32>} : memref<100x256xf32, #tpu.memory_space<vmem>>, vector<4x16xf32>,
    %344 = vector.extract_strided_slice %337 {offsets = [0, 3], sizes = [4, 16], strides = [1, 1]} : vector<4x20xf32> to vector<4x16xf32>
    %c12_354 = arith.constant 12 : index
    %c80_355 = arith.constant 80 : index
    %345 = vector.load %arg8[%c12_354, %c80_355] : memref<100x256xf32, #tpu.memory_space<vmem>>, vector<4x16xf32>
    tpu.vector_store %arg8[%c12_354, %c80_355], %344 {strides = array<i32>} : memref<100x256xf32, #tpu.memory_space<vmem>>, vector<4x16xf32>,
    %346 = vector.extract_strided_slice %337 {offsets = [0, 4], sizes = [4, 16], strides = [1, 1]} : vector<4x20xf32> to vector<4x16xf32>
    %c16_356 = arith.constant 16 : index
    %c80_357 = arith.constant 80 : index
    %347 = vector.load %arg8[%c16_356, %c80_357] : memref<100x256xf32, #tpu.memory_space<vmem>>, vector<4x16xf32>
    tpu.vector_store %arg8[%c16_356, %c80_357], %346 {strides = array<i32>} : memref<100x256xf32, #tpu.memory_space<vmem>>, vector<4x16xf32>,
    %c0_358 = arith.constant 0 : index
    %c6_359 = arith.constant 6 : index
    %c0_360 = arith.constant 0 : index
    %348 = vector.load %arg7[%c0_358, %c6_359, %c0_360] : memref<4x20x20xf32, #tpu.memory_space<vmem>>, vector<4x1x20xf32>
    %349 = vector.shape_cast %348 : vector<4x1x20xf32> to vector<4x20xf32>
    %350 = vector.extract_strided_slice %349 {offsets = [0, 0], sizes = [4, 16], strides = [1, 1]} : vector<4x20xf32> to vector<4x16xf32>
    %c20_361 = arith.constant 20 : index
    %c80_362 = arith.constant 80 : index
    %351 = vector.load %arg8[%c20_361, %c80_362] : memref<100x256xf32, #tpu.memory_space<vmem>>, vector<4x16xf32>
    tpu.vector_store %arg8[%c20_361, %c80_362], %350 {strides = array<i32>} : memref<100x256xf32, #tpu.memory_space<vmem>>, vector<4x16xf32>,
    %352 = vector.extract_strided_slice %349 {offsets = [0, 1], sizes = [4, 16], strides = [1, 1]} : vector<4x20xf32> to vector<4x16xf32>
    %c24_363 = arith.constant 24 : index
    %c80_364 = arith.constant 80 : index
    %353 = vector.load %arg8[%c24_363, %c80_364] : memref<100x256xf32, #tpu.memory_space<vmem>>, vector<4x16xf32>
    tpu.vector_store %arg8[%c24_363, %c80_364], %352 {strides = array<i32>} : memref<100x256xf32, #tpu.memory_space<vmem>>, vector<4x16xf32>,
    %354 = vector.extract_strided_slice %349 {offsets = [0, 2], sizes = [4, 16], strides = [1, 1]} : vector<4x20xf32> to vector<4x16xf32>
    %c28_365 = arith.constant 28 : index
    %c80_366 = arith.constant 80 : index
    %355 = vector.load %arg8[%c28_365, %c80_366] : memref<100x256xf32, #tpu.memory_space<vmem>>, vector<4x16xf32>
    tpu.vector_store %arg8[%c28_365, %c80_366], %354 {strides = array<i32>} : memref<100x256xf32, #tpu.memory_space<vmem>>, vector<4x16xf32>,
    %356 = vector.extract_strided_slice %349 {offsets = [0, 3], sizes = [4, 16], strides = [1, 1]} : vector<4x20xf32> to vector<4x16xf32>
    %c32_367 = arith.constant 32 : index
    %c80_368 = arith.constant 80 : index
    %357 = vector.load %arg8[%c32_367, %c80_368] : memref<100x256xf32, #tpu.memory_space<vmem>>, vector<4x16xf32>
    tpu.vector_store %arg8[%c32_367, %c80_368], %356 {strides = array<i32>} : memref<100x256xf32, #tpu.memory_space<vmem>>, vector<4x16xf32>,
    %358 = vector.extract_strided_slice %349 {offsets = [0, 4], sizes = [4, 16], strides = [1, 1]} : vector<4x20xf32> to vector<4x16xf32>
    %c36_369 = arith.constant 36 : index
    %c80_370 = arith.constant 80 : index
    %359 = vector.load %arg8[%c36_369, %c80_370] : memref<100x256xf32, #tpu.memory_space<vmem>>, vector<4x16xf32>
    tpu.vector_store %arg8[%c36_369, %c80_370], %358 {strides = array<i32>} : memref<100x256xf32, #tpu.memory_space<vmem>>, vector<4x16xf32>,
    %c0_371 = arith.constant 0 : index
    %c7_372 = arith.constant 7 : index
    %c0_373 = arith.constant 0 : index
    %360 = vector.load %arg7[%c0_371, %c7_372, %c0_373] : memref<4x20x20xf32, #tpu.memory_space<vmem>>, vector<4x1x20xf32>
    %361 = vector.shape_cast %360 : vector<4x1x20xf32> to vector<4x20xf32>
    %362 = vector.extract_strided_slice %361 {offsets = [0, 0], sizes = [4, 16], strides = [1, 1]} : vector<4x20xf32> to vector<4x16xf32>
    %c40_374 = arith.constant 40 : index
    %c80_375 = arith.constant 80 : index
    %363 = vector.load %arg8[%c40_374, %c80_375] : memref<100x256xf32, #tpu.memory_space<vmem>>, vector<4x16xf32>
    tpu.vector_store %arg8[%c40_374, %c80_375], %362 {strides = array<i32>} : memref<100x256xf32, #tpu.memory_space<vmem>>, vector<4x16xf32>,
    %364 = vector.extract_strided_slice %361 {offsets = [0, 1], sizes = [4, 16], strides = [1, 1]} : vector<4x20xf32> to vector<4x16xf32>
    %c44_376 = arith.constant 44 : index
    %c80_377 = arith.constant 80 : index
    %365 = vector.load %arg8[%c44_376, %c80_377] : memref<100x256xf32, #tpu.memory_space<vmem>>, vector<4x16xf32>
    tpu.vector_store %arg8[%c44_376, %c80_377], %364 {strides = array<i32>} : memref<100x256xf32, #tpu.memory_space<vmem>>, vector<4x16xf32>,
    %366 = vector.extract_strided_slice %361 {offsets = [0, 2], sizes = [4, 16], strides = [1, 1]} : vector<4x20xf32> to vector<4x16xf32>
    %c48_378 = arith.constant 48 : index
    %c80_379 = arith.constant 80 : index
    %367 = vector.load %arg8[%c48_378, %c80_379] : memref<100x256xf32, #tpu.memory_space<vmem>>, vector<4x16xf32>
    tpu.vector_store %arg8[%c48_378, %c80_379], %366 {strides = array<i32>} : memref<100x256xf32, #tpu.memory_space<vmem>>, vector<4x16xf32>,
    %368 = vector.extract_strided_slice %361 {offsets = [0, 3], sizes = [4, 16], strides = [1, 1]} : vector<4x20xf32> to vector<4x16xf32>
    %c52_380 = arith.constant 52 : index
    %c80_381 = arith.constant 80 : index
    %369 = vector.load %arg8[%c52_380, %c80_381] : memref<100x256xf32, #tpu.memory_space<vmem>>, vector<4x16xf32>
    tpu.vector_store %arg8[%c52_380, %c80_381], %368 {strides = array<i32>} : memref<100x256xf32, #tpu.memory_space<vmem>>, vector<4x16xf32>,
    %370 = vector.extract_strided_slice %361 {offsets = [0, 4], sizes = [4, 16], strides = [1, 1]} : vector<4x20xf32> to vector<4x16xf32>
    %c56_382 = arith.constant 56 : index
    %c80_383 = arith.constant 80 : index
    %371 = vector.load %arg8[%c56_382, %c80_383] : memref<100x256xf32, #tpu.memory_space<vmem>>, vector<4x16xf32>
    tpu.vector_store %arg8[%c56_382, %c80_383], %370 {strides = array<i32>} : memref<100x256xf32, #tpu.memory_space<vmem>>, vector<4x16xf32>,
    %c0_384 = arith.constant 0 : index
    %c8_385 = arith.constant 8 : index
    %c0_386 = arith.constant 0 : index
    %372 = vector.load %arg7[%c0_384, %c8_385, %c0_386] : memref<4x20x20xf32, #tpu.memory_space<vmem>>, vector<4x1x20xf32>
    %373 = vector.shape_cast %372 : vector<4x1x20xf32> to vector<4x20xf32>
    %374 = vector.extract_strided_slice %373 {offsets = [0, 0], sizes = [4, 16], strides = [1, 1]} : vector<4x20xf32> to vector<4x16xf32>
    %c60_387 = arith.constant 60 : index
    %c80_388 = arith.constant 80 : index
    %375 = vector.load %arg8[%c60_387, %c80_388] : memref<100x256xf32, #tpu.memory_space<vmem>>, vector<4x16xf32>
    tpu.vector_store %arg8[%c60_387, %c80_388], %374 {strides = array<i32>} : memref<100x256xf32, #tpu.memory_space<vmem>>, vector<4x16xf32>,
    %376 = vector.extract_strided_slice %373 {offsets = [0, 1], sizes = [4, 16], strides = [1, 1]} : vector<4x20xf32> to vector<4x16xf32>
    %c64_389 = arith.constant 64 : index
    %c80_390 = arith.constant 80 : index
    %377 = vector.load %arg8[%c64_389, %c80_390] : memref<100x256xf32, #tpu.memory_space<vmem>>, vector<4x16xf32>
    tpu.vector_store %arg8[%c64_389, %c80_390], %376 {strides = array<i32>} : memref<100x256xf32, #tpu.memory_space<vmem>>, vector<4x16xf32>,
    %378 = vector.extract_strided_slice %373 {offsets = [0, 2], sizes = [4, 16], strides = [1, 1]} : vector<4x20xf32> to vector<4x16xf32>
    %c68_391 = arith.constant 68 : index
    %c80_392 = arith.constant 80 : index
    %379 = vector.load %arg8[%c68_391, %c80_392] : memref<100x256xf32, #tpu.memory_space<vmem>>, vector<4x16xf32>
    tpu.vector_store %arg8[%c68_391, %c80_392], %378 {strides = array<i32>} : memref<100x256xf32, #tpu.memory_space<vmem>>, vector<4x16xf32>,
    %380 = vector.extract_strided_slice %373 {offsets = [0, 3], sizes = [4, 16], strides = [1, 1]} : vector<4x20xf32> to vector<4x16xf32>
    %c72_393 = arith.constant 72 : index
    %c80_394 = arith.constant 80 : index
    %381 = vector.load %arg8[%c72_393, %c80_394] : memref<100x256xf32, #tpu.memory_space<vmem>>, vector<4x16xf32>
    tpu.vector_store %arg8[%c72_393, %c80_394], %380 {strides = array<i32>} : memref<100x256xf32, #tpu.memory_space<vmem>>, vector<4x16xf32>,
    %382 = vector.extract_strided_slice %373 {offsets = [0, 4], sizes = [4, 16], strides = [1, 1]} : vector<4x20xf32> to vector<4x16xf32>
    %c76_395 = arith.constant 76 : index
    %c80_396 = arith.constant 80 : index
    %383 = vector.load %arg8[%c76_395, %c80_396] : memref<100x256xf32, #tpu.memory_space<vmem>>, vector<4x16xf32>
    tpu.vector_store %arg8[%c76_395, %c80_396], %382 {strides = array<i32>} : memref<100x256xf32, #tpu.memory_space<vmem>>, vector<4x16xf32>,
    %c0_397 = arith.constant 0 : index
    %c9 = arith.constant 9 : index
    %c0_398 = arith.constant 0 : index
    %384 = vector.load %arg7[%c0_397, %c9, %c0_398] : memref<4x20x20xf32, #tpu.memory_space<vmem>>, vector<4x1x20xf32>
    %385 = vector.shape_cast %384 : vector<4x1x20xf32> to vector<4x20xf32>
    %386 = vector.extract_strided_slice %385 {offsets = [0, 0], sizes = [4, 16], strides = [1, 1]} : vector<4x20xf32> to vector<4x16xf32>
    %c80_399 = arith.constant 80 : index
    %c80_400 = arith.constant 80 : index
    %387 = vector.load %arg8[%c80_399, %c80_400] : memref<100x256xf32, #tpu.memory_space<vmem>>, vector<4x16xf32>
    tpu.vector_store %arg8[%c80_399, %c80_400], %386 {strides = array<i32>} : memref<100x256xf32, #tpu.memory_space<vmem>>, vector<4x16xf32>,
    %388 = vector.extract_strided_slice %385 {offsets = [0, 1], sizes = [4, 16], strides = [1, 1]} : vector<4x20xf32> to vector<4x16xf32>
    %c84_401 = arith.constant 84 : index
    %c80_402 = arith.constant 80 : index
    %389 = vector.load %arg8[%c84_401, %c80_402] : memref<100x256xf32, #tpu.memory_space<vmem>>, vector<4x16xf32>
    tpu.vector_store %arg8[%c84_401, %c80_402], %388 {strides = array<i32>} : memref<100x256xf32, #tpu.memory_space<vmem>>, vector<4x16xf32>,
    %390 = vector.extract_strided_slice %385 {offsets = [0, 2], sizes = [4, 16], strides = [1, 1]} : vector<4x20xf32> to vector<4x16xf32>
    %c88_403 = arith.constant 88 : index
    %c80_404 = arith.constant 80 : index
    %391 = vector.load %arg8[%c88_403, %c80_404] : memref<100x256xf32, #tpu.memory_space<vmem>>, vector<4x16xf32>
    tpu.vector_store %arg8[%c88_403, %c80_404], %390 {strides = array<i32>} : memref<100x256xf32, #tpu.memory_space<vmem>>, vector<4x16xf32>,
    %392 = vector.extract_strided_slice %385 {offsets = [0, 3], sizes = [4, 16], strides = [1, 1]} : vector<4x20xf32> to vector<4x16xf32>
    %c92_405 = arith.constant 92 : index
    %c80_406 = arith.constant 80 : index
    %393 = vector.load %arg8[%c92_405, %c80_406] : memref<100x256xf32, #tpu.memory_space<vmem>>, vector<4x16xf32>
    tpu.vector_store %arg8[%c92_405, %c80_406], %392 {strides = array<i32>} : memref<100x256xf32, #tpu.memory_space<vmem>>, vector<4x16xf32>,
    %394 = vector.extract_strided_slice %385 {offsets = [0, 4], sizes = [4, 16], strides = [1, 1]} : vector<4x20xf32> to vector<4x16xf32>
    %c96_407 = arith.constant 96 : index
    %c80_408 = arith.constant 80 : index
    %395 = vector.load %arg8[%c96_407, %c80_408] : memref<100x256xf32, #tpu.memory_space<vmem>>, vector<4x16xf32>
    tpu.vector_store %arg8[%c96_407, %c80_408], %394 {strides = array<i32>} : memref<100x256xf32, #tpu.memory_space<vmem>>, vector<4x16xf32>,
    %c0_409 = arith.constant 0 : index
    %c6_410 = arith.constant 6 : index
    %c0_411 = arith.constant 0 : index
    %396 = vector.load %arg7[%c0_409, %c6_410, %c0_411] : memref<4x20x20xf32, #tpu.memory_space<vmem>>, vector<4x1x20xf32>
    %397 = vector.shape_cast %396 : vector<4x1x20xf32> to vector<4x20xf32>
    %398 = vector.extract_strided_slice %397 {offsets = [0, 0], sizes = [4, 16], strides = [1, 1]} : vector<4x20xf32> to vector<4x16xf32>
    %c0_412 = arith.constant 0 : index
    %c96_413 = arith.constant 96 : index
    %399 = vector.load %arg8[%c0_412, %c96_413] : memref<100x256xf32, #tpu.memory_space<vmem>>, vector<4x16xf32>
    tpu.vector_store %arg8[%c0_412, %c96_413], %398 {strides = array<i32>} : memref<100x256xf32, #tpu.memory_space<vmem>>, vector<4x16xf32>,
    %400 = vector.extract_strided_slice %397 {offsets = [0, 1], sizes = [4, 16], strides = [1, 1]} : vector<4x20xf32> to vector<4x16xf32>
    %c4_414 = arith.constant 4 : index
    %c96_415 = arith.constant 96 : index
    %401 = vector.load %arg8[%c4_414, %c96_415] : memref<100x256xf32, #tpu.memory_space<vmem>>, vector<4x16xf32>
    tpu.vector_store %arg8[%c4_414, %c96_415], %400 {strides = array<i32>} : memref<100x256xf32, #tpu.memory_space<vmem>>, vector<4x16xf32>,
    %402 = vector.extract_strided_slice %397 {offsets = [0, 2], sizes = [4, 16], strides = [1, 1]} : vector<4x20xf32> to vector<4x16xf32>
    %c8_416 = arith.constant 8 : index
    %c96_417 = arith.constant 96 : index
    %403 = vector.load %arg8[%c8_416, %c96_417] : memref<100x256xf32, #tpu.memory_space<vmem>>, vector<4x16xf32>
    tpu.vector_store %arg8[%c8_416, %c96_417], %402 {strides = array<i32>} : memref<100x256xf32, #tpu.memory_space<vmem>>, vector<4x16xf32>,
    %404 = vector.extract_strided_slice %397 {offsets = [0, 3], sizes = [4, 16], strides = [1, 1]} : vector<4x20xf32> to vector<4x16xf32>
    %c12_418 = arith.constant 12 : index
    %c96_419 = arith.constant 96 : index
    %405 = vector.load %arg8[%c12_418, %c96_419] : memref<100x256xf32, #tpu.memory_space<vmem>>, vector<4x16xf32>
    tpu.vector_store %arg8[%c12_418, %c96_419], %404 {strides = array<i32>} : memref<100x256xf32, #tpu.memory_space<vmem>>, vector<4x16xf32>,
    %406 = vector.extract_strided_slice %397 {offsets = [0, 4], sizes = [4, 16], strides = [1, 1]} : vector<4x20xf32> to vector<4x16xf32>
    %c16_420 = arith.constant 16 : index
    %c96_421 = arith.constant 96 : index
    %407 = vector.load %arg8[%c16_420, %c96_421] : memref<100x256xf32, #tpu.memory_space<vmem>>, vector<4x16xf32>
    tpu.vector_store %arg8[%c16_420, %c96_421], %406 {strides = array<i32>} : memref<100x256xf32, #tpu.memory_space<vmem>>, vector<4x16xf32>,
    %c0_422 = arith.constant 0 : index
    %c7_423 = arith.constant 7 : index
    %c0_424 = arith.constant 0 : index
    %408 = vector.load %arg7[%c0_422, %c7_423, %c0_424] : memref<4x20x20xf32, #tpu.memory_space<vmem>>, vector<4x1x20xf32>
    %409 = vector.shape_cast %408 : vector<4x1x20xf32> to vector<4x20xf32>
    %410 = vector.extract_strided_slice %409 {offsets = [0, 0], sizes = [4, 16], strides = [1, 1]} : vector<4x20xf32> to vector<4x16xf32>
    %c20_425 = arith.constant 20 : index
    %c96_426 = arith.constant 96 : index
    %411 = vector.load %arg8[%c20_425, %c96_426] : memref<100x256xf32, #tpu.memory_space<vmem>>, vector<4x16xf32>
    tpu.vector_store %arg8[%c20_425, %c96_426], %410 {strides = array<i32>} : memref<100x256xf32, #tpu.memory_space<vmem>>, vector<4x16xf32>,
    %412 = vector.extract_strided_slice %409 {offsets = [0, 1], sizes = [4, 16], strides = [1, 1]} : vector<4x20xf32> to vector<4x16xf32>
    %c24_427 = arith.constant 24 : index
    %c96_428 = arith.constant 96 : index
    %413 = vector.load %arg8[%c24_427, %c96_428] : memref<100x256xf32, #tpu.memory_space<vmem>>, vector<4x16xf32>
    tpu.vector_store %arg8[%c24_427, %c96_428], %412 {strides = array<i32>} : memref<100x256xf32, #tpu.memory_space<vmem>>, vector<4x16xf32>,
    %414 = vector.extract_strided_slice %409 {offsets = [0, 2], sizes = [4, 16], strides = [1, 1]} : vector<4x20xf32> to vector<4x16xf32>
    %c28_429 = arith.constant 28 : index
    %c96_430 = arith.constant 96 : index
    %415 = vector.load %arg8[%c28_429, %c96_430] : memref<100x256xf32, #tpu.memory_space<vmem>>, vector<4x16xf32>
    tpu.vector_store %arg8[%c28_429, %c96_430], %414 {strides = array<i32>} : memref<100x256xf32, #tpu.memory_space<vmem>>, vector<4x16xf32>,
    %416 = vector.extract_strided_slice %409 {offsets = [0, 3], sizes = [4, 16], strides = [1, 1]} : vector<4x20xf32> to vector<4x16xf32>
    %c32_431 = arith.constant 32 : index
    %c96_432 = arith.constant 96 : index
    %417 = vector.load %arg8[%c32_431, %c96_432] : memref<100x256xf32, #tpu.memory_space<vmem>>, vector<4x16xf32>
    tpu.vector_store %arg8[%c32_431, %c96_432], %416 {strides = array<i32>} : memref<100x256xf32, #tpu.memory_space<vmem>>, vector<4x16xf32>,
    %418 = vector.extract_strided_slice %409 {offsets = [0, 4], sizes = [4, 16], strides = [1, 1]} : vector<4x20xf32> to vector<4x16xf32>
    %c36_433 = arith.constant 36 : index
    %c96_434 = arith.constant 96 : index
    %419 = vector.load %arg8[%c36_433, %c96_434] : memref<100x256xf32, #tpu.memory_space<vmem>>, vector<4x16xf32>
    tpu.vector_store %arg8[%c36_433, %c96_434], %418 {strides = array<i32>} : memref<100x256xf32, #tpu.memory_space<vmem>>, vector<4x16xf32>,
    %c0_435 = arith.constant 0 : index
    %c8_436 = arith.constant 8 : index
    %c0_437 = arith.constant 0 : index
    %420 = vector.load %arg7[%c0_435, %c8_436, %c0_437] : memref<4x20x20xf32, #tpu.memory_space<vmem>>, vector<4x1x20xf32>
    %421 = vector.shape_cast %420 : vector<4x1x20xf32> to vector<4x20xf32>
    %422 = vector.extract_strided_slice %421 {offsets = [0, 0], sizes = [4, 16], strides = [1, 1]} : vector<4x20xf32> to vector<4x16xf32>
    %c40_438 = arith.constant 40 : index
    %c96_439 = arith.constant 96 : index
    %423 = vector.load %arg8[%c40_438, %c96_439] : memref<100x256xf32, #tpu.memory_space<vmem>>, vector<4x16xf32>
    tpu.vector_store %arg8[%c40_438, %c96_439], %422 {strides = array<i32>} : memref<100x256xf32, #tpu.memory_space<vmem>>, vector<4x16xf32>,
    %424 = vector.extract_strided_slice %421 {offsets = [0, 1], sizes = [4, 16], strides = [1, 1]} : vector<4x20xf32> to vector<4x16xf32>
    %c44_440 = arith.constant 44 : index
    %c96_441 = arith.constant 96 : index
    %425 = vector.load %arg8[%c44_440, %c96_441] : memref<100x256xf32, #tpu.memory_space<vmem>>, vector<4x16xf32>
    tpu.vector_store %arg8[%c44_440, %c96_441], %424 {strides = array<i32>} : memref<100x256xf32, #tpu.memory_space<vmem>>, vector<4x16xf32>,
    %426 = vector.extract_strided_slice %421 {offsets = [0, 2], sizes = [4, 16], strides = [1, 1]} : vector<4x20xf32> to vector<4x16xf32>
    %c48_442 = arith.constant 48 : index
    %c96_443 = arith.constant 96 : index
    %427 = vector.load %arg8[%c48_442, %c96_443] : memref<100x256xf32, #tpu.memory_space<vmem>>, vector<4x16xf32>
    tpu.vector_store %arg8[%c48_442, %c96_443], %426 {strides = array<i32>} : memref<100x256xf32, #tpu.memory_space<vmem>>, vector<4x16xf32>,
    %428 = vector.extract_strided_slice %421 {offsets = [0, 3], sizes = [4, 16], strides = [1, 1]} : vector<4x20xf32> to vector<4x16xf32>
    %c52_444 = arith.constant 52 : index
    %c96_445 = arith.constant 96 : index
    %429 = vector.load %arg8[%c52_444, %c96_445] : memref<100x256xf32, #tpu.memory_space<vmem>>, vector<4x16xf32>
    tpu.vector_store %arg8[%c52_444, %c96_445], %428 {strides = array<i32>} : memref<100x256xf32, #tpu.memory_space<vmem>>, vector<4x16xf32>,
    %430 = vector.extract_strided_slice %421 {offsets = [0, 4], sizes = [4, 16], strides = [1, 1]} : vector<4x20xf32> to vector<4x16xf32>
    %c56_446 = arith.constant 56 : index
    %c96_447 = arith.constant 96 : index
    %431 = vector.load %arg8[%c56_446, %c96_447] : memref<100x256xf32, #tpu.memory_space<vmem>>, vector<4x16xf32>
    tpu.vector_store %arg8[%c56_446, %c96_447], %430 {strides = array<i32>} : memref<100x256xf32, #tpu.memory_space<vmem>>, vector<4x16xf32>,
    %c0_448 = arith.constant 0 : index
    %c9_449 = arith.constant 9 : index
    %c0_450 = arith.constant 0 : index
    %432 = vector.load %arg7[%c0_448, %c9_449, %c0_450] : memref<4x20x20xf32, #tpu.memory_space<vmem>>, vector<4x1x20xf32>
    %433 = vector.shape_cast %432 : vector<4x1x20xf32> to vector<4x20xf32>
    %434 = vector.extract_strided_slice %433 {offsets = [0, 0], sizes = [4, 16], strides = [1, 1]} : vector<4x20xf32> to vector<4x16xf32>
    %c60_451 = arith.constant 60 : index
    %c96_452 = arith.constant 96 : index
    %435 = vector.load %arg8[%c60_451, %c96_452] : memref<100x256xf32, #tpu.memory_space<vmem>>, vector<4x16xf32>
    tpu.vector_store %arg8[%c60_451, %c96_452], %434 {strides = array<i32>} : memref<100x256xf32, #tpu.memory_space<vmem>>, vector<4x16xf32>,
    %436 = vector.extract_strided_slice %433 {offsets = [0, 1], sizes = [4, 16], strides = [1, 1]} : vector<4x20xf32> to vector<4x16xf32>
    %c64_453 = arith.constant 64 : index
    %c96_454 = arith.constant 96 : index
    %437 = vector.load %arg8[%c64_453, %c96_454] : memref<100x256xf32, #tpu.memory_space<vmem>>, vector<4x16xf32>
    tpu.vector_store %arg8[%c64_453, %c96_454], %436 {strides = array<i32>} : memref<100x256xf32, #tpu.memory_space<vmem>>, vector<4x16xf32>,
    %438 = vector.extract_strided_slice %433 {offsets = [0, 2], sizes = [4, 16], strides = [1, 1]} : vector<4x20xf32> to vector<4x16xf32>
    %c68_455 = arith.constant 68 : index
    %c96_456 = arith.constant 96 : index
    %439 = vector.load %arg8[%c68_455, %c96_456] : memref<100x256xf32, #tpu.memory_space<vmem>>, vector<4x16xf32>
    tpu.vector_store %arg8[%c68_455, %c96_456], %438 {strides = array<i32>} : memref<100x256xf32, #tpu.memory_space<vmem>>, vector<4x16xf32>,
    %440 = vector.extract_strided_slice %433 {offsets = [0, 3], sizes = [4, 16], strides = [1, 1]} : vector<4x20xf32> to vector<4x16xf32>
    %c72_457 = arith.constant 72 : index
    %c96_458 = arith.constant 96 : index
    %441 = vector.load %arg8[%c72_457, %c96_458] : memref<100x256xf32, #tpu.memory_space<vmem>>, vector<4x16xf32>
    tpu.vector_store %arg8[%c72_457, %c96_458], %440 {strides = array<i32>} : memref<100x256xf32, #tpu.memory_space<vmem>>, vector<4x16xf32>,
    %442 = vector.extract_strided_slice %433 {offsets = [0, 4], sizes = [4, 16], strides = [1, 1]} : vector<4x20xf32> to vector<4x16xf32>
    %c76_459 = arith.constant 76 : index
    %c96_460 = arith.constant 96 : index
    %443 = vector.load %arg8[%c76_459, %c96_460] : memref<100x256xf32, #tpu.memory_space<vmem>>, vector<4x16xf32>
    tpu.vector_store %arg8[%c76_459, %c96_460], %442 {strides = array<i32>} : memref<100x256xf32, #tpu.memory_space<vmem>>, vector<4x16xf32>,
    %c0_461 = arith.constant 0 : index
    %c10 = arith.constant 10 : index
    %c0_462 = arith.constant 0 : index
    %444 = vector.load %arg7[%c0_461, %c10, %c0_462] : memref<4x20x20xf32, #tpu.memory_space<vmem>>, vector<4x1x20xf32>
    %445 = vector.shape_cast %444 : vector<4x1x20xf32> to vector<4x20xf32>
    %446 = vector.extract_strided_slice %445 {offsets = [0, 0], sizes = [4, 16], strides = [1, 1]} : vector<4x20xf32> to vector<4x16xf32>
    %c80_463 = arith.constant 80 : index
    %c96_464 = arith.constant 96 : index
    %447 = vector.load %arg8[%c80_463, %c96_464] : memref<100x256xf32, #tpu.memory_space<vmem>>, vector<4x16xf32>
    tpu.vector_store %arg8[%c80_463, %c96_464], %446 {strides = array<i32>} : memref<100x256xf32, #tpu.memory_space<vmem>>, vector<4x16xf32>,
    %448 = vector.extract_strided_slice %445 {offsets = [0, 1], sizes = [4, 16], strides = [1, 1]} : vector<4x20xf32> to vector<4x16xf32>
    %c84_465 = arith.constant 84 : index
    %c96_466 = arith.constant 96 : index
    %449 = vector.load %arg8[%c84_465, %c96_466] : memref<100x256xf32, #tpu.memory_space<vmem>>, vector<4x16xf32>
    tpu.vector_store %arg8[%c84_465, %c96_466], %448 {strides = array<i32>} : memref<100x256xf32, #tpu.memory_space<vmem>>, vector<4x16xf32>,
    %450 = vector.extract_strided_slice %445 {offsets = [0, 2], sizes = [4, 16], strides = [1, 1]} : vector<4x20xf32> to vector<4x16xf32>
    %c88_467 = arith.constant 88 : index
    %c96_468 = arith.constant 96 : index
    %451 = vector.load %arg8[%c88_467, %c96_468] : memref<100x256xf32, #tpu.memory_space<vmem>>, vector<4x16xf32>
    tpu.vector_store %arg8[%c88_467, %c96_468], %450 {strides = array<i32>} : memref<100x256xf32, #tpu.memory_space<vmem>>, vector<4x16xf32>,
    %452 = vector.extract_strided_slice %445 {offsets = [0, 3], sizes = [4, 16], strides = [1, 1]} : vector<4x20xf32> to vector<4x16xf32>
    %c92_469 = arith.constant 92 : index
    %c96_470 = arith.constant 96 : index
    %453 = vector.load %arg8[%c92_469, %c96_470] : memref<100x256xf32, #tpu.memory_space<vmem>>, vector<4x16xf32>
    tpu.vector_store %arg8[%c92_469, %c96_470], %452 {strides = array<i32>} : memref<100x256xf32, #tpu.memory_space<vmem>>, vector<4x16xf32>,
    %454 = vector.extract_strided_slice %445 {offsets = [0, 4], sizes = [4, 16], strides = [1, 1]} : vector<4x20xf32> to vector<4x16xf32>
    %c96_471 = arith.constant 96 : index
    %c96_472 = arith.constant 96 : index
    %455 = vector.load %arg8[%c96_471, %c96_472] : memref<100x256xf32, #tpu.memory_space<vmem>>, vector<4x16xf32>
    tpu.vector_store %arg8[%c96_471, %c96_472], %454 {strides = array<i32>} : memref<100x256xf32, #tpu.memory_space<vmem>>, vector<4x16xf32>,
    %c0_473 = arith.constant 0 : index
    %c7_474 = arith.constant 7 : index
    %c0_475 = arith.constant 0 : index
    %456 = vector.load %arg7[%c0_473, %c7_474, %c0_475] : memref<4x20x20xf32, #tpu.memory_space<vmem>>, vector<4x1x20xf32>
    %457 = vector.shape_cast %456 : vector<4x1x20xf32> to vector<4x20xf32>
    %458 = vector.extract_strided_slice %457 {offsets = [0, 0], sizes = [4, 16], strides = [1, 1]} : vector<4x20xf32> to vector<4x16xf32>
    %c0_476 = arith.constant 0 : index
    %c112 = arith.constant 112 : index
    %459 = vector.load %arg8[%c0_476, %c112] : memref<100x256xf32, #tpu.memory_space<vmem>>, vector<4x16xf32>
    tpu.vector_store %arg8[%c0_476, %c112], %458 {strides = array<i32>} : memref<100x256xf32, #tpu.memory_space<vmem>>, vector<4x16xf32>,
    %460 = vector.extract_strided_slice %457 {offsets = [0, 1], sizes = [4, 16], strides = [1, 1]} : vector<4x20xf32> to vector<4x16xf32>
    %c4_477 = arith.constant 4 : index
    %c112_478 = arith.constant 112 : index
    %461 = vector.load %arg8[%c4_477, %c112_478] : memref<100x256xf32, #tpu.memory_space<vmem>>, vector<4x16xf32>
    tpu.vector_store %arg8[%c4_477, %c112_478], %460 {strides = array<i32>} : memref<100x256xf32, #tpu.memory_space<vmem>>, vector<4x16xf32>,
    %462 = vector.extract_strided_slice %457 {offsets = [0, 2], sizes = [4, 16], strides = [1, 1]} : vector<4x20xf32> to vector<4x16xf32>
    %c8_479 = arith.constant 8 : index
    %c112_480 = arith.constant 112 : index
    %463 = vector.load %arg8[%c8_479, %c112_480] : memref<100x256xf32, #tpu.memory_space<vmem>>, vector<4x16xf32>
    tpu.vector_store %arg8[%c8_479, %c112_480], %462 {strides = array<i32>} : memref<100x256xf32, #tpu.memory_space<vmem>>, vector<4x16xf32>,
    %464 = vector.extract_strided_slice %457 {offsets = [0, 3], sizes = [4, 16], strides = [1, 1]} : vector<4x20xf32> to vector<4x16xf32>
    %c12_481 = arith.constant 12 : index
    %c112_482 = arith.constant 112 : index
    %465 = vector.load %arg8[%c12_481, %c112_482] : memref<100x256xf32, #tpu.memory_space<vmem>>, vector<4x16xf32>
    tpu.vector_store %arg8[%c12_481, %c112_482], %464 {strides = array<i32>} : memref<100x256xf32, #tpu.memory_space<vmem>>, vector<4x16xf32>,
    %466 = vector.extract_strided_slice %457 {offsets = [0, 4], sizes = [4, 16], strides = [1, 1]} : vector<4x20xf32> to vector<4x16xf32>
    %c16_483 = arith.constant 16 : index
    %c112_484 = arith.constant 112 : index
    %467 = vector.load %arg8[%c16_483, %c112_484] : memref<100x256xf32, #tpu.memory_space<vmem>>, vector<4x16xf32>
    tpu.vector_store %arg8[%c16_483, %c112_484], %466 {strides = array<i32>} : memref<100x256xf32, #tpu.memory_space<vmem>>, vector<4x16xf32>,
    %c0_485 = arith.constant 0 : index
    %c8_486 = arith.constant 8 : index
    %c0_487 = arith.constant 0 : index
    %468 = vector.load %arg7[%c0_485, %c8_486, %c0_487] : memref<4x20x20xf32, #tpu.memory_space<vmem>>, vector<4x1x20xf32>
    %469 = vector.shape_cast %468 : vector<4x1x20xf32> to vector<4x20xf32>
    %470 = vector.extract_strided_slice %469 {offsets = [0, 0], sizes = [4, 16], strides = [1, 1]} : vector<4x20xf32> to vector<4x16xf32>
    %c20_488 = arith.constant 20 : index
    %c112_489 = arith.constant 112 : index
    %471 = vector.load %arg8[%c20_488, %c112_489] : memref<100x256xf32, #tpu.memory_space<vmem>>, vector<4x16xf32>
    tpu.vector_store %arg8[%c20_488, %c112_489], %470 {strides = array<i32>} : memref<100x256xf32, #tpu.memory_space<vmem>>, vector<4x16xf32>,
    %472 = vector.extract_strided_slice %469 {offsets = [0, 1], sizes = [4, 16], strides = [1, 1]} : vector<4x20xf32> to vector<4x16xf32>
    %c24_490 = arith.constant 24 : index
    %c112_491 = arith.constant 112 : index
    %473 = vector.load %arg8[%c24_490, %c112_491] : memref<100x256xf32, #tpu.memory_space<vmem>>, vector<4x16xf32>
    tpu.vector_store %arg8[%c24_490, %c112_491], %472 {strides = array<i32>} : memref<100x256xf32, #tpu.memory_space<vmem>>, vector<4x16xf32>,
    %474 = vector.extract_strided_slice %469 {offsets = [0, 2], sizes = [4, 16], strides = [1, 1]} : vector<4x20xf32> to vector<4x16xf32>
    %c28_492 = arith.constant 28 : index
    %c112_493 = arith.constant 112 : index
    %475 = vector.load %arg8[%c28_492, %c112_493] : memref<100x256xf32, #tpu.memory_space<vmem>>, vector<4x16xf32>
    tpu.vector_store %arg8[%c28_492, %c112_493], %474 {strides = array<i32>} : memref<100x256xf32, #tpu.memory_space<vmem>>, vector<4x16xf32>,
    %476 = vector.extract_strided_slice %469 {offsets = [0, 3], sizes = [4, 16], strides = [1, 1]} : vector<4x20xf32> to vector<4x16xf32>
    %c32_494 = arith.constant 32 : index
    %c112_495 = arith.constant 112 : index
    %477 = vector.load %arg8[%c32_494, %c112_495] : memref<100x256xf32, #tpu.memory_space<vmem>>, vector<4x16xf32>
    tpu.vector_store %arg8[%c32_494, %c112_495], %476 {strides = array<i32>} : memref<100x256xf32, #tpu.memory_space<vmem>>, vector<4x16xf32>,
    %478 = vector.extract_strided_slice %469 {offsets = [0, 4], sizes = [4, 16], strides = [1, 1]} : vector<4x20xf32> to vector<4x16xf32>
    %c36_496 = arith.constant 36 : index
    %c112_497 = arith.constant 112 : index
    %479 = vector.load %arg8[%c36_496, %c112_497] : memref<100x256xf32, #tpu.memory_space<vmem>>, vector<4x16xf32>
    tpu.vector_store %arg8[%c36_496, %c112_497], %478 {strides = array<i32>} : memref<100x256xf32, #tpu.memory_space<vmem>>, vector<4x16xf32>,
    %c0_498 = arith.constant 0 : index
    %c9_499 = arith.constant 9 : index
    %c0_500 = arith.constant 0 : index
    %480 = vector.load %arg7[%c0_498, %c9_499, %c0_500] : memref<4x20x20xf32, #tpu.memory_space<vmem>>, vector<4x1x20xf32>
    %481 = vector.shape_cast %480 : vector<4x1x20xf32> to vector<4x20xf32>
    %482 = vector.extract_strided_slice %481 {offsets = [0, 0], sizes = [4, 16], strides = [1, 1]} : vector<4x20xf32> to vector<4x16xf32>
    %c40_501 = arith.constant 40 : index
    %c112_502 = arith.constant 112 : index
    %483 = vector.load %arg8[%c40_501, %c112_502] : memref<100x256xf32, #tpu.memory_space<vmem>>, vector<4x16xf32>
    tpu.vector_store %arg8[%c40_501, %c112_502], %482 {strides = array<i32>} : memref<100x256xf32, #tpu.memory_space<vmem>>, vector<4x16xf32>,
    %484 = vector.extract_strided_slice %481 {offsets = [0, 1], sizes = [4, 16], strides = [1, 1]} : vector<4x20xf32> to vector<4x16xf32>
    %c44_503 = arith.constant 44 : index
    %c112_504 = arith.constant 112 : index
    %485 = vector.load %arg8[%c44_503, %c112_504] : memref<100x256xf32, #tpu.memory_space<vmem>>, vector<4x16xf32>
    tpu.vector_store %arg8[%c44_503, %c112_504], %484 {strides = array<i32>} : memref<100x256xf32, #tpu.memory_space<vmem>>, vector<4x16xf32>,
    %486 = vector.extract_strided_slice %481 {offsets = [0, 2], sizes = [4, 16], strides = [1, 1]} : vector<4x20xf32> to vector<4x16xf32>
    %c48_505 = arith.constant 48 : index
    %c112_506 = arith.constant 112 : index
    %487 = vector.load %arg8[%c48_505, %c112_506] : memref<100x256xf32, #tpu.memory_space<vmem>>, vector<4x16xf32>
    tpu.vector_store %arg8[%c48_505, %c112_506], %486 {strides = array<i32>} : memref<100x256xf32, #tpu.memory_space<vmem>>, vector<4x16xf32>,
    %488 = vector.extract_strided_slice %481 {offsets = [0, 3], sizes = [4, 16], strides = [1, 1]} : vector<4x20xf32> to vector<4x16xf32>
    %c52_507 = arith.constant 52 : index
    %c112_508 = arith.constant 112 : index
    %489 = vector.load %arg8[%c52_507, %c112_508] : memref<100x256xf32, #tpu.memory_space<vmem>>, vector<4x16xf32>
    tpu.vector_store %arg8[%c52_507, %c112_508], %488 {strides = array<i32>} : memref<100x256xf32, #tpu.memory_space<vmem>>, vector<4x16xf32>,
    %490 = vector.extract_strided_slice %481 {offsets = [0, 4], sizes = [4, 16], strides = [1, 1]} : vector<4x20xf32> to vector<4x16xf32>
    %c56_509 = arith.constant 56 : index
    %c112_510 = arith.constant 112 : index
    %491 = vector.load %arg8[%c56_509, %c112_510] : memref<100x256xf32, #tpu.memory_space<vmem>>, vector<4x16xf32>
    tpu.vector_store %arg8[%c56_509, %c112_510], %490 {strides = array<i32>} : memref<100x256xf32, #tpu.memory_space<vmem>>, vector<4x16xf32>,
    %c0_511 = arith.constant 0 : index
    %c10_512 = arith.constant 10 : index
    %c0_513 = arith.constant 0 : index
    %492 = vector.load %arg7[%c0_511, %c10_512, %c0_513] : memref<4x20x20xf32, #tpu.memory_space<vmem>>, vector<4x1x20xf32>
    %493 = vector.shape_cast %492 : vector<4x1x20xf32> to vector<4x20xf32>
    %494 = vector.extract_strided_slice %493 {offsets = [0, 0], sizes = [4, 16], strides = [1, 1]} : vector<4x20xf32> to vector<4x16xf32>
    %c60_514 = arith.constant 60 : index
    %c112_515 = arith.constant 112 : index
    %495 = vector.load %arg8[%c60_514, %c112_515] : memref<100x256xf32, #tpu.memory_space<vmem>>, vector<4x16xf32>
    tpu.vector_store %arg8[%c60_514, %c112_515], %494 {strides = array<i32>} : memref<100x256xf32, #tpu.memory_space<vmem>>, vector<4x16xf32>,
    %496 = vector.extract_strided_slice %493 {offsets = [0, 1], sizes = [4, 16], strides = [1, 1]} : vector<4x20xf32> to vector<4x16xf32>
    %c64_516 = arith.constant 64 : index
    %c112_517 = arith.constant 112 : index
    %497 = vector.load %arg8[%c64_516, %c112_517] : memref<100x256xf32, #tpu.memory_space<vmem>>, vector<4x16xf32>
    tpu.vector_store %arg8[%c64_516, %c112_517], %496 {strides = array<i32>} : memref<100x256xf32, #tpu.memory_space<vmem>>, vector<4x16xf32>,
    %498 = vector.extract_strided_slice %493 {offsets = [0, 2], sizes = [4, 16], strides = [1, 1]} : vector<4x20xf32> to vector<4x16xf32>
    %c68_518 = arith.constant 68 : index
    %c112_519 = arith.constant 112 : index
    %499 = vector.load %arg8[%c68_518, %c112_519] : memref<100x256xf32, #tpu.memory_space<vmem>>, vector<4x16xf32>
    tpu.vector_store %arg8[%c68_518, %c112_519], %498 {strides = array<i32>} : memref<100x256xf32, #tpu.memory_space<vmem>>, vector<4x16xf32>,
    %500 = vector.extract_strided_slice %493 {offsets = [0, 3], sizes = [4, 16], strides = [1, 1]} : vector<4x20xf32> to vector<4x16xf32>
    %c72_520 = arith.constant 72 : index
    %c112_521 = arith.constant 112 : index
    %501 = vector.load %arg8[%c72_520, %c112_521] : memref<100x256xf32, #tpu.memory_space<vmem>>, vector<4x16xf32>
    tpu.vector_store %arg8[%c72_520, %c112_521], %500 {strides = array<i32>} : memref<100x256xf32, #tpu.memory_space<vmem>>, vector<4x16xf32>,
    %502 = vector.extract_strided_slice %493 {offsets = [0, 4], sizes = [4, 16], strides = [1, 1]} : vector<4x20xf32> to vector<4x16xf32>
    %c76_522 = arith.constant 76 : index
    %c112_523 = arith.constant 112 : index
    %503 = vector.load %arg8[%c76_522, %c112_523] : memref<100x256xf32, #tpu.memory_space<vmem>>, vector<4x16xf32>
    tpu.vector_store %arg8[%c76_522, %c112_523], %502 {strides = array<i32>} : memref<100x256xf32, #tpu.memory_space<vmem>>, vector<4x16xf32>,
    %c0_524 = arith.constant 0 : index
    %c11 = arith.constant 11 : index
    %c0_525 = arith.constant 0 : index
    %504 = vector.load %arg7[%c0_524, %c11, %c0_525] : memref<4x20x20xf32, #tpu.memory_space<vmem>>, vector<4x1x20xf32>
    %505 = vector.shape_cast %504 : vector<4x1x20xf32> to vector<4x20xf32>
    %506 = vector.extract_strided_slice %505 {offsets = [0, 0], sizes = [4, 16], strides = [1, 1]} : vector<4x20xf32> to vector<4x16xf32>
    %c80_526 = arith.constant 80 : index
    %c112_527 = arith.constant 112 : index
    %507 = vector.load %arg8[%c80_526, %c112_527] : memref<100x256xf32, #tpu.memory_space<vmem>>, vector<4x16xf32>
    tpu.vector_store %arg8[%c80_526, %c112_527], %506 {strides = array<i32>} : memref<100x256xf32, #tpu.memory_space<vmem>>, vector<4x16xf32>,
    %508 = vector.extract_strided_slice %505 {offsets = [0, 1], sizes = [4, 16], strides = [1, 1]} : vector<4x20xf32> to vector<4x16xf32>
    %c84_528 = arith.constant 84 : index
    %c112_529 = arith.constant 112 : index
    %509 = vector.load %arg8[%c84_528, %c112_529] : memref<100x256xf32, #tpu.memory_space<vmem>>, vector<4x16xf32>
    tpu.vector_store %arg8[%c84_528, %c112_529], %508 {strides = array<i32>} : memref<100x256xf32, #tpu.memory_space<vmem>>, vector<4x16xf32>,
    %510 = vector.extract_strided_slice %505 {offsets = [0, 2], sizes = [4, 16], strides = [1, 1]} : vector<4x20xf32> to vector<4x16xf32>
    %c88_530 = arith.constant 88 : index
    %c112_531 = arith.constant 112 : index
    %511 = vector.load %arg8[%c88_530, %c112_531] : memref<100x256xf32, #tpu.memory_space<vmem>>, vector<4x16xf32>
    tpu.vector_store %arg8[%c88_530, %c112_531], %510 {strides = array<i32>} : memref<100x256xf32, #tpu.memory_space<vmem>>, vector<4x16xf32>,
    %512 = vector.extract_strided_slice %505 {offsets = [0, 3], sizes = [4, 16], strides = [1, 1]} : vector<4x20xf32> to vector<4x16xf32>
    %c92_532 = arith.constant 92 : index
    %c112_533 = arith.constant 112 : index
    %513 = vector.load %arg8[%c92_532, %c112_533] : memref<100x256xf32, #tpu.memory_space<vmem>>, vector<4x16xf32>
    tpu.vector_store %arg8[%c92_532, %c112_533], %512 {strides = array<i32>} : memref<100x256xf32, #tpu.memory_space<vmem>>, vector<4x16xf32>,
    %514 = vector.extract_strided_slice %505 {offsets = [0, 4], sizes = [4, 16], strides = [1, 1]} : vector<4x20xf32> to vector<4x16xf32>
    %c96_534 = arith.constant 96 : index
    %c112_535 = arith.constant 112 : index
    %515 = vector.load %arg8[%c96_534, %c112_535] : memref<100x256xf32, #tpu.memory_space<vmem>>, vector<4x16xf32>
    tpu.vector_store %arg8[%c96_534, %c112_535], %514 {strides = array<i32>} : memref<100x256xf32, #tpu.memory_space<vmem>>, vector<4x16xf32>,
    %c0_536 = arith.constant 0 : index
    %c8_537 = arith.constant 8 : index
    %c0_538 = arith.constant 0 : index
    %516 = vector.load %arg7[%c0_536, %c8_537, %c0_538] : memref<4x20x20xf32, #tpu.memory_space<vmem>>, vector<4x1x20xf32>
    %517 = vector.shape_cast %516 : vector<4x1x20xf32> to vector<4x20xf32>
    %518 = vector.extract_strided_slice %517 {offsets = [0, 0], sizes = [4, 16], strides = [1, 1]} : vector<4x20xf32> to vector<4x16xf32>
    %c0_539 = arith.constant 0 : index
    %c128 = arith.constant 128 : index
    %519 = vector.load %arg8[%c0_539, %c128] : memref<100x256xf32, #tpu.memory_space<vmem>>, vector<4x16xf32>
    tpu.vector_store %arg8[%c0_539, %c128], %518 {strides = array<i32>} : memref<100x256xf32, #tpu.memory_space<vmem>>, vector<4x16xf32>,
    %520 = vector.extract_strided_slice %517 {offsets = [0, 1], sizes = [4, 16], strides = [1, 1]} : vector<4x20xf32> to vector<4x16xf32>
    %c4_540 = arith.constant 4 : index
    %c128_541 = arith.constant 128 : index
    %521 = vector.load %arg8[%c4_540, %c128_541] : memref<100x256xf32, #tpu.memory_space<vmem>>, vector<4x16xf32>
    tpu.vector_store %arg8[%c4_540, %c128_541], %520 {strides = array<i32>} : memref<100x256xf32, #tpu.memory_space<vmem>>, vector<4x16xf32>,
    %522 = vector.extract_strided_slice %517 {offsets = [0, 2], sizes = [4, 16], strides = [1, 1]} : vector<4x20xf32> to vector<4x16xf32>
    %c8_542 = arith.constant 8 : index
    %c128_543 = arith.constant 128 : index
    %523 = vector.load %arg8[%c8_542, %c128_543] : memref<100x256xf32, #tpu.memory_space<vmem>>, vector<4x16xf32>
    tpu.vector_store %arg8[%c8_542, %c128_543], %522 {strides = array<i32>} : memref<100x256xf32, #tpu.memory_space<vmem>>, vector<4x16xf32>,
    %524 = vector.extract_strided_slice %517 {offsets = [0, 3], sizes = [4, 16], strides = [1, 1]} : vector<4x20xf32> to vector<4x16xf32>
    %c12_544 = arith.constant 12 : index
    %c128_545 = arith.constant 128 : index
    %525 = vector.load %arg8[%c12_544, %c128_545] : memref<100x256xf32, #tpu.memory_space<vmem>>, vector<4x16xf32>
    tpu.vector_store %arg8[%c12_544, %c128_545], %524 {strides = array<i32>} : memref<100x256xf32, #tpu.memory_space<vmem>>, vector<4x16xf32>,
    %526 = vector.extract_strided_slice %517 {offsets = [0, 4], sizes = [4, 16], strides = [1, 1]} : vector<4x20xf32> to vector<4x16xf32>
    %c16_546 = arith.constant 16 : index
    %c128_547 = arith.constant 128 : index
    %527 = vector.load %arg8[%c16_546, %c128_547] : memref<100x256xf32, #tpu.memory_space<vmem>>, vector<4x16xf32>
    tpu.vector_store %arg8[%c16_546, %c128_547], %526 {strides = array<i32>} : memref<100x256xf32, #tpu.memory_space<vmem>>, vector<4x16xf32>,
    %c0_548 = arith.constant 0 : index
    %c9_549 = arith.constant 9 : index
    %c0_550 = arith.constant 0 : index
    %528 = vector.load %arg7[%c0_548, %c9_549, %c0_550] : memref<4x20x20xf32, #tpu.memory_space<vmem>>, vector<4x1x20xf32>
    %529 = vector.shape_cast %528 : vector<4x1x20xf32> to vector<4x20xf32>
    %530 = vector.extract_strided_slice %529 {offsets = [0, 0], sizes = [4, 16], strides = [1, 1]} : vector<4x20xf32> to vector<4x16xf32>
    %c20_551 = arith.constant 20 : index
    %c128_552 = arith.constant 128 : index
    %531 = vector.load %arg8[%c20_551, %c128_552] : memref<100x256xf32, #tpu.memory_space<vmem>>, vector<4x16xf32>
    tpu.vector_store %arg8[%c20_551, %c128_552], %530 {strides = array<i32>} : memref<100x256xf32, #tpu.memory_space<vmem>>, vector<4x16xf32>,
    %532 = vector.extract_strided_slice %529 {offsets = [0, 1], sizes = [4, 16], strides = [1, 1]} : vector<4x20xf32> to vector<4x16xf32>
    %c24_553 = arith.constant 24 : index
    %c128_554 = arith.constant 128 : index
    %533 = vector.load %arg8[%c24_553, %c128_554] : memref<100x256xf32, #tpu.memory_space<vmem>>, vector<4x16xf32>
    tpu.vector_store %arg8[%c24_553, %c128_554], %532 {strides = array<i32>} : memref<100x256xf32, #tpu.memory_space<vmem>>, vector<4x16xf32>,
    %534 = vector.extract_strided_slice %529 {offsets = [0, 2], sizes = [4, 16], strides = [1, 1]} : vector<4x20xf32> to vector<4x16xf32>
    %c28_555 = arith.constant 28 : index
    %c128_556 = arith.constant 128 : index
    %535 = vector.load %arg8[%c28_555, %c128_556] : memref<100x256xf32, #tpu.memory_space<vmem>>, vector<4x16xf32>
    tpu.vector_store %arg8[%c28_555, %c128_556], %534 {strides = array<i32>} : memref<100x256xf32, #tpu.memory_space<vmem>>, vector<4x16xf32>,
    %536 = vector.extract_strided_slice %529 {offsets = [0, 3], sizes = [4, 16], strides = [1, 1]} : vector<4x20xf32> to vector<4x16xf32>
    %c32_557 = arith.constant 32 : index
    %c128_558 = arith.constant 128 : index
    %537 = vector.load %arg8[%c32_557, %c128_558] : memref<100x256xf32, #tpu.memory_space<vmem>>, vector<4x16xf32>
    tpu.vector_store %arg8[%c32_557, %c128_558], %536 {strides = array<i32>} : memref<100x256xf32, #tpu.memory_space<vmem>>, vector<4x16xf32>,
    %538 = vector.extract_strided_slice %529 {offsets = [0, 4], sizes = [4, 16], strides = [1, 1]} : vector<4x20xf32> to vector<4x16xf32>
    %c36_559 = arith.constant 36 : index
    %c128_560 = arith.constant 128 : index
    %539 = vector.load %arg8[%c36_559, %c128_560] : memref<100x256xf32, #tpu.memory_space<vmem>>, vector<4x16xf32>
    tpu.vector_store %arg8[%c36_559, %c128_560], %538 {strides = array<i32>} : memref<100x256xf32, #tpu.memory_space<vmem>>, vector<4x16xf32>,
    %c0_561 = arith.constant 0 : index
    %c10_562 = arith.constant 10 : index
    %c0_563 = arith.constant 0 : index
    %540 = vector.load %arg7[%c0_561, %c10_562, %c0_563] : memref<4x20x20xf32, #tpu.memory_space<vmem>>, vector<4x1x20xf32>
    %541 = vector.shape_cast %540 : vector<4x1x20xf32> to vector<4x20xf32>
    %542 = vector.extract_strided_slice %541 {offsets = [0, 0], sizes = [4, 16], strides = [1, 1]} : vector<4x20xf32> to vector<4x16xf32>
    %c40_564 = arith.constant 40 : index
    %c128_565 = arith.constant 128 : index
    %543 = vector.load %arg8[%c40_564, %c128_565] : memref<100x256xf32, #tpu.memory_space<vmem>>, vector<4x16xf32>
    tpu.vector_store %arg8[%c40_564, %c128_565], %542 {strides = array<i32>} : memref<100x256xf32, #tpu.memory_space<vmem>>, vector<4x16xf32>,
    %544 = vector.extract_strided_slice %541 {offsets = [0, 1], sizes = [4, 16], strides = [1, 1]} : vector<4x20xf32> to vector<4x16xf32>
    %c44_566 = arith.constant 44 : index
    %c128_567 = arith.constant 128 : index
    %545 = vector.load %arg8[%c44_566, %c128_567] : memref<100x256xf32, #tpu.memory_space<vmem>>, vector<4x16xf32>
    tpu.vector_store %arg8[%c44_566, %c128_567], %544 {strides = array<i32>} : memref<100x256xf32, #tpu.memory_space<vmem>>, vector<4x16xf32>,
    %546 = vector.extract_strided_slice %541 {offsets = [0, 2], sizes = [4, 16], strides = [1, 1]} : vector<4x20xf32> to vector<4x16xf32>
    %c48_568 = arith.constant 48 : index
    %c128_569 = arith.constant 128 : index
    %547 = vector.load %arg8[%c48_568, %c128_569] : memref<100x256xf32, #tpu.memory_space<vmem>>, vector<4x16xf32>
    tpu.vector_store %arg8[%c48_568, %c128_569], %546 {strides = array<i32>} : memref<100x256xf32, #tpu.memory_space<vmem>>, vector<4x16xf32>,
    %548 = vector.extract_strided_slice %541 {offsets = [0, 3], sizes = [4, 16], strides = [1, 1]} : vector<4x20xf32> to vector<4x16xf32>
    %c52_570 = arith.constant 52 : index
    %c128_571 = arith.constant 128 : index
    %549 = vector.load %arg8[%c52_570, %c128_571] : memref<100x256xf32, #tpu.memory_space<vmem>>, vector<4x16xf32>
    tpu.vector_store %arg8[%c52_570, %c128_571], %548 {strides = array<i32>} : memref<100x256xf32, #tpu.memory_space<vmem>>, vector<4x16xf32>,
    %550 = vector.extract_strided_slice %541 {offsets = [0, 4], sizes = [4, 16], strides = [1, 1]} : vector<4x20xf32> to vector<4x16xf32>
    %c56_572 = arith.constant 56 : index
    %c128_573 = arith.constant 128 : index
    %551 = vector.load %arg8[%c56_572, %c128_573] : memref<100x256xf32, #tpu.memory_space<vmem>>, vector<4x16xf32>
    tpu.vector_store %arg8[%c56_572, %c128_573], %550 {strides = array<i32>} : memref<100x256xf32, #tpu.memory_space<vmem>>, vector<4x16xf32>,
    %c0_574 = arith.constant 0 : index
    %c11_575 = arith.constant 11 : index
    %c0_576 = arith.constant 0 : index
    %552 = vector.load %arg7[%c0_574, %c11_575, %c0_576] : memref<4x20x20xf32, #tpu.memory_space<vmem>>, vector<4x1x20xf32>
    %553 = vector.shape_cast %552 : vector<4x1x20xf32> to vector<4x20xf32>
    %554 = vector.extract_strided_slice %553 {offsets = [0, 0], sizes = [4, 16], strides = [1, 1]} : vector<4x20xf32> to vector<4x16xf32>
    %c60_577 = arith.constant 60 : index
    %c128_578 = arith.constant 128 : index
    %555 = vector.load %arg8[%c60_577, %c128_578] : memref<100x256xf32, #tpu.memory_space<vmem>>, vector<4x16xf32>
    tpu.vector_store %arg8[%c60_577, %c128_578], %554 {strides = array<i32>} : memref<100x256xf32, #tpu.memory_space<vmem>>, vector<4x16xf32>,
    %556 = vector.extract_strided_slice %553 {offsets = [0, 1], sizes = [4, 16], strides = [1, 1]} : vector<4x20xf32> to vector<4x16xf32>
    %c64_579 = arith.constant 64 : index
    %c128_580 = arith.constant 128 : index
    %557 = vector.load %arg8[%c64_579, %c128_580] : memref<100x256xf32, #tpu.memory_space<vmem>>, vector<4x16xf32>
    tpu.vector_store %arg8[%c64_579, %c128_580], %556 {strides = array<i32>} : memref<100x256xf32, #tpu.memory_space<vmem>>, vector<4x16xf32>,
    %558 = vector.extract_strided_slice %553 {offsets = [0, 2], sizes = [4, 16], strides = [1, 1]} : vector<4x20xf32> to vector<4x16xf32>
    %c68_581 = arith.constant 68 : index
    %c128_582 = arith.constant 128 : index
    %559 = vector.load %arg8[%c68_581, %c128_582] : memref<100x256xf32, #tpu.memory_space<vmem>>, vector<4x16xf32>
    tpu.vector_store %arg8[%c68_581, %c128_582], %558 {strides = array<i32>} : memref<100x256xf32, #tpu.memory_space<vmem>>, vector<4x16xf32>,
    %560 = vector.extract_strided_slice %553 {offsets = [0, 3], sizes = [4, 16], strides = [1, 1]} : vector<4x20xf32> to vector<4x16xf32>
    %c72_583 = arith.constant 72 : index
    %c128_584 = arith.constant 128 : index
    %561 = vector.load %arg8[%c72_583, %c128_584] : memref<100x256xf32, #tpu.memory_space<vmem>>, vector<4x16xf32>
    tpu.vector_store %arg8[%c72_583, %c128_584], %560 {strides = array<i32>} : memref<100x256xf32, #tpu.memory_space<vmem>>, vector<4x16xf32>,
    %562 = vector.extract_strided_slice %553 {offsets = [0, 4], sizes = [4, 16], strides = [1, 1]} : vector<4x20xf32> to vector<4x16xf32>
    %c76_585 = arith.constant 76 : index
    %c128_586 = arith.constant 128 : index
    %563 = vector.load %arg8[%c76_585, %c128_586] : memref<100x256xf32, #tpu.memory_space<vmem>>, vector<4x16xf32>
    tpu.vector_store %arg8[%c76_585, %c128_586], %562 {strides = array<i32>} : memref<100x256xf32, #tpu.memory_space<vmem>>, vector<4x16xf32>,
    %c0_587 = arith.constant 0 : index
    %c12_588 = arith.constant 12 : index
    %c0_589 = arith.constant 0 : index
    %564 = vector.load %arg7[%c0_587, %c12_588, %c0_589] : memref<4x20x20xf32, #tpu.memory_space<vmem>>, vector<4x1x20xf32>
    %565 = vector.shape_cast %564 : vector<4x1x20xf32> to vector<4x20xf32>
    %566 = vector.extract_strided_slice %565 {offsets = [0, 0], sizes = [4, 16], strides = [1, 1]} : vector<4x20xf32> to vector<4x16xf32>
    %c80_590 = arith.constant 80 : index
    %c128_591 = arith.constant 128 : index
    %567 = vector.load %arg8[%c80_590, %c128_591] : memref<100x256xf32, #tpu.memory_space<vmem>>, vector<4x16xf32>
    tpu.vector_store %arg8[%c80_590, %c128_591], %566 {strides = array<i32>} : memref<100x256xf32, #tpu.memory_space<vmem>>, vector<4x16xf32>,
    %568 = vector.extract_strided_slice %565 {offsets = [0, 1], sizes = [4, 16], strides = [1, 1]} : vector<4x20xf32> to vector<4x16xf32>
    %c84_592 = arith.constant 84 : index
    %c128_593 = arith.constant 128 : index
    %569 = vector.load %arg8[%c84_592, %c128_593] : memref<100x256xf32, #tpu.memory_space<vmem>>, vector<4x16xf32>
    tpu.vector_store %arg8[%c84_592, %c128_593], %568 {strides = array<i32>} : memref<100x256xf32, #tpu.memory_space<vmem>>, vector<4x16xf32>,
    %570 = vector.extract_strided_slice %565 {offsets = [0, 2], sizes = [4, 16], strides = [1, 1]} : vector<4x20xf32> to vector<4x16xf32>
    %c88_594 = arith.constant 88 : index
    %c128_595 = arith.constant 128 : index
    %571 = vector.load %arg8[%c88_594, %c128_595] : memref<100x256xf32, #tpu.memory_space<vmem>>, vector<4x16xf32>
    tpu.vector_store %arg8[%c88_594, %c128_595], %570 {strides = array<i32>} : memref<100x256xf32, #tpu.memory_space<vmem>>, vector<4x16xf32>,
    %572 = vector.extract_strided_slice %565 {offsets = [0, 3], sizes = [4, 16], strides = [1, 1]} : vector<4x20xf32> to vector<4x16xf32>
    %c92_596 = arith.constant 92 : index
    %c128_597 = arith.constant 128 : index
    %573 = vector.load %arg8[%c92_596, %c128_597] : memref<100x256xf32, #tpu.memory_space<vmem>>, vector<4x16xf32>
    tpu.vector_store %arg8[%c92_596, %c128_597], %572 {strides = array<i32>} : memref<100x256xf32, #tpu.memory_space<vmem>>, vector<4x16xf32>,
    %574 = vector.extract_strided_slice %565 {offsets = [0, 4], sizes = [4, 16], strides = [1, 1]} : vector<4x20xf32> to vector<4x16xf32>
    %c96_598 = arith.constant 96 : index
    %c128_599 = arith.constant 128 : index
    %575 = vector.load %arg8[%c96_598, %c128_599] : memref<100x256xf32, #tpu.memory_space<vmem>>, vector<4x16xf32>
    tpu.vector_store %arg8[%c96_598, %c128_599], %574 {strides = array<i32>} : memref<100x256xf32, #tpu.memory_space<vmem>>, vector<4x16xf32>,
    %c0_600 = arith.constant 0 : index
    %c9_601 = arith.constant 9 : index
    %c0_602 = arith.constant 0 : index
    %576 = vector.load %arg7[%c0_600, %c9_601, %c0_602] : memref<4x20x20xf32, #tpu.memory_space<vmem>>, vector<4x1x20xf32>
    %577 = vector.shape_cast %576 : vector<4x1x20xf32> to vector<4x20xf32>
    %578 = vector.extract_strided_slice %577 {offsets = [0, 0], sizes = [4, 16], strides = [1, 1]} : vector<4x20xf32> to vector<4x16xf32>
    %c0_603 = arith.constant 0 : index
    %c144 = arith.constant 144 : index
    %579 = vector.load %arg8[%c0_603, %c144] : memref<100x256xf32, #tpu.memory_space<vmem>>, vector<4x16xf32>
    tpu.vector_store %arg8[%c0_603, %c144], %578 {strides = array<i32>} : memref<100x256xf32, #tpu.memory_space<vmem>>, vector<4x16xf32>,
    %580 = vector.extract_strided_slice %577 {offsets = [0, 1], sizes = [4, 16], strides = [1, 1]} : vector<4x20xf32> to vector<4x16xf32>
    %c4_604 = arith.constant 4 : index
    %c144_605 = arith.constant 144 : index
    %581 = vector.load %arg8[%c4_604, %c144_605] : memref<100x256xf32, #tpu.memory_space<vmem>>, vector<4x16xf32>
    tpu.vector_store %arg8[%c4_604, %c144_605], %580 {strides = array<i32>} : memref<100x256xf32, #tpu.memory_space<vmem>>, vector<4x16xf32>,
    %582 = vector.extract_strided_slice %577 {offsets = [0, 2], sizes = [4, 16], strides = [1, 1]} : vector<4x20xf32> to vector<4x16xf32>
    %c8_606 = arith.constant 8 : index
    %c144_607 = arith.constant 144 : index
    %583 = vector.load %arg8[%c8_606, %c144_607] : memref<100x256xf32, #tpu.memory_space<vmem>>, vector<4x16xf32>
    tpu.vector_store %arg8[%c8_606, %c144_607], %582 {strides = array<i32>} : memref<100x256xf32, #tpu.memory_space<vmem>>, vector<4x16xf32>,
    %584 = vector.extract_strided_slice %577 {offsets = [0, 3], sizes = [4, 16], strides = [1, 1]} : vector<4x20xf32> to vector<4x16xf32>
    %c12_608 = arith.constant 12 : index
    %c144_609 = arith.constant 144 : index
    %585 = vector.load %arg8[%c12_608, %c144_609] : memref<100x256xf32, #tpu.memory_space<vmem>>, vector<4x16xf32>
    tpu.vector_store %arg8[%c12_608, %c144_609], %584 {strides = array<i32>} : memref<100x256xf32, #tpu.memory_space<vmem>>, vector<4x16xf32>,
    %586 = vector.extract_strided_slice %577 {offsets = [0, 4], sizes = [4, 16], strides = [1, 1]} : vector<4x20xf32> to vector<4x16xf32>
    %c16_610 = arith.constant 16 : index
    %c144_611 = arith.constant 144 : index
    %587 = vector.load %arg8[%c16_610, %c144_611] : memref<100x256xf32, #tpu.memory_space<vmem>>, vector<4x16xf32>
    tpu.vector_store %arg8[%c16_610, %c144_611], %586 {strides = array<i32>} : memref<100x256xf32, #tpu.memory_space<vmem>>, vector<4x16xf32>,
    %c0_612 = arith.constant 0 : index
    %c10_613 = arith.constant 10 : index
    %c0_614 = arith.constant 0 : index
    %588 = vector.load %arg7[%c0_612, %c10_613, %c0_614] : memref<4x20x20xf32, #tpu.memory_space<vmem>>, vector<4x1x20xf32>
    %589 = vector.shape_cast %588 : vector<4x1x20xf32> to vector<4x20xf32>
    %590 = vector.extract_strided_slice %589 {offsets = [0, 0], sizes = [4, 16], strides = [1, 1]} : vector<4x20xf32> to vector<4x16xf32>
    %c20_615 = arith.constant 20 : index
    %c144_616 = arith.constant 144 : index
    %591 = vector.load %arg8[%c20_615, %c144_616] : memref<100x256xf32, #tpu.memory_space<vmem>>, vector<4x16xf32>
    tpu.vector_store %arg8[%c20_615, %c144_616], %590 {strides = array<i32>} : memref<100x256xf32, #tpu.memory_space<vmem>>, vector<4x16xf32>,
    %592 = vector.extract_strided_slice %589 {offsets = [0, 1], sizes = [4, 16], strides = [1, 1]} : vector<4x20xf32> to vector<4x16xf32>
    %c24_617 = arith.constant 24 : index
    %c144_618 = arith.constant 144 : index
    %593 = vector.load %arg8[%c24_617, %c144_618] : memref<100x256xf32, #tpu.memory_space<vmem>>, vector<4x16xf32>
    tpu.vector_store %arg8[%c24_617, %c144_618], %592 {strides = array<i32>} : memref<100x256xf32, #tpu.memory_space<vmem>>, vector<4x16xf32>,
    %594 = vector.extract_strided_slice %589 {offsets = [0, 2], sizes = [4, 16], strides = [1, 1]} : vector<4x20xf32> to vector<4x16xf32>
    %c28_619 = arith.constant 28 : index
    %c144_620 = arith.constant 144 : index
    %595 = vector.load %arg8[%c28_619, %c144_620] : memref<100x256xf32, #tpu.memory_space<vmem>>, vector<4x16xf32>
    tpu.vector_store %arg8[%c28_619, %c144_620], %594 {strides = array<i32>} : memref<100x256xf32, #tpu.memory_space<vmem>>, vector<4x16xf32>,
    %596 = vector.extract_strided_slice %589 {offsets = [0, 3], sizes = [4, 16], strides = [1, 1]} : vector<4x20xf32> to vector<4x16xf32>
    %c32_621 = arith.constant 32 : index
    %c144_622 = arith.constant 144 : index
    %597 = vector.load %arg8[%c32_621, %c144_622] : memref<100x256xf32, #tpu.memory_space<vmem>>, vector<4x16xf32>
    tpu.vector_store %arg8[%c32_621, %c144_622], %596 {strides = array<i32>} : memref<100x256xf32, #tpu.memory_space<vmem>>, vector<4x16xf32>,
    %598 = vector.extract_strided_slice %589 {offsets = [0, 4], sizes = [4, 16], strides = [1, 1]} : vector<4x20xf32> to vector<4x16xf32>
    %c36_623 = arith.constant 36 : index
    %c144_624 = arith.constant 144 : index
    %599 = vector.load %arg8[%c36_623, %c144_624] : memref<100x256xf32, #tpu.memory_space<vmem>>, vector<4x16xf32>
    tpu.vector_store %arg8[%c36_623, %c144_624], %598 {strides = array<i32>} : memref<100x256xf32, #tpu.memory_space<vmem>>, vector<4x16xf32>,
    %c0_625 = arith.constant 0 : index
    %c11_626 = arith.constant 11 : index
    %c0_627 = arith.constant 0 : index
    %600 = vector.load %arg7[%c0_625, %c11_626, %c0_627] : memref<4x20x20xf32, #tpu.memory_space<vmem>>, vector<4x1x20xf32>
    %601 = vector.shape_cast %600 : vector<4x1x20xf32> to vector<4x20xf32>
    %602 = vector.extract_strided_slice %601 {offsets = [0, 0], sizes = [4, 16], strides = [1, 1]} : vector<4x20xf32> to vector<4x16xf32>
    %c40_628 = arith.constant 40 : index
    %c144_629 = arith.constant 144 : index
    %603 = vector.load %arg8[%c40_628, %c144_629] : memref<100x256xf32, #tpu.memory_space<vmem>>, vector<4x16xf32>
    tpu.vector_store %arg8[%c40_628, %c144_629], %602 {strides = array<i32>} : memref<100x256xf32, #tpu.memory_space<vmem>>, vector<4x16xf32>,
    %604 = vector.extract_strided_slice %601 {offsets = [0, 1], sizes = [4, 16], strides = [1, 1]} : vector<4x20xf32> to vector<4x16xf32>
    %c44_630 = arith.constant 44 : index
    %c144_631 = arith.constant 144 : index
    %605 = vector.load %arg8[%c44_630, %c144_631] : memref<100x256xf32, #tpu.memory_space<vmem>>, vector<4x16xf32>
    tpu.vector_store %arg8[%c44_630, %c144_631], %604 {strides = array<i32>} : memref<100x256xf32, #tpu.memory_space<vmem>>, vector<4x16xf32>,
    %606 = vector.extract_strided_slice %601 {offsets = [0, 2], sizes = [4, 16], strides = [1, 1]} : vector<4x20xf32> to vector<4x16xf32>
    %c48_632 = arith.constant 48 : index
    %c144_633 = arith.constant 144 : index
    %607 = vector.load %arg8[%c48_632, %c144_633] : memref<100x256xf32, #tpu.memory_space<vmem>>, vector<4x16xf32>
    tpu.vector_store %arg8[%c48_632, %c144_633], %606 {strides = array<i32>} : memref<100x256xf32, #tpu.memory_space<vmem>>, vector<4x16xf32>,
    %608 = vector.extract_strided_slice %601 {offsets = [0, 3], sizes = [4, 16], strides = [1, 1]} : vector<4x20xf32> to vector<4x16xf32>
    %c52_634 = arith.constant 52 : index
    %c144_635 = arith.constant 144 : index
    %609 = vector.load %arg8[%c52_634, %c144_635] : memref<100x256xf32, #tpu.memory_space<vmem>>, vector<4x16xf32>
    tpu.vector_store %arg8[%c52_634, %c144_635], %608 {strides = array<i32>} : memref<100x256xf32, #tpu.memory_space<vmem>>, vector<4x16xf32>,
    %610 = vector.extract_strided_slice %601 {offsets = [0, 4], sizes = [4, 16], strides = [1, 1]} : vector<4x20xf32> to vector<4x16xf32>
    %c56_636 = arith.constant 56 : index
    %c144_637 = arith.constant 144 : index
    %611 = vector.load %arg8[%c56_636, %c144_637] : memref<100x256xf32, #tpu.memory_space<vmem>>, vector<4x16xf32>
    tpu.vector_store %arg8[%c56_636, %c144_637], %610 {strides = array<i32>} : memref<100x256xf32, #tpu.memory_space<vmem>>, vector<4x16xf32>,
    %c0_638 = arith.constant 0 : index
    %c12_639 = arith.constant 12 : index
    %c0_640 = arith.constant 0 : index
    %612 = vector.load %arg7[%c0_638, %c12_639, %c0_640] : memref<4x20x20xf32, #tpu.memory_space<vmem>>, vector<4x1x20xf32>
    %613 = vector.shape_cast %612 : vector<4x1x20xf32> to vector<4x20xf32>
    %614 = vector.extract_strided_slice %613 {offsets = [0, 0], sizes = [4, 16], strides = [1, 1]} : vector<4x20xf32> to vector<4x16xf32>
    %c60_641 = arith.constant 60 : index
    %c144_642 = arith.constant 144 : index
    %615 = vector.load %arg8[%c60_641, %c144_642] : memref<100x256xf32, #tpu.memory_space<vmem>>, vector<4x16xf32>
    tpu.vector_store %arg8[%c60_641, %c144_642], %614 {strides = array<i32>} : memref<100x256xf32, #tpu.memory_space<vmem>>, vector<4x16xf32>,
    %616 = vector.extract_strided_slice %613 {offsets = [0, 1], sizes = [4, 16], strides = [1, 1]} : vector<4x20xf32> to vector<4x16xf32>
    %c64_643 = arith.constant 64 : index
    %c144_644 = arith.constant 144 : index
    %617 = vector.load %arg8[%c64_643, %c144_644] : memref<100x256xf32, #tpu.memory_space<vmem>>, vector<4x16xf32>
    tpu.vector_store %arg8[%c64_643, %c144_644], %616 {strides = array<i32>} : memref<100x256xf32, #tpu.memory_space<vmem>>, vector<4x16xf32>,
    %618 = vector.extract_strided_slice %613 {offsets = [0, 2], sizes = [4, 16], strides = [1, 1]} : vector<4x20xf32> to vector<4x16xf32>
    %c68_645 = arith.constant 68 : index
    %c144_646 = arith.constant 144 : index
    %619 = vector.load %arg8[%c68_645, %c144_646] : memref<100x256xf32, #tpu.memory_space<vmem>>, vector<4x16xf32>
    tpu.vector_store %arg8[%c68_645, %c144_646], %618 {strides = array<i32>} : memref<100x256xf32, #tpu.memory_space<vmem>>, vector<4x16xf32>,
    %620 = vector.extract_strided_slice %613 {offsets = [0, 3], sizes = [4, 16], strides = [1, 1]} : vector<4x20xf32> to vector<4x16xf32>
    %c72_647 = arith.constant 72 : index
    %c144_648 = arith.constant 144 : index
    %621 = vector.load %arg8[%c72_647, %c144_648] : memref<100x256xf32, #tpu.memory_space<vmem>>, vector<4x16xf32>
    tpu.vector_store %arg8[%c72_647, %c144_648], %620 {strides = array<i32>} : memref<100x256xf32, #tpu.memory_space<vmem>>, vector<4x16xf32>,
    %622 = vector.extract_strided_slice %613 {offsets = [0, 4], sizes = [4, 16], strides = [1, 1]} : vector<4x20xf32> to vector<4x16xf32>
    %c76_649 = arith.constant 76 : index
    %c144_650 = arith.constant 144 : index
    %623 = vector.load %arg8[%c76_649, %c144_650] : memref<100x256xf32, #tpu.memory_space<vmem>>, vector<4x16xf32>
    tpu.vector_store %arg8[%c76_649, %c144_650], %622 {strides = array<i32>} : memref<100x256xf32, #tpu.memory_space<vmem>>, vector<4x16xf32>,
    %c0_651 = arith.constant 0 : index
    %c13 = arith.constant 13 : index
    %c0_652 = arith.constant 0 : index
    %624 = vector.load %arg7[%c0_651, %c13, %c0_652] : memref<4x20x20xf32, #tpu.memory_space<vmem>>, vector<4x1x20xf32>
    %625 = vector.shape_cast %624 : vector<4x1x20xf32> to vector<4x20xf32>
    %626 = vector.extract_strided_slice %625 {offsets = [0, 0], sizes = [4, 16], strides = [1, 1]} : vector<4x20xf32> to vector<4x16xf32>
    %c80_653 = arith.constant 80 : index
    %c144_654 = arith.constant 144 : index
    %627 = vector.load %arg8[%c80_653, %c144_654] : memref<100x256xf32, #tpu.memory_space<vmem>>, vector<4x16xf32>
    tpu.vector_store %arg8[%c80_653, %c144_654], %626 {strides = array<i32>} : memref<100x256xf32, #tpu.memory_space<vmem>>, vector<4x16xf32>,
    %628 = vector.extract_strided_slice %625 {offsets = [0, 1], sizes = [4, 16], strides = [1, 1]} : vector<4x20xf32> to vector<4x16xf32>
    %c84_655 = arith.constant 84 : index
    %c144_656 = arith.constant 144 : index
    %629 = vector.load %arg8[%c84_655, %c144_656] : memref<100x256xf32, #tpu.memory_space<vmem>>, vector<4x16xf32>
    tpu.vector_store %arg8[%c84_655, %c144_656], %628 {strides = array<i32>} : memref<100x256xf32, #tpu.memory_space<vmem>>, vector<4x16xf32>,
    %630 = vector.extract_strided_slice %625 {offsets = [0, 2], sizes = [4, 16], strides = [1, 1]} : vector<4x20xf32> to vector<4x16xf32>
    %c88_657 = arith.constant 88 : index
    %c144_658 = arith.constant 144 : index
    %631 = vector.load %arg8[%c88_657, %c144_658] : memref<100x256xf32, #tpu.memory_space<vmem>>, vector<4x16xf32>
    tpu.vector_store %arg8[%c88_657, %c144_658], %630 {strides = array<i32>} : memref<100x256xf32, #tpu.memory_space<vmem>>, vector<4x16xf32>,
    %632 = vector.extract_strided_slice %625 {offsets = [0, 3], sizes = [4, 16], strides = [1, 1]} : vector<4x20xf32> to vector<4x16xf32>
    %c92_659 = arith.constant 92 : index
    %c144_660 = arith.constant 144 : index
    %633 = vector.load %arg8[%c92_659, %c144_660] : memref<100x256xf32, #tpu.memory_space<vmem>>, vector<4x16xf32>
    tpu.vector_store %arg8[%c92_659, %c144_660], %632 {strides = array<i32>} : memref<100x256xf32, #tpu.memory_space<vmem>>, vector<4x16xf32>,
    %634 = vector.extract_strided_slice %625 {offsets = [0, 4], sizes = [4, 16], strides = [1, 1]} : vector<4x20xf32> to vector<4x16xf32>
    %c96_661 = arith.constant 96 : index
    %c144_662 = arith.constant 144 : index
    %635 = vector.load %arg8[%c96_661, %c144_662] : memref<100x256xf32, #tpu.memory_space<vmem>>, vector<4x16xf32>
    tpu.vector_store %arg8[%c96_661, %c144_662], %634 {strides = array<i32>} : memref<100x256xf32, #tpu.memory_space<vmem>>, vector<4x16xf32>,
    %c0_663 = arith.constant 0 : index
    %c10_664 = arith.constant 10 : index
    %c0_665 = arith.constant 0 : index
    %636 = vector.load %arg7[%c0_663, %c10_664, %c0_665] : memref<4x20x20xf32, #tpu.memory_space<vmem>>, vector<4x1x20xf32>
    %637 = vector.shape_cast %636 : vector<4x1x20xf32> to vector<4x20xf32>
    %638 = vector.extract_strided_slice %637 {offsets = [0, 0], sizes = [4, 16], strides = [1, 1]} : vector<4x20xf32> to vector<4x16xf32>
    %c0_666 = arith.constant 0 : index
    %c160 = arith.constant 160 : index
    %639 = vector.load %arg8[%c0_666, %c160] : memref<100x256xf32, #tpu.memory_space<vmem>>, vector<4x16xf32>
    tpu.vector_store %arg8[%c0_666, %c160], %638 {strides = array<i32>} : memref<100x256xf32, #tpu.memory_space<vmem>>, vector<4x16xf32>,
    %640 = vector.extract_strided_slice %637 {offsets = [0, 1], sizes = [4, 16], strides = [1, 1]} : vector<4x20xf32> to vector<4x16xf32>
    %c4_667 = arith.constant 4 : index
    %c160_668 = arith.constant 160 : index
    %641 = vector.load %arg8[%c4_667, %c160_668] : memref<100x256xf32, #tpu.memory_space<vmem>>, vector<4x16xf32>
    tpu.vector_store %arg8[%c4_667, %c160_668], %640 {strides = array<i32>} : memref<100x256xf32, #tpu.memory_space<vmem>>, vector<4x16xf32>,
    %642 = vector.extract_strided_slice %637 {offsets = [0, 2], sizes = [4, 16], strides = [1, 1]} : vector<4x20xf32> to vector<4x16xf32>
    %c8_669 = arith.constant 8 : index
    %c160_670 = arith.constant 160 : index
    %643 = vector.load %arg8[%c8_669, %c160_670] : memref<100x256xf32, #tpu.memory_space<vmem>>, vector<4x16xf32>
    tpu.vector_store %arg8[%c8_669, %c160_670], %642 {strides = array<i32>} : memref<100x256xf32, #tpu.memory_space<vmem>>, vector<4x16xf32>,
    %644 = vector.extract_strided_slice %637 {offsets = [0, 3], sizes = [4, 16], strides = [1, 1]} : vector<4x20xf32> to vector<4x16xf32>
    %c12_671 = arith.constant 12 : index
    %c160_672 = arith.constant 160 : index
    %645 = vector.load %arg8[%c12_671, %c160_672] : memref<100x256xf32, #tpu.memory_space<vmem>>, vector<4x16xf32>
    tpu.vector_store %arg8[%c12_671, %c160_672], %644 {strides = array<i32>} : memref<100x256xf32, #tpu.memory_space<vmem>>, vector<4x16xf32>,
    %646 = vector.extract_strided_slice %637 {offsets = [0, 4], sizes = [4, 16], strides = [1, 1]} : vector<4x20xf32> to vector<4x16xf32>
    %c16_673 = arith.constant 16 : index
    %c160_674 = arith.constant 160 : index
    %647 = vector.load %arg8[%c16_673, %c160_674] : memref<100x256xf32, #tpu.memory_space<vmem>>, vector<4x16xf32>
    tpu.vector_store %arg8[%c16_673, %c160_674], %646 {strides = array<i32>} : memref<100x256xf32, #tpu.memory_space<vmem>>, vector<4x16xf32>,
    %c0_675 = arith.constant 0 : index
    %c11_676 = arith.constant 11 : index
    %c0_677 = arith.constant 0 : index
    %648 = vector.load %arg7[%c0_675, %c11_676, %c0_677] : memref<4x20x20xf32, #tpu.memory_space<vmem>>, vector<4x1x20xf32>
    %649 = vector.shape_cast %648 : vector<4x1x20xf32> to vector<4x20xf32>
    %650 = vector.extract_strided_slice %649 {offsets = [0, 0], sizes = [4, 16], strides = [1, 1]} : vector<4x20xf32> to vector<4x16xf32>
    %c20_678 = arith.constant 20 : index
    %c160_679 = arith.constant 160 : index
    %651 = vector.load %arg8[%c20_678, %c160_679] : memref<100x256xf32, #tpu.memory_space<vmem>>, vector<4x16xf32>
    tpu.vector_store %arg8[%c20_678, %c160_679], %650 {strides = array<i32>} : memref<100x256xf32, #tpu.memory_space<vmem>>, vector<4x16xf32>,
    %652 = vector.extract_strided_slice %649 {offsets = [0, 1], sizes = [4, 16], strides = [1, 1]} : vector<4x20xf32> to vector<4x16xf32>
    %c24_680 = arith.constant 24 : index
    %c160_681 = arith.constant 160 : index
    %653 = vector.load %arg8[%c24_680, %c160_681] : memref<100x256xf32, #tpu.memory_space<vmem>>, vector<4x16xf32>
    tpu.vector_store %arg8[%c24_680, %c160_681], %652 {strides = array<i32>} : memref<100x256xf32, #tpu.memory_space<vmem>>, vector<4x16xf32>,
    %654 = vector.extract_strided_slice %649 {offsets = [0, 2], sizes = [4, 16], strides = [1, 1]} : vector<4x20xf32> to vector<4x16xf32>
    %c28_682 = arith.constant 28 : index
    %c160_683 = arith.constant 160 : index
    %655 = vector.load %arg8[%c28_682, %c160_683] : memref<100x256xf32, #tpu.memory_space<vmem>>, vector<4x16xf32>
    tpu.vector_store %arg8[%c28_682, %c160_683], %654 {strides = array<i32>} : memref<100x256xf32, #tpu.memory_space<vmem>>, vector<4x16xf32>,
    %656 = vector.extract_strided_slice %649 {offsets = [0, 3], sizes = [4, 16], strides = [1, 1]} : vector<4x20xf32> to vector<4x16xf32>
    %c32_684 = arith.constant 32 : index
    %c160_685 = arith.constant 160 : index
    %657 = vector.load %arg8[%c32_684, %c160_685] : memref<100x256xf32, #tpu.memory_space<vmem>>, vector<4x16xf32>
    tpu.vector_store %arg8[%c32_684, %c160_685], %656 {strides = array<i32>} : memref<100x256xf32, #tpu.memory_space<vmem>>, vector<4x16xf32>,
    %658 = vector.extract_strided_slice %649 {offsets = [0, 4], sizes = [4, 16], strides = [1, 1]} : vector<4x20xf32> to vector<4x16xf32>
    %c36_686 = arith.constant 36 : index
    %c160_687 = arith.constant 160 : index
    %659 = vector.load %arg8[%c36_686, %c160_687] : memref<100x256xf32, #tpu.memory_space<vmem>>, vector<4x16xf32>
    tpu.vector_store %arg8[%c36_686, %c160_687], %658 {strides = array<i32>} : memref<100x256xf32, #tpu.memory_space<vmem>>, vector<4x16xf32>,
    %c0_688 = arith.constant 0 : index
    %c12_689 = arith.constant 12 : index
    %c0_690 = arith.constant 0 : index
    %660 = vector.load %arg7[%c0_688, %c12_689, %c0_690] : memref<4x20x20xf32, #tpu.memory_space<vmem>>, vector<4x1x20xf32>
    %661 = vector.shape_cast %660 : vector<4x1x20xf32> to vector<4x20xf32>
    %662 = vector.extract_strided_slice %661 {offsets = [0, 0], sizes = [4, 16], strides = [1, 1]} : vector<4x20xf32> to vector<4x16xf32>
    %c40_691 = arith.constant 40 : index
    %c160_692 = arith.constant 160 : index
    %663 = vector.load %arg8[%c40_691, %c160_692] : memref<100x256xf32, #tpu.memory_space<vmem>>, vector<4x16xf32>
    tpu.vector_store %arg8[%c40_691, %c160_692], %662 {strides = array<i32>} : memref<100x256xf32, #tpu.memory_space<vmem>>, vector<4x16xf32>,
    %664 = vector.extract_strided_slice %661 {offsets = [0, 1], sizes = [4, 16], strides = [1, 1]} : vector<4x20xf32> to vector<4x16xf32>
    %c44_693 = arith.constant 44 : index
    %c160_694 = arith.constant 160 : index
    %665 = vector.load %arg8[%c44_693, %c160_694] : memref<100x256xf32, #tpu.memory_space<vmem>>, vector<4x16xf32>
    tpu.vector_store %arg8[%c44_693, %c160_694], %664 {strides = array<i32>} : memref<100x256xf32, #tpu.memory_space<vmem>>, vector<4x16xf32>,
    %666 = vector.extract_strided_slice %661 {offsets = [0, 2], sizes = [4, 16], strides = [1, 1]} : vector<4x20xf32> to vector<4x16xf32>
    %c48_695 = arith.constant 48 : index
    %c160_696 = arith.constant 160 : index
    %667 = vector.load %arg8[%c48_695, %c160_696] : memref<100x256xf32, #tpu.memory_space<vmem>>, vector<4x16xf32>
    tpu.vector_store %arg8[%c48_695, %c160_696], %666 {strides = array<i32>} : memref<100x256xf32, #tpu.memory_space<vmem>>, vector<4x16xf32>,
    %668 = vector.extract_strided_slice %661 {offsets = [0, 3], sizes = [4, 16], strides = [1, 1]} : vector<4x20xf32> to vector<4x16xf32>
    %c52_697 = arith.constant 52 : index
    %c160_698 = arith.constant 160 : index
    %669 = vector.load %arg8[%c52_697, %c160_698] : memref<100x256xf32, #tpu.memory_space<vmem>>, vector<4x16xf32>
    tpu.vector_store %arg8[%c52_697, %c160_698], %668 {strides = array<i32>} : memref<100x256xf32, #tpu.memory_space<vmem>>, vector<4x16xf32>,
    %670 = vector.extract_strided_slice %661 {offsets = [0, 4], sizes = [4, 16], strides = [1, 1]} : vector<4x20xf32> to vector<4x16xf32>
    %c56_699 = arith.constant 56 : index
    %c160_700 = arith.constant 160 : index
    %671 = vector.load %arg8[%c56_699, %c160_700] : memref<100x256xf32, #tpu.memory_space<vmem>>, vector<4x16xf32>
    tpu.vector_store %arg8[%c56_699, %c160_700], %670 {strides = array<i32>} : memref<100x256xf32, #tpu.memory_space<vmem>>, vector<4x16xf32>,
    %c0_701 = arith.constant 0 : index
    %c13_702 = arith.constant 13 : index
    %c0_703 = arith.constant 0 : index
    %672 = vector.load %arg7[%c0_701, %c13_702, %c0_703] : memref<4x20x20xf32, #tpu.memory_space<vmem>>, vector<4x1x20xf32>
    %673 = vector.shape_cast %672 : vector<4x1x20xf32> to vector<4x20xf32>
    %674 = vector.extract_strided_slice %673 {offsets = [0, 0], sizes = [4, 16], strides = [1, 1]} : vector<4x20xf32> to vector<4x16xf32>
    %c60_704 = arith.constant 60 : index
    %c160_705 = arith.constant 160 : index
    %675 = vector.load %arg8[%c60_704, %c160_705] : memref<100x256xf32, #tpu.memory_space<vmem>>, vector<4x16xf32>
    tpu.vector_store %arg8[%c60_704, %c160_705], %674 {strides = array<i32>} : memref<100x256xf32, #tpu.memory_space<vmem>>, vector<4x16xf32>,
    %676 = vector.extract_strided_slice %673 {offsets = [0, 1], sizes = [4, 16], strides = [1, 1]} : vector<4x20xf32> to vector<4x16xf32>
    %c64_706 = arith.constant 64 : index
    %c160_707 = arith.constant 160 : index
    %677 = vector.load %arg8[%c64_706, %c160_707] : memref<100x256xf32, #tpu.memory_space<vmem>>, vector<4x16xf32>
    tpu.vector_store %arg8[%c64_706, %c160_707], %676 {strides = array<i32>} : memref<100x256xf32, #tpu.memory_space<vmem>>, vector<4x16xf32>,
    %678 = vector.extract_strided_slice %673 {offsets = [0, 2], sizes = [4, 16], strides = [1, 1]} : vector<4x20xf32> to vector<4x16xf32>
    %c68_708 = arith.constant 68 : index
    %c160_709 = arith.constant 160 : index
    %679 = vector.load %arg8[%c68_708, %c160_709] : memref<100x256xf32, #tpu.memory_space<vmem>>, vector<4x16xf32>
    tpu.vector_store %arg8[%c68_708, %c160_709], %678 {strides = array<i32>} : memref<100x256xf32, #tpu.memory_space<vmem>>, vector<4x16xf32>,
    %680 = vector.extract_strided_slice %673 {offsets = [0, 3], sizes = [4, 16], strides = [1, 1]} : vector<4x20xf32> to vector<4x16xf32>
    %c72_710 = arith.constant 72 : index
    %c160_711 = arith.constant 160 : index
    %681 = vector.load %arg8[%c72_710, %c160_711] : memref<100x256xf32, #tpu.memory_space<vmem>>, vector<4x16xf32>
    tpu.vector_store %arg8[%c72_710, %c160_711], %680 {strides = array<i32>} : memref<100x256xf32, #tpu.memory_space<vmem>>, vector<4x16xf32>,
    %682 = vector.extract_strided_slice %673 {offsets = [0, 4], sizes = [4, 16], strides = [1, 1]} : vector<4x20xf32> to vector<4x16xf32>
    %c76_712 = arith.constant 76 : index
    %c160_713 = arith.constant 160 : index
    %683 = vector.load %arg8[%c76_712, %c160_713] : memref<100x256xf32, #tpu.memory_space<vmem>>, vector<4x16xf32>
    tpu.vector_store %arg8[%c76_712, %c160_713], %682 {strides = array<i32>} : memref<100x256xf32, #tpu.memory_space<vmem>>, vector<4x16xf32>,
    %c0_714 = arith.constant 0 : index
    %c14 = arith.constant 14 : index
    %c0_715 = arith.constant 0 : index
    %684 = vector.load %arg7[%c0_714, %c14, %c0_715] : memref<4x20x20xf32, #tpu.memory_space<vmem>>, vector<4x1x20xf32>
    %685 = vector.shape_cast %684 : vector<4x1x20xf32> to vector<4x20xf32>
    %686 = vector.extract_strided_slice %685 {offsets = [0, 0], sizes = [4, 16], strides = [1, 1]} : vector<4x20xf32> to vector<4x16xf32>
    %c80_716 = arith.constant 80 : index
    %c160_717 = arith.constant 160 : index
    %687 = vector.load %arg8[%c80_716, %c160_717] : memref<100x256xf32, #tpu.memory_space<vmem>>, vector<4x16xf32>
    tpu.vector_store %arg8[%c80_716, %c160_717], %686 {strides = array<i32>} : memref<100x256xf32, #tpu.memory_space<vmem>>, vector<4x16xf32>,
    %688 = vector.extract_strided_slice %685 {offsets = [0, 1], sizes = [4, 16], strides = [1, 1]} : vector<4x20xf32> to vector<4x16xf32>
    %c84_718 = arith.constant 84 : index
    %c160_719 = arith.constant 160 : index
    %689 = vector.load %arg8[%c84_718, %c160_719] : memref<100x256xf32, #tpu.memory_space<vmem>>, vector<4x16xf32>
    tpu.vector_store %arg8[%c84_718, %c160_719], %688 {strides = array<i32>} : memref<100x256xf32, #tpu.memory_space<vmem>>, vector<4x16xf32>,
    %690 = vector.extract_strided_slice %685 {offsets = [0, 2], sizes = [4, 16], strides = [1, 1]} : vector<4x20xf32> to vector<4x16xf32>
    %c88_720 = arith.constant 88 : index
    %c160_721 = arith.constant 160 : index
    %691 = vector.load %arg8[%c88_720, %c160_721] : memref<100x256xf32, #tpu.memory_space<vmem>>, vector<4x16xf32>
    tpu.vector_store %arg8[%c88_720, %c160_721], %690 {strides = array<i32>} : memref<100x256xf32, #tpu.memory_space<vmem>>, vector<4x16xf32>,
    %692 = vector.extract_strided_slice %685 {offsets = [0, 3], sizes = [4, 16], strides = [1, 1]} : vector<4x20xf32> to vector<4x16xf32>
    %c92_722 = arith.constant 92 : index
    %c160_723 = arith.constant 160 : index
    %693 = vector.load %arg8[%c92_722, %c160_723] : memref<100x256xf32, #tpu.memory_space<vmem>>, vector<4x16xf32>
    tpu.vector_store %arg8[%c92_722, %c160_723], %692 {strides = array<i32>} : memref<100x256xf32, #tpu.memory_space<vmem>>, vector<4x16xf32>,
    %694 = vector.extract_strided_slice %685 {offsets = [0, 4], sizes = [4, 16], strides = [1, 1]} : vector<4x20xf32> to vector<4x16xf32>
    %c96_724 = arith.constant 96 : index
    %c160_725 = arith.constant 160 : index
    %695 = vector.load %arg8[%c96_724, %c160_725] : memref<100x256xf32, #tpu.memory_space<vmem>>, vector<4x16xf32>
    tpu.vector_store %arg8[%c96_724, %c160_725], %694 {strides = array<i32>} : memref<100x256xf32, #tpu.memory_space<vmem>>, vector<4x16xf32>,
    %c0_726 = arith.constant 0 : index
    %c11_727 = arith.constant 11 : index
    %c0_728 = arith.constant 0 : index
    %696 = vector.load %arg7[%c0_726, %c11_727, %c0_728] : memref<4x20x20xf32, #tpu.memory_space<vmem>>, vector<4x1x20xf32>
    %697 = vector.shape_cast %696 : vector<4x1x20xf32> to vector<4x20xf32>
    %698 = vector.extract_strided_slice %697 {offsets = [0, 0], sizes = [4, 16], strides = [1, 1]} : vector<4x20xf32> to vector<4x16xf32>
    %c0_729 = arith.constant 0 : index
    %c176 = arith.constant 176 : index
    %699 = vector.load %arg8[%c0_729, %c176] : memref<100x256xf32, #tpu.memory_space<vmem>>, vector<4x16xf32>
    tpu.vector_store %arg8[%c0_729, %c176], %698 {strides = array<i32>} : memref<100x256xf32, #tpu.memory_space<vmem>>, vector<4x16xf32>,
    %700 = vector.extract_strided_slice %697 {offsets = [0, 1], sizes = [4, 16], strides = [1, 1]} : vector<4x20xf32> to vector<4x16xf32>
    %c4_730 = arith.constant 4 : index
    %c176_731 = arith.constant 176 : index
    %701 = vector.load %arg8[%c4_730, %c176_731] : memref<100x256xf32, #tpu.memory_space<vmem>>, vector<4x16xf32>
    tpu.vector_store %arg8[%c4_730, %c176_731], %700 {strides = array<i32>} : memref<100x256xf32, #tpu.memory_space<vmem>>, vector<4x16xf32>,
    %702 = vector.extract_strided_slice %697 {offsets = [0, 2], sizes = [4, 16], strides = [1, 1]} : vector<4x20xf32> to vector<4x16xf32>
    %c8_732 = arith.constant 8 : index
    %c176_733 = arith.constant 176 : index
    %703 = vector.load %arg8[%c8_732, %c176_733] : memref<100x256xf32, #tpu.memory_space<vmem>>, vector<4x16xf32>
    tpu.vector_store %arg8[%c8_732, %c176_733], %702 {strides = array<i32>} : memref<100x256xf32, #tpu.memory_space<vmem>>, vector<4x16xf32>,
    %704 = vector.extract_strided_slice %697 {offsets = [0, 3], sizes = [4, 16], strides = [1, 1]} : vector<4x20xf32> to vector<4x16xf32>
    %c12_734 = arith.constant 12 : index
    %c176_735 = arith.constant 176 : index
    %705 = vector.load %arg8[%c12_734, %c176_735] : memref<100x256xf32, #tpu.memory_space<vmem>>, vector<4x16xf32>
    tpu.vector_store %arg8[%c12_734, %c176_735], %704 {strides = array<i32>} : memref<100x256xf32, #tpu.memory_space<vmem>>, vector<4x16xf32>,
    %706 = vector.extract_strided_slice %697 {offsets = [0, 4], sizes = [4, 16], strides = [1, 1]} : vector<4x20xf32> to vector<4x16xf32>
    %c16_736 = arith.constant 16 : index
    %c176_737 = arith.constant 176 : index
    %707 = vector.load %arg8[%c16_736, %c176_737] : memref<100x256xf32, #tpu.memory_space<vmem>>, vector<4x16xf32>
    tpu.vector_store %arg8[%c16_736, %c176_737], %706 {strides = array<i32>} : memref<100x256xf32, #tpu.memory_space<vmem>>, vector<4x16xf32>,
    %c0_738 = arith.constant 0 : index
    %c12_739 = arith.constant 12 : index
    %c0_740 = arith.constant 0 : index
    %708 = vector.load %arg7[%c0_738, %c12_739, %c0_740] : memref<4x20x20xf32, #tpu.memory_space<vmem>>, vector<4x1x20xf32>
    %709 = vector.shape_cast %708 : vector<4x1x20xf32> to vector<4x20xf32>
    %710 = vector.extract_strided_slice %709 {offsets = [0, 0], sizes = [4, 16], strides = [1, 1]} : vector<4x20xf32> to vector<4x16xf32>
    %c20_741 = arith.constant 20 : index
    %c176_742 = arith.constant 176 : index
    %711 = vector.load %arg8[%c20_741, %c176_742] : memref<100x256xf32, #tpu.memory_space<vmem>>, vector<4x16xf32>
    tpu.vector_store %arg8[%c20_741, %c176_742], %710 {strides = array<i32>} : memref<100x256xf32, #tpu.memory_space<vmem>>, vector<4x16xf32>,
    %712 = vector.extract_strided_slice %709 {offsets = [0, 1], sizes = [4, 16], strides = [1, 1]} : vector<4x20xf32> to vector<4x16xf32>
    %c24_743 = arith.constant 24 : index
    %c176_744 = arith.constant 176 : index
    %713 = vector.load %arg8[%c24_743, %c176_744] : memref<100x256xf32, #tpu.memory_space<vmem>>, vector<4x16xf32>
    tpu.vector_store %arg8[%c24_743, %c176_744], %712 {strides = array<i32>} : memref<100x256xf32, #tpu.memory_space<vmem>>, vector<4x16xf32>,
    %714 = vector.extract_strided_slice %709 {offsets = [0, 2], sizes = [4, 16], strides = [1, 1]} : vector<4x20xf32> to vector<4x16xf32>
    %c28_745 = arith.constant 28 : index
    %c176_746 = arith.constant 176 : index
    %715 = vector.load %arg8[%c28_745, %c176_746] : memref<100x256xf32, #tpu.memory_space<vmem>>, vector<4x16xf32>
    tpu.vector_store %arg8[%c28_745, %c176_746], %714 {strides = array<i32>} : memref<100x256xf32, #tpu.memory_space<vmem>>, vector<4x16xf32>,
    %716 = vector.extract_strided_slice %709 {offsets = [0, 3], sizes = [4, 16], strides = [1, 1]} : vector<4x20xf32> to vector<4x16xf32>
    %c32_747 = arith.constant 32 : index
    %c176_748 = arith.constant 176 : index
    %717 = vector.load %arg8[%c32_747, %c176_748] : memref<100x256xf32, #tpu.memory_space<vmem>>, vector<4x16xf32>
    tpu.vector_store %arg8[%c32_747, %c176_748], %716 {strides = array<i32>} : memref<100x256xf32, #tpu.memory_space<vmem>>, vector<4x16xf32>,
    %718 = vector.extract_strided_slice %709 {offsets = [0, 4], sizes = [4, 16], strides = [1, 1]} : vector<4x20xf32> to vector<4x16xf32>
    %c36_749 = arith.constant 36 : index
    %c176_750 = arith.constant 176 : index
    %719 = vector.load %arg8[%c36_749, %c176_750] : memref<100x256xf32, #tpu.memory_space<vmem>>, vector<4x16xf32>
    tpu.vector_store %arg8[%c36_749, %c176_750], %718 {strides = array<i32>} : memref<100x256xf32, #tpu.memory_space<vmem>>, vector<4x16xf32>,
    %c0_751 = arith.constant 0 : index
    %c13_752 = arith.constant 13 : index
    %c0_753 = arith.constant 0 : index
    %720 = vector.load %arg7[%c0_751, %c13_752, %c0_753] : memref<4x20x20xf32, #tpu.memory_space<vmem>>, vector<4x1x20xf32>
    %721 = vector.shape_cast %720 : vector<4x1x20xf32> to vector<4x20xf32>
    %722 = vector.extract_strided_slice %721 {offsets = [0, 0], sizes = [4, 16], strides = [1, 1]} : vector<4x20xf32> to vector<4x16xf32>
    %c40_754 = arith.constant 40 : index
    %c176_755 = arith.constant 176 : index
    %723 = vector.load %arg8[%c40_754, %c176_755] : memref<100x256xf32, #tpu.memory_space<vmem>>, vector<4x16xf32>
    tpu.vector_store %arg8[%c40_754, %c176_755], %722 {strides = array<i32>} : memref<100x256xf32, #tpu.memory_space<vmem>>, vector<4x16xf32>,
    %724 = vector.extract_strided_slice %721 {offsets = [0, 1], sizes = [4, 16], strides = [1, 1]} : vector<4x20xf32> to vector<4x16xf32>
    %c44_756 = arith.constant 44 : index
    %c176_757 = arith.constant 176 : index
    %725 = vector.load %arg8[%c44_756, %c176_757] : memref<100x256xf32, #tpu.memory_space<vmem>>, vector<4x16xf32>
    tpu.vector_store %arg8[%c44_756, %c176_757], %724 {strides = array<i32>} : memref<100x256xf32, #tpu.memory_space<vmem>>, vector<4x16xf32>,
    %726 = vector.extract_strided_slice %721 {offsets = [0, 2], sizes = [4, 16], strides = [1, 1]} : vector<4x20xf32> to vector<4x16xf32>
    %c48_758 = arith.constant 48 : index
    %c176_759 = arith.constant 176 : index
    %727 = vector.load %arg8[%c48_758, %c176_759] : memref<100x256xf32, #tpu.memory_space<vmem>>, vector<4x16xf32>
    tpu.vector_store %arg8[%c48_758, %c176_759], %726 {strides = array<i32>} : memref<100x256xf32, #tpu.memory_space<vmem>>, vector<4x16xf32>,
    %728 = vector.extract_strided_slice %721 {offsets = [0, 3], sizes = [4, 16], strides = [1, 1]} : vector<4x20xf32> to vector<4x16xf32>
    %c52_760 = arith.constant 52 : index
    %c176_761 = arith.constant 176 : index
    %729 = vector.load %arg8[%c52_760, %c176_761] : memref<100x256xf32, #tpu.memory_space<vmem>>, vector<4x16xf32>
    tpu.vector_store %arg8[%c52_760, %c176_761], %728 {strides = array<i32>} : memref<100x256xf32, #tpu.memory_space<vmem>>, vector<4x16xf32>,
    %730 = vector.extract_strided_slice %721 {offsets = [0, 4], sizes = [4, 16], strides = [1, 1]} : vector<4x20xf32> to vector<4x16xf32>
    %c56_762 = arith.constant 56 : index
    %c176_763 = arith.constant 176 : index
    %731 = vector.load %arg8[%c56_762, %c176_763] : memref<100x256xf32, #tpu.memory_space<vmem>>, vector<4x16xf32>
    tpu.vector_store %arg8[%c56_762, %c176_763], %730 {strides = array<i32>} : memref<100x256xf32, #tpu.memory_space<vmem>>, vector<4x16xf32>,
    %c0_764 = arith.constant 0 : index
    %c14_765 = arith.constant 14 : index
    %c0_766 = arith.constant 0 : index
    %732 = vector.load %arg7[%c0_764, %c14_765, %c0_766] : memref<4x20x20xf32, #tpu.memory_space<vmem>>, vector<4x1x20xf32>
    %733 = vector.shape_cast %732 : vector<4x1x20xf32> to vector<4x20xf32>
    %734 = vector.extract_strided_slice %733 {offsets = [0, 0], sizes = [4, 16], strides = [1, 1]} : vector<4x20xf32> to vector<4x16xf32>
    %c60_767 = arith.constant 60 : index
    %c176_768 = arith.constant 176 : index
    %735 = vector.load %arg8[%c60_767, %c176_768] : memref<100x256xf32, #tpu.memory_space<vmem>>, vector<4x16xf32>
    tpu.vector_store %arg8[%c60_767, %c176_768], %734 {strides = array<i32>} : memref<100x256xf32, #tpu.memory_space<vmem>>, vector<4x16xf32>,
    %736 = vector.extract_strided_slice %733 {offsets = [0, 1], sizes = [4, 16], strides = [1, 1]} : vector<4x20xf32> to vector<4x16xf32>
    %c64_769 = arith.constant 64 : index
    %c176_770 = arith.constant 176 : index
    %737 = vector.load %arg8[%c64_769, %c176_770] : memref<100x256xf32, #tpu.memory_space<vmem>>, vector<4x16xf32>
    tpu.vector_store %arg8[%c64_769, %c176_770], %736 {strides = array<i32>} : memref<100x256xf32, #tpu.memory_space<vmem>>, vector<4x16xf32>,
    %738 = vector.extract_strided_slice %733 {offsets = [0, 2], sizes = [4, 16], strides = [1, 1]} : vector<4x20xf32> to vector<4x16xf32>
    %c68_771 = arith.constant 68 : index
    %c176_772 = arith.constant 176 : index
    %739 = vector.load %arg8[%c68_771, %c176_772] : memref<100x256xf32, #tpu.memory_space<vmem>>, vector<4x16xf32>
    tpu.vector_store %arg8[%c68_771, %c176_772], %738 {strides = array<i32>} : memref<100x256xf32, #tpu.memory_space<vmem>>, vector<4x16xf32>,
    %740 = vector.extract_strided_slice %733 {offsets = [0, 3], sizes = [4, 16], strides = [1, 1]} : vector<4x20xf32> to vector<4x16xf32>
    %c72_773 = arith.constant 72 : index
    %c176_774 = arith.constant 176 : index
    %741 = vector.load %arg8[%c72_773, %c176_774] : memref<100x256xf32, #tpu.memory_space<vmem>>, vector<4x16xf32>
    tpu.vector_store %arg8[%c72_773, %c176_774], %740 {strides = array<i32>} : memref<100x256xf32, #tpu.memory_space<vmem>>, vector<4x16xf32>,
    %742 = vector.extract_strided_slice %733 {offsets = [0, 4], sizes = [4, 16], strides = [1, 1]} : vector<4x20xf32> to vector<4x16xf32>
    %c76_775 = arith.constant 76 : index
    %c176_776 = arith.constant 176 : index
    %743 = vector.load %arg8[%c76_775, %c176_776] : memref<100x256xf32, #tpu.memory_space<vmem>>, vector<4x16xf32>
    tpu.vector_store %arg8[%c76_775, %c176_776], %742 {strides = array<i32>} : memref<100x256xf32, #tpu.memory_space<vmem>>, vector<4x16xf32>,
    %c0_777 = arith.constant 0 : index
    %c15 = arith.constant 15 : index
    %c0_778 = arith.constant 0 : index
    %744 = vector.load %arg7[%c0_777, %c15, %c0_778] : memref<4x20x20xf32, #tpu.memory_space<vmem>>, vector<4x1x20xf32>
    %745 = vector.shape_cast %744 : vector<4x1x20xf32> to vector<4x20xf32>
    %746 = vector.extract_strided_slice %745 {offsets = [0, 0], sizes = [4, 16], strides = [1, 1]} : vector<4x20xf32> to vector<4x16xf32>
    %c80_779 = arith.constant 80 : index
    %c176_780 = arith.constant 176 : index
    %747 = vector.load %arg8[%c80_779, %c176_780] : memref<100x256xf32, #tpu.memory_space<vmem>>, vector<4x16xf32>
    tpu.vector_store %arg8[%c80_779, %c176_780], %746 {strides = array<i32>} : memref<100x256xf32, #tpu.memory_space<vmem>>, vector<4x16xf32>,
    %748 = vector.extract_strided_slice %745 {offsets = [0, 1], sizes = [4, 16], strides = [1, 1]} : vector<4x20xf32> to vector<4x16xf32>
    %c84_781 = arith.constant 84 : index
    %c176_782 = arith.constant 176 : index
    %749 = vector.load %arg8[%c84_781, %c176_782] : memref<100x256xf32, #tpu.memory_space<vmem>>, vector<4x16xf32>
    tpu.vector_store %arg8[%c84_781, %c176_782], %748 {strides = array<i32>} : memref<100x256xf32, #tpu.memory_space<vmem>>, vector<4x16xf32>,
    %750 = vector.extract_strided_slice %745 {offsets = [0, 2], sizes = [4, 16], strides = [1, 1]} : vector<4x20xf32> to vector<4x16xf32>
    %c88_783 = arith.constant 88 : index
    %c176_784 = arith.constant 176 : index
    %751 = vector.load %arg8[%c88_783, %c176_784] : memref<100x256xf32, #tpu.memory_space<vmem>>, vector<4x16xf32>
    tpu.vector_store %arg8[%c88_783, %c176_784], %750 {strides = array<i32>} : memref<100x256xf32, #tpu.memory_space<vmem>>, vector<4x16xf32>,
    %752 = vector.extract_strided_slice %745 {offsets = [0, 3], sizes = [4, 16], strides = [1, 1]} : vector<4x20xf32> to vector<4x16xf32>
    %c92_785 = arith.constant 92 : index
    %c176_786 = arith.constant 176 : index
    %753 = vector.load %arg8[%c92_785, %c176_786] : memref<100x256xf32, #tpu.memory_space<vmem>>, vector<4x16xf32>
    tpu.vector_store %arg8[%c92_785, %c176_786], %752 {strides = array<i32>} : memref<100x256xf32, #tpu.memory_space<vmem>>, vector<4x16xf32>,
    %754 = vector.extract_strided_slice %745 {offsets = [0, 4], sizes = [4, 16], strides = [1, 1]} : vector<4x20xf32> to vector<4x16xf32>
    %c96_787 = arith.constant 96 : index
    %c176_788 = arith.constant 176 : index
    %755 = vector.load %arg8[%c96_787, %c176_788] : memref<100x256xf32, #tpu.memory_space<vmem>>, vector<4x16xf32>
    tpu.vector_store %arg8[%c96_787, %c176_788], %754 {strides = array<i32>} : memref<100x256xf32, #tpu.memory_space<vmem>>, vector<4x16xf32>,
    %c0_789 = arith.constant 0 : index
    %c12_790 = arith.constant 12 : index
    %c0_791 = arith.constant 0 : index
    %756 = vector.load %arg7[%c0_789, %c12_790, %c0_791] : memref<4x20x20xf32, #tpu.memory_space<vmem>>, vector<4x1x20xf32>
    %757 = vector.shape_cast %756 : vector<4x1x20xf32> to vector<4x20xf32>
    %758 = vector.extract_strided_slice %757 {offsets = [0, 0], sizes = [4, 16], strides = [1, 1]} : vector<4x20xf32> to vector<4x16xf32>
    %c0_792 = arith.constant 0 : index
    %c192 = arith.constant 192 : index
    %759 = vector.load %arg8[%c0_792, %c192] : memref<100x256xf32, #tpu.memory_space<vmem>>, vector<4x16xf32>
    tpu.vector_store %arg8[%c0_792, %c192], %758 {strides = array<i32>} : memref<100x256xf32, #tpu.memory_space<vmem>>, vector<4x16xf32>,
    %760 = vector.extract_strided_slice %757 {offsets = [0, 1], sizes = [4, 16], strides = [1, 1]} : vector<4x20xf32> to vector<4x16xf32>
    %c4_793 = arith.constant 4 : index
    %c192_794 = arith.constant 192 : index
    %761 = vector.load %arg8[%c4_793, %c192_794] : memref<100x256xf32, #tpu.memory_space<vmem>>, vector<4x16xf32>
    tpu.vector_store %arg8[%c4_793, %c192_794], %760 {strides = array<i32>} : memref<100x256xf32, #tpu.memory_space<vmem>>, vector<4x16xf32>,
    %762 = vector.extract_strided_slice %757 {offsets = [0, 2], sizes = [4, 16], strides = [1, 1]} : vector<4x20xf32> to vector<4x16xf32>
    %c8_795 = arith.constant 8 : index
    %c192_796 = arith.constant 192 : index
    %763 = vector.load %arg8[%c8_795, %c192_796] : memref<100x256xf32, #tpu.memory_space<vmem>>, vector<4x16xf32>
    tpu.vector_store %arg8[%c8_795, %c192_796], %762 {strides = array<i32>} : memref<100x256xf32, #tpu.memory_space<vmem>>, vector<4x16xf32>,
    %764 = vector.extract_strided_slice %757 {offsets = [0, 3], sizes = [4, 16], strides = [1, 1]} : vector<4x20xf32> to vector<4x16xf32>
    %c12_797 = arith.constant 12 : index
    %c192_798 = arith.constant 192 : index
    %765 = vector.load %arg8[%c12_797, %c192_798] : memref<100x256xf32, #tpu.memory_space<vmem>>, vector<4x16xf32>
    tpu.vector_store %arg8[%c12_797, %c192_798], %764 {strides = array<i32>} : memref<100x256xf32, #tpu.memory_space<vmem>>, vector<4x16xf32>,
    %766 = vector.extract_strided_slice %757 {offsets = [0, 4], sizes = [4, 16], strides = [1, 1]} : vector<4x20xf32> to vector<4x16xf32>
    %c16_799 = arith.constant 16 : index
    %c192_800 = arith.constant 192 : index
    %767 = vector.load %arg8[%c16_799, %c192_800] : memref<100x256xf32, #tpu.memory_space<vmem>>, vector<4x16xf32>
    tpu.vector_store %arg8[%c16_799, %c192_800], %766 {strides = array<i32>} : memref<100x256xf32, #tpu.memory_space<vmem>>, vector<4x16xf32>,
    %c0_801 = arith.constant 0 : index
    %c13_802 = arith.constant 13 : index
    %c0_803 = arith.constant 0 : index
    %768 = vector.load %arg7[%c0_801, %c13_802, %c0_803] : memref<4x20x20xf32, #tpu.memory_space<vmem>>, vector<4x1x20xf32>
    %769 = vector.shape_cast %768 : vector<4x1x20xf32> to vector<4x20xf32>
    %770 = vector.extract_strided_slice %769 {offsets = [0, 0], sizes = [4, 16], strides = [1, 1]} : vector<4x20xf32> to vector<4x16xf32>
    %c20_804 = arith.constant 20 : index
    %c192_805 = arith.constant 192 : index
    %771 = vector.load %arg8[%c20_804, %c192_805] : memref<100x256xf32, #tpu.memory_space<vmem>>, vector<4x16xf32>
    tpu.vector_store %arg8[%c20_804, %c192_805], %770 {strides = array<i32>} : memref<100x256xf32, #tpu.memory_space<vmem>>, vector<4x16xf32>,
    %772 = vector.extract_strided_slice %769 {offsets = [0, 1], sizes = [4, 16], strides = [1, 1]} : vector<4x20xf32> to vector<4x16xf32>
    %c24_806 = arith.constant 24 : index
    %c192_807 = arith.constant 192 : index
    %773 = vector.load %arg8[%c24_806, %c192_807] : memref<100x256xf32, #tpu.memory_space<vmem>>, vector<4x16xf32>
    tpu.vector_store %arg8[%c24_806, %c192_807], %772 {strides = array<i32>} : memref<100x256xf32, #tpu.memory_space<vmem>>, vector<4x16xf32>,
    %774 = vector.extract_strided_slice %769 {offsets = [0, 2], sizes = [4, 16], strides = [1, 1]} : vector<4x20xf32> to vector<4x16xf32>
    %c28_808 = arith.constant 28 : index
    %c192_809 = arith.constant 192 : index
    %775 = vector.load %arg8[%c28_808, %c192_809] : memref<100x256xf32, #tpu.memory_space<vmem>>, vector<4x16xf32>
    tpu.vector_store %arg8[%c28_808, %c192_809], %774 {strides = array<i32>} : memref<100x256xf32, #tpu.memory_space<vmem>>, vector<4x16xf32>,
    %776 = vector.extract_strided_slice %769 {offsets = [0, 3], sizes = [4, 16], strides = [1, 1]} : vector<4x20xf32> to vector<4x16xf32>
    %c32_810 = arith.constant 32 : index
    %c192_811 = arith.constant 192 : index
    %777 = vector.load %arg8[%c32_810, %c192_811] : memref<100x256xf32, #tpu.memory_space<vmem>>, vector<4x16xf32>
    tpu.vector_store %arg8[%c32_810, %c192_811], %776 {strides = array<i32>} : memref<100x256xf32, #tpu.memory_space<vmem>>, vector<4x16xf32>,
    %778 = vector.extract_strided_slice %769 {offsets = [0, 4], sizes = [4, 16], strides = [1, 1]} : vector<4x20xf32> to vector<4x16xf32>
    %c36_812 = arith.constant 36 : index
    %c192_813 = arith.constant 192 : index
    %779 = vector.load %arg8[%c36_812, %c192_813] : memref<100x256xf32, #tpu.memory_space<vmem>>, vector<4x16xf32>
    tpu.vector_store %arg8[%c36_812, %c192_813], %778 {strides = array<i32>} : memref<100x256xf32, #tpu.memory_space<vmem>>, vector<4x16xf32>,
    %c0_814 = arith.constant 0 : index
    %c14_815 = arith.constant 14 : index
    %c0_816 = arith.constant 0 : index
    %780 = vector.load %arg7[%c0_814, %c14_815, %c0_816] : memref<4x20x20xf32, #tpu.memory_space<vmem>>, vector<4x1x20xf32>
    %781 = vector.shape_cast %780 : vector<4x1x20xf32> to vector<4x20xf32>
    %782 = vector.extract_strided_slice %781 {offsets = [0, 0], sizes = [4, 16], strides = [1, 1]} : vector<4x20xf32> to vector<4x16xf32>
    %c40_817 = arith.constant 40 : index
    %c192_818 = arith.constant 192 : index
    %783 = vector.load %arg8[%c40_817, %c192_818] : memref<100x256xf32, #tpu.memory_space<vmem>>, vector<4x16xf32>
    tpu.vector_store %arg8[%c40_817, %c192_818], %782 {strides = array<i32>} : memref<100x256xf32, #tpu.memory_space<vmem>>, vector<4x16xf32>,
    %784 = vector.extract_strided_slice %781 {offsets = [0, 1], sizes = [4, 16], strides = [1, 1]} : vector<4x20xf32> to vector<4x16xf32>
    %c44_819 = arith.constant 44 : index
    %c192_820 = arith.constant 192 : index
    %785 = vector.load %arg8[%c44_819, %c192_820] : memref<100x256xf32, #tpu.memory_space<vmem>>, vector<4x16xf32>
    tpu.vector_store %arg8[%c44_819, %c192_820], %784 {strides = array<i32>} : memref<100x256xf32, #tpu.memory_space<vmem>>, vector<4x16xf32>,
    %786 = vector.extract_strided_slice %781 {offsets = [0, 2], sizes = [4, 16], strides = [1, 1]} : vector<4x20xf32> to vector<4x16xf32>
    %c48_821 = arith.constant 48 : index
    %c192_822 = arith.constant 192 : index
    %787 = vector.load %arg8[%c48_821, %c192_822] : memref<100x256xf32, #tpu.memory_space<vmem>>, vector<4x16xf32>
    tpu.vector_store %arg8[%c48_821, %c192_822], %786 {strides = array<i32>} : memref<100x256xf32, #tpu.memory_space<vmem>>, vector<4x16xf32>,
    %788 = vector.extract_strided_slice %781 {offsets = [0, 3], sizes = [4, 16], strides = [1, 1]} : vector<4x20xf32> to vector<4x16xf32>
    %c52_823 = arith.constant 52 : index
    %c192_824 = arith.constant 192 : index
    %789 = vector.load %arg8[%c52_823, %c192_824] : memref<100x256xf32, #tpu.memory_space<vmem>>, vector<4x16xf32>
    tpu.vector_store %arg8[%c52_823, %c192_824], %788 {strides = array<i32>} : memref<100x256xf32, #tpu.memory_space<vmem>>, vector<4x16xf32>,
    %790 = vector.extract_strided_slice %781 {offsets = [0, 4], sizes = [4, 16], strides = [1, 1]} : vector<4x20xf32> to vector<4x16xf32>
    %c56_825 = arith.constant 56 : index
    %c192_826 = arith.constant 192 : index
    %791 = vector.load %arg8[%c56_825, %c192_826] : memref<100x256xf32, #tpu.memory_space<vmem>>, vector<4x16xf32>
    tpu.vector_store %arg8[%c56_825, %c192_826], %790 {strides = array<i32>} : memref<100x256xf32, #tpu.memory_space<vmem>>, vector<4x16xf32>,
    %c0_827 = arith.constant 0 : index
    %c15_828 = arith.constant 15 : index
    %c0_829 = arith.constant 0 : index
    %792 = vector.load %arg7[%c0_827, %c15_828, %c0_829] : memref<4x20x20xf32, #tpu.memory_space<vmem>>, vector<4x1x20xf32>
    %793 = vector.shape_cast %792 : vector<4x1x20xf32> to vector<4x20xf32>
    %794 = vector.extract_strided_slice %793 {offsets = [0, 0], sizes = [4, 16], strides = [1, 1]} : vector<4x20xf32> to vector<4x16xf32>
    %c60_830 = arith.constant 60 : index
    %c192_831 = arith.constant 192 : index
    %795 = vector.load %arg8[%c60_830, %c192_831] : memref<100x256xf32, #tpu.memory_space<vmem>>, vector<4x16xf32>
    tpu.vector_store %arg8[%c60_830, %c192_831], %794 {strides = array<i32>} : memref<100x256xf32, #tpu.memory_space<vmem>>, vector<4x16xf32>,
    %796 = vector.extract_strided_slice %793 {offsets = [0, 1], sizes = [4, 16], strides = [1, 1]} : vector<4x20xf32> to vector<4x16xf32>
    %c64_832 = arith.constant 64 : index
    %c192_833 = arith.constant 192 : index
    %797 = vector.load %arg8[%c64_832, %c192_833] : memref<100x256xf32, #tpu.memory_space<vmem>>, vector<4x16xf32>
    tpu.vector_store %arg8[%c64_832, %c192_833], %796 {strides = array<i32>} : memref<100x256xf32, #tpu.memory_space<vmem>>, vector<4x16xf32>,
    %798 = vector.extract_strided_slice %793 {offsets = [0, 2], sizes = [4, 16], strides = [1, 1]} : vector<4x20xf32> to vector<4x16xf32>
    %c68_834 = arith.constant 68 : index
    %c192_835 = arith.constant 192 : index
    %799 = vector.load %arg8[%c68_834, %c192_835] : memref<100x256xf32, #tpu.memory_space<vmem>>, vector<4x16xf32>
    tpu.vector_store %arg8[%c68_834, %c192_835], %798 {strides = array<i32>} : memref<100x256xf32, #tpu.memory_space<vmem>>, vector<4x16xf32>,
    %800 = vector.extract_strided_slice %793 {offsets = [0, 3], sizes = [4, 16], strides = [1, 1]} : vector<4x20xf32> to vector<4x16xf32>
    %c72_836 = arith.constant 72 : index
    %c192_837 = arith.constant 192 : index
    %801 = vector.load %arg8[%c72_836, %c192_837] : memref<100x256xf32, #tpu.memory_space<vmem>>, vector<4x16xf32>
    tpu.vector_store %arg8[%c72_836, %c192_837], %800 {strides = array<i32>} : memref<100x256xf32, #tpu.memory_space<vmem>>, vector<4x16xf32>,
    %802 = vector.extract_strided_slice %793 {offsets = [0, 4], sizes = [4, 16], strides = [1, 1]} : vector<4x20xf32> to vector<4x16xf32>
    %c76_838 = arith.constant 76 : index
    %c192_839 = arith.constant 192 : index
    %803 = vector.load %arg8[%c76_838, %c192_839] : memref<100x256xf32, #tpu.memory_space<vmem>>, vector<4x16xf32>
    tpu.vector_store %arg8[%c76_838, %c192_839], %802 {strides = array<i32>} : memref<100x256xf32, #tpu.memory_space<vmem>>, vector<4x16xf32>,
    %c0_840 = arith.constant 0 : index
    %c16_841 = arith.constant 16 : index
    %c0_842 = arith.constant 0 : index
    %804 = vector.load %arg7[%c0_840, %c16_841, %c0_842] : memref<4x20x20xf32, #tpu.memory_space<vmem>>, vector<4x1x20xf32>
    %805 = vector.shape_cast %804 : vector<4x1x20xf32> to vector<4x20xf32>
    %806 = vector.extract_strided_slice %805 {offsets = [0, 0], sizes = [4, 16], strides = [1, 1]} : vector<4x20xf32> to vector<4x16xf32>
    %c80_843 = arith.constant 80 : index
    %c192_844 = arith.constant 192 : index
    %807 = vector.load %arg8[%c80_843, %c192_844] : memref<100x256xf32, #tpu.memory_space<vmem>>, vector<4x16xf32>
    tpu.vector_store %arg8[%c80_843, %c192_844], %806 {strides = array<i32>} : memref<100x256xf32, #tpu.memory_space<vmem>>, vector<4x16xf32>,
    %808 = vector.extract_strided_slice %805 {offsets = [0, 1], sizes = [4, 16], strides = [1, 1]} : vector<4x20xf32> to vector<4x16xf32>
    %c84_845 = arith.constant 84 : index
    %c192_846 = arith.constant 192 : index
    %809 = vector.load %arg8[%c84_845, %c192_846] : memref<100x256xf32, #tpu.memory_space<vmem>>, vector<4x16xf32>
    tpu.vector_store %arg8[%c84_845, %c192_846], %808 {strides = array<i32>} : memref<100x256xf32, #tpu.memory_space<vmem>>, vector<4x16xf32>,
    %810 = vector.extract_strided_slice %805 {offsets = [0, 2], sizes = [4, 16], strides = [1, 1]} : vector<4x20xf32> to vector<4x16xf32>
    %c88_847 = arith.constant 88 : index
    %c192_848 = arith.constant 192 : index
    %811 = vector.load %arg8[%c88_847, %c192_848] : memref<100x256xf32, #tpu.memory_space<vmem>>, vector<4x16xf32>
    tpu.vector_store %arg8[%c88_847, %c192_848], %810 {strides = array<i32>} : memref<100x256xf32, #tpu.memory_space<vmem>>, vector<4x16xf32>,
    %812 = vector.extract_strided_slice %805 {offsets = [0, 3], sizes = [4, 16], strides = [1, 1]} : vector<4x20xf32> to vector<4x16xf32>
    %c92_849 = arith.constant 92 : index
    %c192_850 = arith.constant 192 : index
    %813 = vector.load %arg8[%c92_849, %c192_850] : memref<100x256xf32, #tpu.memory_space<vmem>>, vector<4x16xf32>
    tpu.vector_store %arg8[%c92_849, %c192_850], %812 {strides = array<i32>} : memref<100x256xf32, #tpu.memory_space<vmem>>, vector<4x16xf32>,
    %814 = vector.extract_strided_slice %805 {offsets = [0, 4], sizes = [4, 16], strides = [1, 1]} : vector<4x20xf32> to vector<4x16xf32>
    %c96_851 = arith.constant 96 : index
    %c192_852 = arith.constant 192 : index
    %815 = vector.load %arg8[%c96_851, %c192_852] : memref<100x256xf32, #tpu.memory_space<vmem>>, vector<4x16xf32>
    tpu.vector_store %arg8[%c96_851, %c192_852], %814 {strides = array<i32>} : memref<100x256xf32, #tpu.memory_space<vmem>>, vector<4x16xf32>,
    %c0_853 = arith.constant 0 : index
    %c13_854 = arith.constant 13 : index
    %c0_855 = arith.constant 0 : index
    %816 = vector.load %arg7[%c0_853, %c13_854, %c0_855] : memref<4x20x20xf32, #tpu.memory_space<vmem>>, vector<4x1x20xf32>
    %817 = vector.shape_cast %816 : vector<4x1x20xf32> to vector<4x20xf32>
    %818 = vector.extract_strided_slice %817 {offsets = [0, 0], sizes = [4, 16], strides = [1, 1]} : vector<4x20xf32> to vector<4x16xf32>
    %c0_856 = arith.constant 0 : index
    %c208 = arith.constant 208 : index
    %819 = vector.load %arg8[%c0_856, %c208] : memref<100x256xf32, #tpu.memory_space<vmem>>, vector<4x16xf32>
    tpu.vector_store %arg8[%c0_856, %c208], %818 {strides = array<i32>} : memref<100x256xf32, #tpu.memory_space<vmem>>, vector<4x16xf32>,
    %820 = vector.extract_strided_slice %817 {offsets = [0, 1], sizes = [4, 16], strides = [1, 1]} : vector<4x20xf32> to vector<4x16xf32>
    %c4_857 = arith.constant 4 : index
    %c208_858 = arith.constant 208 : index
    %821 = vector.load %arg8[%c4_857, %c208_858] : memref<100x256xf32, #tpu.memory_space<vmem>>, vector<4x16xf32>
    tpu.vector_store %arg8[%c4_857, %c208_858], %820 {strides = array<i32>} : memref<100x256xf32, #tpu.memory_space<vmem>>, vector<4x16xf32>,
    %822 = vector.extract_strided_slice %817 {offsets = [0, 2], sizes = [4, 16], strides = [1, 1]} : vector<4x20xf32> to vector<4x16xf32>
    %c8_859 = arith.constant 8 : index
    %c208_860 = arith.constant 208 : index
    %823 = vector.load %arg8[%c8_859, %c208_860] : memref<100x256xf32, #tpu.memory_space<vmem>>, vector<4x16xf32>
    tpu.vector_store %arg8[%c8_859, %c208_860], %822 {strides = array<i32>} : memref<100x256xf32, #tpu.memory_space<vmem>>, vector<4x16xf32>,
    %824 = vector.extract_strided_slice %817 {offsets = [0, 3], sizes = [4, 16], strides = [1, 1]} : vector<4x20xf32> to vector<4x16xf32>
    %c12_861 = arith.constant 12 : index
    %c208_862 = arith.constant 208 : index
    %825 = vector.load %arg8[%c12_861, %c208_862] : memref<100x256xf32, #tpu.memory_space<vmem>>, vector<4x16xf32>
    tpu.vector_store %arg8[%c12_861, %c208_862], %824 {strides = array<i32>} : memref<100x256xf32, #tpu.memory_space<vmem>>, vector<4x16xf32>,
    %826 = vector.extract_strided_slice %817 {offsets = [0, 4], sizes = [4, 16], strides = [1, 1]} : vector<4x20xf32> to vector<4x16xf32>
    %c16_863 = arith.constant 16 : index
    %c208_864 = arith.constant 208 : index
    %827 = vector.load %arg8[%c16_863, %c208_864] : memref<100x256xf32, #tpu.memory_space<vmem>>, vector<4x16xf32>
    tpu.vector_store %arg8[%c16_863, %c208_864], %826 {strides = array<i32>} : memref<100x256xf32, #tpu.memory_space<vmem>>, vector<4x16xf32>,
    %c0_865 = arith.constant 0 : index
    %c14_866 = arith.constant 14 : index
    %c0_867 = arith.constant 0 : index
    %828 = vector.load %arg7[%c0_865, %c14_866, %c0_867] : memref<4x20x20xf32, #tpu.memory_space<vmem>>, vector<4x1x20xf32>
    %829 = vector.shape_cast %828 : vector<4x1x20xf32> to vector<4x20xf32>
    %830 = vector.extract_strided_slice %829 {offsets = [0, 0], sizes = [4, 16], strides = [1, 1]} : vector<4x20xf32> to vector<4x16xf32>
    %c20_868 = arith.constant 20 : index
    %c208_869 = arith.constant 208 : index
    %831 = vector.load %arg8[%c20_868, %c208_869] : memref<100x256xf32, #tpu.memory_space<vmem>>, vector<4x16xf32>
    tpu.vector_store %arg8[%c20_868, %c208_869], %830 {strides = array<i32>} : memref<100x256xf32, #tpu.memory_space<vmem>>, vector<4x16xf32>,
    %832 = vector.extract_strided_slice %829 {offsets = [0, 1], sizes = [4, 16], strides = [1, 1]} : vector<4x20xf32> to vector<4x16xf32>
    %c24_870 = arith.constant 24 : index
    %c208_871 = arith.constant 208 : index
    %833 = vector.load %arg8[%c24_870, %c208_871] : memref<100x256xf32, #tpu.memory_space<vmem>>, vector<4x16xf32>
    tpu.vector_store %arg8[%c24_870, %c208_871], %832 {strides = array<i32>} : memref<100x256xf32, #tpu.memory_space<vmem>>, vector<4x16xf32>,
    %834 = vector.extract_strided_slice %829 {offsets = [0, 2], sizes = [4, 16], strides = [1, 1]} : vector<4x20xf32> to vector<4x16xf32>
    %c28_872 = arith.constant 28 : index
    %c208_873 = arith.constant 208 : index
    %835 = vector.load %arg8[%c28_872, %c208_873] : memref<100x256xf32, #tpu.memory_space<vmem>>, vector<4x16xf32>
    tpu.vector_store %arg8[%c28_872, %c208_873], %834 {strides = array<i32>} : memref<100x256xf32, #tpu.memory_space<vmem>>, vector<4x16xf32>,
    %836 = vector.extract_strided_slice %829 {offsets = [0, 3], sizes = [4, 16], strides = [1, 1]} : vector<4x20xf32> to vector<4x16xf32>
    %c32_874 = arith.constant 32 : index
    %c208_875 = arith.constant 208 : index
    %837 = vector.load %arg8[%c32_874, %c208_875] : memref<100x256xf32, #tpu.memory_space<vmem>>, vector<4x16xf32>
    tpu.vector_store %arg8[%c32_874, %c208_875], %836 {strides = array<i32>} : memref<100x256xf32, #tpu.memory_space<vmem>>, vector<4x16xf32>,
    %838 = vector.extract_strided_slice %829 {offsets = [0, 4], sizes = [4, 16], strides = [1, 1]} : vector<4x20xf32> to vector<4x16xf32>
    %c36_876 = arith.constant 36 : index
    %c208_877 = arith.constant 208 : index
    %839 = vector.load %arg8[%c36_876, %c208_877] : memref<100x256xf32, #tpu.memory_space<vmem>>, vector<4x16xf32>
    tpu.vector_store %arg8[%c36_876, %c208_877], %838 {strides = array<i32>} : memref<100x256xf32, #tpu.memory_space<vmem>>, vector<4x16xf32>,
    %c0_878 = arith.constant 0 : index
    %c15_879 = arith.constant 15 : index
    %c0_880 = arith.constant 0 : index
    %840 = vector.load %arg7[%c0_878, %c15_879, %c0_880] : memref<4x20x20xf32, #tpu.memory_space<vmem>>, vector<4x1x20xf32>
    %841 = vector.shape_cast %840 : vector<4x1x20xf32> to vector<4x20xf32>
    %842 = vector.extract_strided_slice %841 {offsets = [0, 0], sizes = [4, 16], strides = [1, 1]} : vector<4x20xf32> to vector<4x16xf32>
    %c40_881 = arith.constant 40 : index
    %c208_882 = arith.constant 208 : index
    %843 = vector.load %arg8[%c40_881, %c208_882] : memref<100x256xf32, #tpu.memory_space<vmem>>, vector<4x16xf32>
    tpu.vector_store %arg8[%c40_881, %c208_882], %842 {strides = array<i32>} : memref<100x256xf32, #tpu.memory_space<vmem>>, vector<4x16xf32>,
    %844 = vector.extract_strided_slice %841 {offsets = [0, 1], sizes = [4, 16], strides = [1, 1]} : vector<4x20xf32> to vector<4x16xf32>
    %c44_883 = arith.constant 44 : index
    %c208_884 = arith.constant 208 : index
    %845 = vector.load %arg8[%c44_883, %c208_884] : memref<100x256xf32, #tpu.memory_space<vmem>>, vector<4x16xf32>
    tpu.vector_store %arg8[%c44_883, %c208_884], %844 {strides = array<i32>} : memref<100x256xf32, #tpu.memory_space<vmem>>, vector<4x16xf32>,
    %846 = vector.extract_strided_slice %841 {offsets = [0, 2], sizes = [4, 16], strides = [1, 1]} : vector<4x20xf32> to vector<4x16xf32>
    %c48_885 = arith.constant 48 : index
    %c208_886 = arith.constant 208 : index
    %847 = vector.load %arg8[%c48_885, %c208_886] : memref<100x256xf32, #tpu.memory_space<vmem>>, vector<4x16xf32>
    tpu.vector_store %arg8[%c48_885, %c208_886], %846 {strides = array<i32>} : memref<100x256xf32, #tpu.memory_space<vmem>>, vector<4x16xf32>,
    %848 = vector.extract_strided_slice %841 {offsets = [0, 3], sizes = [4, 16], strides = [1, 1]} : vector<4x20xf32> to vector<4x16xf32>
    %c52_887 = arith.constant 52 : index
    %c208_888 = arith.constant 208 : index
    %849 = vector.load %arg8[%c52_887, %c208_888] : memref<100x256xf32, #tpu.memory_space<vmem>>, vector<4x16xf32>
    tpu.vector_store %arg8[%c52_887, %c208_888], %848 {strides = array<i32>} : memref<100x256xf32, #tpu.memory_space<vmem>>, vector<4x16xf32>,
    %850 = vector.extract_strided_slice %841 {offsets = [0, 4], sizes = [4, 16], strides = [1, 1]} : vector<4x20xf32> to vector<4x16xf32>
    %c56_889 = arith.constant 56 : index
    %c208_890 = arith.constant 208 : index
    %851 = vector.load %arg8[%c56_889, %c208_890] : memref<100x256xf32, #tpu.memory_space<vmem>>, vector<4x16xf32>
    tpu.vector_store %arg8[%c56_889, %c208_890], %850 {strides = array<i32>} : memref<100x256xf32, #tpu.memory_space<vmem>>, vector<4x16xf32>,
    %c0_891 = arith.constant 0 : index
    %c16_892 = arith.constant 16 : index
    %c0_893 = arith.constant 0 : index
    %852 = vector.load %arg7[%c0_891, %c16_892, %c0_893] : memref<4x20x20xf32, #tpu.memory_space<vmem>>, vector<4x1x20xf32>
    %853 = vector.shape_cast %852 : vector<4x1x20xf32> to vector<4x20xf32>
    %854 = vector.extract_strided_slice %853 {offsets = [0, 0], sizes = [4, 16], strides = [1, 1]} : vector<4x20xf32> to vector<4x16xf32>
    %c60_894 = arith.constant 60 : index
    %c208_895 = arith.constant 208 : index
    %855 = vector.load %arg8[%c60_894, %c208_895] : memref<100x256xf32, #tpu.memory_space<vmem>>, vector<4x16xf32>
    tpu.vector_store %arg8[%c60_894, %c208_895], %854 {strides = array<i32>} : memref<100x256xf32, #tpu.memory_space<vmem>>, vector<4x16xf32>,
    %856 = vector.extract_strided_slice %853 {offsets = [0, 1], sizes = [4, 16], strides = [1, 1]} : vector<4x20xf32> to vector<4x16xf32>
    %c64_896 = arith.constant 64 : index
    %c208_897 = arith.constant 208 : index
    %857 = vector.load %arg8[%c64_896, %c208_897] : memref<100x256xf32, #tpu.memory_space<vmem>>, vector<4x16xf32>
    tpu.vector_store %arg8[%c64_896, %c208_897], %856 {strides = array<i32>} : memref<100x256xf32, #tpu.memory_space<vmem>>, vector<4x16xf32>,
    %858 = vector.extract_strided_slice %853 {offsets = [0, 2], sizes = [4, 16], strides = [1, 1]} : vector<4x20xf32> to vector<4x16xf32>
    %c68_898 = arith.constant 68 : index
    %c208_899 = arith.constant 208 : index
    %859 = vector.load %arg8[%c68_898, %c208_899] : memref<100x256xf32, #tpu.memory_space<vmem>>, vector<4x16xf32>
    tpu.vector_store %arg8[%c68_898, %c208_899], %858 {strides = array<i32>} : memref<100x256xf32, #tpu.memory_space<vmem>>, vector<4x16xf32>,
    %860 = vector.extract_strided_slice %853 {offsets = [0, 3], sizes = [4, 16], strides = [1, 1]} : vector<4x20xf32> to vector<4x16xf32>
    %c72_900 = arith.constant 72 : index
    %c208_901 = arith.constant 208 : index
    %861 = vector.load %arg8[%c72_900, %c208_901] : memref<100x256xf32, #tpu.memory_space<vmem>>, vector<4x16xf32>
    tpu.vector_store %arg8[%c72_900, %c208_901], %860 {strides = array<i32>} : memref<100x256xf32, #tpu.memory_space<vmem>>, vector<4x16xf32>,
    %862 = vector.extract_strided_slice %853 {offsets = [0, 4], sizes = [4, 16], strides = [1, 1]} : vector<4x20xf32> to vector<4x16xf32>
    %c76_902 = arith.constant 76 : index
    %c208_903 = arith.constant 208 : index
    %863 = vector.load %arg8[%c76_902, %c208_903] : memref<100x256xf32, #tpu.memory_space<vmem>>, vector<4x16xf32>
    tpu.vector_store %arg8[%c76_902, %c208_903], %862 {strides = array<i32>} : memref<100x256xf32, #tpu.memory_space<vmem>>, vector<4x16xf32>,
    %c0_904 = arith.constant 0 : index
    %c17 = arith.constant 17 : index
    %c0_905 = arith.constant 0 : index
    %864 = vector.load %arg7[%c0_904, %c17, %c0_905] : memref<4x20x20xf32, #tpu.memory_space<vmem>>, vector<4x1x20xf32>
    %865 = vector.shape_cast %864 : vector<4x1x20xf32> to vector<4x20xf32>
    %866 = vector.extract_strided_slice %865 {offsets = [0, 0], sizes = [4, 16], strides = [1, 1]} : vector<4x20xf32> to vector<4x16xf32>
    %c80_906 = arith.constant 80 : index
    %c208_907 = arith.constant 208 : index
    %867 = vector.load %arg8[%c80_906, %c208_907] : memref<100x256xf32, #tpu.memory_space<vmem>>, vector<4x16xf32>
    tpu.vector_store %arg8[%c80_906, %c208_907], %866 {strides = array<i32>} : memref<100x256xf32, #tpu.memory_space<vmem>>, vector<4x16xf32>,
    %868 = vector.extract_strided_slice %865 {offsets = [0, 1], sizes = [4, 16], strides = [1, 1]} : vector<4x20xf32> to vector<4x16xf32>
    %c84_908 = arith.constant 84 : index
    %c208_909 = arith.constant 208 : index
    %869 = vector.load %arg8[%c84_908, %c208_909] : memref<100x256xf32, #tpu.memory_space<vmem>>, vector<4x16xf32>
    tpu.vector_store %arg8[%c84_908, %c208_909], %868 {strides = array<i32>} : memref<100x256xf32, #tpu.memory_space<vmem>>, vector<4x16xf32>,
    %870 = vector.extract_strided_slice %865 {offsets = [0, 2], sizes = [4, 16], strides = [1, 1]} : vector<4x20xf32> to vector<4x16xf32>
    %c88_910 = arith.constant 88 : index
    %c208_911 = arith.constant 208 : index
    %871 = vector.load %arg8[%c88_910, %c208_911] : memref<100x256xf32, #tpu.memory_space<vmem>>, vector<4x16xf32>
    tpu.vector_store %arg8[%c88_910, %c208_911], %870 {strides = array<i32>} : memref<100x256xf32, #tpu.memory_space<vmem>>, vector<4x16xf32>,
    %872 = vector.extract_strided_slice %865 {offsets = [0, 3], sizes = [4, 16], strides = [1, 1]} : vector<4x20xf32> to vector<4x16xf32>
    %c92_912 = arith.constant 92 : index
    %c208_913 = arith.constant 208 : index
    %873 = vector.load %arg8[%c92_912, %c208_913] : memref<100x256xf32, #tpu.memory_space<vmem>>, vector<4x16xf32>
    tpu.vector_store %arg8[%c92_912, %c208_913], %872 {strides = array<i32>} : memref<100x256xf32, #tpu.memory_space<vmem>>, vector<4x16xf32>,
    %874 = vector.extract_strided_slice %865 {offsets = [0, 4], sizes = [4, 16], strides = [1, 1]} : vector<4x20xf32> to vector<4x16xf32>
    %c96_914 = arith.constant 96 : index
    %c208_915 = arith.constant 208 : index
    %875 = vector.load %arg8[%c96_914, %c208_915] : memref<100x256xf32, #tpu.memory_space<vmem>>, vector<4x16xf32>
    tpu.vector_store %arg8[%c96_914, %c208_915], %874 {strides = array<i32>} : memref<100x256xf32, #tpu.memory_space<vmem>>, vector<4x16xf32>,
    %c0_916 = arith.constant 0 : index
    %c14_917 = arith.constant 14 : index
    %c0_918 = arith.constant 0 : index
    %876 = vector.load %arg7[%c0_916, %c14_917, %c0_918] : memref<4x20x20xf32, #tpu.memory_space<vmem>>, vector<4x1x20xf32>
    %877 = vector.shape_cast %876 : vector<4x1x20xf32> to vector<4x20xf32>
    %878 = vector.extract_strided_slice %877 {offsets = [0, 0], sizes = [4, 16], strides = [1, 1]} : vector<4x20xf32> to vector<4x16xf32>
    %c0_919 = arith.constant 0 : index
    %c224 = arith.constant 224 : index
    %879 = vector.load %arg8[%c0_919, %c224] : memref<100x256xf32, #tpu.memory_space<vmem>>, vector<4x16xf32>
    tpu.vector_store %arg8[%c0_919, %c224], %878 {strides = array<i32>} : memref<100x256xf32, #tpu.memory_space<vmem>>, vector<4x16xf32>,
    %880 = vector.extract_strided_slice %877 {offsets = [0, 1], sizes = [4, 16], strides = [1, 1]} : vector<4x20xf32> to vector<4x16xf32>
    %c4_920 = arith.constant 4 : index
    %c224_921 = arith.constant 224 : index
    %881 = vector.load %arg8[%c4_920, %c224_921] : memref<100x256xf32, #tpu.memory_space<vmem>>, vector<4x16xf32>
    tpu.vector_store %arg8[%c4_920, %c224_921], %880 {strides = array<i32>} : memref<100x256xf32, #tpu.memory_space<vmem>>, vector<4x16xf32>,
    %882 = vector.extract_strided_slice %877 {offsets = [0, 2], sizes = [4, 16], strides = [1, 1]} : vector<4x20xf32> to vector<4x16xf32>
    %c8_922 = arith.constant 8 : index
    %c224_923 = arith.constant 224 : index
    %883 = vector.load %arg8[%c8_922, %c224_923] : memref<100x256xf32, #tpu.memory_space<vmem>>, vector<4x16xf32>
    tpu.vector_store %arg8[%c8_922, %c224_923], %882 {strides = array<i32>} : memref<100x256xf32, #tpu.memory_space<vmem>>, vector<4x16xf32>,
    %884 = vector.extract_strided_slice %877 {offsets = [0, 3], sizes = [4, 16], strides = [1, 1]} : vector<4x20xf32> to vector<4x16xf32>
    %c12_924 = arith.constant 12 : index
    %c224_925 = arith.constant 224 : index
    %885 = vector.load %arg8[%c12_924, %c224_925] : memref<100x256xf32, #tpu.memory_space<vmem>>, vector<4x16xf32>
    tpu.vector_store %arg8[%c12_924, %c224_925], %884 {strides = array<i32>} : memref<100x256xf32, #tpu.memory_space<vmem>>, vector<4x16xf32>,
    %886 = vector.extract_strided_slice %877 {offsets = [0, 4], sizes = [4, 16], strides = [1, 1]} : vector<4x20xf32> to vector<4x16xf32>
    %c16_926 = arith.constant 16 : index
    %c224_927 = arith.constant 224 : index
    %887 = vector.load %arg8[%c16_926, %c224_927] : memref<100x256xf32, #tpu.memory_space<vmem>>, vector<4x16xf32>
    tpu.vector_store %arg8[%c16_926, %c224_927], %886 {strides = array<i32>} : memref<100x256xf32, #tpu.memory_space<vmem>>, vector<4x16xf32>,
    %c0_928 = arith.constant 0 : index
    %c15_929 = arith.constant 15 : index
    %c0_930 = arith.constant 0 : index
    %888 = vector.load %arg7[%c0_928, %c15_929, %c0_930] : memref<4x20x20xf32, #tpu.memory_space<vmem>>, vector<4x1x20xf32>
    %889 = vector.shape_cast %888 : vector<4x1x20xf32> to vector<4x20xf32>
    %890 = vector.extract_strided_slice %889 {offsets = [0, 0], sizes = [4, 16], strides = [1, 1]} : vector<4x20xf32> to vector<4x16xf32>
    %c20_931 = arith.constant 20 : index
    %c224_932 = arith.constant 224 : index
    %891 = vector.load %arg8[%c20_931, %c224_932] : memref<100x256xf32, #tpu.memory_space<vmem>>, vector<4x16xf32>
    tpu.vector_store %arg8[%c20_931, %c224_932], %890 {strides = array<i32>} : memref<100x256xf32, #tpu.memory_space<vmem>>, vector<4x16xf32>,
    %892 = vector.extract_strided_slice %889 {offsets = [0, 1], sizes = [4, 16], strides = [1, 1]} : vector<4x20xf32> to vector<4x16xf32>
    %c24_933 = arith.constant 24 : index
    %c224_934 = arith.constant 224 : index
    %893 = vector.load %arg8[%c24_933, %c224_934] : memref<100x256xf32, #tpu.memory_space<vmem>>, vector<4x16xf32>
    tpu.vector_store %arg8[%c24_933, %c224_934], %892 {strides = array<i32>} : memref<100x256xf32, #tpu.memory_space<vmem>>, vector<4x16xf32>,
    %894 = vector.extract_strided_slice %889 {offsets = [0, 2], sizes = [4, 16], strides = [1, 1]} : vector<4x20xf32> to vector<4x16xf32>
    %c28_935 = arith.constant 28 : index
    %c224_936 = arith.constant 224 : index
    %895 = vector.load %arg8[%c28_935, %c224_936] : memref<100x256xf32, #tpu.memory_space<vmem>>, vector<4x16xf32>
    tpu.vector_store %arg8[%c28_935, %c224_936], %894 {strides = array<i32>} : memref<100x256xf32, #tpu.memory_space<vmem>>, vector<4x16xf32>,
    %896 = vector.extract_strided_slice %889 {offsets = [0, 3], sizes = [4, 16], strides = [1, 1]} : vector<4x20xf32> to vector<4x16xf32>
    %c32_937 = arith.constant 32 : index
    %c224_938 = arith.constant 224 : index
    %897 = vector.load %arg8[%c32_937, %c224_938] : memref<100x256xf32, #tpu.memory_space<vmem>>, vector<4x16xf32>
    tpu.vector_store %arg8[%c32_937, %c224_938], %896 {strides = array<i32>} : memref<100x256xf32, #tpu.memory_space<vmem>>, vector<4x16xf32>,
    %898 = vector.extract_strided_slice %889 {offsets = [0, 4], sizes = [4, 16], strides = [1, 1]} : vector<4x20xf32> to vector<4x16xf32>
    %c36_939 = arith.constant 36 : index
    %c224_940 = arith.constant 224 : index
    %899 = vector.load %arg8[%c36_939, %c224_940] : memref<100x256xf32, #tpu.memory_space<vmem>>, vector<4x16xf32>
    tpu.vector_store %arg8[%c36_939, %c224_940], %898 {strides = array<i32>} : memref<100x256xf32, #tpu.memory_space<vmem>>, vector<4x16xf32>,
    %c0_941 = arith.constant 0 : index
    %c16_942 = arith.constant 16 : index
    %c0_943 = arith.constant 0 : index
    %900 = vector.load %arg7[%c0_941, %c16_942, %c0_943] : memref<4x20x20xf32, #tpu.memory_space<vmem>>, vector<4x1x20xf32>
    %901 = vector.shape_cast %900 : vector<4x1x20xf32> to vector<4x20xf32>
    %902 = vector.extract_strided_slice %901 {offsets = [0, 0], sizes = [4, 16], strides = [1, 1]} : vector<4x20xf32> to vector<4x16xf32>
    %c40_944 = arith.constant 40 : index
    %c224_945 = arith.constant 224 : index
    %903 = vector.load %arg8[%c40_944, %c224_945] : memref<100x256xf32, #tpu.memory_space<vmem>>, vector<4x16xf32>
    tpu.vector_store %arg8[%c40_944, %c224_945], %902 {strides = array<i32>} : memref<100x256xf32, #tpu.memory_space<vmem>>, vector<4x16xf32>,
    %904 = vector.extract_strided_slice %901 {offsets = [0, 1], sizes = [4, 16], strides = [1, 1]} : vector<4x20xf32> to vector<4x16xf32>
    %c44_946 = arith.constant 44 : index
    %c224_947 = arith.constant 224 : index
    %905 = vector.load %arg8[%c44_946, %c224_947] : memref<100x256xf32, #tpu.memory_space<vmem>>, vector<4x16xf32>
    tpu.vector_store %arg8[%c44_946, %c224_947], %904 {strides = array<i32>} : memref<100x256xf32, #tpu.memory_space<vmem>>, vector<4x16xf32>,
    %906 = vector.extract_strided_slice %901 {offsets = [0, 2], sizes = [4, 16], strides = [1, 1]} : vector<4x20xf32> to vector<4x16xf32>
    %c48_948 = arith.constant 48 : index
    %c224_949 = arith.constant 224 : index
    %907 = vector.load %arg8[%c48_948, %c224_949] : memref<100x256xf32, #tpu.memory_space<vmem>>, vector<4x16xf32>
    tpu.vector_store %arg8[%c48_948, %c224_949], %906 {strides = array<i32>} : memref<100x256xf32, #tpu.memory_space<vmem>>, vector<4x16xf32>,
    %908 = vector.extract_strided_slice %901 {offsets = [0, 3], sizes = [4, 16], strides = [1, 1]} : vector<4x20xf32> to vector<4x16xf32>
    %c52_950 = arith.constant 52 : index
    %c224_951 = arith.constant 224 : index
    %909 = vector.load %arg8[%c52_950, %c224_951] : memref<100x256xf32, #tpu.memory_space<vmem>>, vector<4x16xf32>
    tpu.vector_store %arg8[%c52_950, %c224_951], %908 {strides = array<i32>} : memref<100x256xf32, #tpu.memory_space<vmem>>, vector<4x16xf32>,
    %910 = vector.extract_strided_slice %901 {offsets = [0, 4], sizes = [4, 16], strides = [1, 1]} : vector<4x20xf32> to vector<4x16xf32>
    %c56_952 = arith.constant 56 : index
    %c224_953 = arith.constant 224 : index
    %911 = vector.load %arg8[%c56_952, %c224_953] : memref<100x256xf32, #tpu.memory_space<vmem>>, vector<4x16xf32>
    tpu.vector_store %arg8[%c56_952, %c224_953], %910 {strides = array<i32>} : memref<100x256xf32, #tpu.memory_space<vmem>>, vector<4x16xf32>,
    %c0_954 = arith.constant 0 : index
    %c17_955 = arith.constant 17 : index
    %c0_956 = arith.constant 0 : index
    %912 = vector.load %arg7[%c0_954, %c17_955, %c0_956] : memref<4x20x20xf32, #tpu.memory_space<vmem>>, vector<4x1x20xf32>
    %913 = vector.shape_cast %912 : vector<4x1x20xf32> to vector<4x20xf32>
    %914 = vector.extract_strided_slice %913 {offsets = [0, 0], sizes = [4, 16], strides = [1, 1]} : vector<4x20xf32> to vector<4x16xf32>
    %c60_957 = arith.constant 60 : index
    %c224_958 = arith.constant 224 : index
    %915 = vector.load %arg8[%c60_957, %c224_958] : memref<100x256xf32, #tpu.memory_space<vmem>>, vector<4x16xf32>
    tpu.vector_store %arg8[%c60_957, %c224_958], %914 {strides = array<i32>} : memref<100x256xf32, #tpu.memory_space<vmem>>, vector<4x16xf32>,
    %916 = vector.extract_strided_slice %913 {offsets = [0, 1], sizes = [4, 16], strides = [1, 1]} : vector<4x20xf32> to vector<4x16xf32>
    %c64_959 = arith.constant 64 : index
    %c224_960 = arith.constant 224 : index
    %917 = vector.load %arg8[%c64_959, %c224_960] : memref<100x256xf32, #tpu.memory_space<vmem>>, vector<4x16xf32>
    tpu.vector_store %arg8[%c64_959, %c224_960], %916 {strides = array<i32>} : memref<100x256xf32, #tpu.memory_space<vmem>>, vector<4x16xf32>,
    %918 = vector.extract_strided_slice %913 {offsets = [0, 2], sizes = [4, 16], strides = [1, 1]} : vector<4x20xf32> to vector<4x16xf32>
    %c68_961 = arith.constant 68 : index
    %c224_962 = arith.constant 224 : index
    %919 = vector.load %arg8[%c68_961, %c224_962] : memref<100x256xf32, #tpu.memory_space<vmem>>, vector<4x16xf32>
    tpu.vector_store %arg8[%c68_961, %c224_962], %918 {strides = array<i32>} : memref<100x256xf32, #tpu.memory_space<vmem>>, vector<4x16xf32>,
    %920 = vector.extract_strided_slice %913 {offsets = [0, 3], sizes = [4, 16], strides = [1, 1]} : vector<4x20xf32> to vector<4x16xf32>
    %c72_963 = arith.constant 72 : index
    %c224_964 = arith.constant 224 : index
    %921 = vector.load %arg8[%c72_963, %c224_964] : memref<100x256xf32, #tpu.memory_space<vmem>>, vector<4x16xf32>
    tpu.vector_store %arg8[%c72_963, %c224_964], %920 {strides = array<i32>} : memref<100x256xf32, #tpu.memory_space<vmem>>, vector<4x16xf32>,
    %922 = vector.extract_strided_slice %913 {offsets = [0, 4], sizes = [4, 16], strides = [1, 1]} : vector<4x20xf32> to vector<4x16xf32>
    %c76_965 = arith.constant 76 : index
    %c224_966 = arith.constant 224 : index
    %923 = vector.load %arg8[%c76_965, %c224_966] : memref<100x256xf32, #tpu.memory_space<vmem>>, vector<4x16xf32>
    tpu.vector_store %arg8[%c76_965, %c224_966], %922 {strides = array<i32>} : memref<100x256xf32, #tpu.memory_space<vmem>>, vector<4x16xf32>,
    %c0_967 = arith.constant 0 : index
    %c18 = arith.constant 18 : index
    %c0_968 = arith.constant 0 : index
    %924 = vector.load %arg7[%c0_967, %c18, %c0_968] : memref<4x20x20xf32, #tpu.memory_space<vmem>>, vector<4x1x20xf32>
    %925 = vector.shape_cast %924 : vector<4x1x20xf32> to vector<4x20xf32>
    %926 = vector.extract_strided_slice %925 {offsets = [0, 0], sizes = [4, 16], strides = [1, 1]} : vector<4x20xf32> to vector<4x16xf32>
    %c80_969 = arith.constant 80 : index
    %c224_970 = arith.constant 224 : index
    %927 = vector.load %arg8[%c80_969, %c224_970] : memref<100x256xf32, #tpu.memory_space<vmem>>, vector<4x16xf32>
    tpu.vector_store %arg8[%c80_969, %c224_970], %926 {strides = array<i32>} : memref<100x256xf32, #tpu.memory_space<vmem>>, vector<4x16xf32>,
    %928 = vector.extract_strided_slice %925 {offsets = [0, 1], sizes = [4, 16], strides = [1, 1]} : vector<4x20xf32> to vector<4x16xf32>
    %c84_971 = arith.constant 84 : index
    %c224_972 = arith.constant 224 : index
    %929 = vector.load %arg8[%c84_971, %c224_972] : memref<100x256xf32, #tpu.memory_space<vmem>>, vector<4x16xf32>
    tpu.vector_store %arg8[%c84_971, %c224_972], %928 {strides = array<i32>} : memref<100x256xf32, #tpu.memory_space<vmem>>, vector<4x16xf32>,
    %930 = vector.extract_strided_slice %925 {offsets = [0, 2], sizes = [4, 16], strides = [1, 1]} : vector<4x20xf32> to vector<4x16xf32>
    %c88_973 = arith.constant 88 : index
    %c224_974 = arith.constant 224 : index
    %931 = vector.load %arg8[%c88_973, %c224_974] : memref<100x256xf32, #tpu.memory_space<vmem>>, vector<4x16xf32>
    tpu.vector_store %arg8[%c88_973, %c224_974], %930 {strides = array<i32>} : memref<100x256xf32, #tpu.memory_space<vmem>>, vector<4x16xf32>,
    %932 = vector.extract_strided_slice %925 {offsets = [0, 3], sizes = [4, 16], strides = [1, 1]} : vector<4x20xf32> to vector<4x16xf32>
    %c92_975 = arith.constant 92 : index
    %c224_976 = arith.constant 224 : index
    %933 = vector.load %arg8[%c92_975, %c224_976] : memref<100x256xf32, #tpu.memory_space<vmem>>, vector<4x16xf32>
    tpu.vector_store %arg8[%c92_975, %c224_976], %932 {strides = array<i32>} : memref<100x256xf32, #tpu.memory_space<vmem>>, vector<4x16xf32>,
    %934 = vector.extract_strided_slice %925 {offsets = [0, 4], sizes = [4, 16], strides = [1, 1]} : vector<4x20xf32> to vector<4x16xf32>
    %c96_977 = arith.constant 96 : index
    %c224_978 = arith.constant 224 : index
    %935 = vector.load %arg8[%c96_977, %c224_978] : memref<100x256xf32, #tpu.memory_space<vmem>>, vector<4x16xf32>
    tpu.vector_store %arg8[%c96_977, %c224_978], %934 {strides = array<i32>} : memref<100x256xf32, #tpu.memory_space<vmem>>, vector<4x16xf32>,
    %c0_979 = arith.constant 0 : index
    %c15_980 = arith.constant 15 : index
    %c0_981 = arith.constant 0 : index
    %936 = vector.load %arg7[%c0_979, %c15_980, %c0_981] : memref<4x20x20xf32, #tpu.memory_space<vmem>>, vector<4x1x20xf32>
    %937 = vector.shape_cast %936 : vector<4x1x20xf32> to vector<4x20xf32>
    %938 = vector.extract_strided_slice %937 {offsets = [0, 0], sizes = [4, 16], strides = [1, 1]} : vector<4x20xf32> to vector<4x16xf32>
    %c0_982 = arith.constant 0 : index
    %c240 = arith.constant 240 : index
    %939 = vector.load %arg8[%c0_982, %c240] : memref<100x256xf32, #tpu.memory_space<vmem>>, vector<4x16xf32>
    tpu.vector_store %arg8[%c0_982, %c240], %938 {strides = array<i32>} : memref<100x256xf32, #tpu.memory_space<vmem>>, vector<4x16xf32>,
    %940 = vector.extract_strided_slice %937 {offsets = [0, 1], sizes = [4, 16], strides = [1, 1]} : vector<4x20xf32> to vector<4x16xf32>
    %c4_983 = arith.constant 4 : index
    %c240_984 = arith.constant 240 : index
    %941 = vector.load %arg8[%c4_983, %c240_984] : memref<100x256xf32, #tpu.memory_space<vmem>>, vector<4x16xf32>
    tpu.vector_store %arg8[%c4_983, %c240_984], %940 {strides = array<i32>} : memref<100x256xf32, #tpu.memory_space<vmem>>, vector<4x16xf32>,
    %942 = vector.extract_strided_slice %937 {offsets = [0, 2], sizes = [4, 16], strides = [1, 1]} : vector<4x20xf32> to vector<4x16xf32>
    %c8_985 = arith.constant 8 : index
    %c240_986 = arith.constant 240 : index
    %943 = vector.load %arg8[%c8_985, %c240_986] : memref<100x256xf32, #tpu.memory_space<vmem>>, vector<4x16xf32>
    tpu.vector_store %arg8[%c8_985, %c240_986], %942 {strides = array<i32>} : memref<100x256xf32, #tpu.memory_space<vmem>>, vector<4x16xf32>,
    %944 = vector.extract_strided_slice %937 {offsets = [0, 3], sizes = [4, 16], strides = [1, 1]} : vector<4x20xf32> to vector<4x16xf32>
    %c12_987 = arith.constant 12 : index
    %c240_988 = arith.constant 240 : index
    %945 = vector.load %arg8[%c12_987, %c240_988] : memref<100x256xf32, #tpu.memory_space<vmem>>, vector<4x16xf32>
    tpu.vector_store %arg8[%c12_987, %c240_988], %944 {strides = array<i32>} : memref<100x256xf32, #tpu.memory_space<vmem>>, vector<4x16xf32>,
    %946 = vector.extract_strided_slice %937 {offsets = [0, 4], sizes = [4, 16], strides = [1, 1]} : vector<4x20xf32> to vector<4x16xf32>
    %c16_989 = arith.constant 16 : index
    %c240_990 = arith.constant 240 : index
    %947 = vector.load %arg8[%c16_989, %c240_990] : memref<100x256xf32, #tpu.memory_space<vmem>>, vector<4x16xf32>
    tpu.vector_store %arg8[%c16_989, %c240_990], %946 {strides = array<i32>} : memref<100x256xf32, #tpu.memory_space<vmem>>, vector<4x16xf32>,
    %c0_991 = arith.constant 0 : index
    %c16_992 = arith.constant 16 : index
    %c0_993 = arith.constant 0 : index
    %948 = vector.load %arg7[%c0_991, %c16_992, %c0_993] : memref<4x20x20xf32, #tpu.memory_space<vmem>>, vector<4x1x20xf32>
    %949 = vector.shape_cast %948 : vector<4x1x20xf32> to vector<4x20xf32>
    %950 = vector.extract_strided_slice %949 {offsets = [0, 0], sizes = [4, 16], strides = [1, 1]} : vector<4x20xf32> to vector<4x16xf32>
    %c20_994 = arith.constant 20 : index
    %c240_995 = arith.constant 240 : index
    %951 = vector.load %arg8[%c20_994, %c240_995] : memref<100x256xf32, #tpu.memory_space<vmem>>, vector<4x16xf32>
    tpu.vector_store %arg8[%c20_994, %c240_995], %950 {strides = array<i32>} : memref<100x256xf32, #tpu.memory_space<vmem>>, vector<4x16xf32>,
    %952 = vector.extract_strided_slice %949 {offsets = [0, 1], sizes = [4, 16], strides = [1, 1]} : vector<4x20xf32> to vector<4x16xf32>
    %c24_996 = arith.constant 24 : index
    %c240_997 = arith.constant 240 : index
    %953 = vector.load %arg8[%c24_996, %c240_997] : memref<100x256xf32, #tpu.memory_space<vmem>>, vector<4x16xf32>
    tpu.vector_store %arg8[%c24_996, %c240_997], %952 {strides = array<i32>} : memref<100x256xf32, #tpu.memory_space<vmem>>, vector<4x16xf32>,
    %954 = vector.extract_strided_slice %949 {offsets = [0, 2], sizes = [4, 16], strides = [1, 1]} : vector<4x20xf32> to vector<4x16xf32>
    %c28_998 = arith.constant 28 : index
    %c240_999 = arith.constant 240 : index
    %955 = vector.load %arg8[%c28_998, %c240_999] : memref<100x256xf32, #tpu.memory_space<vmem>>, vector<4x16xf32>
    tpu.vector_store %arg8[%c28_998, %c240_999], %954 {strides = array<i32>} : memref<100x256xf32, #tpu.memory_space<vmem>>, vector<4x16xf32>,
    %956 = vector.extract_strided_slice %949 {offsets = [0, 3], sizes = [4, 16], strides = [1, 1]} : vector<4x20xf32> to vector<4x16xf32>
    %c32_1000 = arith.constant 32 : index
    %c240_1001 = arith.constant 240 : index
    %957 = vector.load %arg8[%c32_1000, %c240_1001] : memref<100x256xf32, #tpu.memory_space<vmem>>, vector<4x16xf32>
    tpu.vector_store %arg8[%c32_1000, %c240_1001], %956 {strides = array<i32>} : memref<100x256xf32, #tpu.memory_space<vmem>>, vector<4x16xf32>,
    %958 = vector.extract_strided_slice %949 {offsets = [0, 4], sizes = [4, 16], strides = [1, 1]} : vector<4x20xf32> to vector<4x16xf32>
    %c36_1002 = arith.constant 36 : index
    %c240_1003 = arith.constant 240 : index
    %959 = vector.load %arg8[%c36_1002, %c240_1003] : memref<100x256xf32, #tpu.memory_space<vmem>>, vector<4x16xf32>
    tpu.vector_store %arg8[%c36_1002, %c240_1003], %958 {strides = array<i32>} : memref<100x256xf32, #tpu.memory_space<vmem>>, vector<4x16xf32>,
    %c0_1004 = arith.constant 0 : index
    %c17_1005 = arith.constant 17 : index
    %c0_1006 = arith.constant 0 : index
    %960 = vector.load %arg7[%c0_1004, %c17_1005, %c0_1006] : memref<4x20x20xf32, #tpu.memory_space<vmem>>, vector<4x1x20xf32>
    %961 = vector.shape_cast %960 : vector<4x1x20xf32> to vector<4x20xf32>
    %962 = vector.extract_strided_slice %961 {offsets = [0, 0], sizes = [4, 16], strides = [1, 1]} : vector<4x20xf32> to vector<4x16xf32>
    %c40_1007 = arith.constant 40 : index
    %c240_1008 = arith.constant 240 : index
    %963 = vector.load %arg8[%c40_1007, %c240_1008] : memref<100x256xf32, #tpu.memory_space<vmem>>, vector<4x16xf32>
    tpu.vector_store %arg8[%c40_1007, %c240_1008], %962 {strides = array<i32>} : memref<100x256xf32, #tpu.memory_space<vmem>>, vector<4x16xf32>,
    %964 = vector.extract_strided_slice %961 {offsets = [0, 1], sizes = [4, 16], strides = [1, 1]} : vector<4x20xf32> to vector<4x16xf32>
    %c44_1009 = arith.constant 44 : index
    %c240_1010 = arith.constant 240 : index
    %965 = vector.load %arg8[%c44_1009, %c240_1010] : memref<100x256xf32, #tpu.memory_space<vmem>>, vector<4x16xf32>
    tpu.vector_store %arg8[%c44_1009, %c240_1010], %964 {strides = array<i32>} : memref<100x256xf32, #tpu.memory_space<vmem>>, vector<4x16xf32>,
    %966 = vector.extract_strided_slice %961 {offsets = [0, 2], sizes = [4, 16], strides = [1, 1]} : vector<4x20xf32> to vector<4x16xf32>
    %c48_1011 = arith.constant 48 : index
    %c240_1012 = arith.constant 240 : index
    %967 = vector.load %arg8[%c48_1011, %c240_1012] : memref<100x256xf32, #tpu.memory_space<vmem>>, vector<4x16xf32>
    tpu.vector_store %arg8[%c48_1011, %c240_1012], %966 {strides = array<i32>} : memref<100x256xf32, #tpu.memory_space<vmem>>, vector<4x16xf32>,
    %968 = vector.extract_strided_slice %961 {offsets = [0, 3], sizes = [4, 16], strides = [1, 1]} : vector<4x20xf32> to vector<4x16xf32>
    %c52_1013 = arith.constant 52 : index
    %c240_1014 = arith.constant 240 : index
    %969 = vector.load %arg8[%c52_1013, %c240_1014] : memref<100x256xf32, #tpu.memory_space<vmem>>, vector<4x16xf32>
    tpu.vector_store %arg8[%c52_1013, %c240_1014], %968 {strides = array<i32>} : memref<100x256xf32, #tpu.memory_space<vmem>>, vector<4x16xf32>,
    %970 = vector.extract_strided_slice %961 {offsets = [0, 4], sizes = [4, 16], strides = [1, 1]} : vector<4x20xf32> to vector<4x16xf32>
    %c56_1015 = arith.constant 56 : index
    %c240_1016 = arith.constant 240 : index
    %971 = vector.load %arg8[%c56_1015, %c240_1016] : memref<100x256xf32, #tpu.memory_space<vmem>>, vector<4x16xf32>
    tpu.vector_store %arg8[%c56_1015, %c240_1016], %970 {strides = array<i32>} : memref<100x256xf32, #tpu.memory_space<vmem>>, vector<4x16xf32>,
    %c0_1017 = arith.constant 0 : index
    %c18_1018 = arith.constant 18 : index
    %c0_1019 = arith.constant 0 : index
    %972 = vector.load %arg7[%c0_1017, %c18_1018, %c0_1019] : memref<4x20x20xf32, #tpu.memory_space<vmem>>, vector<4x1x20xf32>
    %973 = vector.shape_cast %972 : vector<4x1x20xf32> to vector<4x20xf32>
    %974 = vector.extract_strided_slice %973 {offsets = [0, 0], sizes = [4, 16], strides = [1, 1]} : vector<4x20xf32> to vector<4x16xf32>
    %c60_1020 = arith.constant 60 : index
    %c240_1021 = arith.constant 240 : index
    %975 = vector.load %arg8[%c60_1020, %c240_1021] : memref<100x256xf32, #tpu.memory_space<vmem>>, vector<4x16xf32>
    tpu.vector_store %arg8[%c60_1020, %c240_1021], %974 {strides = array<i32>} : memref<100x256xf32, #tpu.memory_space<vmem>>, vector<4x16xf32>,
    %976 = vector.extract_strided_slice %973 {offsets = [0, 1], sizes = [4, 16], strides = [1, 1]} : vector<4x20xf32> to vector<4x16xf32>
    %c64_1022 = arith.constant 64 : index
    %c240_1023 = arith.constant 240 : index
    %977 = vector.load %arg8[%c64_1022, %c240_1023] : memref<100x256xf32, #tpu.memory_space<vmem>>, vector<4x16xf32>
    tpu.vector_store %arg8[%c64_1022, %c240_1023], %976 {strides = array<i32>} : memref<100x256xf32, #tpu.memory_space<vmem>>, vector<4x16xf32>,
    %978 = vector.extract_strided_slice %973 {offsets = [0, 2], sizes = [4, 16], strides = [1, 1]} : vector<4x20xf32> to vector<4x16xf32>
    %c68_1024 = arith.constant 68 : index
    %c240_1025 = arith.constant 240 : index
    %979 = vector.load %arg8[%c68_1024, %c240_1025] : memref<100x256xf32, #tpu.memory_space<vmem>>, vector<4x16xf32>
    tpu.vector_store %arg8[%c68_1024, %c240_1025], %978 {strides = array<i32>} : memref<100x256xf32, #tpu.memory_space<vmem>>, vector<4x16xf32>,
    %980 = vector.extract_strided_slice %973 {offsets = [0, 3], sizes = [4, 16], strides = [1, 1]} : vector<4x20xf32> to vector<4x16xf32>
    %c72_1026 = arith.constant 72 : index
    %c240_1027 = arith.constant 240 : index
    %981 = vector.load %arg8[%c72_1026, %c240_1027] : memref<100x256xf32, #tpu.memory_space<vmem>>, vector<4x16xf32>
    tpu.vector_store %arg8[%c72_1026, %c240_1027], %980 {strides = array<i32>} : memref<100x256xf32, #tpu.memory_space<vmem>>, vector<4x16xf32>,
    %982 = vector.extract_strided_slice %973 {offsets = [0, 4], sizes = [4, 16], strides = [1, 1]} : vector<4x20xf32> to vector<4x16xf32>
    %c76_1028 = arith.constant 76 : index
    %c240_1029 = arith.constant 240 : index
    %983 = vector.load %arg8[%c76_1028, %c240_1029] : memref<100x256xf32, #tpu.memory_space<vmem>>, vector<4x16xf32>
    tpu.vector_store %arg8[%c76_1028, %c240_1029], %982 {strides = array<i32>} : memref<100x256xf32, #tpu.memory_space<vmem>>, vector<4x16xf32>,
    %c0_1030 = arith.constant 0 : index
    %c19 = arith.constant 19 : index
    %c0_1031 = arith.constant 0 : index
    %984 = vector.load %arg7[%c0_1030, %c19, %c0_1031] : memref<4x20x20xf32, #tpu.memory_space<vmem>>, vector<4x1x20xf32>
    %985 = vector.shape_cast %984 : vector<4x1x20xf32> to vector<4x20xf32>
    %986 = vector.extract_strided_slice %985 {offsets = [0, 0], sizes = [4, 16], strides = [1, 1]} : vector<4x20xf32> to vector<4x16xf32>
    %c80_1032 = arith.constant 80 : index
    %c240_1033 = arith.constant 240 : index
    %987 = vector.load %arg8[%c80_1032, %c240_1033] : memref<100x256xf32, #tpu.memory_space<vmem>>, vector<4x16xf32>
    tpu.vector_store %arg8[%c80_1032, %c240_1033], %986 {strides = array<i32>} : memref<100x256xf32, #tpu.memory_space<vmem>>, vector<4x16xf32>,
    %988 = vector.extract_strided_slice %985 {offsets = [0, 1], sizes = [4, 16], strides = [1, 1]} : vector<4x20xf32> to vector<4x16xf32>
    %c84_1034 = arith.constant 84 : index
    %c240_1035 = arith.constant 240 : index
    %989 = vector.load %arg8[%c84_1034, %c240_1035] : memref<100x256xf32, #tpu.memory_space<vmem>>, vector<4x16xf32>
    tpu.vector_store %arg8[%c84_1034, %c240_1035], %988 {strides = array<i32>} : memref<100x256xf32, #tpu.memory_space<vmem>>, vector<4x16xf32>,
    %990 = vector.extract_strided_slice %985 {offsets = [0, 2], sizes = [4, 16], strides = [1, 1]} : vector<4x20xf32> to vector<4x16xf32>
    %c88_1036 = arith.constant 88 : index
    %c240_1037 = arith.constant 240 : index
    %991 = vector.load %arg8[%c88_1036, %c240_1037] : memref<100x256xf32, #tpu.memory_space<vmem>>, vector<4x16xf32>
    tpu.vector_store %arg8[%c88_1036, %c240_1037], %990 {strides = array<i32>} : memref<100x256xf32, #tpu.memory_space<vmem>>, vector<4x16xf32>,
    %992 = vector.extract_strided_slice %985 {offsets = [0, 3], sizes = [4, 16], strides = [1, 1]} : vector<4x20xf32> to vector<4x16xf32>
    %c92_1038 = arith.constant 92 : index
    %c240_1039 = arith.constant 240 : index
    %993 = vector.load %arg8[%c92_1038, %c240_1039] : memref<100x256xf32, #tpu.memory_space<vmem>>, vector<4x16xf32>
    tpu.vector_store %arg8[%c92_1038, %c240_1039], %992 {strides = array<i32>} : memref<100x256xf32, #tpu.memory_space<vmem>>, vector<4x16xf32>,
    %994 = vector.extract_strided_slice %985 {offsets = [0, 4], sizes = [4, 16], strides = [1, 1]} : vector<4x20xf32> to vector<4x16xf32>
    %c96_1040 = arith.constant 96 : index
    %c240_1041 = arith.constant 240 : index
    %995 = vector.load %arg8[%c96_1040, %c240_1041] : memref<100x256xf32, #tpu.memory_space<vmem>>, vector<4x16xf32>
    tpu.vector_store %arg8[%c96_1040, %c240_1041], %994 {strides = array<i32>} : memref<100x256xf32, #tpu.memory_space<vmem>>, vector<4x16xf32>,
    %c0_1042 = arith.constant 0 : index
    %c0_1043 = arith.constant 0 : index
    %996 = vector.load %arg4[%c0_1042, %c0_1043] : memref<4x100xf32, #tpu.memory_space<vmem>>, vector<4x100xf32>
    %c0_1044 = arith.constant 0 : index
    %c0_1045 = arith.constant 0 : index
    %997 = vector.load %arg8[%c0_1044, %c0_1045] : memref<100x256xf32, #tpu.memory_space<vmem>>, vector<100x256xf32>
    %cst_1046 = arith.constant dense<0.000000e+00> : vector<4x256xf32>
    %998 = tpu.matmul %996, %997, %cst_1046 {dimension_numbers = #tpu.dot_dimension_numbers<[1], [0], [0], [1], [0, 0, 1, 1], [], []>} : vector<4x100xf32>, vector<100x256xf32>, vector<4x256xf32> -> vector<4x256xf32>
    %c0_1047 = arith.constant 0 : index
    %c0_1048 = arith.constant 0 : index
    %999 = vector.load %arg5[%c0_1047, %c0_1048] : memref<4x1xf32, #tpu.memory_space<vmem>>, vector<4x1xf32>
    %1000 = vector.broadcast %999 : vector<4x1xf32> to vector<4x256xf32>
    %1001 = arith.addf %998, %1000 : vector<4x256xf32>
    %c0_1049 = arith.constant 0 : index
    %c0_1050 = arith.constant 0 : index
    %c0_1051 = arith.constant 0 : index
    %1002 = vector.load %arg6[%c0_1049, %c0_1050, %c0_1051] : memref<1x4x256xf32, #tpu.memory_space<vmem>>, vector<1x4x256xf32>
    %1003 = vector.shape_cast %1002 : vector<1x4x256xf32> to vector<4x256xf32>
    %1004 = vector.shape_cast %1001 : vector<4x256xf32> to vector<1x4x256xf32>
    tpu.vector_store %arg6[%c0_1049, %c0_1050, %c0_1051], %1004 {strides = array<i32>} : memref<1x4x256xf32, #tpu.memory_space<vmem>>, vector<1x4x256xf32>,
    return
  }
  func.func @transform_0(%arg0: i32) -> (i32, i32, i32, i32) {
    %c0_i32 = arith.constant 0 : i32
    %c0_i32_0 = arith.constant 0 : i32
    %c0_i32_1 = arith.constant 0 : i32
    %c0_i32_2 = arith.constant 0 : i32
    return %arg0, %c0_i32, %c0_i32_0, %c0_i32_1 : i32, i32, i32, i32
  }
  func.func @transform_1(%arg0: i32) -> (i32, i32) {
    %c0_i32 = arith.constant 0 : i32
    %c0_i32_0 = arith.constant 0 : i32
    %c0_i32_1 = arith.constant 0 : i32
    return %c0_i32, %c0_i32_0 : i32, i32
  }
  func.func @transform_2(%arg0: i32) -> (i32, i32) {
    %c0_i32 = arith.constant 0 : i32
    %c0_i32_0 = arith.constant 0 : i32
    %c0_i32_1 = arith.constant 0 : i32
    return %c0_i32, %c0_i32_0 : i32, i32
  }
  func.func @transform_3(%arg0: i32) -> (i32, i32) {
    %c0_i32 = arith.constant 0 : i32
    %c0_i32_0 = arith.constant 0 : i32
    %c0_i32_1 = arith.constant 0 : i32
    return %c0_i32, %c0_i32_0 : i32, i32
  }
  func.func @transform_4(%arg0: i32) -> (i32, i32) {
    %c0_i32 = arith.constant 0 : i32
    %c0_i32_0 = arith.constant 0 : i32
    %c0_i32_1 = arith.constant 0 : i32
    return %c0_i32, %c0_i32_0 : i32, i32
  }
  func.func @transform_5(%arg0: i32) -> (i32, i32, i32) {
    %c0_i32 = arith.constant 0 : i32
    %c0_i32_0 = arith.constant 0 : i32
    %c0_i32_1 = arith.constant 0 : i32
    return %arg0, %c0_i32, %c0_i32_0 : i32, i32, i32
  }
}

</mosaic_0001>

<bundles_post_ra>
// kernel: tpu_custom_call.1
= control target key start
LH: loop header
LB: loop body
LE: loop exit
PB: predicated region body
PF: predicated region fallthrough
CT: control target
= control target key end

     0   :  { %s6846_s0 = inlined_call_operand.hbm [shape: f32[2,4,8,8], index: 0, kind: input, shape index: {}]   ;;  %s6847_s1 = inlined_call_operand.vmem [shape: f32[20,8], index: 1, kind: input, shape index: {}]   ;;  %s6848_s2 = inlined_call_operand.vmem [shape: f32[8,20], index: 2, kind: input, shape index: {}]   ;;  %s6849_s3 = inlined_call_operand.vmem [shape: f32[4,100], index: 3, kind: input, shape index: {}]   ;;  %s6850_s4 = inlined_call_operand.vmem [shape: f32[4,1], index: 4, kind: input, shape index: {}]   ;;  %s6851_s5 = inlined_call_operand.hbm [shape: f32[2,4,256], index: 5, kind: output, shape index: {}]  }
   0x1   :  { %6954 = sst [smem:[#allocation20_spill]] %s6846_s0 }
   0x2   :  { %6955 = sst [smem:[#allocation21_spill]] %s6847_s1 }
   0x3   :  { %6956 = sst [smem:[#allocation22_spill]] %s6848_s2 }
   0x4   :  { %6957 = sst [smem:[#allocation23_spill]] %s6849_s3 }
   0x5   :  { %6958 = sst [smem:[#allocation24_spill]] %s6850_s4 }
   0x6   :  { %6959 = sst [smem:[#allocation25_spill]] %s6851_s5 }
   0x7   :  { %10 = vsyncpa [#allocation5], 0 }
   0x8   :  { %12 = vsyncpa [#allocation5 + $0x1], 0 }
   0x9   :  { %13 = vsyncpa [#allocation6], 0 }
   0xa   :  { %15 = vsyncpa [#allocation6 + $0x1], 0  ;;  %s4836_s18 = smov 0   ;;  %s4838_s19 = smov 0  }
   0xb   :  { %s4840_s20 = smov 0   ;;  %s4842_s21 = smov 0  }
   0xc LB: > { %6960 = sst [smem:[#allocation10_spill]] %s4746_s18  ;;  %s4857_s22 = sadd.s32 4294967295, %s4758_s21   ;;  %s4758_s21 = sphi %s4842_s21, %s7108_s21   ;;  %s4754_s20 = sphi %s4840_s20, %s7111_s20   ;;  %s4750_s19 = sphi %s4838_s19, %s7110_s19   ;;  %s4746_s18 = sphi %s4836_s18, %s7109_s18  }
   0xd   : > { %6961 = sst [smem:[#allocation11_spill]] %s4750_s19  ;;  %s4419_s23 = sadd.s32 4294967294, %s4758_s21  }
   0xe   : > { %6962 = sst [smem:[#allocation12_spill]] %s4754_s20  ;;  %s4861_s24 = sadd.s32 1, %s4758_s21  }
   0xf   : > { %6963 = sst [smem:[#allocation13_spill]] %s4758_s21  ;;  %s28_s25 = sadd.s32 1, %s4754_s20 }
  0x10   : > { %6964 = sst [smem:[#allocation14_spill]] %s4857_s22  ;;  %s25_s26 = ssub.s32 %s4758_s21, %s4861_s24 }
  0x11   : > { %6965 = sst [smem:[#allocation15_spill]] %s4861_s24  ;;  %p35_p0 = scmp.ne.s32.totalorder %s4754_s20, %s4750_s19 }
  0x12   : > { %p26_p1 = scmp.eq.s32.totalorder %s25_s26, 0  ;;  %p36_p2 = scmp.eq.s32.totalorder %s4758_s21, 0 }
  0x13   : > { %p41_p3 = scmp.ne.s32.totalorder %s4750_s19, %s4746_s18  ;;  %p42_p4 = scmp.eq.s32.totalorder %s4857_s22, 0 }
  0x14   : > { %s4873_s27 = scalar_select %p26_p1, %s4754_s20, %s28_s25  }
  0x15   : > { %p4875_p5 = por %p36_p2, %p35_p0  ;;  %p4879_p6 = por %p42_p4, %p41_p3 }
  0x16   : > { %6966 = sst [smem:[#allocation16_spill]] %s4873_s27  ;;  %p149_p7 = scmp.eq.s32.totalorder %s4857_s22, 1 }
  0x17   : > { %p155_p8 = scmp.eq.s32.totalorder %s4419_s23, 1  ;;  %p4583_p10 = scmp.lt.s32.totalorder %s4758_s21, 2 }
  0x18   : > { %p4886_p11 = por %p149_p7, %p35_p0  ;;  %s187_s7 = sand.u32 1, %s4754_s20  }
  0x19   : > { %p4890_p12 = por %p155_p8, %p41_p3  ;;  %s4455_s8 = sshll.u32 %s4758_s21, 9 }
  0x1a   : > { %s6969_s30 = scalar_select %p4886_p11, 1, 0 }
  0x1b   : > { %s6971_s6 = scalar_select %p4890_p12, 1, 0 }
  0x1c   : > { %6970 = sst [smem:[#allocation17_spill]] %s6969_s30  ;;  %s4422_s9 = sshll.u32 %s187_s7, 5 }
  0x1d   : > { %6972 = sst [smem:[#allocation18_spill]] %s6971_s6  ;;  %s6973_s0 = sld [smem:[#allocation20_spill]] }
  0x1e   : > { %s191_s13 = scalar_lea.vmem [#allocation4], %s4422_s9  ;;  %p4903_p13 = pnand %p4583_p10, %p4875_p5 }
  0x1f   : > { %s198_s14 = sshll.u32 %s191_s13, 4  ;;  %s4909_s16 = scalar_lea.sflag [#allocation5], %s187_s7  ;;  %s4907_s14 = int_to_ptr.vmem [resolvable:$true] %s198_s14 }
  0x20   : > { %p4664_p1 = pneg %p4903_p13 }
  0x23   : > { %s4899_s12 = scalar_lea.hbm %s6973_s0, %s4455_s8  ;;  %s4667_s26 = scalar_lea.hbm %s6973_s0, 1024 }
  0x24   : > { %s4662_s17 = scalar_lea.hbm %s4899_s12, 512  ;;  %p4668_p4 = scmp.lt.u32.totalorder %s4899_s12, %s6973_s0 }
  0x25   : > { %p4663_p0 = scmp.ne.s32.totalorder %s4899_s12, %s4662_s17  ;;  %p4669_p5 = scmp.lt.u32.totalorder %s4667_s26, %s4662_s17 }
  0x26   : > { %p4671_p8 = scmp.lt.u32.totalorder %s4662_s17, %s4899_s12 }
  0x27   : > { %p4665_p2 = pnand %p4664_p1, %p4663_p0  ;;  %p4670_p7 = por %p4669_p5, %p4668_p4 }
  0x29   : > { %p4666_p3 = pneg %p4665_p2  ;;  %p4672_p10 = por %p4671_p8, %p4670_p7 }
  0x2b   : > { %p4673_p9 = pnand %p4672_p10, %p4666_p3 }
  0x2d   : > { %4676 = shalt.err (!%p4673_p9)
}
  0x2e   : > { %s4677_s7 = scalar_lea.vmem %s4907_s14, 512  ;;  %s4760_s9 = smov [#allocation4]  }
  0x2f   : > { %p4678_p0 = scmp.ne.s32.totalorder %s4907_s14, %s4677_s7  ;;  %s4682_s10 = sshll.u32 %s4760_s9, 4  ;;  %s4683_s10 = int_to_ptr.vmem [resolvable:$false] %s4682_s10 }
  0x30   : > { %s4684_s11 = scalar_lea.vmem %s4683_s10, 1024  ;;  %p4685_p11 = scmp.lt.s32.totalorder %s4907_s14, %s4683_s10 }
  0x31   : > { %p4680_p2 = pnand %p4678_p0, %p4664_p1  ;;  %p4686_p4 = scmp.lt.s32.totalorder %s4684_s11, %s4677_s7 }
  0x33   : > { %p4681_p12 = pneg %p4680_p2  ;;  %p4687_p5 = por %p4686_p4, %p4685_p11 }
  0x35   : > { %p4688_p7 = pnand %p4687_p5, %p4681_p12 }
  0x37   : > { %4691 = shalt.err (!%p4688_p7)
}
  0x38   : > { %s4761_s13 = smov 128   ;;  %s4762_s17 = smov 8  }
  0x39   : > { %4578 = dma.hbm_to_vmem [thread:$0]  (!%p4903_p13), %s4899_s12, 512, %s4907_s14, %s4909_s16, %s4761_s13, %s4761_s13, %s4762_s17  }
  0x3a   : > { %p4425_p9 = scmp.ge.s32.totalorder %s4758_s21, 1  ;;  %p206_p1 = scmp.lt.s32.totalorder %s4758_s21, 3 }
  0x3c   : > { %p207_p3 = pnand %p4425_p9, %p206_p1 }
  0x3e   : > { %210 = sbr.rel (%p207_p3) target bundleno = 2092 (0x82c), region = 40 }
  0x45   : > { %s4940_s23 = sand.u32 1, %s4750_s19  }
  0x46   : > { %6975 = sst [smem:[#allocation19_spill]] %s4940_s23  ;;  %s4426_s25 = sshll.u32 %s4940_s23, 5 }
  0x47   : > { %s213_s26 = scalar_lea.sflag [#allocation5], %s4940_s23  ;;  %s4944_s28 = scalar_lea.vmem [#allocation4], %s4426_s25 }
  0x48   : > { %4737 = dma.done.wait (%p4879_p6), %s213_s26, 512  }
  0x49   : > { %4739 = vsyncadd (%p4879_p6), %s213_s26, 4294966784  ;;  %v4763_v0 = vmov 0.0   ;;  %vm4764_vm0 = vmmov 0   ;;  %vm245_vm1 = vcmask 64512   ;;  %s6976_s2 = sld [smem:[#allocation22_spill]]  ;;  %v243_v2 = vld [vmem:[%s4944_s28] sm:$0xff] }
  0x4a   : > { %4481 = vmatprep.subr.mxu0 %v4763_v0  ;;  %4483 = vmatprep.mubr.msk.f32.mxu0 %vm4764_vm0, %v4763_v0  ;;  %s6977_s1 = sld [smem:[#allocation21_spill]]  ;;  %v4432_v8 = vld [vmem:[%s4944_s28 + $0x8] sm:$0xff]  ;;  %v4437_v9 = vld [vmem:[%s4944_s28 + $0x10] sm:$0xff]  ;;  %vm411_vm2 = vcmask 162816   ;;  %vm414_vm3 = vcmask 158720   ;;  %v4442_v22 = vld [vmem:[%s4944_s28 + $0x18] sm:$0xff] }
  0x4b   : > { %4569 = vmatprep.subr.mxu1 %v4763_v0  ;;  %4491 = vmatprep.mubr.msk.f32.mxu1 %vm4764_vm0, %v4763_v0  ;;  %vm954_vm4 = vcmask 1045509   ;;  %vm957_vm5 = vcmask 1046534   ;;  %vm941_vm6 = vcmask 1041409   ;;  %vm944_vm7 = vcmask 1042434   ;;  %s6885_s28 = smov 125   ;;  %s6889_s12 = smov 127  }
  0x4c   : > { %vm960_vm8 = vcmask 1047559   ;;  %vm947_vm9 = vcmask 1043459   ;;  %vm950_vm10 = vcmask 125952   ;;  %vm965_vm11 = vcmask 130052   ;;  %s6883_s14 = smov 124   ;;  %s6887_s29 = smov 126  }
  0x4d   : > { %s6879_s15 = smov 15   ;;  %s6881_s16 = smov 16   ;;  %vm6915_vm12 = vcmask 261252   ;;  %vm6922_vm13 = vcmask 257152   ;;  %vm6912_vm14 = vcmask 388352   ;;  %vm6911_vm15 = vcmask 392452  }
  0x4e   : > { %s6875_s8 = smov 13   ;;  %s6877_s7 = smov 14  }
  0x4f   : > { %v244_v1 = vld [vmem:[%s6976_s2] sm:$0xff]  ;;  %s6873_s9 = smov 12   ;;  %s6871_s10 = smov 32  }
  0x50   : > { %4482 = vmatpush3.msra.mxu0 %v244_v1  ;;  %v4967_v3 = vld [vmem:[%s6977_s1] sm:$0xff]  ;;  %v4972_v4 = vld [vmem:[%s6977_s1 + $0x8] sm:$0xff]  ;;  %v321_v7 = vld [vmem:[%s6977_s1 + $0x10] sm:$0xf]  ;;  %s6857_s11 = smov 30   ;;  %s6859_s13 = smov 31  }
  0x51   : > { %4484 = vmatmul.mubr.msk.f32.vlgmr.msra.gmra.mrb[0].mxu0 %vm245_vm1, %v243_v2  ;;  %4486 = vmatprep.subr.mxu0 %v4763_v0  ;;  %v494_v20 = vld [vmem:[%s6977_s1 + $0x10] sm:$0xf]  ;;  %s6853_s17 = smov 28   ;;  %s6855_s25 = smov 29  }
  0x52   : > { %4488 = vmatprep.mubr.msk.f32.mxu0 %vm4764_vm0, %v4763_v0  ;;  %v666_v21 = vld [vmem:[%s6977_s1 + $0x10] sm:$0xf]  ;;  %s6865_s26 = smov 47   ;;  %s6997_s0 = smov 46  }
  0x53   : > { %v838_v37 = vld [vmem:[%s6977_s1 + $0x10] sm:$0xf]  ;;  %s6998_s1 = smov 45   ;;  %s6999_s2 = smov 64  }
  0x54   : > { %s7000_s27 = smov 63   ;;  %s7001_s20 = smov 62  }
  0x55   : > { %s7002_s19 = smov 61   ;;  %s7003_s24 = smov 80  }
  0x56   : > { %s7004_s21 = smov 79   ;;  %s7005_s6 = smov 78  }
  0x57   : > { %s7006_s18 = smov 77   ;;  %s7007_s5 = smov 28  }
  0x58   : > { %s7008_s30 = smov 96   ;;  %s7009_s3 = smov 94  }
  0x59   : > { %s7010_s22 = smov 44   ;;  %s7011_s23 = smov 112  }
  0x5a   : > { %s7012_s4 = smov 110  }
 0x124   : > { %v315_v5 = vpop.f32.mrb[0].mxu0 }
 0x125   : > { %v4485_v6 = vpop.f32.mrb[1].mxu0  ;;  %4487 = vmatpush3.msra.mxu0 %v315_v5  ;;  %4570 = vmatpush3.msra.mxu1 %v315_v5 }
 0x126   : > { %4489 = vmatmul.mubr.msk.f32.vlgmr.msra.gmra.mrb[2].mxu0 %vm245_vm1, %v4967_v3  ;;  %4492 = vmatmul.mubr.msk.f32.vlgmr.msra.gmra.mrb[0].mxu1 %vm245_vm1, %v4972_v4 }
 0x127   : > { %4497 = vmatprep.subr.mxu0 %v4763_v0  ;;  %4494 = vmatprep.mubr.msk.f32.mxu1 %vm4764_vm0, %v4763_v0 }
 0x128   : > { %4498 = vmatpush3.msra.mxu0 %v244_v1  ;;  %4499 = vmatprep.mubr.msk.f32.mxu0 %vm4764_vm0, %v4763_v0 }
 0x129   : > { %4513 = vmatprep.subr.mxu1 %v4763_v0  ;;  %4502 = vmatprep.subr.mxu0 %v4763_v0 }
 0x12a   : > { %4495 = vmatmul.mubr.msk.f32.gmra.mrb[2].mxu1 %vm245_vm1, %v321_v7  ;;  %4500 = vmatmul.mubr.msk.f32.vlgmr.msra.gmra.mrb[4].mxu0 %vm245_vm1, %v4432_v8 }
 0x12b   : > { %4514 = vmatpush3.msra.mxu1 %v244_v1  ;;  %4515 = vmatprep.mubr.msk.f32.mxu1 %vm4764_vm0, %v4763_v0 }
 0x12c   : > { %4504 = vmatprep.mubr.msk.f32.mxu0 %vm4764_vm0, %v4763_v0  ;;  %4518 = vmatprep.subr.mxu1 %v4763_v0 }
 0x12e   : > { %4516 = vmatmul.mubr.msk.f32.vlgmr.msra.gmra.mrb[4].mxu1 %vm245_vm1, %v4437_v9 }
 0x12f   : > { %4520 = vmatprep.mubr.msk.f32.mxu1 %vm4764_vm0, %v4763_v0 }
 0x1f9   : > { %v397_v10 = vpop.f32.mrb[2].mxu0  ;;  %v402_v11 = vpop.f32.mrb[0].mxu1 }
 0x1fa   : > { %412 = vst.msk [vmem:[#allocation2] sm:$0xff] %vm411_vm2, %v397_v10  ;;  %v4490_v12 = vpop.f32.mrb[3].mxu0  ;;  %413 = vst.msk [vmem:[#allocation2 + $0x8] sm:$0xff] %vm411_vm2, %v402_v11  ;;  %v4493_v13 = vpop.f32.mrb[1].mxu1 }
 0x1fd   : > { %v488_v14 = vpop.f32.mrb[4].mxu0  ;;  %v407_v15 = vpop.f32.mrb[2].mxu1 }
 0x1fe   : > { %v4501_v16 = vpop.f32.mrb[5].mxu0  ;;  %4503 = vmatpush3.msra.mxu0 %v488_v14  ;;  %415 = vst.msk [vmem:[#allocation2 + $0x10] sm:$0xf] %vm414_vm3, %v407_v15  ;;  %v4496_v17 = vpop.f32.mrb[3].mxu1 }
 0x1ff   : > { %4505 = vmatmul.mubr.msk.f32.vlgmr.msra.gmra.mrb[6].mxu0 %vm245_vm1, %v4967_v3  ;;  %4529 = vmatprep.subr.mxu0 %v4763_v0 }
 0x200   : > { %4507 = vmatprep.mubr.msk.f32.mxu0 %vm4764_vm0, %v4763_v0  ;;  %4530 = vmatpush3.msra.mxu0 %v244_v1 }
 0x201   : > { %v660_v18 = vpop.f32.mrb[4].mxu1  ;;  %4534 = vmatprep.subr.mxu0 %v4763_v0  ;;  %v5054_v38 = vld [vmem:[#allocation2 + $0x8] sm:$0x1]  ;;  %v5063_v43 = vld [vmem:[#allocation2 + $0xa] sm:$0x1] }
 0x202   : > { %4519 = vmatpush3.msra.mxu1 %v660_v18  ;;  %v4517_v19 = vpop.f32.mrb[5].mxu1  ;;  %v2600_v41 = vrot.slane %v5054_v38, 4  ;;  %v5072_v49 = vld [vmem:[#allocation2 + $0x9] sm:$0x1]  ;;  %v2678_v52 = vrot.slane %v5063_v43, 4 }
 0x203   : > { %4508 = vmatmul.mubr.msk.f32.gmra.mrb[8].mxu0 %vm245_vm1, %v4972_v4  ;;  %4521 = vmatmul.mubr.msk.f32.vlgmr.msra.gmra.mrb[6].mxu1 %vm245_vm1, %v4967_v3  ;;  %v5084_v56 = vld [vmem:[#allocation2 + $0xc] sm:$0x1]  ;;  %v932_v12 = vld [vmem:[#allocation2] sm:$0x1]  ;;  %v5119_v15 = vld [vmem:[#allocation2 + $0x1] sm:$0x1] }
 0x204   : > { %4510 = vmatprep.mubr.msk.f32.mxu0 %vm4764_vm0, %v4763_v0  ;;  %4523 = vmatprep.mubr.msk.f32.mxu1 %vm4764_vm0, %v4763_v0  ;;  %v2756_v2 = vrot.slane %v5084_v56, 4  ;;  %v952_v19 = vrot.slane %v932_v12, 4 }
 0x207   : > { %4511 = vmatmul.mubr.msk.f32.gmra.mrb[10].mxu0 %vm245_vm1, %v494_v20  ;;  %4524 = vmatmul.mubr.msk.f32.gmra.mrb[8].mxu1 %vm245_vm1, %v4972_v4 }
 0x208   : > { %4526 = vmatprep.mubr.msk.f32.mxu1 %vm4764_vm0, %v4763_v0  ;;  %4531 = vmatprep.mubr.msk.f32.mxu0 %vm4764_vm0, %v4763_v0 }
 0x20b   : > { %4527 = vmatmul.mubr.msk.f32.gmra.mrb[10].mxu1 %vm245_vm1, %v666_v21  ;;  %4532 = vmatmul.mubr.msk.f32.vlgmr.msra.gmra.mrb[12].mxu0 %vm245_vm1, %v4442_v22 }
 0x20c   : > { %4536 = vmatprep.mubr.msk.f32.mxu0 %vm4764_vm0, %v4763_v0  ;;  %4322 = vmatprep.mubr.f32.mxu1 %v4763_v0 }
 0x2d2   : > { %v570_v23 = vpop.f32.mrb[6].mxu0 }
 0x2d3   : > { %585 = vst.msk [vmem:[#allocation2 + $0x18] sm:$0xff] %vm411_vm2, %v570_v23  ;;  %v4506_v24 = vpop.f32.mrb[7].mxu0  ;;  %v5126_v23 = vld [vmem:[#allocation2 + $0x3] sm:$0x1] }
 0x2d6   : > { %v575_v25 = vpop.f32.mrb[8].mxu0  ;;  %v742_v26 = vpop.f32.mrb[6].mxu1 }
 0x2d7   : > { %586 = vst.msk [vmem:[#allocation2 + $0x20] sm:$0xff] %vm411_vm2, %v575_v25  ;;  %757 = vst.msk [vmem:[#allocation2 + $0x30] sm:$0xff] %vm411_vm2, %v742_v26  ;;  %v4509_v27 = vpop.f32.mrb[9].mxu0  ;;  %v4522_v28 = vpop.f32.mrb[7].mxu1 }
 0x2da   : > { %v580_v29 = vpop.f32.mrb[10].mxu0  ;;  %v747_v30 = vpop.f32.mrb[8].mxu1  ;;  %v933_v13 = vld [vmem:[#allocation2 + $0x18] sm:$0x1]  ;;  %v5121_v16 = vld [vmem:[#allocation2 + $0x19] sm:$0x1] }
 0x2db   : > { %587 = vst.msk [vmem:[#allocation2 + $0x28] sm:$0xf] %vm414_vm3, %v580_v29  ;;  %v4512_v31 = vpop.f32.mrb[11].mxu0  ;;  %v4525_v32 = vpop.f32.mrb[9].mxu1  ;;  %v953_v20 = vrot.slane %v933_v13, 3  ;;  %v940_v21 = vrot.slane %v933_v13, 7 }
 0x2dc   : > { %758 = vst.msk [vmem:[#allocation2 + $0x38] sm:$0xff] %vm411_vm2, %v747_v30  ;;  %v5124_v22 = vld [vmem:[#allocation2 + $0x1a] sm:$0x1]  ;;  %v5128_v24 = vld [vmem:[#allocation2 + $0x1b] sm:$0x1]  ;;  %v988_v31 = vrot.slane %v5121_v16, 3 }
 0x2dd   : > { %v5134_v27 = vld [vmem:[#allocation2 + $0x1c] sm:$0x1] }
 0x2de   : > { %v752_v33 = vpop.f32.mrb[10].mxu1  ;;  %v832_v34 = vpop.f32.mrb[12].mxu0  ;;  %v5056_v39 = vld [vmem:[#allocation2 + $0x20] sm:$0x1]  ;;  %v5061_v42 = vld [vmem:[#allocation2 + $0x21] sm:$0x1] }
 0x2df   : > { %759 = vst.msk [vmem:[#allocation2 + $0x40] sm:$0xf] %vm414_vm3, %v752_v33  ;;  %v4533_v35 = vpop.f32.mrb[13].mxu0  ;;  %4535 = vmatpush3.msra.mxu0 %v832_v34  ;;  %v4528_v36 = vpop.f32.mrb[11].mxu1  ;;  %v2601_v44 = vrot.slane %v5056_v39, 3  ;;  %v2640_v50 = vrot.slane %v5061_v42, 7  ;;  %v955_v34 = vsel %vm954_vm4, %v953_v20, %v952_v19 }
 0x2e0   : > { %4537 = vmatmul.mubr.msk.f32.vlgmr.msra.gmra.mrb[14].mxu0 %vm245_vm1, %v4967_v3  ;;  %v5069_v47 = vld [vmem:[#allocation2 + $0x22] sm:$0x1]  ;;  %v5082_v55 = vld [vmem:[#allocation2 + $0x23] sm:$0x1]  ;;  %v5095_v62 = vld [vmem:[#allocation2 + $0x24] sm:$0x1]  ;;  %v942_v35 = vsel %vm941_vm6, %v940_v21, %v932_v12 }
 0x2e1   : > { %4539 = vmatprep.mubr.msk.f32.mxu0 %vm4764_vm0, %v4763_v0  ;;  %v2602_v48 = vsel %vm954_vm4, %v2601_v44, %v2600_v41  ;;  %v2641_v57 = vsel %vm941_vm6, %v2640_v50, %v5072_v49  ;;  %v2679_v58 = vrot.slane %v5069_v47, 3  ;;  %v2757_v7 = vrot.slane %v5095_v62, 3  ;;  %v934_v18 = vld [vmem:[#allocation2 + $0x30] sm:$0x1]  ;;  %v5130_v25 = vld [vmem:[#allocation2 + $0x31] sm:$0x1] }
 0x2e2   : > { %v5132_v26 = vld [vmem:[#allocation2 + $0x32] sm:$0x1]  ;;  %v956_v29 = vrot.slane %v934_v18, 2  ;;  %v943_v30 = vrot.slane %v934_v18, 6  ;;  %v5137_v32 = vld [vmem:[#allocation2 + $0x33] sm:$0x1] }
 0x2e3   : > { %v5058_v40 = vld [vmem:[#allocation2 + $0x38] sm:$0x1]  ;;  %v5066_v45 = vld [vmem:[#allocation2 + $0x39] sm:$0x1]  ;;  %v5075_v51 = vld [vmem:[#allocation2 + $0x3a] sm:$0x1]  ;;  %v2680_v63 = vsel %vm954_vm4, %v2679_v58, %v2678_v52  ;;  %v2758_v10 = vsel %vm954_vm4, %v2757_v7, %v2756_v2 }
 0x2e4   : > { %4540 = vmatmul.mubr.msk.f32.gmra.mrb[16].mxu0 %vm245_vm1, %v4972_v4  ;;  %v2603_v46 = vrot.slane %v5058_v40, 2  ;;  %v2642_v54 = vrot.slane %v5066_v45, 6  ;;  %v5089_v59 = vld [vmem:[#allocation2 + $0x3b] sm:$0x1]  ;;  %v2681_v61 = vrot.slane %v5075_v51, 2  ;;  %v987_v36 = vrot.slane %v5119_v15, 4 }
 0x2e5   : > { %4542 = vmatprep.mubr.msk.f32.mxu0 %vm4764_vm0, %v4763_v0  ;;  %v2718_v0 = vrot.slane %v5082_v55, 7  ;;  %v5099_v1 = vld [vmem:[#allocation2 + $0x3c] sm:$0x1]  ;;  %v5105_v4 = vld [vmem:[#allocation2 + $0xb] sm:$0x1]  ;;  %v2720_v5 = vrot.slane %v5089_v59, 6 }
 0x2e6   : > { %v5079_v53 = vsel %vm957_vm5, %v2603_v46, %v2602_v48  ;;  %v5092_v60 = vsel %vm944_vm7, %v2642_v54, %v2641_v57  ;;  %v5103_v3 = vsel %vm957_vm5, %v2681_v61, %v2680_v63  ;;  %v2759_v9 = vrot.slane %v5099_v1, 2  ;;  %v5148_v50 = vld [vmem:[#allocation2 + $0x34] sm:$0x1]  ;;  %v5150_v52 = vld [vmem:[#allocation2 + $0x2] sm:$0x1] }
 0x2e7   : > { %v2719_v6 = vsel %vm941_vm6, %v2718_v0, %v5105_v4  ;;  %v990_v41 = vrot.slane %v5130_v25, 2  ;;  %v1026_v44 = vrot.slane %v5124_v22, 7  ;;  %v1028_v46 = vrot.slane %v5132_v26, 6 }
 0x2e8   : > { %4543 = vmatmul.mubr.msk.f32.gmra.mrb[18].mxu0 %vm245_vm1, %v838_v37  ;;  %v5112_v8 = vsel %vm944_vm7, %v2720_v5, %v2719_v6  ;;  %v5117_v11 = vsel %vm957_vm5, %v2759_v9, %v2758_v10  ;;  %v1065_v37 = vrot.slane %v5126_v23, 4  ;;  %v1066_v48 = vrot.slane %v5128_v24, 3 }
 0x2e9   : > { %v1068_v54 = vrot.slane %v5137_v32, 2  ;;  %v1104_v57 = vrot.slane %v5134_v27, 7  ;;  %v958_v63 = vsel %vm957_vm5, %v956_v29, %v955_v34  ;;  %v945_v0 = vsel %vm944_vm7, %v943_v30, %v942_v35  ;;  %v1096_v34 = vld [vmem:[#allocation2 + $0x4] sm:$0x1] }
 0x2ea   : > { %v989_v5 = vsel %vm954_vm4, %v988_v31, %v987_v36  ;;  %v1027_v13 = vsel %vm941_vm6, %v1026_v44, %v5150_v52  ;;  %v1106_v19 = vrot.slane %v5148_v50, 6  ;;  %v1067_v31 = vsel %vm954_vm4, %v1066_v48, %v1065_v37 }
 0x2eb   : > { %v991_v12 = vsel %vm957_vm5, %v990_v41, %v989_v5  ;;  %v1029_v29 = vsel %vm944_vm7, %v1028_v46, %v1027_v13  ;;  %v996_v35 = vrot.slane %v5121_v16, 7  ;;  %v1069_v36 = vsel %vm957_vm5, %v1068_v54, %v1067_v31  ;;  %v1135_v13 = vld [vmem:[#allocation2 + $0x1] sm:$0x1] }
 0x2ec   : > { %v1105_v41 = vsel %vm941_vm6, %v1104_v57, %v1096_v34  ;;  %v998_v46 = vrot.slane %v5130_v25, 6  ;;  %v1035_v54 = vrot.slane %v5124_v22, 3  ;;  %v1037_v57 = vrot.slane %v5132_v26, 2 }
 0x2ed   : > { %v997_v16 = vsel %vm941_vm6, %v996_v35, %v5119_v15  ;;  %v1074_v22 = vrot.slane %v5128_v24, 7  ;;  %v1076_v26 = vrot.slane %v5137_v32, 6  ;;  %v1113_v24 = vrot.slane %v5134_v27, 3  ;;  %v1136_v32 = vld [vmem:[#allocation2 + $0x19] sm:$0x1] }
 0x2ee   : > { %v999_v25 = vsel %vm944_vm7, %v998_v46, %v997_v16  ;;  %v2631_v31 = vrot.slane %v5072_v49, 4  ;;  %v5227_v35 = vld [vmem:[#allocation2 + $0x1a] sm:$0x1]  ;;  %v2632_v46 = vrot.slane %v5061_v42, 3  ;;  %v2710_v42 = vrot.slane %v5082_v55, 3 }
 0x2ef   : > { %vm6905_vm0 = vcmask 523652   ;;  %vm6906_vm1 = vcmask 519552  }
 0x3b3   : > { %v914_v14 = vpop.f32.mrb[14].mxu0 }
 0x3b4   : > { %929 = vst.msk [vmem:[#allocation2 + $0x48] sm:$0xff] %vm411_vm2, %v914_v14  ;;  %v4538_v17 = vpop.f32.mrb[15].mxu0 }
 0x3b7   : > { %v919_v28 = vpop.f32.mrb[16].mxu0 }
 0x3b8   : > { %930 = vst.msk [vmem:[#allocation2 + $0x50] sm:$0xff] %vm411_vm2, %v919_v28  ;;  %v4541_v33 = vpop.f32.mrb[17].mxu0  ;;  %vm1773_vm2 = vcmask 650752  }
 0x3bb   : > { %v924_v58 = vpop.f32.mrb[18].mxu0  ;;  %v935_v61 = vld [vmem:[#allocation2 + $0x48] sm:$0x1]  ;;  %v982_v2 = vld [vmem:[#allocation2 + $0x49] sm:$0x1] }
 0x3bc   : > { %931 = vst.msk [vmem:[#allocation2 + $0x58] sm:$0xf] %vm414_vm3, %v924_v58  ;;  %v959_v6 = vrot.slane %v935_v61, 1  ;;  %v946_v7 = vrot.slane %v935_v61, 5  ;;  %v992_v9 = vrot.slane %v982_v2, 1  ;;  %v1107_v61 = vsel %vm944_vm7, %v1106_v19, %v1105_v41  ;;  %v4544_v5 = vpop.f32.mrb[19].mxu0 }
 0x3bd   : > { %v1021_v10 = vld [vmem:[#allocation2 + $0x4a] sm:$0x1]  ;;  %v1060_v17 = vld [vmem:[#allocation2 + $0x4b] sm:$0x1]  ;;  %v5161_v18 = vld [vmem:[#allocation2 + $0x4c] sm:$0x1] }
 0x3be   : > { %v1030_v14 = vrot.slane %v1021_v10, 5  ;;  %v961_v20 = vsel %vm960_vm8, %v959_v6, %v958_v63  ;;  %v948_v21 = vsel %vm947_vm9, %v946_v7, %v945_v0  ;;  %v993_v28 = vsel %vm960_vm8, %v992_v9, %v991_v12  ;;  %v1138_v41 = vld [vmem:[#allocation2 + $0x49] sm:$0x1] }
 0x3bf   : > { %971 = vrot.lane.b32.xlu1 %v961_v20, %s6885_s28  ;;  %962 = vrot.lane.b32.xlu0 %v961_v20, %s6889_s12  ;;  %951 = vst.msk [vmem:[#allocation3] sm:$0xf] %vm950_vm10, %v948_v21  ;;  %v1070_v33 = vrot.slane %v1060_v17, 1  ;;  %v1108_v44 = vrot.slane %v5161_v18, 5  ;;  %v1000_v63 = vrot.slane %v982_v2, 5  ;;  %v1034_v0 = vrot.slane %v5150_v52, 4 }
 0x3c0   : > { %995 = vst.msk [vmem:[#allocation3 + $0x20] sm:$0xf0] %vm965_vm11, %v993_v28  ;;  %v1031_v30 = vsel %vm947_vm9, %v1030_v14, %v1029_v29  ;;  %v1039_v2 = vrot.slane %v1021_v10, 1  ;;  %v1078_v52 = vrot.slane %v1060_v17, 5  ;;  %v1075_v9 = vsel %vm941_vm6, %v1074_v22, %v5126_v23  ;;  %v5218_v17 = vld [vmem:[#allocation2 + $0x2] sm:$0x1] }
 0x3c1   : > { %1033 = vst.msk [vmem:[#allocation3 + $0x50] sm:$0xf] %vm950_vm10, %v1031_v30  ;;  %v1071_v58 = vsel %vm960_vm8, %v1070_v33, %v1069_v36  ;;  %v5184_v37 = vsel %vm947_vm9, %v1108_v44, %v1107_v61  ;;  %v1001_v48 = vsel %vm947_vm9, %v1000_v63, %v999_v25  ;;  %v1036_v15 = vsel %vm954_vm4, %v1035_v54, %v1034_v0  ;;  %v1137_v23 = vld [vmem:[#allocation2 + $0x31] sm:$0x1]  ;;  %v2665_v5 = vld [vmem:[#allocation2 + $0x52] sm:$0x1] }
 0x3c2   : > { %1073 = vst.msk [vmem:[#allocation3 + $0x70] sm:$0xf0] %vm965_vm11, %v1071_v58  ;;  %v1038_v6 = vsel %vm957_vm5, %v1037_v57, %v1036_v15  ;;  %v1077_v10 = vsel %vm944_vm7, %v1076_v26, %v1075_v9  ;;  %v1115_v14 = vrot.slane %v5148_v50, 2  ;;  %v1112_v19 = vrot.slane %v1096_v34, 4  ;;  %v2587_v57 = vld [vmem:[#allocation2 + $0x50] sm:$0x1] }
 0x3c3   : > { %975 = vrot.lane.b32.xlu1 %v948_v21, %s6883_s14  ;;  %967 = vrot.lane.b32.xlu0 %v948_v21, %s6887_s29  ;;  %1111 = vst.msk [vmem:[#allocation3 + $0xa0] sm:$0xf] %vm950_vm10, %v5184_v37  ;;  %v1040_v7 = vsel %vm960_vm8, %v1039_v2, %v1038_v6  ;;  %v1079_v12 = vsel %vm947_vm9, %v1078_v52, %v1077_v10  ;;  %v1117_v20 = vrot.slane %v5161_v18, 1  ;;  %v1154_v21 = vrot.slane %v1135_v13, 4  ;;  %v2626_v0 = vld [vmem:[#allocation2 + $0x51] sm:$0x1] }
 0x3c4   : > { %v1114_v29 = vsel %vm954_vm4, %v1113_v24, %v1112_v19  ;;  %v1186_v27 = vrot.slane %v5218_v17, 4  ;;  %v1157_v33 = vrot.slane %v1137_v23, 2  ;;  %v1145_v34 = vrot.slane %v1137_v23, 6  ;;  %v2704_v26 = vld [vmem:[#allocation2 + $0x53] sm:$0x1] }
 0x3c5   : > { %v1116_v50 = vsel %vm957_vm5, %v1115_v14, %v1114_v29  ;;  %v2592_v18 = vrot.slane %v5056_v39, 7  ;;  %v2594_v44 = vrot.slane %v5058_v40, 6  ;;  %v2634_v61 = vrot.slane %v5066_v45, 2  ;;  %v2743_v24 = vld [vmem:[#allocation2 + $0x54] sm:$0x1] }
 0x3c6   : > { %v1118_v36 = vsel %vm960_vm8, %v1117_v20, %v1116_v50  ;;  %v2672_v39 = vrot.slane %v5075_v51, 6  ;;  %v2709_v63 = vrot.slane %v5105_v4, 4  ;;  %v1187_v40 = vrot.slane %v5227_v35, 3 }
 0x3c7   : > { %1006 = vrot.lane.b32.xlu1 %v993_v28, %s6887_s29  ;;  %1002 = vrot.lane.b32.xlu0 %v1001_v48, %s6889_s12  ;;  %v2593_v45 = vsel %vm941_vm6, %v2592_v18, %v5054_v38  ;;  %v1147_v51 = vrot.slane %v1138_v41, 5  ;;  %v2633_v2 = vsel %vm954_vm4, %v2632_v46, %v2631_v31  ;;  %v2712_v38 = vrot.slane %v5089_v59, 2 }
 0x3c8   : > { %v2595_v4 = vsel %vm944_vm7, %v2594_v44, %v2593_v45  ;;  %v2750_v6 = vrot.slane %v5099_v1, 6  ;;  %v2596_v22 = vrot.slane %v2587_v57, 5  ;;  %v2711_v52 = vsel %vm954_vm4, %v2710_v42, %v2709_v63  ;;  %v1219_v63 = vld [vmem:[#allocation2 + $0x3] sm:$0x1] }
 0x3c9   : > { %v2644_v9 = vrot.slane %v2626_v0, 5  ;;  %v2636_v10 = vrot.slane %v2626_v0, 1  ;;  %v2674_v14 = vrot.slane %v2665_v5, 5  ;;  %v2722_v23 = vrot.slane %v2704_v26, 5  ;;  %v1261_v0 = vld [vmem:[#allocation2 + $0x1c] sm:$0x1] }
 0x3ca   : > { %v5270_v1 = vsel %vm947_vm9, %v2596_v22, %v2595_v4  ;;  %v2761_v29 = vrot.slane %v2743_v24, 1  ;;  %vm1785_vm3 = vcmask 654852  }
 0x3cb   : > { %1014 = vrot.lane.b32.xlu1 %v993_v28, %s6883_s14  ;;  %1010 = vrot.lane.b32.xlu0 %v1001_v48, %s6885_s28  ;;  %v1155_v28 = vrot.slane %v1136_v32, 3  ;;  %v1159_v48 = vrot.slane %v1138_v41, 1  ;;  %2599 = vst.msk [vmem:[#allocation3 + $0x8] sm:$0xf] %vm950_vm10, %v5270_v1  ;;  %v5278_v19 = vsel %vm947_vm9, %v2644_v9, %v5092_v60  ;;  %v5296_v60 = vsel %vm947_vm9, %v2722_v23, %v5112_v8  ;;  %v1304_v23 = vld [vmem:[#allocation2 + $0x4d] sm:$0x1] }
 0x3cc   : > { %v5305_v18 = vsel %vm960_vm8, %v2761_v29, %v5117_v11  ;;  %v1188_v8 = vsel %vm954_vm4, %v1187_v40, %v1186_v27  ;;  %v1197_v11 = vrot.slane %v5227_v35, 7  ;;  %v1221_v35 = vld [vmem:[#allocation2 + $0x33] sm:$0x1] }
 0x3cd   : > { %v1156_v49 = vsel %vm954_vm4, %v1155_v28, %v1154_v21  ;;  %v2714_v28 = vrot.slane %v2704_v26, 1 }
 0x3ce   : > { %v1158_v25 = vsel %vm957_vm5, %v1157_v33, %v1156_v49  ;;  %v1198_v49 = vsel %vm941_vm6, %v1197_v11, %v5218_v17 }
 0x3cf   : > { %1045 = vrot.lane.b32.xlu1 %v1031_v30, %s6887_s29  ;;  %1041 = vrot.lane.b32.xlu0 %v1040_v7, %s6889_s12 }
 0x3d3   : > { %1053 = vrot.lane.b32.xlu1 %v1031_v30, %s6883_s14  ;;  %1049 = vrot.lane.b32.xlu0 %v1040_v7, %s6885_s28  ;;  %v1143_v30 = vrot.slane %v1136_v32, 7  ;;  %v2605_v7 = vrot.slane %v2587_v57, 1  ;;  %v1180_v32 = vld [vmem:[#allocation2 + $0x32] sm:$0x1] }
 0x3d4   : > { %v1189_v31 = vrot.slane %v1180_v32, 2  ;;  %v1199_v44 = vrot.slane %v1180_v32, 6 }
 0x3d5   : > { %v1144_v16 = vsel %vm941_vm6, %v1143_v30, %v1135_v13  ;;  %v5267_v59 = vsel %vm960_vm8, %v2605_v7, %v5079_v53  ;;  %v2752_v30 = vrot.slane %v2743_v24, 5 }
 0x3d6   : > { %v1146_v54 = vsel %vm944_vm7, %v1145_v34, %v1144_v16  ;;  %v1190_v41 = vsel %vm957_vm5, %v1189_v31, %v1188_v8  ;;  %v1222_v16 = vld [vmem:[#allocation2 + $0x4b] sm:$0x1] }
 0x3d7   : > { %1084 = vrot.lane.b32.xlu1 %v1071_v58, %s6887_s29  ;;  %1080 = vrot.lane.b32.xlu0 %v1079_v12, %s6889_s12  ;;  %v1148_v13 = vsel %vm947_vm9, %v1147_v51, %v1146_v54  ;;  %v1242_v54 = vrot.slane %v1222_v16, 1  ;;  %v1231_v57 = vrot.slane %v1222_v16, 5  ;;  %v1342_v16 = vld [vmem:[#allocation2 + $0x2] sm:$0x1] }
 0x3db   : > { %1092 = vrot.lane.b32.xlu1 %v1071_v58, %s6883_s14  ;;  %1088 = vrot.lane.b32.xlu0 %v1079_v12, %s6885_s28  ;;  %v2670_v58 = vrot.slane %v5069_v47, 7  ;;  %v2748_v47 = vrot.slane %v5095_v62, 7  ;;  %v2635_v62 = vsel %vm957_vm5, %v2634_v61, %v2633_v2  ;;  %v2683_v12 = vrot.slane %v2665_v5, 1 }
 0x3dc   : > { %v5281_v53 = vsel %vm960_vm8, %v2636_v10, %v2635_v62  ;;  %v1200_v61 = vsel %vm944_vm7, %v1199_v44, %v1198_v49  ;;  %v1260_v62 = vld [vmem:[#allocation2 + $0x4] sm:$0x1] }
 0x3dd   : > { %v2671_v55 = vsel %vm941_vm6, %v2670_v58, %v5063_v43  ;;  %v2749_v43 = vsel %vm941_vm6, %v2748_v47, %v5084_v56  ;;  %v1181_v56 = vld [vmem:[#allocation2 + $0x4a] sm:$0x1]  ;;  %v5285_v20 = vsel %vm960_vm8, %v2683_v12, %v5103_v3  ;;  %2639 = vst.msk [vmem:[#allocation3 + $0x28] sm:$0xf0] %vm965_vm11, %v5281_v53  ;;  %v2713_v3 = vsel %vm957_vm5, %v2712_v38, %v2711_v52 }
 0x3de   : > { %v2673_v15 = vsel %vm944_vm7, %v2672_v39, %v2671_v55  ;;  %v2751_v50 = vsel %vm944_vm7, %v2750_v6, %v2749_v43  ;;  %v1191_v33 = vrot.slane %v1181_v56, 1  ;;  %v5301_v34 = vsel %vm960_vm8, %v2714_v28, %v2713_v3  ;;  %v1220_v39 = vld [vmem:[#allocation2 + $0x1b] sm:$0x1]  ;;  %v1262_v55 = vld [vmem:[#allocation2 + $0x34] sm:$0x1] }
 0x3df   : > { %1123 = vrot.lane.b32.xlu1 %v5184_v37, %s6887_s29  ;;  %1119 = vrot.lane.b32.xlu0 %v1118_v36, %s6889_s12  ;;  %v5290_v21 = vsel %vm947_vm9, %v2674_v14, %v2673_v15  ;;  %2717 = vst.msk [vmem:[#allocation3 + $0x78] sm:$0xf0] %vm965_vm11, %v5301_v34  ;;  %v1201_v58 = vrot.slane %v1181_v56, 5  ;;  %v1238_v40 = vrot.slane %v1220_v39, 3  ;;  %v1227_v42 = vrot.slane %v1220_v39, 7  ;;  %s6891_s29 = smov 95  }
 0x3e0   : > { %2677 = vst.msk [vmem:[#allocation3 + $0x58] sm:$0xf] %vm950_vm10, %v5290_v21  ;;  %v1192_v46 = vsel %vm960_vm8, %v1191_v33, %v1190_v41  ;;  %v1240_v47 = vrot.slane %v1221_v35, 2  ;;  %v1263_v15 = vld [vmem:[#allocation2 + $0x4c] sm:$0x1]  ;;  %v1269_v38 = vrot.slane %v1261_v0, 3 }
 0x3e1   : > { %v1202_v27 = vsel %vm947_vm9, %v1201_v58, %v1200_v61  ;;  %v1228_v45 = vsel %vm941_vm6, %v1227_v42, %v1219_v63  ;;  %v1271_v6 = vrot.slane %v1262_v55, 2  ;;  %v1268_v7 = vrot.slane %v1260_v62, 4  ;;  %v1303_v14 = vld [vmem:[#allocation2 + $0x35] sm:$0x1]  ;;  %v1301_v56 = vld [vmem:[#allocation2 + $0x5] sm:$0x1] }
 0x3e2   : > { %v1273_v22 = vrot.slane %v1263_v15, 1  ;;  %v1279_v52 = vrot.slane %v1261_v0, 7  ;;  %v1283_v10 = vrot.slane %v1263_v15, 5  ;;  %v1311_v31 = vrot.slane %v1303_v14, 6  ;;  %v1344_v61 = vld [vmem:[#allocation2 + $0x32] sm:$0x1] }
 0x3e3   : > { %1131 = vrot.lane.b32.xlu1 %v5184_v37, %s6883_s14  ;;  %1127 = vrot.lane.b32.xlu0 %v1118_v36, %s6885_s28  ;;  %v1160_v37 = vsel %vm960_vm8, %v1159_v48, %v1158_v25  ;;  %v5308_v36 = vsel %vm947_vm9, %v2752_v30, %v2751_v50  ;;  %v1229_v25 = vrot.slane %v1221_v35, 6  ;;  %v1237_v48 = vrot.slane %v1219_v63, 4  ;;  %v1345_v39 = vld [vmem:[#allocation2 + $0x4a] sm:$0x1]  ;;  %v1387_v0 = vld [vmem:[#allocation2 + $0x33] sm:$0x1] }
 0x3e4   : > { %2755 = vst.msk [vmem:[#allocation3 + $0xa8] sm:$0xf] %vm950_vm10, %v5308_v36  ;;  %v1270_v26 = vsel %vm954_vm4, %v1269_v38, %v1268_v7  ;;  %v1280_v12 = vsel %vm941_vm6, %v1279_v52, %v1260_v62  ;;  %v1322_v30 = vrot.slane %v1303_v14, 2  ;;  %v1319_v3 = vrot.slane %v1301_v56, 4  ;;  %s6909_s14 = smov 94   ;;  %s6907_s28 = smov 92  }
 0x3e5   : > { %v1239_v17 = vsel %vm954_vm4, %v1238_v40, %v1237_v48  ;;  %v1230_v4 = vsel %vm944_vm7, %v1229_v25, %v1228_v45  ;;  %v1272_v43 = vsel %vm957_vm5, %v1271_v6, %v1270_v26  ;;  %v1324_v50 = vrot.slane %v1304_v23, 1  ;;  %s6897_s12 = smov 93  }
 0x3e6   : > { %v1241_v51 = vsel %vm957_vm5, %v1240_v47, %v1239_v17  ;;  %v1232_v5 = vsel %vm947_vm9, %v1231_v57, %v1230_v4  ;;  %v1274_v9 = vsel %vm960_vm8, %v1273_v22, %v1272_v43  ;;  %v1313_v33 = vrot.slane %v1304_v23, 5  ;;  %v1426_v23 = vld [vmem:[#allocation2 + $0x4] sm:$0x1] }
 0x3e7   : > { %1161 = vrot.lane.b32.xlu1 %v1160_v37, %s6879_s15  ;;  %1149 = vrot.lane.b32.xlu0 %v1148_v13, %s6881_s16  ;;  %v1243_v2 = vsel %vm960_vm8, %v1242_v54, %v1241_v51  ;;  %v1352_v35 = vrot.slane %v1344_v61, 6  ;;  %v1354_v63 = vrot.slane %v1345_v39, 5  ;;  %v1364_v25 = vrot.slane %v1344_v61, 2  ;;  %v1386_v51 = vld [vmem:[#allocation2 + $0x1b] sm:$0x1] }
 0x3e8   : > { %v1361_v54 = vrot.slane %v1342_v16, 4  ;;  %v1366_v57 = vrot.slane %v1345_v39, 1  ;;  %v1394_v62 = vrot.slane %v1386_v51, 3  ;;  %v1406_v15 = vrot.slane %v1387_v0, 6 }
 0x3e9   : > { %v1396_v38 = vrot.slane %v1387_v0, 2 }
 0x3eb   : > { %1170 = vrot.lane.b32.xlu1 %v1160_v37, %s6875_s8  ;;  %1166 = vrot.lane.b32.xlu0 %v1148_v13, %s6877_s7  ;;  %v1281_v37 = vrot.slane %v1262_v55, 6  ;;  %v1404_v55 = vrot.slane %v1386_v51, 7  ;;  %v1509_v51 = vld [vmem:[#allocation2 + $0x1e] sm:$0x1] }
 0x3ed   : > { %v1282_v24 = vsel %vm944_vm7, %v1281_v37, %v1280_v12 }
 0x3ee   : > { %v1284_v32 = vsel %vm947_vm9, %v1283_v10, %v1282_v24  ;;  %v1428_v24 = vld [vmem:[#allocation2 + $0x34] sm:$0x1] }
 0x3ef   : > { %1193 = vrot.lane.b32.xlu1 %v1192_v46, %s6881_s16  ;;  %1174 = vrot.lane.b32.xlu0 %v1148_v13, %s6873_s9  ;;  %v1302_v13 = vld [vmem:[#allocation2 + $0x1d] sm:$0x1]  ;;  %v1436_v14 = vrot.slane %v1428_v24, 6 }
 0x3f0   : > { %v1320_v28 = vrot.slane %v1302_v13, 3  ;;  %v1309_v29 = vrot.slane %v1302_v13, 7  ;;  %v1429_v13 = vld [vmem:[#allocation2 + $0x4c] sm:$0x1] }
 0x3f2   : > { %v1321_v8 = vsel %vm954_vm4, %v1320_v28, %v1319_v3  ;;  %v1310_v11 = vsel %vm941_vm6, %v1309_v29, %v1301_v56  ;;  %v1438_v56 = vrot.slane %v1429_v13, 5 }
 0x3f3   : > { %1207 = vrot.lane.b32.xlu1 %v1192_v46, %s6877_s7  ;;  %1203 = vrot.lane.b32.xlu0 %v1202_v27, %s6879_s15  ;;  %v1323_v41 = vsel %vm957_vm5, %v1322_v30, %v1321_v8  ;;  %v1312_v44 = vsel %vm944_vm7, %v1311_v31, %v1310_v11  ;;  %v1447_v31 = vrot.slane %v1428_v24, 2 }
 0x3f4   : > { %v1325_v58 = vsel %vm960_vm8, %v1324_v50, %v1323_v41  ;;  %v1314_v49 = vsel %vm947_vm9, %v1313_v33, %v1312_v44  ;;  %v1444_v50 = vrot.slane %v1426_v23, 4  ;;  %v1449_v33 = vrot.slane %v1429_v13, 1  ;;  %v1468_v41 = vld [vmem:[#allocation2 + $0x1d] sm:$0x1] }
 0x3f5   : > { %v1486_v61 = vrot.slane %v1468_v41, 7  ;;  %v1476_v39 = vrot.slane %v1468_v41, 3 }
 0x3f7   : > { %1215 = vrot.lane.b32.xlu1 %v1192_v46, %s6873_s9  ;;  %1211 = vrot.lane.b32.xlu0 %v1202_v27, %s6875_s8  ;;  %v1343_v46 = vld [vmem:[#allocation2 + $0x1a] sm:$0x1] }
 0x3f8   : > { %v1350_v27 = vrot.slane %v1343_v46, 7  ;;  %v1362_v42 = vrot.slane %v1343_v46, 3  ;;  %v1469_v46 = vld [vmem:[#allocation2 + $0x35] sm:$0x1] }
 0x3fa   : > { %v1351_v40 = vsel %vm941_vm6, %v1350_v27, %v1342_v16  ;;  %v1363_v17 = vsel %vm954_vm4, %v1362_v42, %v1361_v54  ;;  %v1478_v16 = vrot.slane %v1469_v46, 2 }
 0x3fb   : > { %1244 = vrot.lane.b32.xlu1 %v1243_v2, %s6879_s15  ;;  %1233 = vrot.lane.b32.xlu0 %v1232_v5, %s6881_s16  ;;  %v1353_v47 = vsel %vm944_vm7, %v1352_v35, %v1351_v40  ;;  %v1365_v45 = vsel %vm957_vm5, %v1364_v25, %v1363_v17 }
 0x3fc   : > { %v1355_v48 = vsel %vm947_vm9, %v1354_v63, %v1353_v47  ;;  %v1367_v4 = vsel %vm960_vm8, %v1366_v57, %v1365_v45  ;;  %v1488_v63 = vrot.slane %v1469_v46, 6 }
 0x3ff   : > { %1252 = vrot.lane.b32.xlu1 %v1243_v2, %s6875_s8  ;;  %1248 = vrot.lane.b32.xlu0 %v1232_v5, %s6877_s7  ;;  %v1385_v2 = vld [vmem:[#allocation2 + $0x3] sm:$0x1] }
 0x400   : > { %v1393_v6 = vrot.slane %v1385_v2, 4  ;;  %v1405_v26 = vsel %vm941_vm6, %v1404_v55, %v1385_v2  ;;  %v1510_v2 = vld [vmem:[#allocation2 + $0x36] sm:$0x1]  ;;  %v1516_v55 = vrot.slane %v1509_v51, 7 }
 0x401   : > { %v1407_v43 = vsel %vm944_vm7, %v1406_v15, %v1405_v26  ;;  %v1527_v26 = vrot.slane %v1509_v51, 3 }
 0x402   : > { %v1395_v52 = vsel %vm954_vm4, %v1394_v62, %v1393_v6 }
 0x403   : > { %1275 = vrot.lane.b32.xlu1 %v1274_v9, %s6881_s16  ;;  %1256 = vrot.lane.b32.xlu0 %v1232_v5, %s6873_s9  ;;  %v1388_v5 = vld [vmem:[#allocation2 + $0x4b] sm:$0x1]  ;;  %v1397_v37 = vsel %vm957_vm5, %v1396_v38, %v1395_v52  ;;  %v1518_v38 = vrot.slane %v1510_v2, 6 }
 0x404   : > { %v1408_v7 = vrot.slane %v1388_v5, 5  ;;  %v1398_v22 = vrot.slane %v1388_v5, 1  ;;  %v1511_v5 = vld [vmem:[#allocation2 + $0x4e] sm:$0x1] }
 0x405   : > { %v1520_v6 = vrot.slane %v1511_v5, 5  ;;  %v1531_v24 = vrot.slane %v1511_v5, 1 }
 0x406   : > { %v1409_v10 = vsel %vm947_vm9, %v1408_v7, %v1407_v43  ;;  %v1399_v12 = vsel %vm960_vm8, %v1398_v22, %v1397_v37  ;;  %v1508_v7 = vld [vmem:[#allocation2 + $0x6] sm:$0x1] }
 0x407   : > { %1289 = vrot.lane.b32.xlu1 %v1274_v9, %s6877_s7  ;;  %1285 = vrot.lane.b32.xlu0 %v1284_v32, %s6879_s15  ;;  %v1517_v22 = vsel %vm941_vm6, %v1516_v55, %v1508_v7 }
 0x408   : > { %v1519_v37 = vsel %vm944_vm7, %v1518_v38, %v1517_v22 }
 0x40b   : > { %1297 = vrot.lane.b32.xlu1 %v1274_v9, %s6873_s9  ;;  %1293 = vrot.lane.b32.xlu0 %v1284_v32, %s6875_s8  ;;  %v1427_v9 = vld [vmem:[#allocation2 + $0x1c] sm:$0x1] }
 0x40c   : > { %v1434_v32 = vrot.slane %v1427_v9, 7  ;;  %v1445_v29 = vrot.slane %v1427_v9, 3  ;;  %v1529_v9 = vrot.slane %v1510_v2, 2 }
 0x40e   : > { %v1435_v28 = vsel %vm941_vm6, %v1434_v32, %v1426_v23  ;;  %v1446_v8 = vsel %vm954_vm4, %v1445_v29, %v1444_v50  ;;  %v1550_v23 = vld [vmem:[#allocation2 + $0x1b] sm:$0x1]  ;;  %v1551_v29 = vld [vmem:[#allocation2 + $0x33] sm:$0x1] }
 0x40f   : > { %1326 = vrot.lane.b32.xlu1 %v1325_v58, %s6879_s15  ;;  %1315 = vrot.lane.b32.xlu0 %v1314_v49, %s6881_s16  ;;  %v1437_v30 = vsel %vm944_vm7, %v1436_v14, %v1435_v28  ;;  %v1448_v11 = vsel %vm957_vm5, %v1447_v31, %v1446_v8  ;;  %v1552_v31 = vld [vmem:[#allocation2 + $0x4b] sm:$0x1]  ;;  %v1557_v50 = vrot.slane %v1550_v23, 7  ;;  %v1559_v41 = vrot.slane %v1551_v29, 6  ;;  %s6901_s15 = smov 76   ;;  %s6918_s16 = smov 96  }
 0x410   : > { %v1439_v3 = vsel %vm947_vm9, %v1438_v56, %v1437_v30  ;;  %v1450_v44 = vsel %vm960_vm8, %v1449_v33, %v1448_v11  ;;  %v1549_v30 = vld [vmem:[#allocation2 + $0x3] sm:$0x1]  ;;  %v1571_v11 = vrot.slane %v1551_v29, 2  ;;  %v1573_v46 = vrot.slane %v1552_v31, 1 }
 0x413   : > { %1334 = vrot.lane.b32.xlu1 %v1325_v58, %s6875_s8  ;;  %1330 = vrot.lane.b32.xlu0 %v1314_v49, %s6877_s7  ;;  %v1467_v58 = vld [vmem:[#allocation2 + $0x5] sm:$0x1]  ;;  %s6929_s8 = smov 80   ;;  %s6925_s7 = smov 78  }
 0x414   : > { %v1475_v40 = vrot.slane %v1467_v58, 4  ;;  %v1487_v25 = vsel %vm941_vm6, %v1486_v61, %v1467_v58  ;;  %v1561_v58 = vrot.slane %v1552_v31, 5  ;;  %v1558_v61 = vsel %vm941_vm6, %v1557_v50, %v1549_v30 }
 0x415   : > { %v1489_v17 = vsel %vm944_vm7, %v1488_v63, %v1487_v25  ;;  %v1560_v63 = vsel %vm944_vm7, %v1559_v41, %v1558_v61  ;;  %v1592_v25 = vld [vmem:[#allocation2 + $0x4] sm:$0x1]  ;;  %v1675_v41 = vld [vmem:[#allocation2 + $0x1e] sm:$0x1]  ;;  %v1677_v61 = vld [vmem:[#allocation2 + $0x4e] sm:$0x1] }
 0x416   : > { %v1600_v51 = vrot.slane %v1592_v25, 4 }
 0x417   : > { %1356 = vrot.lane.b32.xlu1 %v1355_v48, %s6871_s10  ;;  %1338 = vrot.lane.b32.xlu0 %v1314_v49, %s6873_s9  ;;  %v1470_v49 = vld [vmem:[#allocation2 + $0x4d] sm:$0x1]  ;;  %s6923_s9 = smov 77  }
 0x418   : > { %v1490_v42 = vrot.slane %v1470_v49, 5  ;;  %v1480_v47 = vrot.slane %v1470_v49, 1 }
 0x41b   : > { %1373 = vrot.lane.b32.xlu1 %v1355_v48, %s6857_s11  ;;  %1368 = vrot.lane.b32.xlu0 %v1367_v4, %s6859_s13 }
 0x41f   : > { %1381 = vrot.lane.b32.xlu1 %v1355_v48, %s6853_s17  ;;  %1377 = vrot.lane.b32.xlu0 %v1367_v4, %s6855_s25  ;;  %v1477_v48 = vsel %vm954_vm4, %v1476_v39, %v1475_v40  ;;  %v1491_v4 = vsel %vm947_vm9, %v1490_v42, %v1489_v17  ;;  %v1562_v42 = vsel %vm947_vm9, %v1561_v58, %v1560_v63  ;;  %v1676_v58 = vld [vmem:[#allocation2 + $0x36] sm:$0x1] }
 0x420   : > { %v1479_v45 = vsel %vm957_vm5, %v1478_v16, %v1477_v48  ;;  %v1593_v16 = vld [vmem:[#allocation2 + $0x1c] sm:$0x1]  ;;  %v1595_v48 = vld [vmem:[#allocation2 + $0x4c] sm:$0x1]  ;;  %v1685_v63 = vrot.slane %v1676_v58, 2 }
 0x421   : > { %v1481_v0 = vsel %vm960_vm8, %v1480_v47, %v1479_v45  ;;  %v1594_v47 = vld [vmem:[#allocation2 + $0x34] sm:$0x1]  ;;  %v1611_v2 = vrot.slane %v1593_v16, 7 }
 0x422   : > { %v1603_v45 = vrot.slane %v1594_v47, 2 }
 0x423   : > { %1410 = vrot.lane.b32.xlu1 %v1409_v10, %s6859_s13  ;;  %1400 = vrot.lane.b32.xlu0 %v1399_v12, %s6871_s10 }
 0x427   : > { %1418 = vrot.lane.b32.xlu1 %v1409_v10, %s6855_s25  ;;  %1414 = vrot.lane.b32.xlu0 %v1399_v12, %s6857_s11  ;;  %v1521_v10 = vsel %vm947_vm9, %v1520_v6, %v1519_v37  ;;  %v1615_v6 = vrot.slane %v1595_v48, 5 }
 0x42b   : > { %1440 = vrot.lane.b32.xlu1 %v1439_v3, %s6871_s10  ;;  %1422 = vrot.lane.b32.xlu0 %v1399_v12, %s6853_s17  ;;  %v1526_v12 = vrot.slane %v1508_v7, 4  ;;  %v1612_v7 = vsel %vm941_vm6, %v1611_v2, %v1592_v25 }
 0x42d   : > { %v1528_v13 = vsel %vm954_vm4, %v1527_v26, %v1526_v12  ;;  %v1636_v12 = vld [vmem:[#allocation2 + $0x4d] sm:$0x1] }
 0x42e   : > { %v1530_v56 = vsel %vm957_vm5, %v1529_v9, %v1528_v13  ;;  %v1635_v9 = vld [vmem:[#allocation2 + $0x35] sm:$0x1]  ;;  %v1656_v29 = vrot.slane %v1636_v12, 1 }
 0x42f   : > { %1455 = vrot.lane.b32.xlu1 %v1439_v3, %s6857_s11  ;;  %1451 = vrot.lane.b32.xlu0 %v1450_v44, %s6859_s13  ;;  %v1532_v28 = vsel %vm960_vm8, %v1531_v24, %v1530_v56  ;;  %v1654_v56 = vrot.slane %v1635_v9, 2 }
 0x431   : > { %v972_v27 = vpop.permute.xlu1 %971  ;;  %v963_v35 = vpop.permute.xlu0 %962 }
 0x432   : > { %974 = vst.msk [vmem:[#allocation3 + $0x10] sm:$0xf0] %vm965_vm11, %v972_v27  ;;  %966 = vst.msk [vmem:[#allocation3] sm:$0xf0] %vm965_vm11, %v963_v35 }
 0x433   : > { %1463 = vrot.lane.b32.xlu1 %v1439_v3, %s6853_s17  ;;  %1459 = vrot.lane.b32.xlu0 %v1450_v44, %s6855_s25  ;;  %v1569_v3 = vrot.slane %v1550_v23, 3  ;;  %v1568_v44 = vrot.slane %v1549_v30, 4  ;;  %v1643_v23 = vrot.slane %v1635_v9, 6  ;;  %v1645_v30 = vrot.slane %v1636_v12, 5 }
 0x435   : > { %v976_v54 = vpop.permute.xlu1 %975  ;;  %v968_v57 = vpop.permute.xlu0 %967  ;;  %v1570_v49 = vsel %vm954_vm4, %v1569_v3, %v1568_v44 }
 0x436   : > { %978 = vst.msk [vmem:[#allocation3 + $0x20] sm:$0xf] %vm950_vm10, %v976_v54  ;;  %970 = vst.msk [vmem:[#allocation3 + $0x10] sm:$0xf] %vm950_vm10, %v968_v57  ;;  %v1572_v35 = vsel %vm957_vm5, %v1571_v11, %v1570_v49  ;;  %v1601_v54 = vrot.slane %v1593_v16, 3 }
 0x437   : > { %1492 = vrot.lane.b32.xlu1 %v1491_v4, %s6859_s13  ;;  %1482 = vrot.lane.b32.xlu0 %v1481_v0, %s6871_s10  ;;  %v1574_v40 = vsel %vm960_vm8, %v1573_v46, %v1572_v35  ;;  %v1674_v49 = vld [vmem:[#allocation2 + $0x6] sm:$0x1] }
 0x438   : > { %v1682_v16 = vrot.slane %v1674_v49, 4 }
 0x439   : > { %v1007_v62 = vpop.permute.xlu1 %1006  ;;  %v1003_v15 = vpop.permute.xlu0 %1002 }
 0x43a   : > { %1009 = vst.msk [vmem:[#allocation3 + $0x30] sm:$0xf0] %vm965_vm11, %v1007_v62 }
 0x43b   : > { %1005 = vst.msk [vmem:[#allocation3 + $0x30] sm:$0xf] %vm950_vm10, %v1003_v15  ;;  %1500 = vrot.lane.b32.xlu1 %v1491_v4, %s6855_s25  ;;  %1496 = vrot.lane.b32.xlu0 %v1481_v0, %s6857_s11  ;;  %v1605_v4 = vrot.slane %v1595_v48, 1  ;;  %v1613_v15 = vrot.slane %v1594_v47, 6  ;;  %v1693_v47 = vrot.slane %v1675_v41, 7 }
 0x43d   : > { %v1015_v52 = vpop.permute.xlu1 %1014  ;;  %v1011_v43 = vpop.permute.xlu0 %1010 }
 0x43e   : > { %1017 = vst.msk [vmem:[#allocation3 + $0x40] sm:$0xf0] %vm965_vm11, %v1015_v52  ;;  %v1614_v52 = vsel %vm944_vm7, %v1613_v15, %v1612_v7  ;;  %v1715_v15 = vld [vmem:[#allocation2 + $0x7] sm:$0x1] }
 0x43f   : > { %1013 = vst.msk [vmem:[#allocation3 + $0x40] sm:$0xf] %vm950_vm10, %v1011_v43  ;;  %1522 = vrot.lane.b32.xlu1 %v1521_v10, %s6871_s10  ;;  %1504 = vrot.lane.b32.xlu0 %v1481_v0, %s6853_s17  ;;  %v1602_v0 = vsel %vm954_vm4, %v1601_v54, %v1600_v51  ;;  %v1634_v43 = vld [vmem:[#allocation2 + $0x1d] sm:$0x1]  ;;  %v1616_v37 = vsel %vm947_vm9, %v1615_v6, %v1614_v52  ;;  %s6927_s10 = smov 79  }
 0x440   : > { %v1604_v62 = vsel %vm957_vm5, %v1603_v45, %v1602_v0  ;;  %v1652_v24 = vrot.slane %v1634_v43, 3  ;;  %v1641_v13 = vrot.slane %v1634_v43, 7  ;;  %v1697_v45 = vrot.slane %v1677_v61, 5 }
 0x441   : > { %v1046_v32 = vpop.permute.xlu1 %1045  ;;  %v1042_v14 = vpop.permute.xlu0 %1041  ;;  %v1606_v38 = vsel %vm960_vm8, %v1605_v4, %v1604_v62  ;;  %v1694_v51 = vsel %vm941_vm6, %v1693_v47, %v1674_v49  ;;  %v1717_v62 = vld [vmem:[#allocation2 + $0x37] sm:$0x1] }
 0x442   : > { %1048 = vst.msk [vmem:[#allocation3 + $0x60] sm:$0xf] %vm950_vm10, %v1046_v32  ;;  %v1736_v52 = vrot.slane %v1717_v62, 2  ;;  %v1725_v43 = vrot.slane %v1717_v62, 6 }
 0x443   : > { %1044 = vst.msk [vmem:[#allocation3 + $0x50] sm:$0xf0] %vm965_vm11, %v1042_v14  ;;  %1537 = vrot.lane.b32.xlu1 %v1521_v10, %s6857_s11  ;;  %1533 = vrot.lane.b32.xlu0 %v1532_v28, %s6859_s13  ;;  %s6863_s11 = smov 46   ;;  %s6867_s13 = smov 44  }
 0x445   : > { %v1054_v33 = vpop.permute.xlu1 %1053  ;;  %v1050_v8 = vpop.permute.xlu0 %1049 }
 0x446   : > { %1056 = vst.msk [vmem:[#allocation3 + $0x70] sm:$0xf] %vm950_vm10, %v1054_v33 }
 0x447   : > { %1052 = vst.msk [vmem:[#allocation3 + $0x60] sm:$0xf0] %vm965_vm11, %v1050_v8  ;;  %1545 = vrot.lane.b32.xlu1 %v1521_v10, %s6853_s17  ;;  %1541 = vrot.lane.b32.xlu0 %v1532_v28, %s6855_s25  ;;  %s6869_s17 = smov 48   ;;  %s6861_s25 = smov 45   ;;  %v1633_v10 = vld [vmem:[#allocation2 + $0x5] sm:$0x1] }
 0x448   : > { %v1651_v28 = vrot.slane %v1633_v10, 4  ;;  %v1642_v3 = vsel %vm941_vm6, %v1641_v13, %v1633_v10 }
 0x449   : > { %v1085_v39 = vpop.permute.xlu1 %1084  ;;  %v1081_v27 = vpop.permute.xlu0 %1080  ;;  %v1644_v11 = vsel %vm944_vm7, %v1643_v23, %v1642_v3  ;;  %v1757_v23 = vld [vmem:[#allocation2 + $0x1c] sm:$0x1] }
 0x44a   : > { %1087 = vst.msk [vmem:[#allocation3 + $0x80] sm:$0xf0] %vm965_vm11, %v1085_v39  ;;  %v1653_v31 = vsel %vm954_vm4, %v1652_v24, %v1651_v28  ;;  %v1646_v46 = vsel %vm947_vm9, %v1645_v30, %v1644_v11  ;;  %v1683_v39 = vrot.slane %v1675_v41, 3  ;;  %v1758_v30 = vld [vmem:[#allocation2 + $0x34] sm:$0x1]  ;;  %v1764_v3 = vrot.slane %v1757_v23, 7 }
 0x44b   : > { %1083 = vst.msk [vmem:[#allocation3 + $0x80] sm:$0xf] %vm950_vm10, %v1081_v27  ;;  %1575 = vrot.lane.b32.xlu1 %v1574_v40, %s6865_s26  ;;  %1563 = vrot.lane.b32.xlu0 %v1562_v42, %s6869_s17  ;;  %v1655_v8 = vsel %vm957_vm5, %v1654_v56, %v1653_v31  ;;  %v1759_v31 = vld [vmem:[#allocation2 + $0x4c] sm:$0x1]  ;;  %v1756_v41 = vld [vmem:[#allocation2 + $0x4] sm:$0x1] }
 0x44c   : > { %v1657_v44 = vsel %vm960_vm8, %v1656_v29, %v1655_v8  ;;  %v1766_v8 = vrot.slane %v1758_v30, 6  ;;  %v1768_v11 = vrot.slane %v1759_v31, 5 }
 0x44d   : > { %v1093_v57 = vpop.permute.xlu1 %1092  ;;  %v1089_v17 = vpop.permute.xlu0 %1088 }
 0x44e   : > { %1095 = vst.msk [vmem:[#allocation3 + $0x90] sm:$0xf0] %vm965_vm11, %v1093_v57  ;;  %v1695_v57 = vrot.slane %v1676_v58, 6 }
 0x44f   : > { %1091 = vst.msk [vmem:[#allocation3 + $0x90] sm:$0xf] %vm950_vm10, %v1089_v17  ;;  %1584 = vrot.lane.b32.xlu1 %v1574_v40, %s6861_s25  ;;  %1580 = vrot.lane.b32.xlu0 %v1562_v42, %s6863_s11  ;;  %v1687_v40 = vrot.slane %v1677_v61, 1 }
 0x450   : > { %v1696_v2 = vsel %vm944_vm7, %v1695_v57, %v1694_v51  ;;  %v1799_v57 = vld [vmem:[#allocation2 + $0x5] sm:$0x1] }
 0x451   : > { %v1124_v5 = vpop.permute.xlu1 %1123  ;;  %v1120_v55 = vpop.permute.xlu0 %1119 }
 0x452   : > { %1126 = vst.msk [vmem:[#allocation3 + $0xb0] sm:$0xf] %vm950_vm10, %v1124_v5  ;;  %v1716_v5 = vld [vmem:[#allocation2 + $0x1f] sm:$0x1] }
 0x453   : > { %1122 = vst.msk [vmem:[#allocation3 + $0xa0] sm:$0xf0] %vm965_vm11, %v1120_v55  ;;  %1607 = vrot.lane.b32.xlu1 %v1606_v38, %s6869_s17  ;;  %1588 = vrot.lane.b32.xlu0 %v1562_v42, %s6867_s13  ;;  %v1684_v42 = vsel %vm954_vm4, %v1683_v39, %v1682_v16  ;;  %v1698_v55 = vsel %vm947_vm9, %v1697_v45, %v1696_v2  ;;  %v1734_v6 = vrot.slane %v1716_v5, 3  ;;  %v1723_v7 = vrot.slane %v1716_v5, 7 }
 0x454   : > { %v1686_v54 = vsel %vm957_vm5, %v1685_v63, %v1684_v42  ;;  %v1778_v39 = vrot.slane %v1758_v30, 2  ;;  %v1780_v63 = vrot.slane %v1759_v31, 1 }
 0x455   : > { %v1132_v22 = vpop.permute.xlu1 %1131  ;;  %v1128_v26 = vpop.permute.xlu0 %1127  ;;  %v1688_v17 = vsel %vm960_vm8, %v1687_v40, %v1686_v54  ;;  %v1724_v24 = vsel %vm941_vm6, %v1723_v7, %v1715_v15  ;;  %v1801_v54 = vld [vmem:[#allocation2 + $0x35] sm:$0x1] }
 0x456   : > { %1134 = vst.msk [vmem:[#allocation3 + $0xc0] sm:$0xf] %vm950_vm10, %v1132_v22  ;;  %v1726_v56 = vsel %vm944_vm7, %v1725_v43, %v1724_v24  ;;  %v1820_v2 = vrot.slane %v1801_v54, 6  ;;  %v1810_v5 = vrot.slane %v1801_v54, 2  ;;  %v1841_v43 = vld [vmem:[#allocation2 + $0x1e] sm:$0x1] }
 0x457   : > { %1130 = vst.msk [vmem:[#allocation3 + $0xb0] sm:$0xf0] %vm965_vm11, %v1128_v26  ;;  %1621 = vrot.lane.b32.xlu1 %v1606_v38, %s6863_s11  ;;  %1617 = vrot.lane.b32.xlu0 %v1616_v37, %s6865_s26  ;;  %v1848_v24 = vrot.slane %v1841_v43, 7 }
 0x459   : > { %v1162_v32 = vpop.permute.xlu1 %1161  ;;  %v1150_v14 = vpop.permute.xlu0 %1149 }
 0x45a   : > { %1165 = vst.msk [vmem:[#allocation3] sm:$0xf0] %vm6915_vm12, %v1162_v32 }
 0x45b   : > { %1153 = vst.msk [vmem:[#allocation3] sm:$0xf] %vm6922_vm13, %v1150_v14  ;;  %1629 = vrot.lane.b32.xlu1 %v1606_v38, %s6867_s13  ;;  %1625 = vrot.lane.b32.xlu0 %v1616_v37, %s6861_s25  ;;  %v1718_v38 = vld [vmem:[#allocation2 + $0x4f] sm:$0x1]  ;;  %v1733_v37 = vrot.slane %v1715_v15, 4 }
 0x45c   : > { %v1738_v9 = vrot.slane %v1718_v38, 1  ;;  %v1727_v10 = vrot.slane %v1718_v38, 5 }
 0x45d   : > { %v1171_v50 = vpop.permute.xlu1 %1170  ;;  %v1167_v33 = vpop.permute.xlu0 %1166  ;;  %v1735_v12 = vsel %vm954_vm4, %v1734_v6, %v1733_v37 }
 0x45e   : > { %1173 = vst.msk [vmem:[#allocation3 + $0x10] sm:$0xf0] %vm6915_vm12, %v1171_v50  ;;  %v1737_v14 = vsel %vm957_vm5, %v1736_v52, %v1735_v12  ;;  %v1728_v29 = vsel %vm947_vm9, %v1727_v10, %v1726_v56  ;;  %v1842_v10 = vld [vmem:[#allocation2 + $0x36] sm:$0x1]  ;;  %v1843_v12 = vld [vmem:[#allocation2 + $0x4e] sm:$0x1] }
 0x45f   : > { %1169 = vst.msk [vmem:[#allocation3 + $0x10] sm:$0xf] %vm6922_vm13, %v1167_v33  ;;  %1658 = vrot.lane.b32.xlu1 %v1657_v44, %s6865_s26  ;;  %1647 = vrot.lane.b32.xlu0 %v1646_v46, %s6869_s17  ;;  %v1739_v28 = vsel %vm960_vm8, %v1738_v9, %v1737_v14  ;;  %v1850_v14 = vrot.slane %v1842_v10, 6  ;;  %v1852_v56 = vrot.slane %v1843_v12, 5 }
 0x461   : > { %v1194_v27 = vpop.permute.xlu1 %1193  ;;  %v1175_v35 = vpop.permute.xlu0 %1174 }
 0x462   : > { %1196 = vst.msk [vmem:[#allocation3 + $0x20] sm:$0xf0] %vm6915_vm12, %v1194_v27 }
 0x463   : > { %1177 = vst.msk [vmem:[#allocation3 + $0x20] sm:$0xf] %vm6922_vm13, %v1175_v35  ;;  %1666 = vrot.lane.b32.xlu1 %v1657_v44, %s6861_s25  ;;  %1662 = vrot.lane.b32.xlu0 %v1646_v46, %s6863_s11  ;;  %v1765_v44 = vsel %vm941_vm6, %v1764_v3, %v1756_v41  ;;  %v1775_v35 = vrot.slane %v1756_v41, 4 }
 0x464   : > { %v1767_v61 = vsel %vm944_vm7, %v1766_v8, %v1765_v44 }
 0x465   : > { %v1208_v25 = vpop.permute.xlu1 %1207  ;;  %v1204_v48 = vpop.permute.xlu0 %1203  ;;  %v1769_v27 = vsel %vm947_vm9, %v1768_v11, %v1767_v61  ;;  %v1863_v11 = vrot.slane %v1843_v12, 1 }
 0x466   : > { %1210 = vst.msk [vmem:[#allocation3 + $0x30] sm:$0xf0] %vm6915_vm12, %v1208_v25  ;;  %v1800_v25 = vld [vmem:[#allocation2 + $0x1d] sm:$0x1] }
 0x467   : > { %1206 = vst.msk [vmem:[#allocation3 + $0x30] sm:$0xf] %vm6922_vm13, %v1204_v48  ;;  %1689 = vrot.lane.b32.xlu1 %v1688_v17, %s6869_s17  ;;  %1670 = vrot.lane.b32.xlu0 %v1646_v46, %s6867_s13  ;;  %v1776_v46 = vrot.slane %v1757_v23, 3  ;;  %v1818_v45 = vrot.slane %v1800_v25, 7  ;;  %v1808_v51 = vrot.slane %v1800_v25, 3 }
 0x468   : > { %v1840_v23 = vld [vmem:[#allocation2 + $0x6] sm:$0x1] }
 0x469   : > { %v1216_v4 = vpop.permute.xlu1 %1215  ;;  %v1212_v0 = vpop.permute.xlu0 %1211  ;;  %v1777_v16 = vsel %vm954_vm4, %v1776_v46, %v1775_v35  ;;  %v1819_v38 = vsel %vm941_vm6, %v1818_v45, %v1799_v57  ;;  %v1858_v8 = vrot.slane %v1840_v23, 4  ;;  %v1884_v35 = vld [vmem:[#allocation2 + $0x4f] sm:$0x1] }
 0x46a   : > { %1218 = vst.msk [vmem:[#allocation3 + $0x40] sm:$0xf0] %vm6915_vm12, %v1216_v4  ;;  %v1779_v47 = vsel %vm957_vm5, %v1778_v39, %v1777_v16  ;;  %v1883_v39 = vld [vmem:[#allocation2 + $0x37] sm:$0x1]  ;;  %v1904_v54 = vrot.slane %v1884_v35, 5 }
 0x46b   : > { %1214 = vst.msk [vmem:[#allocation3 + $0x40] sm:$0xf] %vm6922_vm13, %v1212_v0  ;;  %1703 = vrot.lane.b32.xlu1 %v1688_v17, %s6863_s11  ;;  %1699 = vrot.lane.b32.xlu0 %v1698_v55, %s6865_s26  ;;  %v1781_v48 = vsel %vm960_vm8, %v1780_v63, %v1779_v47  ;;  %v1902_v47 = vrot.slane %v1883_v39, 6  ;;  %v1892_v25 = vrot.slane %v1883_v39, 2 }
 0x46d   : > { %v1245_v22 = vpop.permute.xlu1 %1244  ;;  %v1234_v26 = vpop.permute.xlu0 %1233 }
 0x46e   : > { %1247 = vst.msk [vmem:[#allocation3 + $0x50] sm:$0xf0] %vm6915_vm12, %v1245_v22 }
 0x46f   : > { %1236 = vst.msk [vmem:[#allocation3 + $0x50] sm:$0xf] %vm6922_vm13, %v1234_v26  ;;  %1711 = vrot.lane.b32.xlu1 %v1688_v17, %s6867_s13  ;;  %1707 = vrot.lane.b32.xlu0 %v1698_v55, %s6861_s25  ;;  %v1802_v17 = vld [vmem:[#allocation2 + $0x4d] sm:$0x1]  ;;  %v1807_v55 = vrot.slane %v1799_v57, 4  ;;  %v1821_v26 = vsel %vm944_vm7, %v1820_v2, %v1819_v38  ;;  %v1894_v57 = vrot.slane %v1884_v35, 1 }
 0x470   : > { %v1822_v62 = vrot.slane %v1802_v17, 5  ;;  %v1812_v15 = vrot.slane %v1802_v17, 1  ;;  %v1963_v38 = vld [vmem:[#allocation2 + $0x5] sm:$0x1] }
 0x471   : > { %v1253_v13 = vpop.permute.xlu1 %1252  ;;  %v1249_v32 = vpop.permute.xlu0 %1248  ;;  %v1809_v6 = vsel %vm954_vm4, %v1808_v51, %v1807_v55 }
 0x472   : > { %1255 = vst.msk [vmem:[#allocation3 + $0x60] sm:$0xf0] %vm6915_vm12, %v1253_v13  ;;  %v1811_v52 = vsel %vm957_vm5, %v1810_v5, %v1809_v6  ;;  %v1823_v37 = vsel %vm947_vm9, %v1822_v62, %v1821_v26  ;;  %v1964_v5 = vld [vmem:[#allocation2 + $0x1d] sm:$0x1]  ;;  %v1966_v6 = vld [vmem:[#allocation2 + $0x4d] sm:$0x1] }
 0x473   : > { %1251 = vst.msk [vmem:[#allocation3 + $0x60] sm:$0xf] %vm6922_vm13, %v1249_v32  ;;  %1740 = vrot.lane.b32.xlu1 %v1739_v28, %s6865_s26  ;;  %1729 = vrot.lane.b32.xlu0 %v1728_v29, %s6869_s17  ;;  %s6935_s26 = smov 63   ;;  %s6931_s17 = smov 61   ;;  %v1813_v9 = vsel %vm960_vm8, %v1812_v15, %v1811_v52  ;;  %v1965_v15 = vld [vmem:[#allocation2 + $0x35] sm:$0x1] }
 0x474   : > { %v1985_v52 = vrot.slane %v1965_v15, 2 }
 0x475   : > { %v1276_v50 = vpop.permute.xlu1 %1275  ;;  %v1257_v33 = vpop.permute.xlu0 %1256 }
 0x476   : > { %1278 = vst.msk [vmem:[#allocation3 + $0x70] sm:$0xf0] %vm6915_vm12, %v1276_v50  ;;  %v1861_v50 = vrot.slane %v1842_v10, 2  ;;  %v1971_v10 = vrot.slane %v1964_v5, 7 }
 0x477   : > { %1259 = vst.msk [vmem:[#allocation3 + $0x70] sm:$0xf] %vm6922_vm13, %v1257_v33  ;;  %1748 = vrot.lane.b32.xlu1 %v1739_v28, %s6861_s25  ;;  %1744 = vrot.lane.b32.xlu0 %v1728_v29, %s6863_s11  ;;  %s6899_s25 = smov 64   ;;  %s6933_s11 = smov 62   ;;  %v1849_v28 = vsel %vm941_vm6, %v1848_v24, %v1840_v23  ;;  %v1975_v23 = vrot.slane %v1966_v6, 5 }
 0x478   : > { %v1851_v3 = vsel %vm944_vm7, %v1850_v14, %v1849_v28  ;;  %v2007_v14 = vld [vmem:[#allocation2 + $0x1e] sm:$0x1]  ;;  %v2008_v28 = vld [vmem:[#allocation2 + $0x36] sm:$0x1] }
 0x479   : > { %v1290_v58 = vpop.permute.xlu1 %1289  ;;  %v1286_v49 = vpop.permute.xlu0 %1285  ;;  %v1853_v33 = vsel %vm947_vm9, %v1852_v56, %v1851_v3  ;;  %v2015_v3 = vrot.slane %v2007_v14, 3  ;;  %v2025_v35 = vrot.slane %v2007_v14, 7 }
 0x47a   : > { %1292 = vst.msk [vmem:[#allocation3 + $0x80] sm:$0xf0] %vm6915_vm12, %v1290_v58 }
 0x47b   : > { %1288 = vst.msk [vmem:[#allocation3 + $0x80] sm:$0xf] %vm6922_vm13, %v1286_v49  ;;  %1770 = vrot.lane.b32.xlu1 %v1769_v27, %s6899_s25  ;;  %1752 = vrot.lane.b32.xlu0 %v1728_v29, %s6867_s13  ;;  %s6903_s13 = smov 60   ;;  %v1859_v29 = vrot.slane %v1841_v43, 3  ;;  %v1882_v49 = vld [vmem:[#allocation2 + $0x1f] sm:$0x1] }
 0x47c   : > { %v1900_v63 = vrot.slane %v1882_v49, 7  ;;  %v1890_v16 = vrot.slane %v1882_v49, 3  ;;  %v1982_v43 = vrot.slane %v1963_v38, 4 }
 0x47d   : > { %v1298_v40 = vpop.permute.xlu1 %1297  ;;  %v1294_v42 = vpop.permute.xlu0 %1293  ;;  %v1860_v41 = vsel %vm954_vm4, %v1859_v29, %v1858_v8  ;;  %v2006_v29 = vld [vmem:[#allocation2 + $0x6] sm:$0x1] }
 0x47e   : > { %1300 = vst.msk [vmem:[#allocation3 + $0x90] sm:$0xf0] %vm6915_vm12, %v1298_v40  ;;  %v1862_v58 = vsel %vm957_vm5, %v1861_v50, %v1860_v41 }
 0x47f   : > { %1296 = vst.msk [vmem:[#allocation3 + $0x90] sm:$0xf] %vm6922_vm13, %v1294_v42  ;;  %1787 = vrot.lane.b32.xlu1 %v1769_v27, %s6933_s11  ;;  %1782 = vrot.lane.b32.xlu0 %v1781_v48, %s6935_s26  ;;  %v1864_v61 = vsel %vm960_vm8, %v1863_v11, %v1862_v58  ;;  %v2017_v11 = vrot.slane %v2008_v28, 2 }
 0x481   : > { %v1327_v4 = vpop.permute.xlu1 %1326  ;;  %v1316_v0 = vpop.permute.xlu0 %1315 }
 0x482   : > { %1329 = vst.msk [vmem:[#allocation3 + $0xa0] sm:$0xf0] %vm6915_vm12, %v1327_v4 }
 0x483   : > { %1318 = vst.msk [vmem:[#allocation3 + $0xa0] sm:$0xf] %vm6922_vm13, %v1316_v0  ;;  %1795 = vrot.lane.b32.xlu1 %v1769_v27, %s6903_s13  ;;  %1791 = vrot.lane.b32.xlu0 %v1781_v48, %s6931_s17  ;;  %v1881_v27 = vld [vmem:[#allocation2 + $0x7] sm:$0x1] }
 0x484   : > { %v1889_v48 = vrot.slane %v1881_v27, 4  ;;  %v1901_v17 = vsel %vm941_vm6, %v1900_v63, %v1881_v27 }
 0x485   : > { %v1335_v7 = vpop.permute.xlu1 %1334  ;;  %v1331_v22 = vpop.permute.xlu0 %1330  ;;  %v1903_v0 = vsel %vm944_vm7, %v1902_v47, %v1901_v17 }
 0x486   : > { %1337 = vst.msk [vmem:[#allocation3 + $0xb0] sm:$0xf0] %vm6915_vm12, %v1335_v7  ;;  %v1891_v45 = vsel %vm954_vm4, %v1890_v16, %v1889_v48  ;;  %v1905_v55 = vsel %vm947_vm9, %v1904_v54, %v1903_v0  ;;  %v1983_v7 = vrot.slane %v1964_v5, 3  ;;  %v2047_v48 = vld [vmem:[#allocation2 + $0x7] sm:$0x1]  ;;  %vm6952_vm12 = vcmask 1048452  }
 0x487   : > { %1333 = vst.msk [vmem:[#allocation3 + $0xb0] sm:$0xf] %vm6922_vm13, %v1331_v22  ;;  %1824 = vrot.lane.b32.xlu1 %v1823_v37, %s6935_s26  ;;  %1814 = vrot.lane.b32.xlu0 %v1813_v9, %s6899_s25  ;;  %v1893_v2 = vsel %vm957_vm5, %v1892_v25, %v1891_v45  ;;  %v2049_v25 = vld [vmem:[#allocation2 + $0x37] sm:$0x1]  ;;  %v2050_v54 = vld [vmem:[#allocation2 + $0x4f] sm:$0x1] }
 0x488   : > { %v1895_v62 = vsel %vm960_vm8, %v1894_v57, %v1893_v2  ;;  %v2026_v57 = vsel %vm941_vm6, %v2025_v35, %v2006_v29  ;;  %v2068_v0 = vrot.slane %v2049_v25, 2  ;;  %v2065_v5 = vrot.slane %v2047_v48, 4 }
 0x489   : > { %v1357_v13 = vpop.permute.xlu1 %1356  ;;  %v1339_v32 = vpop.permute.xlu0 %1338 }
 0x48a   : > { %1360 = vst.msk [vmem:[#allocation3] sm:$0xf] %vm6912_vm14, %v1357_v13 }
 0x48b   : > { %1341 = vst.msk [vmem:[#allocation3 + $0xc0] sm:$0xf] %vm6922_vm13, %v1339_v32  ;;  %1832 = vrot.lane.b32.xlu1 %v1823_v37, %s6931_s17  ;;  %1828 = vrot.lane.b32.xlu0 %v1813_v9, %s6933_s11  ;;  %v1987_v37 = vrot.slane %v1966_v6, 1  ;;  %v1973_v32 = vrot.slane %v1965_v15, 6  ;;  %vm2394_vm13 = vcmask 1044352  }
 0x48d   : > { %v1374_v30 = vpop.permute.xlu1 %1373  ;;  %v1369_v31 = vpop.permute.xlu0 %1368 }
 0x48e   : > { %1376 = vst.msk [vmem:[#allocation3 + $0x10] sm:$0xf] %vm6912_vm14, %v1374_v30  ;;  %v2009_v30 = vld [vmem:[#allocation2 + $0x4e] sm:$0x1] }
 0x48f   : > { %1372 = vst.msk [vmem:[#allocation3] sm:$0xf0] %vm6911_vm15, %v1369_v31  ;;  %1854 = vrot.lane.b32.xlu1 %v1853_v33, %s6899_s25  ;;  %1836 = vrot.lane.b32.xlu0 %v1813_v9, %s6903_s13  ;;  %v1984_v9 = vsel %vm954_vm4, %v1983_v7, %v1982_v43  ;;  %v1972_v31 = vsel %vm941_vm6, %v1971_v10, %v1963_v38  ;;  %v2029_v47 = vrot.slane %v2009_v30, 5  ;;  %v2059_v43 = vrot.slane %v2050_v54, 5 }
 0x490   : > { %v1986_v13 = vsel %vm957_vm5, %v1985_v52, %v1984_v9  ;;  %v1974_v8 = vsel %vm944_vm7, %v1973_v32, %v1972_v31  ;;  %v2173_v9 = vld [vmem:[#allocation2 + $0x4e] sm:$0x1] }
 0x491   : > { %v1382_v44 = vpop.permute.xlu1 %1381  ;;  %v1378_v46 = vpop.permute.xlu0 %1377  ;;  %v1988_v56 = vsel %vm960_vm8, %v1987_v37, %v1986_v13  ;;  %v1976_v41 = vsel %vm947_vm9, %v1975_v23, %v1974_v8  ;;  %v2172_v37 = vld [vmem:[#allocation2 + $0x36] sm:$0x1]  ;;  %v2182_v23 = vrot.slane %v2173_v9, 5 }
 0x492   : > { %1384 = vst.msk [vmem:[#allocation3 + $0x20] sm:$0xf] %vm6912_vm14, %v1382_v44  ;;  %v2014_v44 = vrot.slane %v2006_v29, 4  ;;  %v2180_v14 = vrot.slane %v2172_v37, 6 }
 0x493   : > { %1380 = vst.msk [vmem:[#allocation3 + $0x10] sm:$0xf0] %vm6911_vm15, %v1378_v46  ;;  %1869 = vrot.lane.b32.xlu1 %v1853_v33, %s6933_s11  ;;  %1865 = vrot.lane.b32.xlu0 %v1864_v61, %s6935_s26  ;;  %v2019_v46 = vrot.slane %v2009_v30, 1 }
 0x494   : > { %v2016_v58 = vsel %vm954_vm4, %v2015_v3, %v2014_v44  ;;  %v2214_v44 = vld [vmem:[#allocation2 + $0x1f] sm:$0x1] }
 0x495   : > { %v1411_v40 = vpop.permute.xlu1 %1410  ;;  %v1401_v42 = vpop.permute.xlu0 %1400  ;;  %v2018_v39 = vsel %vm957_vm5, %v2017_v11, %v2016_v58  ;;  %v2194_v58 = vrot.slane %v2173_v9, 1 }
 0x496   : > { %1413 = vst.msk [vmem:[#allocation3 + $0x30] sm:$0xf] %vm6912_vm14, %v1411_v40  ;;  %v2020_v27 = vsel %vm960_vm8, %v2019_v46, %v2018_v39  ;;  %v2027_v40 = vrot.slane %v2008_v28, 6  ;;  %v2170_v28 = vld [vmem:[#allocation2 + $0x6] sm:$0x1] }
 0x497   : > { %1403 = vst.msk [vmem:[#allocation3 + $0x20] sm:$0xf0] %vm6911_vm15, %v1401_v42  ;;  %1877 = vrot.lane.b32.xlu1 %v1853_v33, %s6903_s13  ;;  %1873 = vrot.lane.b32.xlu0 %v1864_v61, %s6931_s17  ;;  %v2048_v42 = vld [vmem:[#allocation2 + $0x1f] sm:$0x1]  ;;  %v2189_v46 = vrot.slane %v2170_v28, 4 }
 0x498   : > { %v2066_v17 = vrot.slane %v2048_v42, 3  ;;  %v2055_v15 = vrot.slane %v2048_v42, 7 }
 0x499   : > { %v1419_v51 = vpop.permute.xlu1 %1418  ;;  %v1415_v4 = vpop.permute.xlu0 %1414 }
 0x49a   : > { %1421 = vst.msk [vmem:[#allocation3 + $0x40] sm:$0xf] %vm6912_vm14, %v1419_v51  ;;  %v2056_v10 = vsel %vm941_vm6, %v2055_v15, %v2047_v48  ;;  %v2380_v15 = vld [vmem:[#allocation2 + $0x4f] sm:$0x1] }
 0x49b   : > { %1417 = vst.msk [vmem:[#allocation3 + $0x30] sm:$0xf0] %vm6911_vm15, %v1415_v4  ;;  %1906 = vrot.lane.b32.xlu1 %v1905_v55, %s6935_s26  ;;  %1896 = vrot.lane.b32.xlu0 %v1895_v62, %s6899_s25  ;;  %v2028_v4 = vsel %vm944_vm7, %v2027_v40, %v2026_v57  ;;  %v2401_v9 = vrot.slane %v2380_v15, 1 }
 0x49c   : > { %v2030_v2 = vsel %vm947_vm9, %v2029_v47, %v2028_v4  ;;  %v2378_v4 = vld [vmem:[#allocation2 + $0x1f] sm:$0x1] }
 0x49d   : > { %v1441_v22 = vpop.permute.xlu1 %1440  ;;  %v1423_v26 = vpop.permute.xlu0 %1422 }
 0x49e   : > { %1443 = vst.msk [vmem:[#allocation3 + $0x50] sm:$0xf] %vm6912_vm14, %v1441_v22  ;;  %v2057_v22 = vrot.slane %v2049_v25, 6  ;;  %v2213_v25 = vld [vmem:[#allocation2 + $0x7] sm:$0x1] }
 0x49f   : > { %1425 = vst.msk [vmem:[#allocation3 + $0x40] sm:$0xf0] %vm6911_vm15, %v1423_v26  ;;  %1914 = vrot.lane.b32.xlu1 %v1905_v55, %s6931_s17  ;;  %1910 = vrot.lane.b32.xlu0 %v1895_v62, %s6933_s11  ;;  %v2070_v55 = vrot.slane %v2050_v54, 1  ;;  %v2171_v26 = vld [vmem:[#allocation2 + $0x1e] sm:$0x1]  ;;  %v2222_v54 = vrot.slane %v2214_v44, 3 }
 0x4a0   : > { %v2058_v32 = vsel %vm944_vm7, %v2057_v22, %v2056_v10 }
 0x4a1   : > { %v1456_v12 = vpop.permute.xlu1 %1455  ;;  %v1452_v24 = vpop.permute.xlu0 %1451 }
 0x4a2   : > { %1458 = vst.msk [vmem:[#allocation3 + $0x60] sm:$0xf] %vm6912_vm14, %v1456_v12  ;;  %v2178_v12 = vrot.slane %v2171_v26, 7 }
 0x4a3   : > { %1454 = vst.msk [vmem:[#allocation3 + $0x50] sm:$0xf0] %vm6911_vm15, %v1452_v24  ;;  %1989 = vrot.lane.b32.xlu1 %v1988_v56, %s6927_s10  ;;  %1918 = vrot.lane.b32.xlu0 %v1895_v62, %s6903_s13  ;;  %v2067_v62 = vsel %vm954_vm4, %v2066_v17, %v2065_v5 }
 0x4a4   : > { %v2069_v7 = vsel %vm957_vm5, %v2068_v0, %v2067_v62  ;;  %v2179_v29 = vsel %vm941_vm6, %v2178_v12, %v2170_v28  ;;  %v2221_v0 = vrot.slane %v2213_v25, 4  ;;  %v2377_v62 = vld [vmem:[#allocation2 + $0x7] sm:$0x1]  ;;  %v2385_v28 = vrot.slane %v2378_v4, 7 }
 0x4a5   : > { %v1464_v50 = vpop.permute.xlu1 %1463  ;;  %v1460_v33 = vpop.permute.xlu0 %1459  ;;  %v2071_v52 = vsel %vm960_vm8, %v2070_v55, %v2069_v7  ;;  %v2181_v3 = vsel %vm944_vm7, %v2180_v14, %v2179_v29  ;;  %v2379_v55 = vld [vmem:[#allocation2 + $0x37] sm:$0x1] }
 0x4a6   : > { %1466 = vst.msk [vmem:[#allocation3 + $0x70] sm:$0xf] %vm6912_vm14, %v1464_v50  ;;  %v2183_v50 = vsel %vm947_vm9, %v2182_v23, %v2181_v3  ;;  %v5665_v23 = vld [vmem:[#allocation2 + $0x50] sm:$0x1]  ;;  %v2387_v3 = vrot.slane %v2379_v55, 6 }
 0x4a7   : > { %1462 = vst.msk [vmem:[#allocation3 + $0x60] sm:$0xf0] %vm6911_vm15, %v1460_v33  ;;  %1998 = vrot.lane.b32.xlu1 %v1988_v56, %s6923_s9  ;;  %1977 = vrot.lane.b32.xlu0 %v1976_v41, %s6929_s8  ;;  %v2060_v56 = vsel %vm947_vm9, %v2059_v43, %v2058_v32  ;;  %v2190_v33 = vrot.slane %v2171_v26, 3  ;;  %v5656_v32 = vld [vmem:[#allocation2 + $0x20] sm:$0x1] }
 0x4a8   : > { %v1930_v29 = vrot.slane %v5656_v32, 7 }
 0x4a9   : > { %v1493_v49 = vpop.permute.xlu1 %1492  ;;  %v1483_v61 = vpop.permute.xlu0 %1482  ;;  %v2191_v39 = vsel %vm954_vm4, %v2190_v33, %v2189_v46  ;;  %v2389_v33 = vrot.slane %v2380_v15, 5 }
 0x4aa   : > { %1495 = vst.msk [vmem:[#allocation3 + $0x80] sm:$0xf] %vm6912_vm14, %v1493_v49  ;;  %v2215_v49 = vld [vmem:[#allocation2 + $0x37] sm:$0x1] }
 0x4ab   : > { %1485 = vst.msk [vmem:[#allocation3 + $0x70] sm:$0xf0] %vm6911_vm15, %v1483_v61  ;;  %2021 = vrot.lane.b32.xlu1 %v2020_v27, %s6929_s8  ;;  %1994 = vrot.lane.b32.xlu0 %v1976_v41, %s6925_s7  ;;  %v2216_v61 = vld [vmem:[#allocation2 + $0x4f] sm:$0x1]  ;;  %v2234_v40 = vrot.slane %v2215_v49, 6 }
 0x4ac   : > { %v2236_v47 = vrot.slane %v2216_v61, 5  ;;  %v2226_v5 = vrot.slane %v2216_v61, 1 }
 0x4ad   : > { %v1501_v63 = vpop.permute.xlu1 %1500  ;;  %v1497_v16 = vpop.permute.xlu0 %1496 }
 0x4ae   : > { %1503 = vst.msk [vmem:[#allocation3 + $0x90] sm:$0xf] %vm6912_vm14, %v1501_v63 }
 0x4af   : > { %1499 = vst.msk [vmem:[#allocation3 + $0x80] sm:$0xf0] %vm6911_vm15, %v1497_v16  ;;  %2035 = vrot.lane.b32.xlu1 %v2020_v27, %s6925_s7  ;;  %2002 = vrot.lane.b32.xlu0 %v1976_v41, %s6901_s15  ;;  %v2192_v41 = vrot.slane %v2172_v37, 2  ;;  %v2396_v37 = vrot.slane %v2377_v62, 4 }
 0x4b1   : > { %v1523_v45 = vpop.permute.xlu1 %1522  ;;  %v1505_v51 = vpop.permute.xlu0 %1504  ;;  %v2193_v16 = vsel %vm957_vm5, %v2192_v41, %v2191_v39  ;;  %v2386_v41 = vsel %vm941_vm6, %v2385_v28, %v2377_v62 }
 0x4b2   : > { %1525 = vst.msk [vmem:[#allocation3 + $0xa0] sm:$0xf] %vm6912_vm14, %v1523_v45  ;;  %v2195_v42 = vsel %vm960_vm8, %v2194_v58, %v2193_v16  ;;  %v2088_v16 = vld [vmem:[#allocation2 + $0x8] sm:$0x1] }
 0x4b3   : > { %1507 = vst.msk [vmem:[#allocation3 + $0x90] sm:$0xf0] %vm6911_vm15, %v1505_v51  ;;  %2043 = vrot.lane.b32.xlu1 %v2020_v27, %s6901_s15  ;;  %2031 = vrot.lane.b32.xlu0 %v2030_v2, %s6927_s10  ;;  %v2232_v27 = vrot.slane %v2214_v44, 7  ;;  %v2224_v51 = vrot.slane %v2215_v49, 2  ;;  %v2388_v49 = vsel %vm944_vm7, %v2387_v3, %v2386_v41 }
 0x4b4   : > { %v2390_v39 = vsel %vm947_vm9, %v2389_v33, %v2388_v49 }
 0x4b5   : > { %v1538_v38 = vpop.permute.xlu1 %1537  ;;  %v1534_v6 = vpop.permute.xlu0 %1533  ;;  %v2233_v48 = vsel %vm941_vm6, %v2232_v27, %v2213_v25 }
 0x4b6   : > { %1540 = vst.msk [vmem:[#allocation3 + $0xb0] sm:$0xf] %vm6912_vm14, %v1538_v38  ;;  %v2235_v45 = vsel %vm944_vm7, %v2234_v40, %v2233_v48  ;;  %v2223_v38 = vsel %vm954_vm4, %v2222_v54, %v2221_v0  ;;  %v2089_v40 = vld [vmem:[#allocation2 + $0x20] sm:$0x1]  ;;  %v1941_v48 = vrot.slane %v5656_v32, 3  ;;  %v2096_v54 = vrot.slane %v2088_v16, 4 }
 0x4b7   : > { %1536 = vst.msk [vmem:[#allocation3 + $0xa0] sm:$0xf0] %vm6911_vm15, %v1534_v6  ;;  %2072 = vrot.lane.b32.xlu1 %v2071_v52, %s6927_s10  ;;  %2039 = vrot.lane.b32.xlu0 %v2030_v2, %s6923_s9  ;;  %v2237_v2 = vsel %vm947_vm9, %v2236_v47, %v2235_v45  ;;  %v2397_v6 = vrot.slane %v2378_v4, 3  ;;  %v2225_v26 = vsel %vm957_vm5, %v2224_v51, %v2223_v38  ;;  %v2091_v47 = vld [vmem:[#allocation2 + $0x50] sm:$0x1]  ;;  %v1945_v0 = vrot.slane %v5665_v23, 1 }
 0x4b8   : > { %v2227_v43 = vsel %vm960_vm8, %v2226_v5, %v2225_v26  ;;  %v2107_v26 = vrot.slane %v2089_v40, 7 }
 0x4b9   : > { %v1546_v24 = vpop.permute.xlu1 %1545  ;;  %v1542_v13 = vpop.permute.xlu0 %1541  ;;  %v2398_v10 = vsel %vm954_vm4, %v2397_v6, %v2396_v37 }
 0x4ba   : > { %1548 = vst.msk [vmem:[#allocation3 + $0xc0] sm:$0xf] %vm6912_vm14, %v1546_v24  ;;  %v2108_v32 = vsel %vm941_vm6, %v2107_v26, %v2088_v16  ;;  %vm2199_vm14 = vcmask 917252  }
 0x4bb   : > { %1544 = vst.msk [vmem:[#allocation3 + $0xb0] sm:$0xf0] %vm6911_vm15, %v1542_v13  ;;  %2080 = vrot.lane.b32.xlu1 %v2071_v52, %s6923_s9  ;;  %2061 = vrot.lane.b32.xlu0 %v2060_v56, %s6929_s8  ;;  %v2399_v52 = vrot.slane %v2379_v55, 2  ;;  %vm2187_vm15 = vcmask 913152  }
 0x4bd   : > { %v1576_v30 = vpop.permute.xlu1 %1575  ;;  %v1564_v31 = vpop.permute.xlu0 %1563  ;;  %v2400_v13 = vsel %vm957_vm5, %v2399_v52, %v2398_v10  ;;  %v2130_v10 = vld [vmem:[#allocation2 + $0x21] sm:$0x1] }
 0x4be   : > { %1579 = vst.msk [vmem:[#allocation3] sm:$0xf0] %vm6905_vm0, %v1576_v30  ;;  %v2402_v14 = vsel %vm960_vm8, %v2401_v9, %v2400_v13  ;;  %v2129_v9 = vld [vmem:[#allocation2 + $0x9] sm:$0x1]  ;;  %v2132_v13 = vld [vmem:[#allocation2 + $0x51] sm:$0x1] }
 0x4bf   : > { %1567 = vst.msk [vmem:[#allocation3] sm:$0xf] %vm6906_vm1, %v1564_v31  ;;  %2184 = vrot.lane.b32.xlu1 %v2183_v50, %s6918_s16  ;;  %2076 = vrot.lane.b32.xlu0 %v2060_v56, %s6925_s7  ;;  %v2152_v3 = vrot.slane %v2132_v13, 1  ;;  %v2137_v33 = vrot.slane %v2130_v10, 7  ;;  %v2141_v49 = vrot.slane %v2132_v13, 5 }
 0x4c1   : > { %v1585_v8 = vpop.permute.xlu1 %1584  ;;  %v1581_v11 = vpop.permute.xlu0 %1580 }
 0x4c2   : > { %1587 = vst.msk [vmem:[#allocation3 + $0x10] sm:$0xf0] %vm6905_vm0, %v1585_v8  ;;  %v1934_v8 = vrot.slane %v5665_v23, 5 }
 0x4c3   : > { %1583 = vst.msk [vmem:[#allocation3 + $0x10] sm:$0xf] %vm6906_vm1, %v1581_v11  ;;  %2201 = vrot.lane.b32.xlu1 %v2183_v50, %s6909_s14  ;;  %2084 = vrot.lane.b32.xlu0 %v2060_v56, %s6901_s15  ;;  %v5661_v56 = vld [vmem:[#allocation2 + $0x38] sm:$0x1]  ;;  %v1922_v11 = vld [vmem:[#allocation2 + $0x8] sm:$0x1] }
 0x4c4   : > { %v1931_v44 = vsel %vm941_vm6, %v1930_v29, %v1922_v11  ;;  %v1940_v25 = vrot.slane %v1922_v11, 4  ;;  %v1943_v51 = vrot.slane %v5661_v56, 2 }
 0x4c5   : > { %v1608_v35 = vpop.permute.xlu1 %1607  ;;  %v1589_v63 = vpop.permute.xlu0 %1588 }
 0x4c6   : > { %1610 = vst.msk [vmem:[#allocation3 + $0x20] sm:$0xf0] %vm6905_vm0, %v1608_v35  ;;  %v1942_v5 = vsel %vm954_vm4, %v1941_v48, %v1940_v25  ;;  %v2254_v48 = vld [vmem:[#allocation2 + $0x8] sm:$0x1] }
 0x4c7   : > { %1591 = vst.msk [vmem:[#allocation3 + $0x20] sm:$0xf] %vm6906_vm1, %v1589_v63  ;;  %2209 = vrot.lane.b32.xlu1 %v2183_v50, %s6907_s28  ;;  %2196 = vrot.lane.b32.xlu0 %v2195_v42, %s6891_s29  ;;  %v1932_v50 = vrot.slane %v5661_v56, 6  ;;  %v1944_v38 = vsel %vm957_vm5, %v1943_v51, %v1942_v5  ;;  %v2148_v56 = vrot.slane %v2130_v10, 3 }
 0x4c9   : > { %v1622_v57 = vpop.permute.xlu1 %1621  ;;  %v1618_v17 = vpop.permute.xlu0 %1617  ;;  %v1933_v61 = vsel %vm944_vm7, %v1932_v50, %v1931_v44 }
 0x4ca   : > { %1624 = vst.msk [vmem:[#allocation3 + $0x30] sm:$0xf0] %vm6905_vm0, %v1622_v57  ;;  %v1935_v27 = vsel %vm947_vm9, %v1934_v8, %v1933_v61  ;;  %v2097_v57 = vrot.slane %v2089_v40, 3  ;;  %v2256_v61 = vld [vmem:[#allocation2 + $0x38] sm:$0x1] }
 0x4cb   : > { %1620 = vst.msk [vmem:[#allocation3 + $0x30] sm:$0xf] %vm6906_vm1, %v1618_v17  ;;  %2238 = vrot.lane.b32.xlu1 %v2237_v2, %s6891_s29  ;;  %2205 = vrot.lane.b32.xlu0 %v2195_v42, %s6897_s12  ;;  %s6893_s29 = smov 111   ;;  %v2090_v42 = vld [vmem:[#allocation2 + $0x38] sm:$0x1] }
 0x4cc   : > { %v2099_v4 = vrot.slane %v2090_v42, 2  ;;  %v2098_v55 = vsel %vm954_vm4, %v2097_v57, %v2096_v54  ;;  %v2109_v37 = vrot.slane %v2090_v42, 6  ;;  %v2264_v42 = vrot.slane %v2256_v61, 6 }
 0x4cd   : > { %v1630_v7 = vpop.permute.xlu1 %1629  ;;  %v1626_v22 = vpop.permute.xlu0 %1625 }
 0x4ce   : > { %1632 = vst.msk [vmem:[#allocation3 + $0x40] sm:$0xf0] %vm6905_vm0, %v1630_v7  ;;  %v2100_v6 = vsel %vm957_vm5, %v2099_v4, %v2098_v55  ;;  %v1946_v7 = vsel %vm960_vm8, %v1945_v0, %v1944_v38  ;;  %v2110_v29 = vsel %vm944_vm7, %v2109_v37, %v2108_v32  ;;  %v2272_v4 = vrot.slane %v2254_v48, 4  ;;  %v2297_v38 = vld [vmem:[#allocation2 + $0x39] sm:$0x1] }
 0x4cf   : > { %1628 = vst.msk [vmem:[#allocation3 + $0x40] sm:$0xf] %vm6906_vm1, %v1626_v22  ;;  %2246 = vrot.lane.b32.xlu1 %v2237_v2, %s6897_s12  ;;  %2228 = vrot.lane.b32.xlu0 %v2227_v43, %s6918_s16  ;;  %s6916_s12 = smov 110   ;;  %v2101_v2 = vrot.slane %v2091_v47, 1  ;;  %v2275_v55 = vrot.slane %v2256_v61, 2 }
 0x4d0   : > { %v2295_v37 = vld [vmem:[#allocation2 + $0x9] sm:$0x1]  ;;  %v2336_v61 = vld [vmem:[#allocation2 + $0xa] sm:$0x1] }
 0x4d1   : > { %v1659_v12 = vpop.permute.xlu1 %1658  ;;  %v1648_v24 = vpop.permute.xlu0 %1647  ;;  %v2102_v22 = vsel %vm960_vm8, %v2101_v2, %v2100_v6  ;;  %v2298_v6 = vld [vmem:[#allocation2 + $0x51] sm:$0x1] }
 0x4d2   : > { %1661 = vst.msk [vmem:[#allocation3 + $0x50] sm:$0xf0] %vm6905_vm0, %v1659_v12  ;;  %v2111_v12 = vrot.slane %v2091_v47, 5 }
 0x4d3   : > { %1650 = vst.msk [vmem:[#allocation3 + $0x50] sm:$0xf] %vm6906_vm1, %v1648_v24  ;;  %2403 = vrot.lane.b32.xlu1 %v2402_v14, %s6893_s29  ;;  %2242 = vrot.lane.b32.xlu0 %v2227_v43, %s6909_s14  ;;  %s6895_s29 = smov 109   ;;  %v2131_v24 = vld [vmem:[#allocation2 + $0x39] sm:$0x1] }
 0x4d4   : > { %v2139_v44 = vrot.slane %v2131_v24, 6 }
 0x4d5   : > { %v1667_v30 = vpop.permute.xlu1 %1666  ;;  %v1663_v31 = vpop.permute.xlu0 %1662 }
 0x4d6   : > { %1669 = vst.msk [vmem:[#allocation3 + $0x60] sm:$0xf0] %vm6905_vm0, %v1667_v30  ;;  %v2150_v30 = vrot.slane %v2131_v24, 2  ;;  %v2303_v24 = vrot.slane %v2295_v37, 4 }
 0x4d7   : > { %1665 = vst.msk [vmem:[#allocation3 + $0x60] sm:$0xf] %vm6906_vm1, %v1663_v31  ;;  %2412 = vrot.lane.b32.xlu1 %v2402_v14, %s6895_s29  ;;  %2250 = vrot.lane.b32.xlu0 %v2227_v43, %s6907_s28  ;;  %s6913_s29 = smov 112   ;;  %v2147_v14 = vrot.slane %v2129_v9, 4  ;;  %v2112_v31 = vsel %vm947_vm9, %v2111_v12, %v2110_v29  ;;  %v2318_v12 = vrot.slane %v2298_v6, 5 }
 0x4d8   : > { %v2337_v29 = vld [vmem:[#allocation2 + $0x22] sm:$0x1] }
 0x4d9   : > { %v1690_v46 = vpop.permute.xlu1 %1689  ;;  %v1671_v58 = vpop.permute.xlu0 %1670  ;;  %v2149_v50 = vsel %vm954_vm4, %v2148_v56, %v2147_v14 }
 0x4da   : > { %1692 = vst.msk [vmem:[#allocation3 + $0x70] sm:$0xf0] %vm6905_vm0, %v1690_v46  ;;  %v2151_v41 = vsel %vm957_vm5, %v2150_v30, %v2149_v50  ;;  %v2255_v46 = vld [vmem:[#allocation2 + $0x20] sm:$0x1]  ;;  %v2339_v50 = vld [vmem:[#allocation2 + $0x52] sm:$0x1] }
 0x4db   : > { %1673 = vst.msk [vmem:[#allocation3 + $0x70] sm:$0xf] %vm6906_vm1, %v1671_v58  ;;  %2391 = vrot.lane.b32.xlu0 %v2390_v39, %s6913_s29  ;;  %1936 = vrot.lane.b32.xlu1 %v1935_v27, %s6899_s25  ;;  %s6920_s25 = smov 108   ;;  %v2153_v58 = vsel %vm960_vm8, %v2152_v3, %v2151_v41  ;;  %v2273_v0 = vrot.slane %v2255_v46, 3  ;;  %v2338_v3 = vld [vmem:[#allocation2 + $0x3a] sm:$0x1] }
 0x4dd   : > { %v1704_v35 = vpop.permute.xlu1 %1703  ;;  %v1700_v63 = vpop.permute.xlu0 %1699 }
 0x4de   : > { %1706 = vst.msk [vmem:[#allocation3 + $0x80] sm:$0xf0] %vm6905_vm0, %v1704_v35  ;;  %v2262_v35 = vrot.slane %v2255_v46, 7  ;;  %v2346_v46 = vrot.slane %v2338_v3, 6 }
 0x4df   : > { %1702 = vst.msk [vmem:[#allocation3 + $0x80] sm:$0xf] %vm6906_vm1, %v1700_v63  ;;  %2408 = vrot.lane.b32.xlu0 %v2390_v39, %s6916_s12  ;;  %1951 = vrot.lane.b32.xlu1 %v1935_v27, %s6933_s11  ;;  %s6995_s11 = smov 48  }
 0x4e0   : > { %v2263_v54 = vsel %vm941_vm6, %v2262_v35, %v2254_v48  ;;  %v2357_v48 = vrot.slane %v2338_v3, 2 }
 0x4e1   : > { %v1712_v17 = vpop.permute.xlu1 %1711  ;;  %v1708_v45 = vpop.permute.xlu0 %1707 }
 0x4e2   : > { %1714 = vst.msk [vmem:[#allocation3 + $0x90] sm:$0xf0] %vm6905_vm0, %v1712_v17 }
 0x4e3   : > { %1710 = vst.msk [vmem:[#allocation3 + $0x90] sm:$0xf] %vm6906_vm1, %v1708_v45  ;;  %2416 = vrot.lane.b32.xlu0 %v2390_v39, %s6920_s25  ;;  %1959 = vrot.lane.b32.xlu1 %v1935_v27, %s6903_s13  ;;  %v2257_v39 = vld [vmem:[#allocation2 + $0x50] sm:$0x1]  ;;  %v2138_v27 = vsel %vm941_vm6, %v2137_v33, %v2129_v9  ;;  %v2265_v45 = vsel %vm944_vm7, %v2264_v42, %v2263_v54  ;;  %v2316_v9 = vrot.slane %v2297_v38, 6  ;;  %s6979_s13 = smov 93  }
 0x4e4   : > { %v2140_v40 = vsel %vm944_vm7, %v2139_v44, %v2138_v27  ;;  %v2266_v25 = vrot.slane %v2257_v39, 5  ;;  %v2355_v42 = vrot.slane %v2337_v29, 3  ;;  %v2420_v54 = vld [vmem:[#allocation2 + $0x8] sm:$0x1] }
 0x4e5   : > { %v1741_v62 = vpop.permute.xlu1 %1740  ;;  %v1730_v15 = vpop.permute.xlu0 %1729  ;;  %v2142_v47 = vsel %vm947_vm9, %v2141_v49, %v2140_v40  ;;  %v2348_v49 = vrot.slane %v2339_v50, 5  ;;  %v2354_v40 = vrot.slane %v2336_v61, 4 }
 0x4e6   : > { %1743 = vst.msk [vmem:[#allocation3 + $0xa0] sm:$0xf0] %vm6905_vm0, %v1741_v62  ;;  %v2267_v51 = vsel %vm947_vm9, %v2266_v25, %v2265_v45  ;;  %v2296_v62 = vld [vmem:[#allocation2 + $0x21] sm:$0x1]  ;;  %v2422_v45 = vld [vmem:[#allocation2 + $0x38] sm:$0x1] }
 0x4e7   : > { %1732 = vst.msk [vmem:[#allocation3 + $0xa0] sm:$0xf] %vm6906_vm1, %v1730_v15  ;;  %1947 = vrot.lane.b32.xlu0 %v1946_v7, %s6935_s26  ;;  %2103 = vrot.lane.b32.xlu1 %v2102_v22, %s6929_s8  ;;  %v2277_v15 = vrot.slane %v2257_v39, 1  ;;  %v2304_v32 = vrot.slane %v2296_v62, 3  ;;  %s6996_s26 = smov 47  }
 0x4e9   : > { %v1749_v52 = vpop.permute.xlu1 %1748  ;;  %v1745_v43 = vpop.permute.xlu0 %1744  ;;  %v2305_v33 = vsel %vm954_vm4, %v2304_v32, %v2303_v24 }
 0x4ea   : > { %1751 = vst.msk [vmem:[#allocation3 + $0xb0] sm:$0xf0] %vm6905_vm0, %v1749_v52  ;;  %vm6953_vm0 = vcmask 786052  }
 0x4eb   : > { %1747 = vst.msk [vmem:[#allocation3 + $0xb0] sm:$0xf] %vm6906_vm1, %v1745_v43  ;;  %1955 = vrot.lane.b32.xlu0 %v1946_v7, %s6931_s17  ;;  %2117 = vrot.lane.b32.xlu1 %v2102_v22, %s6925_s7  ;;  %v2274_v7 = vsel %vm954_vm4, %v2273_v0, %v2272_v4  ;;  %v2356_v4 = vsel %vm954_vm4, %v2355_v42, %v2354_v40  ;;  %v2428_v0 = vrot.slane %v2420_v54, 4  ;;  %v2504_v42 = vld [vmem:[#allocation2 + $0x3a] sm:$0x1]  ;;  %s6994_s17 = smov 29  }
 0x4ec   : > { %v2276_v43 = vsel %vm957_vm5, %v2275_v55, %v2274_v7 }
 0x4ed   : > { %v1771_v23 = vpop.permute.xlu1 %1770  ;;  %v1753_v28 = vpop.permute.xlu0 %1752  ;;  %v2278_v10 = vsel %vm960_vm8, %v2277_v15, %v2276_v43  ;;  %v2431_v15 = vrot.slane %v2422_v45, 2 }
 0x4ee   : > { %1774 = vst.msk [vmem:[#allocation3] sm:$0xf] %vm1773_vm2, %v1771_v23 }
 0x4ef   : > { %1755 = vst.msk [vmem:[#allocation3 + $0xc0] sm:$0xf] %vm6906_vm1, %v1753_v28  ;;  %2113 = vrot.lane.b32.xlu0 %v2112_v31, %s6927_s10  ;;  %2125 = vrot.lane.b32.xlu1 %v2102_v22, %s6901_s15  ;;  %v2314_v22 = vrot.slane %v2296_v62, 7  ;;  %v2306_v28 = vrot.slane %v2297_v38, 2  ;;  %v2358_v62 = vsel %vm957_vm5, %v2357_v48, %v2356_v4  ;;  %vm1980_vm1 = vcmask 781952  }
 0x4f1   : > { %v1788_v8 = vpop.permute.xlu1 %1787  ;;  %v1783_v11 = vpop.permute.xlu0 %1782  ;;  %v2315_v13 = vsel %vm941_vm6, %v2314_v22, %v2295_v37  ;;  %v2307_v44 = vsel %vm957_vm5, %v2306_v28, %v2305_v33  ;;  %v2441_v37 = vrot.slane %v2422_v45, 6  ;;  %v2463_v28 = vld [vmem:[#allocation2 + $0x39] sm:$0x1] }
 0x4f2   : > { %1790 = vst.msk [vmem:[#allocation3 + $0x10] sm:$0xf] %vm1773_vm2, %v1788_v8  ;;  %v2317_v23 = vsel %vm944_vm7, %v2316_v9, %v2315_v13  ;;  %v2344_v8 = vrot.slane %v2337_v29, 7  ;;  %v2464_v29 = vld [vmem:[#allocation2 + $0x51] sm:$0x1] }
 0x4f3   : > { %1786 = vst.msk [vmem:[#allocation3] sm:$0xf0] %vm1785_vm3, %v1783_v11  ;;  %2121 = vrot.lane.b32.xlu0 %v2112_v31, %s6923_s9  ;;  %2154 = vrot.lane.b32.xlu1 %v2153_v58, %s6927_s10  ;;  %v2319_v30 = vsel %vm947_vm9, %v2318_v12, %v2317_v23  ;;  %v2308_v31 = vrot.slane %v2298_v6, 1  ;;  %s6992_s10 = smov 31  }
 0x4f4   : > { %v2345_v39 = vsel %vm941_vm6, %v2344_v8, %v2336_v61  ;;  %v2471_v8 = vrot.slane %v2463_v28, 6 }
 0x4f5   : > { %v1796_v63 = vpop.permute.xlu1 %1795  ;;  %v1792_v16 = vpop.permute.xlu0 %1791 }
 0x4f6   : > { %1798 = vst.msk [vmem:[#allocation3 + $0x20] sm:$0xf] %vm1773_vm2, %v1796_v63  ;;  %v2347_v63 = vsel %vm944_vm7, %v2346_v46, %v2345_v39 }
 0x4f7   : > { %1794 = vst.msk [vmem:[#allocation3 + $0x10] sm:$0xf0] %vm1785_vm3, %v1792_v16  ;;  %2143 = vrot.lane.b32.xlu0 %v2142_v47, %s6929_s8  ;;  %2162 = vrot.lane.b32.xlu1 %v2153_v58, %s6923_s9  ;;  %v2309_v58 = vsel %vm960_vm8, %v2308_v31, %v2307_v44  ;;  %v2349_v16 = vsel %vm947_vm9, %v2348_v49, %v2347_v63  ;;  %v2484_v44 = vrot.slane %v2464_v29, 1  ;;  %v2503_v63 = vld [vmem:[#allocation2 + $0x22] sm:$0x1]  ;;  %s6990_s9 = smov 12  }
 0x4f8   : > { %v2511_v48 = vrot.slane %v2503_v63, 3  ;;  %v2521_v4 = vrot.slane %v2503_v63, 7  ;;  %s6993_s8 = smov 30  }
 0x4f9   : > { %v1825_v57 = vpop.permute.xlu1 %1824  ;;  %v1815_v17 = vpop.permute.xlu0 %1814 }
 0x4fa   : > { %1827 = vst.msk [vmem:[#allocation3 + $0x30] sm:$0xf] %vm1773_vm2, %v1825_v57  ;;  %v2421_v57 = vld [vmem:[#allocation2 + $0x20] sm:$0x1] }
 0x4fb   : > { %1817 = vst.msk [vmem:[#allocation3 + $0x20] sm:$0xf0] %vm1785_vm3, %v1815_v17  ;;  %2158 = vrot.lane.b32.xlu0 %v2142_v47, %s6925_s7  ;;  %2268 = vrot.lane.b32.xlu1 %v2267_v51, %s6918_s16  ;;  %v2359_v17 = vrot.slane %v2339_v50, 1  ;;  %v2439_v22 = vrot.slane %v2421_v57, 7  ;;  %s6991_s7 = smov 32  }
 0x4fd   : > { %v1833_v2 = vpop.permute.xlu1 %1832  ;;  %v1829_v5 = vpop.permute.xlu0 %1828  ;;  %v2360_v38 = vsel %vm960_vm8, %v2359_v17, %v2358_v62  ;;  %v2440_v12 = vsel %vm941_vm6, %v2439_v22, %v2420_v54  ;;  %v2513_v17 = vrot.slane %v2504_v42, 2 }
 0x4fe   : > { %1835 = vst.msk [vmem:[#allocation3 + $0x40] sm:$0xf] %vm1773_vm2, %v1833_v2  ;;  %v2429_v2 = vrot.slane %v2421_v57, 3  ;;  %v2442_v32 = vsel %vm944_vm7, %v2441_v37, %v2440_v12  ;;  %v2545_v37 = vld [vmem:[#allocation2 + $0x3b] sm:$0x1] }
 0x4ff   : > { %1831 = vst.msk [vmem:[#allocation3 + $0x30] sm:$0xf0] %vm1785_vm3, %v1829_v5  ;;  %2166 = vrot.lane.b32.xlu0 %v2142_v47, %s6901_s15  ;;  %2283 = vrot.lane.b32.xlu1 %v2267_v51, %s6909_s14  ;;  %s6978_s15 = smov 95  }
 0x500   : > { %v2430_v7 = vsel %vm954_vm4, %v2429_v2, %v2428_v0 }
 0x501   : > { %v1855_v26 = vpop.permute.xlu1 %1854  ;;  %v1837_v52 = vpop.permute.xlu0 %1836  ;;  %v2432_v43 = vsel %vm957_vm5, %v2431_v15, %v2430_v7 }
 0x502   : > { %1857 = vst.msk [vmem:[#allocation3 + $0x50] sm:$0xf] %vm1773_vm2, %v1855_v26 }
 0x503   : > { %1839 = vst.msk [vmem:[#allocation3 + $0x40] sm:$0xf0] %vm1785_vm3, %v1837_v52  ;;  %2279 = vrot.lane.b32.xlu0 %v2278_v10, %s6978_s15  ;;  %2291 = vrot.lane.b32.xlu1 %v2267_v51, %s6907_s28  ;;  %v2423_v51 = vld [vmem:[#allocation2 + $0x50] sm:$0x1] }
 0x504   : > { %v2433_v6 = vrot.slane %v2423_v51, 1 }
 0x505   : > { %v1870_v14 = vpop.permute.xlu1 %1869  ;;  %v1866_v56 = vpop.permute.xlu0 %1865 }
 0x506   : > { %1872 = vst.msk [vmem:[#allocation3 + $0x60] sm:$0xf] %vm1773_vm2, %v1870_v14  ;;  %v2434_v9 = vsel %vm960_vm8, %v2433_v6, %v2432_v43  ;;  %v2461_v14 = vld [vmem:[#allocation2 + $0x9] sm:$0x1] }
 0x507   : > { %1868 = vst.msk [vmem:[#allocation3 + $0x50] sm:$0xf0] %vm1785_vm3, %v1866_v56  ;;  %2287 = vrot.lane.b32.xlu0 %v2278_v10, %s6979_s13  ;;  %2320 = vrot.lane.b32.xlu1 %v2319_v30, %s6978_s15  ;;  %v2443_v10 = vrot.slane %v2423_v51, 5  ;;  %v2462_v56 = vld [vmem:[#allocation2 + $0x21] sm:$0x1]  ;;  %v2479_v31 = vrot.slane %v2461_v14, 4 }
 0x508   : > { %v2480_v3 = vrot.slane %v2462_v56, 3 }
 0x509   : > { %v1878_v11 = vpop.permute.xlu1 %1877  ;;  %v1874_v41 = vpop.permute.xlu0 %1873  ;;  %v2444_v23 = vsel %vm947_vm9, %v2443_v10, %v2442_v32 }
 0x50a   : > { %1880 = vst.msk [vmem:[#allocation3 + $0x70] sm:$0xf] %vm1773_vm2, %v1878_v11  ;;  %v2482_v11 = vrot.slane %v2463_v28, 2 }
 0x50b   : > { %1876 = vst.msk [vmem:[#allocation3 + $0x60] sm:$0xf0] %vm1785_vm3, %v1874_v41  ;;  %2310 = vrot.lane.b32.xlu0 %v2309_v58, %s6918_s16  ;;  %2328 = vrot.lane.b32.xlu1 %v2319_v30, %s6979_s13  ;;  %v2469_v30 = vrot.slane %v2462_v56, 7  ;;  %v2473_v41 = vrot.slane %v2464_v29, 5  ;;  %v2564_v56 = vrot.slane %v2545_v37, 2 }
 0x50d   : > { %v1907_v27 = vpop.permute.xlu1 %1906  ;;  %v1897_v35 = vpop.permute.xlu0 %1896  ;;  %v2470_v46 = vsel %vm941_vm6, %v2469_v30, %v2461_v14  ;;  %v2553_v14 = vrot.slane %v2545_v37, 6 }
 0x50e   : > { %1909 = vst.msk [vmem:[#allocation3 + $0x80] sm:$0xf] %vm1773_vm2, %v1907_v27  ;;  %v2472_v39 = vsel %vm944_vm7, %v2471_v8, %v2470_v46 }
 0x50f   : > { %1899 = vst.msk [vmem:[#allocation3 + $0x70] sm:$0xf0] %vm1785_vm3, %v1897_v35  ;;  %2324 = vrot.lane.b32.xlu0 %v2309_v58, %s6909_s14  ;;  %2350 = vrot.lane.b32.xlu1 %v2349_v16, %s6918_s16  ;;  %v2502_v35 = vld [vmem:[#allocation2 + $0xa] sm:$0x1]  ;;  %s6984_s16 = smov 125  }
 0x511   : > { %v1915_v47 = vpop.permute.xlu1 %1914  ;;  %v1911_v25 = vpop.permute.xlu0 %1910 }
 0x512   : > { %1917 = vst.msk [vmem:[#allocation3 + $0x90] sm:$0xf] %vm1773_vm2, %v1915_v47  ;;  %v2505_v47 = vld [vmem:[#allocation2 + $0x52] sm:$0x1] }
 0x513   : > { %1913 = vst.msk [vmem:[#allocation3 + $0x80] sm:$0xf0] %vm1785_vm3, %v1911_v25  ;;  %2332 = vrot.lane.b32.xlu0 %v2309_v58, %s6907_s28  ;;  %2365 = vrot.lane.b32.xlu1 %v2349_v16, %s6909_s14  ;;  %s6981_s14 = smov 109   ;;  %v2481_v58 = vsel %vm954_vm4, %v2480_v3, %v2479_v31  ;;  %v2510_v25 = vrot.slane %v2502_v35, 4  ;;  %v2515_v45 = vrot.slane %v2505_v47, 1  ;;  %v2525_v15 = vrot.slane %v2505_v47, 5 }
 0x514   : > { %v2483_v27 = vsel %vm957_vm5, %v2482_v11, %v2481_v58 }
 0x515   : > { %v1990_v5 = vpop.permute.xlu1 %1989  ;;  %v1919_v55 = vpop.permute.xlu0 %1918  ;;  %v2485_v40 = vsel %vm960_vm8, %v2484_v44, %v2483_v27  ;;  %v2512_v51 = vsel %vm954_vm4, %v2511_v48, %v2510_v25  ;;  %v2780_v48 = vld [vmem:[#allocation2 + $0x21] sm:$0x1] }
 0x516   : > { %1993 = vst.msk [vmem:[#allocation3] sm:$0xf0] %vm6953_vm0, %v1990_v5  ;;  %v2514_v5 = vsel %vm957_vm5, %v2513_v17, %v2512_v51  ;;  %v2779_v51 = vld [vmem:[#allocation2 + $0x9] sm:$0x1] }
 0x517   : > { %1921 = vst.msk [vmem:[#allocation3 + $0x90] sm:$0xf0] %vm1785_vm3, %v1919_v55  ;;  %2361 = vrot.lane.b32.xlu0 %v2360_v38, %s6978_s15  ;;  %2373 = vrot.lane.b32.xlu1 %v2349_v16, %s6907_s28  ;;  %s6980_s28 = smov 111   ;;  %v2474_v16 = vsel %vm947_vm9, %v2473_v41, %v2472_v39  ;;  %v2523_v55 = vrot.slane %v2504_v42, 6  ;;  %v2516_v62 = vsel %vm960_vm8, %v2515_v45, %v2514_v5 }
 0x519   : > { %v1999_v26 = vpop.permute.xlu1 %1998  ;;  %v1978_v52 = vpop.permute.xlu0 %1977 }
 0x51a   : > { %2001 = vst.msk [vmem:[#allocation3 + $0x10] sm:$0xf0] %vm6953_vm0, %v1999_v26  ;;  %v2543_v26 = vld [vmem:[#allocation2 + $0xb] sm:$0x1] }
 0x51b   : > { %1981 = vst.msk [vmem:[#allocation3] sm:$0xf] %vm1980_vm1, %v1978_v52  ;;  %2369 = vrot.lane.b32.xlu0 %v2360_v38, %s6979_s13  ;;  %2435 = vrot.lane.b32.xlu1 %v2434_v9, %s6913_s29  ;;  %v2522_v38 = vsel %vm941_vm6, %v2521_v4, %v2502_v35  ;;  %v2544_v52 = vld [vmem:[#allocation2 + $0x23] sm:$0x1]  ;;  %v2561_v12 = vrot.slane %v2543_v26, 4 }
 0x51c   : > { %v2524_v22 = vsel %vm944_vm7, %v2523_v55, %v2522_v38  ;;  %v2551_v10 = vrot.slane %v2544_v52, 7 }
 0x51d   : > { %v2022_v24 = vpop.permute.xlu1 %2021  ;;  %v1995_v13 = vpop.permute.xlu0 %1994  ;;  %v2526_v43 = vsel %vm947_vm9, %v2525_v15, %v2524_v22 }
 0x51e   : > { %2024 = vst.msk [vmem:[#allocation3 + $0x20] sm:$0xf0] %vm6953_vm0, %v2022_v24  ;;  %v2562_v24 = vrot.slane %v2544_v52, 3  ;;  %v2552_v29 = vsel %vm941_vm6, %v2551_v10, %v2543_v26  ;;  %v2820_v52 = vld [vmem:[#allocation2 + $0xa] sm:$0x1] }
 0x51f   : > { %1997 = vst.msk [vmem:[#allocation3 + $0x10] sm:$0xf] %vm1980_vm1, %v1995_v13  ;;  %2445 = vrot.lane.b32.xlu0 %v2444_v23, %s6980_s28  ;;  %2449 = vrot.lane.b32.xlu1 %v2434_v9, %s6916_s12  ;;  %v2828_v10 = vrot.slane %v2820_v52, 4 }
 0x520   : > { %v2563_v30 = vsel %vm954_vm4, %v2562_v24, %v2561_v12 }
 0x521   : > { %v2036_v50 = vpop.permute.xlu1 %2035  ;;  %v2003_v33 = vpop.permute.xlu0 %2002 }
 0x522   : > { %2038 = vst.msk [vmem:[#allocation3 + $0x30] sm:$0xf0] %vm6953_vm0, %v2036_v50  ;;  %v2554_v50 = vsel %vm944_vm7, %v2553_v14, %v2552_v29 }
 0x523   : > { %2005 = vst.msk [vmem:[#allocation3 + $0x20] sm:$0xf] %vm1980_vm1, %v2003_v33  ;;  %2453 = vrot.lane.b32.xlu0 %v2444_v23, %s6981_s14  ;;  %2457 = vrot.lane.b32.xlu1 %v2434_v9, %s6920_s25  ;;  %v2546_v9 = vld [vmem:[#allocation2 + $0x53] sm:$0x1]  ;;  %v2565_v33 = vsel %vm957_vm5, %v2564_v56, %v2563_v30 }
 0x524   : > { %v2555_v23 = vrot.slane %v2546_v9, 5  ;;  %v2566_v28 = vrot.slane %v2546_v9, 1  ;;  %v2822_v9 = vld [vmem:[#allocation2 + $0x3a] sm:$0x1] }
 0x525   : > { %v2044_v49 = vpop.permute.xlu1 %2043  ;;  %v2032_v61 = vpop.permute.xlu0 %2031  ;;  %v2831_v14 = vrot.slane %v2822_v9, 2  ;;  %v2841_v56 = vrot.slane %v2822_v9, 6 }
 0x526   : > { %2046 = vst.msk [vmem:[#allocation3 + $0x40] sm:$0xf0] %vm6953_vm0, %v2044_v49  ;;  %v2556_v8 = vsel %vm947_vm9, %v2555_v23, %v2554_v50  ;;  %v2567_v11 = vsel %vm960_vm8, %v2566_v28, %v2565_v33 }
 0x527   : > { %2034 = vst.msk [vmem:[#allocation3 + $0x30] sm:$0xf] %vm1980_vm1, %v2032_v61  ;;  %2475 = vrot.lane.b32.xlu0 %v2474_v16, %s6913_s29  ;;  %2486 = vrot.lane.b32.xlu1 %v2485_v40, %s6980_s28 }
 0x529   : > { %v2073_v54 = vpop.permute.xlu1 %2072  ;;  %v2040_v57 = vpop.permute.xlu0 %2039 }
 0x52a   : > { %2075 = vst.msk [vmem:[#allocation3 + $0x50] sm:$0xf0] %vm6953_vm0, %v2073_v54  ;;  %v2782_v54 = vld [vmem:[#allocation2 + $0x51] sm:$0x1] }
 0x52b   : > { %2042 = vst.msk [vmem:[#allocation3 + $0x40] sm:$0xf] %vm1980_vm1, %v2040_v57  ;;  %2490 = vrot.lane.b32.xlu0 %v2474_v16, %s6916_s12  ;;  %2494 = vrot.lane.b32.xlu1 %v2485_v40, %s6981_s14  ;;  %v2787_v57 = vrot.slane %v2780_v48, 7  ;;  %v2791_v4 = vrot.slane %v2782_v54, 5 }
 0x52d   : > { %v2081_v0 = vpop.permute.xlu1 %2080  ;;  %v2062_v2 = vpop.permute.xlu0 %2061 }
 0x52e   : > { %2083 = vst.msk [vmem:[#allocation3 + $0x60] sm:$0xf0] %vm6953_vm0, %v2081_v0  ;;  %v2797_v0 = vrot.slane %v2779_v51, 4 }
 0x52f   : > { %2064 = vst.msk [vmem:[#allocation3 + $0x50] sm:$0xf] %vm1980_vm1, %v2062_v2  ;;  %2498 = vrot.lane.b32.xlu0 %v2474_v16, %s6920_s25  ;;  %2517 = vrot.lane.b32.xlu1 %v2516_v62, %s6913_s29  ;;  %v2798_v2 = vrot.slane %v2780_v48, 3 }
 0x531   : > { %v2185_v6 = vpop.permute.xlu1 %2184  ;;  %v2077_v7 = vpop.permute.xlu0 %2076 }
 0x532   : > { %2188 = vst.msk [vmem:[#allocation3] sm:$0xf] %vm2187_vm15, %v2185_v6  ;;  %v2802_v6 = vrot.slane %v2782_v54, 1  ;;  %v2902_v54 = vld [vmem:[#allocation2 + $0xc] sm:$0x1] }
 0x533   : > { %2079 = vst.msk [vmem:[#allocation3 + $0x60] sm:$0xf] %vm1980_vm1, %v2077_v7  ;;  %2527 = vrot.lane.b32.xlu0 %v2526_v43, %s6980_s28  ;;  %2531 = vrot.lane.b32.xlu1 %v2516_v62, %s6916_s12 }
 0x535   : > { %v2202_v13 = vpop.permute.xlu1 %2201  ;;  %v2085_v32 = vpop.permute.xlu0 %2084 }
 0x536   : > { %2204 = vst.msk [vmem:[#allocation3 + $0x10] sm:$0xf] %vm2187_vm15, %v2202_v13 }
 0x537   : > { %2087 = vst.msk [vmem:[#allocation3 + $0x70] sm:$0xf] %vm1980_vm1, %v2085_v32  ;;  %2535 = vrot.lane.b32.xlu0 %v2526_v43, %s6981_s14  ;;  %2539 = vrot.lane.b32.xlu1 %v2516_v62, %s6920_s25  ;;  %v2821_v43 = vld [vmem:[#allocation2 + $0x22] sm:$0x1] }
 0x538   : > { %v2829_v12 = vrot.slane %v2821_v43, 3  ;;  %v2839_v24 = vrot.slane %v2821_v43, 7  ;;  %v2985_v43 = vld [vmem:[#allocation2 + $0x22] sm:$0x1] }
 0x539   : > { %v2210_v31 = vpop.permute.xlu1 %2209  ;;  %v2197_v3 = vpop.permute.xlu0 %2196 }
 0x53a   : > { %2212 = vst.msk [vmem:[#allocation3 + $0x20] sm:$0xf] %vm2187_vm15, %v2210_v31  ;;  %v2830_v29 = vsel %vm954_vm4, %v2829_v12, %v2828_v10  ;;  %v2840_v30 = vsel %vm941_vm6, %v2839_v24, %v2820_v52  ;;  %v2984_v52 = vld [vmem:[#allocation2 + $0xa] sm:$0x1]  ;;  %v2987_v10 = vld [vmem:[#allocation2 + $0x52] sm:$0x1] }
 0x53b   : > { %2200 = vst.msk [vmem:[#allocation3] sm:$0xf0] %vm2199_vm14, %v2197_v3  ;;  %2557 = vrot.lane.b32.xlu0 %v2556_v8, %s6913_s29  ;;  %2568 = vrot.lane.b32.xlu1 %v2567_v11, %s6980_s28  ;;  %s6982_s29 = smov 127   ;;  %v2832_v50 = vsel %vm957_vm5, %v2831_v14, %v2830_v29  ;;  %v2842_v33 = vsel %vm944_vm7, %v2841_v56, %v2840_v30  ;;  %v2992_v12 = vrot.slane %v2985_v43, 7  ;;  %v3002_v24 = vrot.slane %v2984_v52, 4 }
 0x53c   : > { %v3007_v29 = vrot.slane %v2987_v10, 1 }
 0x53d   : > { %v2239_v41 = vpop.permute.xlu1 %2238  ;;  %v2206_v44 = vpop.permute.xlu0 %2205  ;;  %v2993_v30 = vsel %vm941_vm6, %v2992_v12, %v2984_v52  ;;  %v3600_v52 = vld [vmem:[#allocation2 + $0x25] sm:$0x1] }
 0x53e   : > { %2241 = vst.msk [vmem:[#allocation3 + $0x30] sm:$0xf] %vm2187_vm15, %v2239_v41  ;;  %v3607_v12 = vrot.slane %v3600_v52, 7 }
 0x53f   : > { %2208 = vst.msk [vmem:[#allocation3 + $0x10] sm:$0xf0] %vm2199_vm14, %v2206_v44  ;;  %2572 = vrot.lane.b32.xlu0 %v2556_v8, %s6916_s12  ;;  %2576 = vrot.lane.b32.xlu1 %v2567_v11, %s6981_s14  ;;  %s6983_s12 = smov 126   ;;  %v2863_v44 = vld [vmem:[#allocation2 + $0x3b] sm:$0x1] }
 0x541   : > { %v2247_v46 = vpop.permute.xlu1 %2246  ;;  %v2229_v58 = vpop.permute.xlu0 %2228 }
 0x542   : > { %2249 = vst.msk [vmem:[#allocation3 + $0x40] sm:$0xf] %vm2187_vm15, %v2247_v46  ;;  %v2864_v46 = vld [vmem:[#allocation2 + $0x53] sm:$0x1] }
 0x543   : > { %2231 = vst.msk [vmem:[#allocation3 + $0x20] sm:$0xf0] %vm2199_vm14, %v2229_v58  ;;  %2580 = vrot.lane.b32.xlu0 %v2556_v8, %s6920_s25  ;;  %2607 = vrot.lane.b32.xlu1 %v5267_v59, %s6982_s29  ;;  %s6985_s25 = smov 124   ;;  %v2862_v8 = vld [vmem:[#allocation2 + $0x23] sm:$0x1] }
 0x544   : > { %v2869_v58 = vrot.slane %v2862_v8, 7 }
 0x545   : > { %v2404_v49 = vpop.permute.xlu1 %2403  ;;  %v2243_v61 = vpop.permute.xlu0 %2242 }
 0x546   : > { %2407 = vst.msk [vmem:[#allocation3] sm:$0xf0] %vm6952_vm12, %v2404_v49 }
 0x547   : > { %2245 = vst.msk [vmem:[#allocation3 + $0x30] sm:$0xf0] %vm2199_vm14, %v2243_v61  ;;  %2611 = vrot.lane.b32.xlu0 %v5270_v1, %s6983_s12  ;;  %2615 = vrot.lane.b32.xlu1 %v5267_v59, %s6984_s16 }
 0x549   : > { %v2413_v39 = vpop.permute.xlu1 %2412  ;;  %v2251_v27 = vpop.permute.xlu0 %2250 }
 0x54a   : > { %2415 = vst.msk [vmem:[#allocation3 + $0x10] sm:$0xf0] %vm6952_vm12, %v2413_v39  ;;  %v2861_v39 = vld [vmem:[#allocation2 + $0xb] sm:$0x1] }
 0x54b   : > { %2253 = vst.msk [vmem:[#allocation3 + $0x40] sm:$0xf0] %vm2199_vm14, %v2251_v27  ;;  %2619 = vrot.lane.b32.xlu0 %v5270_v1, %s6985_s25  ;;  %2646 = vrot.lane.b32.xlu1 %v5278_v19, %s6982_s29  ;;  %v2871_v27 = vrot.slane %v2863_v44, 6 }
 0x54d   : > { %v2392_v35 = vpop.permute.xlu0 %2391  ;;  %v1937_v63 = vpop.permute.xlu1 %1936 }
 0x54e   : > { %2395 = vst.msk [vmem:[#allocation3] sm:$0xf] %vm2394_vm13, %v2392_v35  ;;  %v2873_v35 = vrot.slane %v2864_v46, 5 }
 0x54f   : > { %1939 = vst.msk [vmem:[#allocation3 + $0xa0] sm:$0xf] %vm1773_vm2, %v1937_v63  ;;  %2650 = vrot.lane.b32.xlu0 %v5281_v53, %s6983_s12  ;;  %2654 = vrot.lane.b32.xlu1 %v5278_v19, %s6984_s16  ;;  %v2870_v63 = vsel %vm941_vm6, %v2869_v58, %v2861_v39  ;;  %v3191_v58 = vld [vmem:[#allocation2 + $0x3b] sm:$0x1] }
 0x551   : > { %v2409_v59 = vpop.permute.xlu0 %2408  ;;  %v1952_v16 = vpop.permute.xlu1 %1951 }
 0x552   : > { %2411 = vst.msk [vmem:[#allocation3 + $0x10] sm:$0xf] %vm2394_vm13, %v2409_v59  ;;  %v2879_v59 = vrot.slane %v2861_v39, 4 }
 0x553   : > { %1954 = vst.msk [vmem:[#allocation3 + $0xb0] sm:$0xf] %vm1773_vm2, %v1952_v16  ;;  %2658 = vrot.lane.b32.xlu0 %v5281_v53, %s6985_s25  ;;  %2685 = vrot.lane.b32.xlu1 %v5285_v20, %s6982_s29  ;;  %v2880_v16 = vrot.slane %v2862_v8, 3 }
 0x555   : > { %v2417_v1 = vpop.permute.xlu0 %2416  ;;  %v1960_v40 = vpop.permute.xlu1 %1959 }
 0x556   : > { %2419 = vst.msk [vmem:[#allocation3 + $0x20] sm:$0xf] %vm2394_vm13, %v2417_v1 }
 0x557   : > { %1962 = vst.msk [vmem:[#allocation3 + $0xc0] sm:$0xf] %vm1773_vm2, %v1960_v40  ;;  %2689 = vrot.lane.b32.xlu0 %v5290_v21, %s6983_s12  ;;  %2693 = vrot.lane.b32.xlu1 %v5285_v20, %s6984_s16 }
 0x559   : > { %v1948_v19 = vpop.permute.xlu0 %1947  ;;  %v2104_v42 = vpop.permute.xlu1 %2103 }
 0x55a   : > { %1950 = vst.msk [vmem:[#allocation3 + $0xa0] sm:$0xf0] %vm1785_vm3, %v1948_v19  ;;  %v2872_v19 = vsel %vm944_vm7, %v2871_v27, %v2870_v63 }
 0x55b   : > { %2106 = vst.msk [vmem:[#allocation3 + $0x70] sm:$0xf0] %vm6953_vm0, %v2104_v42  ;;  %2697 = vrot.lane.b32.xlu0 %v5290_v21, %s6985_s25  ;;  %2724 = vrot.lane.b32.xlu1 %v5296_v60, %s6982_s29  ;;  %v2781_v21 = vld [vmem:[#allocation2 + $0x39] sm:$0x1]  ;;  %v2882_v42 = vrot.slane %v2863_v44, 2 }
 0x55c   : > { %v2800_v15 = vrot.slane %v2781_v21, 2 }
 0x55d   : > { %v1956_v53 = vpop.permute.xlu0 %1955  ;;  %v2118_v47 = vpop.permute.xlu1 %2117 }
 0x55e   : > { %1958 = vst.msk [vmem:[#allocation3 + $0xb0] sm:$0xf0] %vm1785_vm3, %v1956_v53  ;;  %v2874_v53 = vsel %vm947_vm9, %v2873_v35, %v2872_v19 }
 0x55f   : > { %2120 = vst.msk [vmem:[#allocation3 + $0x80] sm:$0xf0] %vm6953_vm0, %v2118_v47  ;;  %2728 = vrot.lane.b32.xlu0 %v5301_v34, %s6983_s12  ;;  %2732 = vrot.lane.b32.xlu1 %v5296_v60, %s6984_s16  ;;  %v2789_v60 = vrot.slane %v2781_v21, 6  ;;  %v2884_v47 = vrot.slane %v2864_v46, 1 }
 0x561   : > { %v2114_v20 = vpop.permute.xlu0 %2113  ;;  %v2126_v25 = vpop.permute.xlu1 %2125 }
 0x562   : > { %2116 = vst.msk [vmem:[#allocation3 + $0x80] sm:$0xf] %vm1980_vm1, %v2114_v20  ;;  %v2881_v20 = vsel %vm954_vm4, %v2880_v16, %v2879_v59  ;;  %v3199_v59 = vrot.slane %v3191_v58, 6  ;;  %v3210_v16 = vrot.slane %v3191_v58, 2 }
 0x563   : > { %2128 = vst.msk [vmem:[#allocation3 + $0x90] sm:$0xf0] %vm6953_vm0, %v2126_v25  ;;  %2736 = vrot.lane.b32.xlu0 %v5301_v34, %s6985_s25  ;;  %2763 = vrot.lane.b32.xlu1 %v5305_v18, %s6982_s29  ;;  %v2788_v34 = vsel %vm941_vm6, %v2787_v57, %v2779_v51  ;;  %s6987_s29 = smov 15   ;;  %v2883_v21 = vsel %vm957_vm5, %v2882_v42, %v2881_v20  ;;  %v2903_v57 = vld [vmem:[#allocation2 + $0x24] sm:$0x1] }
 0x564   : > { %v2790_v62 = vsel %vm944_vm7, %v2789_v60, %v2788_v34  ;;  %v2905_v51 = vld [vmem:[#allocation2 + $0x54] sm:$0x1]  ;;  %v2910_v60 = vrot.slane %v2902_v54, 4  ;;  %v2921_v34 = vrot.slane %v2903_v57, 7 }
 0x565   : > { %v2122_v17 = vpop.permute.xlu0 %2121  ;;  %v2155_v45 = vpop.permute.xlu1 %2154  ;;  %v2792_v38 = vsel %vm947_vm9, %v2791_v4, %v2790_v62  ;;  %v2911_v4 = vrot.slane %v2903_v57, 3  ;;  %v2915_v62 = vrot.slane %v2905_v51, 1 }
 0x566   : > { %2124 = vst.msk [vmem:[#allocation3 + $0x90] sm:$0xf] %vm1980_vm1, %v2122_v17  ;;  %v2885_v17 = vsel %vm960_vm8, %v2884_v47, %v2883_v21  ;;  %v3395_v21 = vld [vmem:[#allocation2 + $0x24] sm:$0x1] }
 0x567   : > { %2157 = vst.msk [vmem:[#allocation3 + $0xa0] sm:$0xf0] %vm6953_vm0, %v2155_v45  ;;  %2767 = vrot.lane.b32.xlu0 %v5308_v36, %s6983_s12  ;;  %2771 = vrot.lane.b32.xlu1 %v5305_v18, %s6984_s16  ;;  %s6986_s12 = smov 16   ;;  %v2799_v18 = vsel %vm954_vm4, %v2798_v2, %v2797_v0  ;;  %s6988_s16 = smov 14   ;;  %v2904_v45 = vld [vmem:[#allocation2 + $0x3c] sm:$0x1] }
 0x568   : > { %v2801_v26 = vsel %vm957_vm5, %v2800_v15, %v2799_v18  ;;  %v2925_v15 = vrot.slane %v2905_v51, 5  ;;  %v3402_v51 = vrot.slane %v3395_v21, 7 }
 0x569   : > { %v2144_v5 = vpop.permute.xlu0 %2143  ;;  %v2163_v55 = vpop.permute.xlu1 %2162  ;;  %v2803_v37 = vsel %vm960_vm8, %v2802_v6, %v2801_v26  ;;  %v2922_v6 = vsel %vm941_vm6, %v2921_v34, %v2902_v54 }
 0x56a   : > { %2146 = vst.msk [vmem:[#allocation3 + $0xa0] sm:$0xf] %vm1980_vm1, %v2144_v5  ;;  %v2913_v5 = vrot.slane %v2904_v45, 2 }
 0x56b   : > { %2165 = vst.msk [vmem:[#allocation3 + $0xb0] sm:$0xf0] %vm6953_vm0, %v2163_v55  ;;  %2775 = vrot.lane.b32.xlu0 %v5308_v36, %s6985_s25  ;;  %2793 = vrot.lane.b32.xlu1 %v2792_v38, %s6986_s12  ;;  %v2823_v36 = vld [vmem:[#allocation2 + $0x52] sm:$0x1]  ;;  %s6989_s25 = smov 13   ;;  %v2923_v55 = vrot.slane %v2904_v45, 6 }
 0x56c   : > { %v2833_v23 = vrot.slane %v2823_v36, 1  ;;  %v2843_v28 = vrot.slane %v2823_v36, 5  ;;  %v2986_v36 = vld [vmem:[#allocation2 + $0x3a] sm:$0x1]  ;;  %v3397_v45 = vld [vmem:[#allocation2 + $0x54] sm:$0x1] }
 0x56d   : > { %v2159_v7 = vpop.permute.xlu0 %2158  ;;  %v2269_v22 = vpop.permute.xlu1 %2268  ;;  %v2924_v26 = vsel %vm944_vm7, %v2923_v55, %v2922_v6  ;;  %v2994_v56 = vrot.slane %v2986_v36, 6  ;;  %v3406_v55 = vrot.slane %v3397_v45, 5 }
 0x56e   : > { %2161 = vst.msk [vmem:[#allocation3 + $0xb0] sm:$0xf] %vm1980_vm1, %v2159_v7  ;;  %v2834_v11 = vsel %vm960_vm8, %v2833_v23, %v2832_v50  ;;  %v2844_v41 = vsel %vm947_vm9, %v2843_v28, %v2842_v33  ;;  %v2926_v9 = vsel %vm947_vm9, %v2925_v15, %v2924_v26  ;;  %v3005_v23 = vrot.slane %v2986_v36, 2  ;;  %v3599_v26 = vld [vmem:[#allocation2 + $0xd] sm:$0x1] }
 0x56f   : > { %2271 = vst.msk [vmem:[#allocation3 + $0x50] sm:$0xf] %vm2187_vm15, %v2269_v22  ;;  %2804 = vrot.lane.b32.xlu0 %v2803_v37, %s6987_s29  ;;  %2808 = vrot.lane.b32.xlu1 %v2792_v38, %s6988_s16  ;;  %v2996_v28 = vrot.slane %v2987_v10, 5  ;;  %v2995_v33 = vsel %vm944_vm7, %v2994_v56, %v2993_v30  ;;  %v3601_v36 = vld [vmem:[#allocation2 + $0x3d] sm:$0x1]  ;;  %v3608_v30 = vsel %vm941_vm6, %v3607_v12, %v3599_v26 }
 0x570   : > { %v3602_v10 = vld [vmem:[#allocation2 + $0x55] sm:$0x1]  ;;  %v3609_v56 = vrot.slane %v3601_v36, 6  ;;  %v3232_v12 = vld [vmem:[#allocation2 + $0x3c] sm:$0x1] }
 0x571   : > { %v2167_v13 = vpop.permute.xlu0 %2166  ;;  %v2284_v32 = vpop.permute.xlu1 %2283  ;;  %v5979_v44 = vsel %vm947_vm9, %v2996_v28, %v2995_v33  ;;  %v3611_v28 = vrot.slane %v3602_v10, 5 }
 0x572   : > { %2169 = vst.msk [vmem:[#allocation3 + $0xc0] sm:$0xf] %vm1980_vm1, %v2167_v13  ;;  %v3003_v13 = vrot.slane %v2985_v43, 3  ;;  %v3610_v33 = vsel %vm944_vm7, %v3609_v56, %v3608_v30 }
 0x573   : > { %2286 = vst.msk [vmem:[#allocation3 + $0x60] sm:$0xf] %vm2187_vm15, %v2284_v32  ;;  %2812 = vrot.lane.b32.xlu0 %v2803_v37, %s6989_s25  ;;  %2816 = vrot.lane.b32.xlu1 %v2792_v38, %s6990_s9  ;;  %v2912_v38 = vsel %vm954_vm4, %v2911_v4, %v2910_v60  ;;  %v3413_v4 = vrot.slane %v3395_v21, 3 }
 0x574   : > { %v2914_v22 = vsel %vm957_vm5, %v2913_v5, %v2912_v38 }
 0x575   : > { %v2280_v31 = vpop.permute.xlu0 %2279  ;;  %v2292_v3 = vpop.permute.xlu1 %2291  ;;  %v5961_v37 = vsel %vm960_vm8, %v2915_v62, %v2914_v22  ;;  %v3417_v62 = vrot.slane %v3397_v45, 1 }
 0x576   : > { %2282 = vst.msk [vmem:[#allocation3 + $0x50] sm:$0xf0] %vm2199_vm14, %v2280_v31  ;;  %v3004_v31 = vsel %vm954_vm4, %v3003_v13, %v3002_v24  ;;  %v3617_v24 = vrot.slane %v3599_v26, 4  ;;  %v3618_v13 = vrot.slane %v3600_v52, 3  ;;  %v3230_v52 = vld [vmem:[#allocation2 + $0xc] sm:$0x1] }
 0x577   : > { %2294 = vst.msk [vmem:[#allocation3 + $0x70] sm:$0xf] %vm2187_vm15, %v2292_v3  ;;  %2835 = vrot.lane.b32.xlu0 %v2834_v11, %s6986_s12  ;;  %2845 = vrot.lane.b32.xlu1 %v2844_v41, %s6987_s29  ;;  %v3006_v8 = vsel %vm957_vm5, %v3005_v23, %v3004_v31  ;;  %v3620_v23 = vrot.slane %v3601_v36, 2 }
 0x578   : > { %v3008_v46 = vsel %vm960_vm8, %v3007_v29, %v3006_v8  ;;  %v3622_v29 = vrot.slane %v3602_v10, 1  ;;  %v3619_v31 = vsel %vm954_vm4, %v3618_v13, %v3617_v24  ;;  %v3233_v24 = vld [vmem:[#allocation2 + $0x54] sm:$0x1]  ;;  %v3238_v13 = vrot.slane %v3230_v52, 4 }
 0x579   : > { %v2288_v49 = vpop.permute.xlu0 %2287  ;;  %v2321_v61 = vpop.permute.xlu1 %2320  ;;  %v3621_v8 = vsel %vm957_vm5, %v3620_v23, %v3619_v31  ;;  %v3241_v23 = vrot.slane %v3232_v12, 2 }
 0x57a   : > { %2290 = vst.msk [vmem:[#allocation3 + $0x60] sm:$0xf0] %vm2199_vm14, %v2288_v49  ;;  %v3192_v49 = vld [vmem:[#allocation2 + $0x53] sm:$0x1]  ;;  %v3623_v58 = vsel %vm960_vm8, %v3622_v29, %v3621_v8  ;;  %v4009_v8 = vld [vmem:[#allocation2 + $0xf] sm:$0x1] }
 0x57b   : > { %2323 = vst.msk [vmem:[#allocation3 + $0x80] sm:$0xf] %vm2187_vm15, %v2321_v61  ;;  %2849 = vrot.lane.b32.xlu0 %v2834_v11, %s6988_s16  ;;  %2853 = vrot.lane.b32.xlu1 %v2844_v41, %s6989_s25  ;;  %v3190_v41 = vld [vmem:[#allocation2 + $0x23] sm:$0x1] }
 0x57c   : > { %v3197_v61 = vrot.slane %v3190_v41, 7  ;;  %v3208_v27 = vrot.slane %v3190_v41, 3  ;;  %v3026_v41 = vld [vmem:[#allocation2 + $0x23] sm:$0x1] }
 0x57d   : > { %v2311_v1 = vpop.permute.xlu0 %2310  ;;  %v2329_v40 = vpop.permute.xlu1 %2328 }
 0x57e   : > { %2313 = vst.msk [vmem:[#allocation3 + $0x70] sm:$0xf0] %vm2199_vm14, %v2311_v1  ;;  %v3201_v1 = vrot.slane %v3192_v49, 5 }
 0x57f   : > { %2331 = vst.msk [vmem:[#allocation3 + $0x90] sm:$0xf] %vm2187_vm15, %v2329_v40  ;;  %2857 = vrot.lane.b32.xlu0 %v2834_v11, %s6990_s9  ;;  %2875 = vrot.lane.b32.xlu1 %v2874_v53, %s6986_s12  ;;  %v3189_v11 = vld [vmem:[#allocation2 + $0xb] sm:$0x1]  ;;  %v3212_v40 = vrot.slane %v3192_v49, 1 }
 0x580   : > { %v3207_v39 = vrot.slane %v3189_v11, 4  ;;  %v3198_v19 = vsel %vm941_vm6, %v3197_v61, %v3189_v11  ;;  %v3025_v11 = vld [vmem:[#allocation2 + $0xb] sm:$0x1]  ;;  %v3027_v49 = vld [vmem:[#allocation2 + $0x3b] sm:$0x1] }
 0x581   : > { %v2325_v25 = vpop.permute.xlu0 %2324  ;;  %v2351_v48 = vpop.permute.xlu1 %2350  ;;  %v3200_v20 = vsel %vm944_vm7, %v3199_v59, %v3198_v19  ;;  %v3028_v61 = vld [vmem:[#allocation2 + $0x53] sm:$0x1]  ;;  %v3036_v59 = vrot.slane %v3027_v49, 2 }
 0x582   : > { %2327 = vst.msk [vmem:[#allocation3 + $0x80] sm:$0xf0] %vm2199_vm14, %v2325_v25  ;;  %v3209_v42 = vsel %vm954_vm4, %v3208_v27, %v3207_v39  ;;  %v5997_v54 = vsel %vm947_vm9, %v3201_v1, %v3200_v20  ;;  %v3033_v39 = vrot.slane %v3025_v11, 4  ;;  %v3034_v27 = vrot.slane %v3026_v41, 3  ;;  %v3804_v20 = vld [vmem:[#allocation2 + $0xe] sm:$0x1] }
 0x583   : > { %2353 = vst.msk [vmem:[#allocation3 + $0xa0] sm:$0xf] %vm2187_vm15, %v2351_v48  ;;  %2886 = vrot.lane.b32.xlu0 %v2885_v17, %s6987_s29  ;;  %2890 = vrot.lane.b32.xlu1 %v2874_v53, %s6988_s16  ;;  %v3211_v25 = vsel %vm957_vm5, %v3210_v16, %v3209_v42  ;;  %v3394_v48 = vld [vmem:[#allocation2 + $0xc] sm:$0x1]  ;;  %v3038_v16 = vrot.slane %v3028_v61, 1  ;;  %v3048_v21 = vrot.slane %v3028_v61, 5 }
 0x584   : > { %v3213_v57 = vsel %vm960_vm8, %v3212_v40, %v3211_v25  ;;  %v3412_v60 = vrot.slane %v3394_v48, 4  ;;  %v3403_v15 = vsel %vm941_vm6, %v3402_v51, %v3394_v48  ;;  %v3035_v1 = vsel %vm954_vm4, %v3034_v27, %v3033_v39  ;;  %v3805_v25 = vld [vmem:[#allocation2 + $0x26] sm:$0x1]  ;;  %v4012_v61 = vld [vmem:[#allocation2 + $0x57] sm:$0x1] }
 0x585   : > { %v2333_v0 = vpop.permute.xlu0 %2332  ;;  %v2366_v2 = vpop.permute.xlu1 %2365  ;;  %v3044_v40 = vrot.slane %v3026_v41, 7  ;;  %v3812_v51 = vrot.slane %v3805_v25, 7 }
 0x586   : > { %2335 = vst.msk [vmem:[#allocation3 + $0x90] sm:$0xf0] %vm2199_vm14, %v2333_v0  ;;  %v3414_v38 = vsel %vm954_vm4, %v3413_v4, %v3412_v60  ;;  %v3822_v60 = vrot.slane %v3804_v20, 4  ;;  %v3823_v4 = vrot.slane %v3805_v25, 3 }
 0x587   : > { %2368 = vst.msk [vmem:[#allocation3 + $0xb0] sm:$0xf] %vm2187_vm15, %v2366_v2  ;;  %2894 = vrot.lane.b32.xlu0 %v2885_v17, %s6989_s25  ;;  %2898 = vrot.lane.b32.xlu1 %v2874_v53, %s6990_s9  ;;  %v3396_v17 = vld [vmem:[#allocation2 + $0x3c] sm:$0x1]  ;;  %v3045_v45 = vsel %vm941_vm6, %v3044_v40, %v3025_v11  ;;  %v4010_v11 = vld [vmem:[#allocation2 + $0x27] sm:$0x1] }
 0x588   : > { %v3404_v2 = vrot.slane %v3396_v17, 6  ;;  %v3415_v5 = vrot.slane %v3396_v17, 2  ;;  %v3807_v17 = vld [vmem:[#allocation2 + $0x56] sm:$0x1]  ;;  %v4017_v27 = vrot.slane %v4010_v11, 7 }
 0x589   : > { %v2362_v18 = vpop.permute.xlu0 %2361  ;;  %v2374_v7 = vpop.permute.xlu1 %2373 }
 0x58a   : > { %2364 = vst.msk [vmem:[#allocation3 + $0xa0] sm:$0xf0] %vm2199_vm14, %v2362_v18  ;;  %v3416_v22 = vsel %vm957_vm5, %v3415_v5, %v3414_v38  ;;  %v3813_v38 = vsel %vm941_vm6, %v3812_v51, %v3804_v20  ;;  %v3436_v51 = vld [vmem:[#allocation2 + $0x25] sm:$0x1] }
 0x58b   : > { %2376 = vst.msk [vmem:[#allocation3 + $0xc0] sm:$0xf] %vm2187_vm15, %v2374_v7  ;;  %2917 = vrot.lane.b32.xlu0 %v5961_v37, %s6986_s12  ;;  %2927 = vrot.lane.b32.xlu1 %v2926_v9, %s6987_s29  ;;  %v3405_v7 = vsel %vm944_vm7, %v3404_v2, %v3403_v15  ;;  %v3827_v15 = vrot.slane %v3807_v17, 1 }
 0x58c   : > { %v6015_v43 = vsel %vm947_vm9, %v3406_v55, %v3405_v7 }
 0x58d   : > { %v2370_v32 = vpop.permute.xlu0 %2369  ;;  %v2436_v14 = vpop.permute.xlu1 %2435 }
 0x58e   : > { %2372 = vst.msk [vmem:[#allocation3 + $0xb0] sm:$0xf0] %vm2199_vm14, %v2370_v32 }
 0x58f   : > { %2438 = vst.msk [vmem:[#allocation3 + $0x20] sm:$0xf0] %vm6952_vm12, %v2436_v14  ;;  %2931 = vrot.lane.b32.xlu0 %v5961_v37, %s6988_s16  ;;  %2935 = vrot.lane.b32.xlu1 %v2926_v9, %s6989_s25  ;;  %v3418_v9 = vsel %vm960_vm8, %v3417_v62, %v3416_v22  ;;  %v3816_v62 = vrot.slane %v3807_v17, 5 }
 0x591   : > { %v2446_v3 = vpop.permute.xlu0 %2445  ;;  %v2450_v50 = vpop.permute.xlu1 %2449 }
 0x592   : > { %2448 = vst.msk [vmem:[#allocation3 + $0x30] sm:$0xf] %vm2394_vm13, %v2446_v3 }
 0x593   : > { %2452 = vst.msk [vmem:[#allocation3 + $0x30] sm:$0xf0] %vm6952_vm12, %v2450_v50  ;;  %2998 = vrot.lane.b32.xlu0 %v5979_v44, %s6991_s7  ;;  %3009 = vrot.lane.b32.xlu1 %v3008_v46, %s6992_s10 }
 0x595   : > { %v2454_v35 = vpop.permute.xlu0 %2453  ;;  %v2458_v63 = vpop.permute.xlu1 %2457 }
 0x596   : > { %2456 = vst.msk [vmem:[#allocation3 + $0x40] sm:$0xf] %vm2394_vm13, %v2454_v35 }
 0x597   : > { %2460 = vst.msk [vmem:[#allocation3 + $0x40] sm:$0xf0] %vm6952_vm12, %v2458_v63  ;;  %3013 = vrot.lane.b32.xlu0 %v5979_v44, %s6993_s8  ;;  %3017 = vrot.lane.b32.xlu1 %v3008_v46, %s6994_s17  ;;  %v6033_v46 = vsel %vm947_vm9, %v3611_v28, %v3610_v33  ;;  %v3243_v28 = vrot.slane %v3233_v24, 1  ;;  %v3251_v33 = vrot.slane %v3232_v12, 6 }
 0x599   : > { %v2476_v53 = vpop.permute.xlu0 %2475  ;;  %v2487_v47 = vpop.permute.xlu1 %2486 }
 0x59a   : > { %2478 = vst.msk [vmem:[#allocation3 + $0x50] sm:$0xf] %vm2394_vm13, %v2476_v53  ;;  %v3037_v53 = vsel %vm957_vm5, %v3036_v59, %v3035_v1 }
 0x59b   : > { %2489 = vst.msk [vmem:[#allocation3 + $0x50] sm:$0xf0] %vm6952_vm12, %v2487_v47  ;;  %3203 = vrot.lane.b32.xlu0 %v5997_v54, %s6995_s11  ;;  %3214 = vrot.lane.b32.xlu1 %v3213_v57, %s6996_s26  ;;  %v3046_v47 = vrot.slane %v3027_v49, 6  ;;  %v6049_v48 = vsel %vm960_vm8, %v3038_v16, %v3037_v53  ;;  %v4011_v49 = vld [vmem:[#allocation2 + $0x3f] sm:$0x1]  ;;  %v4032_v53 = vrot.slane %v4012_v61, 1 }
 0x59c   : > { %v4019_v40 = vrot.slane %v4011_v49, 6 }
 0x59d   : > { %v2491_v34 = vpop.permute.xlu0 %2490  ;;  %v2495_v0 = vpop.permute.xlu1 %2494  ;;  %v3047_v2 = vsel %vm944_vm7, %v3046_v47, %v3045_v45  ;;  %v4018_v47 = vsel %vm941_vm6, %v4017_v27, %v4009_v8  ;;  %v3435_v45 = vld [vmem:[#allocation2 + $0xd] sm:$0x1] }
 0x59e   : > { %2493 = vst.msk [vmem:[#allocation3 + $0x60] sm:$0xf] %vm2394_vm13, %v2491_v34 }
 0x59f   : > { %2497 = vst.msk [vmem:[#allocation3 + $0x60] sm:$0xf0] %vm6952_vm12, %v2495_v0  ;;  %3218 = vrot.lane.b32.xlu0 %v5997_v54, %s6997_s0  ;;  %3222 = vrot.lane.b32.xlu1 %v3213_v57, %s6998_s1  ;;  %v3806_v57 = vld [vmem:[#allocation2 + $0x3e] sm:$0x1] }
 0x5a0   : > { %v3814_v5 = vrot.slane %v3806_v57, 6  ;;  %v3825_v55 = vrot.slane %v3806_v57, 2  ;;  %v4020_v57 = vsel %vm944_vm7, %v4019_v40, %v4018_v47 }
 0x5a1   : > { %v2499_v6 = vpop.permute.xlu0 %2498  ;;  %v2518_v18 = vpop.permute.xlu1 %2517 }
 0x5a2   : > { %2501 = vst.msk [vmem:[#allocation3 + $0x70] sm:$0xf] %vm2394_vm13, %v2499_v6  ;;  %v3824_v6 = vsel %vm954_vm4, %v3823_v4, %v3822_v60  ;;  %v3815_v22 = vsel %vm944_vm7, %v3814_v5, %v3813_v38  ;;  %v3444_v5 = vrot.slane %v3436_v51, 3 }
 0x5a3   : > { %2520 = vst.msk [vmem:[#allocation3 + $0x70] sm:$0xf0] %vm6952_vm12, %v2518_v18  ;;  %3408 = vrot.lane.b32.xlu0 %v6015_v43, %s6999_s2  ;;  %3419 = vrot.lane.b32.xlu1 %v3418_v9, %s7000_s27  ;;  %v3826_v26 = vsel %vm957_vm5, %v3825_v55, %v3824_v6  ;;  %v6073_v36 = vsel %vm947_vm9, %v3816_v62, %v3815_v22 }
 0x5a4   : > { %v3828_v10 = vsel %vm960_vm8, %v3827_v15, %v3826_v26 }
 0x5a5   : > { %v2528_v32 = vpop.permute.xlu0 %2527  ;;  %v2532_v14 = vpop.permute.xlu1 %2531 }
 0x5a6   : > { %2530 = vst.msk [vmem:[#allocation3 + $0x80] sm:$0xf] %vm2394_vm13, %v2528_v32 }
 0x5a7   : > { %2534 = vst.msk [vmem:[#allocation3 + $0x80] sm:$0xf0] %vm6952_vm12, %v2532_v14  ;;  %3423 = vrot.lane.b32.xlu0 %v6015_v43, %s7001_s20  ;;  %3427 = vrot.lane.b32.xlu1 %v3418_v9, %s7002_s19  ;;  %v3231_v9 = vld [vmem:[#allocation2 + $0x24] sm:$0x1] }
 0x5a8   : > { %v3239_v32 = vrot.slane %v3231_v9, 3  ;;  %v3249_v30 = vrot.slane %v3231_v9, 7  ;;  %v3640_v9 = vld [vmem:[#allocation2 + $0xe] sm:$0x1] }
 0x5a9   : > { %v2536_v3 = vpop.permute.xlu0 %2535  ;;  %v2540_v50 = vpop.permute.xlu1 %2539 }
 0x5aa   : > { %2538 = vst.msk [vmem:[#allocation3 + $0x90] sm:$0xf] %vm2394_vm13, %v2536_v3  ;;  %v3240_v29 = vsel %vm954_vm4, %v3239_v32, %v3238_v13  ;;  %v3250_v39 = vsel %vm941_vm6, %v3249_v30, %v3230_v52  ;;  %v3642_v13 = vld [vmem:[#allocation2 + $0x3e] sm:$0x1]  ;;  %v3643_v32 = vld [vmem:[#allocation2 + $0x56] sm:$0x1] }
 0x5ab   : > { %2542 = vst.msk [vmem:[#allocation3 + $0x90] sm:$0xf0] %vm6952_vm12, %v2540_v50  ;;  %3613 = vrot.lane.b32.xlu0 %v6033_v46, %s7003_s24  ;;  %3624 = vrot.lane.b32.xlu1 %v3623_v58, %s7004_s21  ;;  %v3242_v50 = vsel %vm957_vm5, %v3241_v23, %v3240_v29  ;;  %v3252_v1 = vsel %vm944_vm7, %v3251_v33, %v3250_v39  ;;  %v3663_v39 = vrot.slane %v3643_v32, 5 }
 0x5ac   : > { %v6089_v41 = vsel %vm960_vm8, %v3243_v28, %v3242_v50 }
 0x5ad   : > { %v2558_v35 = vpop.permute.xlu0 %2557  ;;  %v2569_v63 = vpop.permute.xlu1 %2568 }
 0x5ae   : > { %2560 = vst.msk [vmem:[#allocation3 + $0xa0] sm:$0xf] %vm2394_vm13, %v2558_v35  ;;  %v4027_v35 = vrot.slane %v4009_v8, 4 }
 0x5af   : > { %2571 = vst.msk [vmem:[#allocation3 + $0xa0] sm:$0xf0] %vm6952_vm12, %v2569_v63  ;;  %3628 = vrot.lane.b32.xlu0 %v6033_v46, %s7005_s6  ;;  %3632 = vrot.lane.b32.xlu1 %v3623_v58, %s7006_s18  ;;  %v3253_v58 = vrot.slane %v3233_v24, 5  ;;  %v4028_v63 = vrot.slane %v4010_v11, 3 }
 0x5b1   : > { %v2573_v19 = vpop.permute.xlu0 %2572  ;;  %v2577_v42 = vpop.permute.xlu1 %2576  ;;  %v4029_v20 = vsel %vm954_vm4, %v4028_v63, %v4027_v35 }
 0x5b2   : > { %2575 = vst.msk [vmem:[#allocation3 + $0xb0] sm:$0xf] %vm2394_vm13, %v2573_v19  ;;  %v4030_v19 = vrot.slane %v4011_v49, 2  ;;  %v3661_v49 = vrot.slane %v3642_v13, 6 }
 0x5b3   : > { %2579 = vst.msk [vmem:[#allocation3 + $0xb0] sm:$0xf0] %vm6952_vm12, %v2577_v42  ;;  %3021 = vrot.lane.b32.xlu0 %v5979_v44, %s7007_s5  ;;  %3040 = vrot.lane.b32.xlu1 %v6049_v48, %s6991_s7  ;;  %v6060_v44 = vsel %vm947_vm9, %v3048_v21, %v3047_v2  ;;  %v4021_v42 = vrot.slane %v4012_v61, 5  ;;  %v3443_v2 = vrot.slane %v3435_v45, 4 }
 0x5b4   : > { %v4031_v17 = vsel %vm957_vm5, %v4030_v19, %v4029_v20  ;;  %v3068_v19 = vld [vmem:[#allocation2 + $0x3c] sm:$0x1] }
 0x5b5   : > { %v2581_v34 = vpop.permute.xlu0 %2580  ;;  %v2608_v0 = vpop.permute.xlu1 %2607  ;;  %v6113_v60 = vsel %vm947_vm9, %v4021_v42, %v4020_v57  ;;  %v4033_v4 = vsel %vm960_vm8, %v4032_v53, %v4031_v17  ;;  %v3445_v6 = vsel %vm954_vm4, %v3444_v5, %v3443_v2  ;;  %v3087_v57 = vrot.slane %v3068_v19, 2  ;;  %v3845_v17 = vld [vmem:[#allocation2 + $0xf] sm:$0x1] }
 0x5b6   : > { %2583 = vst.msk [vmem:[#allocation3 + $0xc0] sm:$0xf] %vm2394_vm13, %v2581_v34  ;;  %v3437_v34 = vld [vmem:[#allocation2 + $0x3d] sm:$0x1] }
 0x5b7   : > { %2610 = vst.msk [vmem:[#allocation3 + $0x8] sm:$0xf0] %vm965_vm11, %v2608_v0  ;;  %3050 = vrot.lane.b32.xlu0 %v6060_v44, %s6992_s10  ;;  %3054 = vrot.lane.b32.xlu1 %v6049_v48, %s6993_s8  ;;  %v3438_v0 = vld [vmem:[#allocation2 + $0x55] sm:$0x1]  ;;  %v3446_v15 = vrot.slane %v3437_v34, 2  ;;  %v3456_v52 = vrot.slane %v3437_v34, 6 }
 0x5b8   : > { %v3448_v38 = vrot.slane %v3438_v0, 1  ;;  %v3458_v24 = vrot.slane %v3438_v0, 5  ;;  %v3847_v34 = vld [vmem:[#allocation2 + $0x3f] sm:$0x1]  ;;  %v3848_v0 = vld [vmem:[#allocation2 + $0x57] sm:$0x1] }
 0x5b9   : > { %v2612_v18 = vpop.permute.xlu0 %2611  ;;  %v2616_v7 = vpop.permute.xlu1 %2615  ;;  %v3447_v26 = vsel %vm957_vm5, %v3446_v15, %v3445_v6 }
 0x5ba   : > { %2614 = vst.msk [vmem:[#allocation3 + $0x18] sm:$0xf] %vm950_vm10, %v2612_v18  ;;  %v3454_v18 = vrot.slane %v3436_v51, 7  ;;  %v6129_v12 = vsel %vm960_vm8, %v3448_v38, %v3447_v26 }
 0x5bb   : > { %2618 = vst.msk [vmem:[#allocation3 + $0x18] sm:$0xf0] %vm965_vm11, %v2616_v7  ;;  %3818 = vrot.lane.b32.xlu0 %v6073_v36, %s7008_s30  ;;  %3829 = vrot.lane.b32.xlu1 %v3828_v10, %s6978_s15 }
 0x5bd   : > { %v2620_v14 = vpop.permute.xlu0 %2619  ;;  %v2647_v56 = vpop.permute.xlu1 %2646 }
 0x5be   : > { %2622 = vst.msk [vmem:[#allocation3 + $0x28] sm:$0xf] %vm950_vm10, %v2620_v14  ;;  %2649 = vst.msk [vmem:[#allocation3 + $0x38] sm:$0xf] %vm950_vm10, %v2647_v56  ;;  %v3455_v14 = vsel %vm941_vm6, %v3454_v18, %v3435_v45  ;;  %v3648_v56 = vrot.slane %v3640_v9, 4 }
 0x5bf   : > { %3833 = vrot.lane.b32.xlu0 %v6073_v36, %s7009_s3  ;;  %3837 = vrot.lane.b32.xlu1 %v3828_v10, %s6979_s13  ;;  %v3641_v10 = vld [vmem:[#allocation2 + $0x26] sm:$0x1]  ;;  %v3457_v30 = vsel %vm944_vm7, %v3456_v52, %v3455_v14  ;;  %v3846_v45 = vld [vmem:[#allocation2 + $0x27] sm:$0x1]  ;;  %v3868_v14 = vrot.slane %v3848_v0, 5 }
 0x5c0   : > { %v3649_v23 = vrot.slane %v3641_v10, 3  ;;  %v3659_v33 = vrot.slane %v3641_v10, 7  ;;  %v3864_v52 = vrot.slane %v3846_v45, 7 }
 0x5c1   : > { %v2651_v31 = vpop.permute.xlu0 %2650  ;;  %v2655_v3 = vpop.permute.xlu1 %2654 }
 0x5c2   : > { %2653 = vst.msk [vmem:[#allocation3 + $0x38] sm:$0xf0] %vm965_vm11, %v2651_v31  ;;  %v3651_v31 = vrot.slane %v3642_v13, 2  ;;  %v3650_v50 = vsel %vm954_vm4, %v3649_v23, %v3648_v56  ;;  %v3660_v27 = vsel %vm941_vm6, %v3659_v33, %v3640_v9  ;;  %v3866_v13 = vrot.slane %v3847_v34, 6 }
 0x5c3   : > { %2657 = vst.msk [vmem:[#allocation3 + $0x48] sm:$0xf] %vm950_vm10, %v2655_v3  ;;  %3226 = vrot.lane.b32.xlu0 %v5997_v54, %s7010_s22  ;;  %3245 = vrot.lane.b32.xlu1 %v6089_v41, %s6995_s11  ;;  %v6100_v54 = vsel %vm947_vm9, %v3253_v58, %v3252_v1  ;;  %v6140_v3 = vsel %vm947_vm9, %v3458_v24, %v3457_v30  ;;  %v3067_v1 = vld [vmem:[#allocation2 + $0x24] sm:$0x1]  ;;  %v3271_v30 = vld [vmem:[#allocation2 + $0xd] sm:$0x1] }
 0x5c4   : > { %v3652_v58 = vsel %vm957_vm5, %v3651_v31, %v3650_v50  ;;  %v3074_v42 = vrot.slane %v3067_v1, 7  ;;  %v3085_v47 = vrot.slane %v3067_v1, 3  ;;  %v3865_v56 = vsel %vm941_vm6, %v3864_v52, %v3845_v17  ;;  %v3272_v31 = vld [vmem:[#allocation2 + $0x25] sm:$0x1]  ;;  %v3273_v50 = vld [vmem:[#allocation2 + $0x3d] sm:$0x1] }
 0x5c5   : > { %v2659_v59 = vpop.permute.xlu0 %2658  ;;  %v2686_v16 = vpop.permute.xlu1 %2685  ;;  %v3279_v33 = vrot.slane %v3272_v31, 7 }
 0x5c6   : > { %2661 = vst.msk [vmem:[#allocation3 + $0x48] sm:$0xf0] %vm965_vm11, %v2659_v59  ;;  %2688 = vst.msk [vmem:[#allocation3 + $0x58] sm:$0xf0] %vm965_vm11, %v2686_v16  ;;  %v3662_v59 = vsel %vm944_vm7, %v3661_v49, %v3660_v27  ;;  %v3066_v16 = vld [vmem:[#allocation2 + $0xc] sm:$0x1] }
 0x5c7   : > { %3255 = vrot.lane.b32.xlu0 %v6100_v54, %s6996_s26  ;;  %3259 = vrot.lane.b32.xlu1 %v6089_v41, %s6997_s0  ;;  %v6162_v40 = vsel %vm947_vm9, %v3663_v39, %v3662_v59  ;;  %v3084_v53 = vrot.slane %v3066_v16, 4  ;;  %v3075_v2 = vsel %vm941_vm6, %v3074_v42, %v3066_v16  ;;  %v3281_v39 = vrot.slane %v3273_v50, 6 }
 0x5c8   : > { %v3292_v27 = vrot.slane %v3273_v50, 2  ;;  %v3280_v59 = vsel %vm941_vm6, %v3279_v33, %v3271_v30  ;;  %v6266_v50 = vld [vmem:[#allocation2 + $0x25] sm:$0x1]  ;;  %v6273_v33 = vld [vmem:[#allocation2 + $0x3d] sm:$0x1] }
 0x5c9   : > { %v2690_v25 = vpop.permute.xlu0 %2689  ;;  %v2694_v21 = vpop.permute.xlu1 %2693  ;;  %v3086_v5 = vsel %vm954_vm4, %v3085_v47, %v3084_v53  ;;  %v3476_v53 = vld [vmem:[#allocation2 + $0xe] sm:$0x1]  ;;  %v3477_v47 = vld [vmem:[#allocation2 + $0x26] sm:$0x1] }
 0x5ca   : > { %2692 = vst.msk [vmem:[#allocation3 + $0x68] sm:$0xf] %vm950_vm10, %v2690_v25  ;;  %v3088_v18 = vsel %vm957_vm5, %v3087_v57, %v3086_v5  ;;  %v3495_v57 = vrot.slane %v3477_v47, 3 }
 0x5cb   : > { %2696 = vst.msk [vmem:[#allocation3 + $0x68] sm:$0xf0] %vm965_vm11, %v2694_v21  ;;  %4023 = vrot.lane.b32.xlu0 %v6113_v60, %s7011_s23  ;;  %4034 = vrot.lane.b32.xlu1 %v4033_v4, %s6980_s28  ;;  %v3076_v21 = vrot.slane %v3068_v19, 6  ;;  %s7017_s23 = smov 92  }
 0x5cd   : > { %v2698_v55 = vpop.permute.xlu0 %2697  ;;  %v2725_v62 = vpop.permute.xlu1 %2724  ;;  %v3077_v6 = vsel %vm944_vm7, %v3076_v21, %v3075_v2  ;;  %v3494_v21 = vrot.slane %v3476_v53, 4 }
 0x5ce   : > { %2700 = vst.msk [vmem:[#allocation3 + $0x78] sm:$0xf] %vm950_vm10, %v2698_v55  ;;  %2727 = vst.msk [vmem:[#allocation3 + $0x88] sm:$0xf] %vm950_vm10, %v2725_v62  ;;  %v3853_v55 = vrot.slane %v3845_v17, 4  ;;  %v3854_v62 = vrot.slane %v3846_v45, 3 }
 0x5cf   : > { %4038 = vrot.lane.b32.xlu0 %v6113_v60, %s7012_s4  ;;  %4042 = vrot.lane.b32.xlu1 %v4033_v4, %s6981_s14  ;;  %s7013_s14 = smov 60   ;;  %s7014_s4 = smov 76  }
 0x5d0   : > { %v3855_v26 = vsel %vm954_vm4, %v3854_v62, %v3853_v55 }
 0x5d1   : > { %v2729_v7 = vpop.permute.xlu0 %2728  ;;  %v2733_v22 = vpop.permute.xlu1 %2732 }
 0x5d2   : > { %2731 = vst.msk [vmem:[#allocation3 + $0x88] sm:$0xf0] %vm965_vm11, %v2729_v7  ;;  %v3856_v7 = vrot.slane %v3847_v34, 2  ;;  %v3496_v34 = vsel %vm954_vm4, %v3495_v57, %v3494_v21  ;;  %v6319_v21 = vld [vmem:[#allocation2 + $0x56] sm:$0x1] }
 0x5d3   : > { %2735 = vst.msk [vmem:[#allocation3 + $0x98] sm:$0xf] %vm950_vm10, %v2733_v22  ;;  %3431 = vrot.lane.b32.xlu0 %v6015_v43, %s7013_s14  ;;  %3450 = vrot.lane.b32.xlu1 %v6129_v12, %s6999_s2  ;;  %v3653_v43 = vrot.slane %v3643_v32, 1  ;;  %v3858_v22 = vrot.slane %v3848_v0, 1  ;;  %v3484_v0 = vrot.slane %v3477_v47, 7 }
 0x5d4   : > { %v3857_v24 = vsel %vm957_vm5, %v3856_v7, %v3855_v26  ;;  %v6307_v47 = vld [vmem:[#allocation2 + $0xe] sm:$0x1] }
 0x5d5   : > { %v2737_v28 = vpop.permute.xlu0 %2736  ;;  %v2764_v29 = vpop.permute.xlu1 %2763  ;;  %v6151_v61 = vsel %vm960_vm8, %v3653_v43, %v3652_v58  ;;  %v6195_v32 = vsel %vm960_vm8, %v3858_v22, %v3857_v24  ;;  %v3485_v7 = vsel %vm941_vm6, %v3484_v0, %v3476_v53  ;;  %v3320_v57 = vrot.slane %v6307_v47, 4 }
 0x5d6   : > { %2739 = vst.msk [vmem:[#allocation3 + $0x98] sm:$0xf0] %vm965_vm11, %v2737_v28  ;;  %2766 = vst.msk [vmem:[#allocation3 + $0xa8] sm:$0xf0] %vm965_vm11, %v2764_v29  ;;  %v3867_v29 = vsel %vm944_vm7, %v3866_v13, %v3865_v56 }
 0x5d7   : > { %3460 = vrot.lane.b32.xlu0 %v6140_v3, %s7000_s27  ;;  %3464 = vrot.lane.b32.xlu1 %v6129_v12, %s7001_s20  ;;  %v6206_v43 = vsel %vm947_vm9, %v3868_v14, %v3867_v29 }
 0x5d9   : > { %v2768_v8 = vpop.permute.xlu0 %2767  ;;  %v2772_v11 = vpop.permute.xlu1 %2771 }
 0x5da   : > { %2770 = vst.msk [vmem:[#allocation3 + $0xb8] sm:$0xf] %vm950_vm10, %v2768_v8  ;;  %v3289_v8 = vrot.slane %v3271_v30, 4 }
 0x5db   : > { %2774 = vst.msk [vmem:[#allocation3 + $0xb8] sm:$0xf0] %vm965_vm11, %v2772_v11  ;;  %3636 = vrot.lane.b32.xlu0 %v6033_v46, %s7014_s4  ;;  %3655 = vrot.lane.b32.xlu1 %v6151_v61, %s7003_s24  ;;  %vm7015_vm11 = vcmask 257152   ;;  %v3069_v46 = vld [vmem:[#allocation2 + $0x54] sm:$0x1]  ;;  %v3290_v11 = vrot.slane %v3272_v31, 3 }
 0x5dc   : > { %v3078_v51 = vrot.slane %v3069_v46, 5  ;;  %v3089_v4 = vrot.slane %v3069_v46, 1  ;;  %v3282_v46 = vsel %vm944_vm7, %v3281_v39, %v3280_v59  ;;  %v6264_v31 = vld [vmem:[#allocation2 + $0xd] sm:$0x1] }
 0x5dd   : > { %v2776_v35 = vpop.permute.xlu0 %2775  ;;  %v2794_v63 = vpop.permute.xlu1 %2793  ;;  %v3291_v16 = vsel %vm954_vm4, %v3290_v11, %v3289_v8  ;;  %v6279_v8 = vld [vmem:[#allocation2 + $0x55] sm:$0x1] }
 0x5de   : > { %2778 = vst.msk [vmem:[#allocation3 + $0xc8] sm:$0xf] %vm950_vm10, %v2776_v35  ;;  %vm7016_vm10 = vcmask 261252   ;;  %v3293_v42 = vsel %vm957_vm5, %v3292_v27, %v3291_v16  ;;  %v3120_v59 = vrot.slane %v6279_v8, 1 }
 0x5df   : > { %2796 = vst.msk [vmem:[#allocation3 + $0x8] sm:$0xf] %vm7015_vm11, %v2794_v63  ;;  %3665 = vrot.lane.b32.xlu0 %v6162_v40, %s7004_s21  ;;  %3669 = vrot.lane.b32.xlu1 %v6151_v61, %s7005_s6 }
 0x5e1   : > { %v2805_v20 = vpop.permute.xlu0 %2804  ;;  %v2809_v25 = vpop.permute.xlu1 %2808 }
 0x5e2   : > { %2807 = vst.msk [vmem:[#allocation3 + $0x8] sm:$0xf0] %vm7016_vm10, %v2805_v20  ;;  %v3478_v20 = vld [vmem:[#allocation2 + $0x3e] sm:$0x1] }
 0x5e3   : > { %2811 = vst.msk [vmem:[#allocation3 + $0x18] sm:$0xf] %vm7015_vm11, %v2809_v25  ;;  %3058 = vrot.lane.b32.xlu0 %v6060_v44, %s6994_s17  ;;  %3062 = vrot.lane.b32.xlu1 %v6049_v48, %s7007_s5  ;;  %v6181_v48 = vsel %vm947_vm9, %v3078_v51, %v3077_v6  ;;  %v6184_v44 = vsel %vm960_vm8, %v3089_v4, %v3088_v18  ;;  %v3479_v25 = vld [vmem:[#allocation2 + $0x56] sm:$0x1]  ;;  %v3497_v51 = vrot.slane %v3478_v20, 2  ;;  %v3486_v62 = vrot.slane %v3478_v20, 6 }
 0x5e4   : > { %v3499_v4 = vrot.slane %v3479_v25, 1  ;;  %v3683_v18 = vld [vmem:[#allocation2 + $0x3f] sm:$0x1]  ;;  %v6309_v20 = vld [vmem:[#allocation2 + $0x26] sm:$0x1] }
 0x5e5   : > { %v2813_v15 = vpop.permute.xlu0 %2812  ;;  %v2817_v38 = vpop.permute.xlu1 %2816  ;;  %v3498_v55 = vsel %vm957_vm5, %v3497_v51, %v3496_v34  ;;  %v3702_v24 = vrot.slane %v3683_v18, 2  ;;  %v3691_v30 = vrot.slane %v3683_v18, 6  ;;  %v3325_v34 = vrot.slane %v6319_v21, 1 }
 0x5e6   : > { %2815 = vst.msk [vmem:[#allocation3 + $0x18] sm:$0xf0] %vm7016_vm10, %v2813_v15  ;;  %v3681_v15 = vld [vmem:[#allocation2 + $0xf] sm:$0x1]  ;;  %v6245_v6 = vsel %vm960_vm8, %v3499_v4, %v3498_v55  ;;  %v6335_v55 = vld [vmem:[#allocation2 + $0x27] sm:$0x1] }
 0x5e7   : > { %2819 = vst.msk [vmem:[#allocation3 + $0x28] sm:$0xf] %vm7015_vm11, %v2817_v38  ;;  %3080 = vrot.lane.b32.xlu0 %v6181_v48, %s6991_s7  ;;  %3091 = vrot.lane.b32.xlu1 %v6184_v44, %s6992_s10  ;;  %v3682_v38 = vld [vmem:[#allocation2 + $0x27] sm:$0x1]  ;;  %v3699_v22 = vrot.slane %v3681_v15, 4 }
 0x5e8   : > { %v3700_v26 = vrot.slane %v3682_v38, 3  ;;  %v3689_v56 = vrot.slane %v3682_v38, 7  ;;  %v3526_v38 = vrot.slane %v6335_v55, 3 }
 0x5e9   : > { %v2836_v9 = vpop.permute.xlu0 %2835  ;;  %v2846_v10 = vpop.permute.xlu1 %2845 }
 0x5ea   : > { %2838 = vst.msk [vmem:[#allocation3 + $0x28] sm:$0xf0] %vm7016_vm10, %v2836_v9  ;;  %v3701_v14 = vsel %vm954_vm4, %v3700_v26, %v3699_v22  ;;  %v3690_v11 = vsel %vm941_vm6, %v3689_v56, %v3681_v15  ;;  %v3128_v56 = vrot.slane %v6273_v33, 6 }
 0x5eb   : > { %2848 = vst.msk [vmem:[#allocation3 + $0x38] sm:$0xf] %vm7015_vm11, %v2846_v10  ;;  %3841 = vrot.lane.b32.xlu0 %v6073_v36, %s7017_s23  ;;  %3860 = vrot.lane.b32.xlu1 %v6195_v32, %s7008_s30  ;;  %v3274_v36 = vld [vmem:[#allocation2 + $0x55] sm:$0x1]  ;;  %v3487_v10 = vsel %vm944_vm7, %v3486_v62, %v3485_v7  ;;  %v3703_v29 = vsel %vm957_vm5, %v3702_v24, %v3701_v14  ;;  %v3126_v24 = vrot.slane %v6266_v50, 7 }
 0x5ec   : > { %v3283_v35 = vrot.slane %v3274_v36, 5  ;;  %v3294_v63 = vrot.slane %v3274_v36, 1 }
 0x5ed   : > { %v2850_v23 = vpop.permute.xlu0 %2849  ;;  %v2854_v28 = vpop.permute.xlu1 %2853 }
 0x5ee   : > { %2852 = vst.msk [vmem:[#allocation3 + $0x38] sm:$0xf0] %vm7016_vm10, %v2850_v23 }
 0x5ef   : > { %2856 = vst.msk [vmem:[#allocation3 + $0x48] sm:$0xf] %vm7015_vm11, %v2854_v28  ;;  %3870 = vrot.lane.b32.xlu0 %v6206_v43, %s6978_s15  ;;  %3874 = vrot.lane.b32.xlu1 %v6195_v32, %s7009_s3  ;;  %s7018_s3 = smov 108  }
 0x5f1   : > { %v2858_v58 = vpop.permute.xlu0 %2857  ;;  %v2876_v49 = vpop.permute.xlu1 %2875 }
 0x5f2   : > { %2860 = vst.msk [vmem:[#allocation3 + $0x48] sm:$0xf0] %vm7016_vm10, %v2858_v58  ;;  %v3115_v58 = vrot.slane %v6264_v31, 4 }
 0x5f3   : > { %2878 = vst.msk [vmem:[#allocation3 + $0x58] sm:$0xf] %vm7015_vm11, %v2876_v49  ;;  %3263 = vrot.lane.b32.xlu0 %v6100_v54, %s6998_s1  ;;  %3267 = vrot.lane.b32.xlu1 %v6089_v41, %s7010_s22  ;;  %v6225_v54 = vsel %vm947_vm9, %v3283_v35, %v3282_v46  ;;  %v6228_v41 = vsel %vm960_vm8, %v3294_v63, %v3293_v42  ;;  %v3116_v49 = vrot.slane %v6266_v50, 3  ;;  %v3118_v63 = vrot.slane %v6273_v33, 2 }
 0x5f4   : > { %v3692_v35 = vsel %vm944_vm7, %v3691_v30, %v3690_v11 }
 0x5f5   : > { %v2887_v1 = vpop.permute.xlu0 %2886  ;;  %v2891_v19 = vpop.permute.xlu1 %2890  ;;  %v3117_v16 = vsel %vm954_vm4, %v3116_v49, %v3115_v58 }
 0x5f6   : > { %2889 = vst.msk [vmem:[#allocation3 + $0x58] sm:$0xf0] %vm7016_vm10, %v2887_v1  ;;  %v3119_v46 = vsel %vm957_vm5, %v3118_v63, %v3117_v16 }
 0x5f7   : > { %2893 = vst.msk [vmem:[#allocation3 + $0x68] sm:$0xf] %vm7015_vm11, %v2891_v19  ;;  %3285 = vrot.lane.b32.xlu0 %v6225_v54, %s6995_s11  ;;  %3296 = vrot.lane.b32.xlu1 %v6228_v41, %s6996_s26  ;;  %v6301_v42 = vsel %vm960_vm8, %v3120_v59, %v3119_v46 }
 0x5f9   : > { %v2895_v17 = vpop.permute.xlu0 %2894  ;;  %v2899_v45 = vpop.permute.xlu1 %2898 }
 0x5fa   : > { %2897 = vst.msk [vmem:[#allocation3 + $0x68] sm:$0xf0] %vm7016_vm10, %v2895_v17  ;;  %v3321_v17 = vrot.slane %v6309_v20, 3 }
 0x5fb   : > { %2901 = vst.msk [vmem:[#allocation3 + $0x78] sm:$0xf] %vm7015_vm11, %v2899_v45  ;;  %4046 = vrot.lane.b32.xlu0 %v6113_v60, %s7018_s3  ;;  %3472 = vrot.lane.b32.xlu1 %v6129_v12, %s7013_s14  ;;  %v3488_v60 = vrot.slane %v3479_v25, 5  ;;  %v3684_v12 = vld [vmem:[#allocation2 + $0x57] sm:$0x1] }
 0x5fc   : > { %v6313_v25 = vld [vmem:[#allocation2 + $0x3e] sm:$0x1] }
 0x5fd   : > { %v2918_v2 = vpop.permute.xlu0 %2917  ;;  %v2928_v5 = vpop.permute.xlu1 %2927  ;;  %v6256_v13 = vsel %vm947_vm9, %v3488_v60, %v3487_v10  ;;  %v3323_v4 = vrot.slane %v6313_v25, 2 }
 0x5fe   : > { %2920 = vst.msk [vmem:[#allocation3 + $0x78] sm:$0xf0] %vm7016_vm10, %v2918_v2 }
 0x5ff   : > { %2930 = vst.msk [vmem:[#allocation3 + $0x88] sm:$0xf] %vm7015_vm11, %v2928_v5  ;;  %3468 = vrot.lane.b32.xlu0 %v6140_v3, %s7002_s19  ;;  %3501 = vrot.lane.b32.xlu1 %v6245_v6, %s7000_s27  ;;  %v3704_v3 = vrot.slane %v3684_v12, 1  ;;  %v6333_v5 = vld [vmem:[#allocation2 + $0xf] sm:$0x1] }
 0x600   : > { %v3525_v15 = vrot.slane %v6333_v5, 4 }
 0x601   : > { %v2932_v52 = vpop.permute.xlu0 %2931  ;;  %v2936_v9 = vpop.permute.xlu1 %2935  ;;  %v6271_v36 = vsel %vm960_vm8, %v3704_v3, %v3703_v29 }
 0x602   : > { %2934 = vst.msk [vmem:[#allocation3 + $0x88] sm:$0xf0] %vm7016_vm10, %v2932_v52  ;;  %vm7019_vm10 = vcmask 388352   ;;  %v3527_v22 = vsel %vm954_vm4, %v3526_v38, %v3525_v15  ;;  %v4217_v38 = vld [vmem:[#allocation3 + $0x10] sm:$0xff] }
 0x603   : > { %2938 = vst.msk [vmem:[#allocation3 + $0x98] sm:$0xf] %vm7015_vm11, %v2936_v9  ;;  %3490 = vrot.lane.b32.xlu0 %v6256_v13, %s6999_s2  ;;  %3677 = vrot.lane.b32.xlu1 %v6151_v61, %s7014_s4  ;;  %vm7020_vm11 = vcmask 392452   ;;  %v3693_v61 = vrot.slane %v3684_v12, 5 }
 0x605   : > { %v2999_v23 = vpop.permute.xlu0 %2998  ;;  %v3010_v28 = vpop.permute.xlu1 %3009 }
 0x606   : > { %3001 = vst.msk [vmem:[#allocation3 + $0x8] sm:$0xf] %vm7019_vm10, %v2999_v23  ;;  %v3130_v23 = vrot.slane %v6279_v8, 5  ;;  %v3335_v8 = vrot.slane %v6319_v21, 5 }
 0x607   : > { %3012 = vst.msk [vmem:[#allocation3 + $0x8] sm:$0xf0] %vm7020_vm11, %v3010_v28  ;;  %3673 = vrot.lane.b32.xlu0 %v6162_v40, %s7006_s18  ;;  %3706 = vrot.lane.b32.xlu1 %v6271_v36, %s7004_s21  ;;  %v6289_v40 = vsel %vm947_vm9, %v3693_v61, %v3692_v35 }
 0x609   : > { %v3014_v39 = vpop.permute.xlu0 %3013  ;;  %v3018_v27 = vpop.permute.xlu1 %3017 }
 0x60a   : > { %3016 = vst.msk [vmem:[#allocation3 + $0x18] sm:$0xf] %vm7019_vm10, %v3014_v39  ;;  %vm7021_vm10 = vcmask 519552  }
 0x60b   : > { %3020 = vst.msk [vmem:[#allocation3 + $0x18] sm:$0xf0] %vm7020_vm11, %v3018_v27  ;;  %3695 = vrot.lane.b32.xlu0 %v6289_v40, %s7003_s24  ;;  %3099 = vrot.lane.b32.xlu1 %v6184_v44, %s6994_s17  ;;  %vm7022_vm11 = vcmask 523652   ;;  %vm7023_vm12 = vmmov %vm7021_vm10  ;;  %v3536_v27 = vrot.slane %v6335_v55, 7 }
 0x60d   : > { %v3204_v1 = vpop.permute.xlu0 %3203  ;;  %v3215_v19 = vpop.permute.xlu1 %3214  ;;  %v3537_v16 = vsel %vm941_vm6, %v3536_v27, %v6333_v5  ;;  %v3149_v5 = vld [vmem:[#allocation2 + $0x26] sm:$0x1] }
 0x60e   : > { %3206 = vst.msk [vmem:[#allocation3 + $0x8] sm:$0xf] %vm7021_vm10, %v3204_v1  ;;  %vm7024_vm10 = vmmov %vm7022_vm11 }
 0x60f   : > { %3217 = vst.msk [vmem:[#allocation3 + $0x8] sm:$0xf0] %vm7022_vm11, %v3215_v19  ;;  %3095 = vrot.lane.b32.xlu0 %v6181_v48, %s6993_s8  ;;  %3122 = vrot.lane.b32.xlu1 %v6301_v42, %s6991_s7  ;;  %vm7026_vm11 = vcmask 392452  }
 0x611   : > { %v3219_v44 = vpop.permute.xlu0 %3218  ;;  %v3223_v53 = vpop.permute.xlu1 %3222 }
 0x612   : > { %3221 = vst.msk [vmem:[#allocation3 + $0x18] sm:$0xf] %vm7023_vm12, %v3219_v44  ;;  %vm7025_vm12 = vcmask 388352  }
 0x613   : > { %3225 = vst.msk [vmem:[#allocation3 + $0x18] sm:$0xf0] %vm7024_vm10, %v3223_v53  ;;  %3103 = vrot.lane.b32.xlu0 %v6181_v48, %s7007_s5  ;;  %3882 = vrot.lane.b32.xlu1 %v6195_v32, %s7017_s23  ;;  %v3322_v48 = vsel %vm954_vm4, %v3321_v17, %v3320_v57  ;;  %vm7027_vm10 = vmmov %vm7025_vm12  ;;  %v2945_v53 = vld [vmem:[#allocation2 + $0x3d] sm:$0x1]  ;;  %v2943_v57 = vld [vmem:[#allocation2 + $0xd] sm:$0x1] }
 0x614   : > { %v3324_v2 = vsel %vm957_vm5, %v3323_v4, %v3322_v48  ;;  %v2953_v17 = vrot.slane %v2945_v53, 6  ;;  %v2961_v4 = vrot.slane %v2943_v57, 4 }
 0x615   : > { %v3409_v45 = vpop.permute.xlu0 %3408  ;;  %v3420_v51 = vpop.permute.xlu1 %3419  ;;  %v6340_v62 = vsel %vm960_vm8, %v3325_v34, %v3324_v2  ;;  %v2964_v2 = vrot.slane %v2945_v53, 2 }
 0x616   : > { %3411 = vst.msk [vmem:[#allocation3 + $0x8] sm:$0xf] %vm1773_vm2, %v3409_v45 }
 0x617   : > { %3422 = vst.msk [vmem:[#allocation3 + $0x8] sm:$0xf0] %vm1785_vm3, %v3420_v51  ;;  %3878 = vrot.lane.b32.xlu0 %v6206_v43, %s6979_s13  ;;  %3304 = vrot.lane.b32.xlu1 %v6228_v41, %s6998_s1  ;;  %v6342_v43 = vld [vmem:[#allocation2 + $0x3f] sm:$0x1]  ;;  %v6348_v41 = vld [vmem:[#allocation2 + $0x57] sm:$0x1] }
 0x618   : > { %v3528_v12 = vrot.slane %v6342_v43, 2  ;;  %v3530_v7 = vrot.slane %v6348_v41, 1  ;;  %v3540_v59 = vrot.slane %v6348_v41, 5  ;;  %v3151_v41 = vld [vmem:[#allocation2 + $0x56] sm:$0x1] }
 0x619   : > { %v3424_v32 = vpop.permute.xlu0 %3423  ;;  %v3428_v0 = vpop.permute.xlu1 %3427 }
 0x61a   : > { %3426 = vst.msk [vmem:[#allocation3 + $0x18] sm:$0xf] %vm1773_vm2, %v3424_v32  ;;  %v3529_v9 = vsel %vm957_vm5, %v3528_v12, %v3527_v22 }
 0x61b   : > { %3430 = vst.msk [vmem:[#allocation3 + $0x18] sm:$0xf0] %vm1785_vm3, %v3428_v0  ;;  %3300 = vrot.lane.b32.xlu0 %v6225_v54, %s6997_s0  ;;  %3327 = vrot.lane.b32.xlu1 %v6340_v62, %s6995_s11  ;;  %v6365_v10 = vsel %vm960_vm8, %v3530_v7, %v3529_v9 }
 0x61d   : > { %v3614_v60 = vpop.permute.xlu0 %3613  ;;  %v3625_v18 = vpop.permute.xlu1 %3624 }
 0x61e   : > { %3616 = vst.msk [vmem:[#allocation3 + $0x8] sm:$0xf] %vm1980_vm1, %v3614_v60  ;;  %v3156_v60 = vrot.slane %v3149_v5, 7 }
 0x61f   : > { %3627 = vst.msk [vmem:[#allocation3 + $0x8] sm:$0xf0] %vm6953_vm0, %v3625_v18  ;;  %3308 = vrot.lane.b32.xlu0 %v6225_v54, %s7010_s22  ;;  %3509 = vrot.lane.b32.xlu1 %v6245_v6, %s7002_s19 }
 0x621   : > { %v3629_v26 = vpop.permute.xlu0 %3628  ;;  %v3633_v52 = vpop.permute.xlu1 %3632 }
 0x622   : > { %3631 = vst.msk [vmem:[#allocation3 + $0x18] sm:$0xf] %vm1980_vm1, %v3629_v26 }
 0x623   : > { %3635 = vst.msk [vmem:[#allocation3 + $0x18] sm:$0xf0] %vm6953_vm0, %v3633_v52  ;;  %3505 = vrot.lane.b32.xlu0 %v6256_v13, %s7001_s20  ;;  %3532 = vrot.lane.b32.xlu1 %v6365_v10, %s6999_s2  ;;  %vm7028_vm0 = vmmov %vm7026_vm11  ;;  %v3148_v52 = vld [vmem:[#allocation2 + $0xe] sm:$0x1] }
 0x625   : > { %v3022_v54 = vpop.permute.xlu0 %3021  ;;  %v3041_v6 = vpop.permute.xlu1 %3040 }
 0x626   : > { %3024 = vst.msk [vmem:[#allocation3 + $0x28] sm:$0xf] %vm7025_vm12, %v3022_v54  ;;  %vm7030_vm12 = vcmask 523652  }
 0x627   : > { %3043 = vst.msk [vmem:[#allocation3 + $0x28] sm:$0xf0] %vm7026_vm11, %v3041_v6  ;;  %3513 = vrot.lane.b32.xlu0 %v6256_v13, %s7013_s14  ;;  %3710 = vrot.lane.b32.xlu1 %v6289_v40, %s7005_s6  ;;  %v3127_v13 = vsel %vm941_vm6, %v3126_v24, %v6264_v31  ;;  %v3333_v31 = vrot.slane %v6313_v25, 6  ;;  %v4215_v6 = vld [vmem:[#allocation3] sm:$0xff]  ;;  %v3160_v24 = vrot.slane %v3151_v41, 5 }
 0x628   : > { %v3129_v30 = vsel %vm944_vm7, %v3128_v56, %v3127_v13  ;;  %v3166_v56 = vrot.slane %v3148_v52, 4 }
 0x629   : > { %v3051_v3 = vpop.permute.xlu0 %3050  ;;  %v3055_v14 = vpop.permute.xlu1 %3054  ;;  %v3131_v50 = vsel %vm947_vm9, %v3130_v23, %v3129_v30  ;;  %v3167_v23 = vrot.slane %v3149_v5, 3 }
 0x62a   : > { %3053 = vst.msk [vmem:[#allocation3 + $0x38] sm:$0xf] %vm7027_vm10, %v3051_v3  ;;  %vm7032_vm10 = vmmov %vm7030_vm12  ;;  %v4547_v3 = vpack.c.bf16 %v4217_v38, %v4215_v6 }
 0x62b   : > { %3057 = vst.msk [vmem:[#allocation3 + $0x38] sm:$0xf0] %vm7028_vm0, %v3055_v14  ;;  %2939 = vrot.lane.b32.xlu0 %v5961_v37, %s6990_s9  ;;  %3718 = vrot.lane.b32.xlu1 %v6289_v40, %s7014_s4  ;;  %v3331_v37 = vrot.slane %v6309_v20, 7  ;;  %vm7029_vm0 = vcmask 519552   ;;  %v3538_v40 = vrot.slane %v6342_v43, 6  ;;  %v3157_v14 = vsel %vm941_vm6, %v3156_v60, %v3148_v52 }
 0x62c   : > { %vm7031_vm11 = vmmov %vm7029_vm0  ;;  %v3150_v43 = vld [vmem:[#allocation2 + $0x3e] sm:$0x1] }
 0x62d   : > { %v3819_v28 = vpop.permute.xlu0 %3818  ;;  %v3830_v29 = vpop.permute.xlu1 %3829  ;;  %v3539_v46 = vsel %vm944_vm7, %v3538_v40, %v3537_v16  ;;  %v3158_v9 = vrot.slane %v3150_v43, 6  ;;  %v3169_v30 = vrot.slane %v3150_v43, 2 }
 0x62e   : > { %3821 = vst.msk [vmem:[#allocation3 + $0x8] sm:$0xf] %vm2187_vm15, %v3819_v28  ;;  %v3541_v44 = vsel %vm947_vm9, %v3540_v59, %v3539_v46 }
 0x62f   : > { %3832 = vst.msk [vmem:[#allocation3 + $0x8] sm:$0xf0] %vm2199_vm14, %v3830_v29  ;;  %3714 = vrot.lane.b32.xlu0 %v6271_v36, %s7006_s18  ;;  %3132 = vrot.lane.b32.xlu1 %v3131_v50, %s6992_s10  ;;  %v3332_v36 = vsel %vm941_vm6, %v3331_v37, %v6307_v47  ;;  %v2946_v47 = vld [vmem:[#allocation2 + $0x55] sm:$0x1]  ;;  %v3159_v29 = vsel %vm944_vm7, %v3158_v9, %v3157_v14 }
 0x630   : > { %v3334_v49 = vsel %vm944_vm7, %v3333_v31, %v3332_v36  ;;  %v2955_v45 = vrot.slane %v2946_v47, 5  ;;  %v6458_v37 = vsel %vm947_vm9, %v3160_v24, %v3159_v29  ;;  %v3356_v31 = vld [vmem:[#allocation2 + $0x57] sm:$0x1] }
 0x631   : > { %v3834_v61 = vpop.permute.xlu0 %3833  ;;  %v3838_v33 = vpop.permute.xlu1 %3837  ;;  %v3336_v39 = vsel %vm947_vm9, %v3335_v8, %v3334_v49  ;;  %v3168_v8 = vsel %vm954_vm4, %v3167_v23, %v3166_v56  ;;  %v3376_v53 = vrot.slane %v3356_v31, 1 }
 0x632   : > { %3836 = vst.msk [vmem:[#allocation3 + $0x18] sm:$0xf] %vm2187_vm15, %v3834_v61  ;;  %v3171_v61 = vrot.slane %v3151_v41, 1  ;;  %v3170_v49 = vsel %vm957_vm5, %v3169_v30, %v3168_v8  ;;  %v4094_v8 = vld [vmem:[#allocation2 + $0x59] sm:$0x1] }
 0x633   : > { %3840 = vst.msk [vmem:[#allocation3 + $0x18] sm:$0xf0] %vm2199_vm14, %v3838_v33  ;;  %3136 = vrot.lane.b32.xlu0 %v6301_v42, %s6993_s8  ;;  %3140 = vrot.lane.b32.xlu1 %v3131_v50, %s6994_s17  ;;  %v3354_v50 = vld [vmem:[#allocation2 + $0x27] sm:$0x1]  ;;  %v3355_v33 = vld [vmem:[#allocation2 + $0x3f] sm:$0x1] }
 0x634   : > { %v3361_v36 = vrot.slane %v3354_v50, 7  ;;  %v3363_v27 = vrot.slane %v3355_v33, 6  ;;  %v3372_v16 = vrot.slane %v3354_v50, 3 }
 0x635   : > { %v3227_v11 = vpop.permute.xlu0 %3226  ;;  %v3246_v58 = vpop.permute.xlu1 %3245 }
 0x636   : > { %3229 = vst.msk [vmem:[#allocation3 + $0x28] sm:$0xf] %vm7029_vm0, %v3227_v11  ;;  %vm7033_vm0 = vcmask 1048452  }
 0x637   : > { %3248 = vst.msk [vmem:[#allocation3 + $0x28] sm:$0xf0] %vm7030_vm12, %v3246_v58  ;;  %3144 = vrot.lane.b32.xlu0 %v6301_v42, %s7007_s5  ;;  %3337 = vrot.lane.b32.xlu1 %v3336_v39, %s6996_s26  ;;  %v2944_v42 = vld [vmem:[#allocation2 + $0x25] sm:$0x1]  ;;  %vm7034_vm12 = vmmov %vm7033_vm0 }
 0x638   : > { %v2951_v20 = vrot.slane %v2944_v42, 7  ;;  %v2962_v34 = vrot.slane %v2944_v42, 3  ;;  %v3374_v42 = vrot.slane %v3355_v33, 2 }
 0x639   : > { %v3256_v35 = vpop.permute.xlu0 %3255  ;;  %v3260_v63 = vpop.permute.xlu1 %3259 }
 0x63a   : > { %3258 = vst.msk [vmem:[#allocation3 + $0x38] sm:$0xf] %vm7031_vm11, %v3256_v35  ;;  %v2952_v51 = vsel %vm941_vm6, %v2951_v20, %v2943_v57  ;;  %v2963_v15 = vsel %vm954_vm4, %v2962_v34, %v2961_v4  ;;  %vm7035_vm11 = vcmask 786052   ;;  %v3172_v35 = vsel %vm960_vm8, %v3171_v61, %v3170_v49  ;;  %v4051_v4 = vld [vmem:[#allocation2 + $0x28] sm:$0x1] }
 0x63b   : > { %3262 = vst.msk [vmem:[#allocation3 + $0x38] sm:$0xf0] %vm7032_vm10, %v3260_v63  ;;  %3341 = vrot.lane.b32.xlu0 %v6340_v62, %s6997_s0  ;;  %3345 = vrot.lane.b32.xlu1 %v3336_v39, %s6998_s1  ;;  %v2954_v0 = vsel %vm944_vm7, %v2953_v17, %v2952_v51  ;;  %v2965_v7 = vsel %vm957_vm5, %v2964_v2, %v2963_v15  ;;  %v3353_v39 = vld [vmem:[#allocation2 + $0xf] sm:$0x1]  ;;  %vm7036_vm10 = vmmov %vm7035_vm11  ;;  %v3365_v63 = vrot.slane %v3356_v31, 5  ;;  %v4059_v2 = vrot.slane %v4051_v4, 3 }
 0x63c   : > { %v6439_v55 = vsel %vm947_vm9, %v2955_v45, %v2954_v0  ;;  %v3362_v40 = vsel %vm941_vm6, %v3361_v36, %v3353_v39  ;;  %v3371_v59 = vrot.slane %v3353_v39, 4  ;;  %v4050_v51 = vld [vmem:[#allocation2 + $0x10] sm:$0x1]  ;;  %v4052_v34 = vld [vmem:[#allocation2 + $0x40] sm:$0x1]  ;;  %v4069_v0 = vrot.slane %v4051_v4, 7 }
 0x63d   : > { %v4024_v1 = vpop.permute.xlu0 %4023  ;;  %v4035_v19 = vpop.permute.xlu1 %4034  ;;  %v3364_v46 = vsel %vm944_vm7, %v3363_v27, %v3362_v40  ;;  %v4071_v43 = vrot.slane %v4052_v34, 6  ;;  %v4061_v41 = vrot.slane %v4052_v34, 2  ;;  %v3887_v15 = vld [vmem:[#allocation2 + $0x28] sm:$0x1]  ;;  %v4093_v31 = vld [vmem:[#allocation2 + $0x41] sm:$0x1] }
 0x63e   : > { %4026 = vst.msk [vmem:[#allocation3 + $0x8] sm:$0xf] %vm2394_vm13, %v4024_v1  ;;  %v6519_v40 = vld [vmem:[#allocation2 + $0x28] sm:$0x1] }
 0x63f   : > { %4037 = vst.msk [vmem:[#allocation3 + $0x8] sm:$0xf0] %vm7033_vm0, %v4035_v19  ;;  %3349 = vrot.lane.b32.xlu0 %v6340_v62, %s7010_s22  ;;  %3542 = vrot.lane.b32.xlu1 %v3541_v44, %s7000_s27  ;;  %v2966_v62 = vrot.slane %v2946_v47, 1  ;;  %vm7037_vm0 = vcmask 388352   ;;  %v3373_v47 = vsel %vm954_vm4, %v3372_v16, %v3371_v59  ;;  %v4103_v16 = vrot.slane %v4094_v8, 5 }
 0x641   : > { %v4039_v25 = vpop.permute.xlu0 %4038  ;;  %v4043_v21 = vpop.permute.xlu1 %4042 }
 0x642   : > { %4041 = vst.msk [vmem:[#allocation3 + $0x18] sm:$0xf] %vm2394_vm13, %v4039_v25 }
 0x643   : > { %4045 = vst.msk [vmem:[#allocation3 + $0x18] sm:$0xf0] %vm7034_vm12, %v4043_v21  ;;  %3546 = vrot.lane.b32.xlu0 %v6365_v10, %s7001_s20  ;;  %3550 = vrot.lane.b32.xlu1 %v3541_v44, %s7002_s19  ;;  %vm7038_vm12 = vcmask 392452   ;;  %v3366_v44 = vsel %vm947_vm9, %v3365_v63, %v3364_v46  ;;  %v3375_v21 = vsel %vm957_vm5, %v3374_v42, %v3373_v47  ;;  %v6517_v63 = vld [vmem:[#allocation2 + $0x10] sm:$0x1]  ;;  %v3731_v47 = vrot.slane %v6519_v40, 3 }
 0x644   : > { %v3377_v57 = vsel %vm960_vm8, %v3376_v53, %v3375_v21  ;;  %v6528_v46 = vld [vmem:[#allocation2 + $0x58] sm:$0x1]  ;;  %v3730_v53 = vrot.slane %v6517_v63, 4 }
 0x645   : > { %v3432_v48 = vpop.permute.xlu0 %3431  ;;  %v3451_v32 = vpop.permute.xlu1 %3450  ;;  %v3735_v4 = vrot.slane %v6528_v46, 1 }
 0x646   : > { %3434 = vst.msk [vmem:[#allocation3 + $0x28] sm:$0xf] %vm1773_vm2, %v3432_v48  ;;  %v4216_v22 = vld [vmem:[#allocation3 + $0x8] sm:$0xff]  ;;  %v4053_v48 = vld [vmem:[#allocation2 + $0x58] sm:$0x1] }
 0x647   : > { %3453 = vst.msk [vmem:[#allocation3 + $0x28] sm:$0xf0] %vm1785_vm3, %v3451_v32  ;;  %3554 = vrot.lane.b32.xlu0 %v6365_v10, %s7013_s14  ;;  %2957 = vrot.lane.b32.xlu1 %v6439_v55, %s6986_s12  ;;  %v2967_v10 = vsel %vm960_vm8, %v2966_v62, %v2965_v7  ;;  %v4058_v32 = vrot.slane %v4050_v51, 4  ;;  %v4073_v38 = vrot.slane %v4053_v48, 5  ;;  %v4063_v60 = vrot.slane %v4053_v48, 1 }
 0x648   : > { %v3732_v48 = vsel %vm954_vm4, %v3731_v47, %v3730_v53 }
 0x649   : > { %v3461_v18 = vpop.permute.xlu0 %3460  ;;  %v3465_v12 = vpop.permute.xlu1 %3464  ;;  %v4060_v7 = vsel %vm954_vm4, %v4059_v2, %v4058_v32 }
 0x64a   : > { %v4218_v26 = vld [vmem:[#allocation3 + $0x18] sm:$0xff]  ;;  %3463 = vst.msk [vmem:[#allocation3 + $0x38] sm:$0xf] %vm1773_vm2, %v3461_v18  ;;  %v3888_v18 = vld [vmem:[#allocation2 + $0x40] sm:$0x1] }
 0x64b   : > { %3467 = vst.msk [vmem:[#allocation3 + $0x38] sm:$0xf0] %vm1785_vm3, %v3465_v12  ;;  %v4545_v54 = vpack.c.bf16 %v4218_v26, %v4216_v22  ;;  %2968 = vrot.lane.b32.xlu0 %v2967_v10, %s6987_s29  ;;  %2972 = vrot.lane.b32.xlu1 %v6439_v55, %s6988_s16  ;;  %v4070_v12 = vsel %vm941_vm6, %v4069_v0, %v4050_v51  ;;  %v3894_v22 = vrot.slane %v3887_v15, 7  ;;  %v3896_v6 = vrot.slane %v3888_v18, 6 }
 0x64c   : > { %v4072_v9 = vsel %vm944_vm7, %v4071_v43, %v4070_v12  ;;  %v3907_v50 = vrot.slane %v3888_v18, 2  ;;  %v4114_v51 = vrot.slane %v4094_v8, 1  ;;  %v6550_v43 = vld [vmem:[#allocation2 + $0x29] sm:$0x1] }
 0x64d   : > { %4546 = vmatprep.subr.bf16.mxu1 %v4545_v54  ;;  %v3637_v13 = vpop.permute.xlu0 %3636  ;;  %v3656_v28 = vpop.permute.xlu1 %3655  ;;  %v3886_v54 = vld [vmem:[#allocation2 + $0x10] sm:$0x1]  ;;  %v4074_v24 = vsel %vm947_vm9, %v4073_v38, %v4072_v9  ;;  %v6558_v38 = vld [vmem:[#allocation2 + $0x41] sm:$0x1] }
 0x64e   : > { %4548 = vmatpush1.bf16.msra.mxu1 %v4547_v3  ;;  %3639 = vst.msk [vmem:[#allocation3 + $0x28] sm:$0xf] %vm1980_vm1, %v3637_v13  ;;  %v3895_v56 = vsel %vm941_vm6, %v3894_v22, %v3886_v54  ;;  %v3904_v23 = vrot.slane %v3886_v54, 4  ;;  %v3905_v13 = vrot.slane %v3887_v15, 3  ;;  %v3938_v22 = vrot.slane %v6558_v38, 2 }
 0x64f   : > { %3658 = vst.msk [vmem:[#allocation3 + $0x28] sm:$0xf0] %vm7035_vm11, %v3656_v28  ;;  %2976 = vrot.lane.b32.xlu0 %v2967_v10, %s6989_s25  ;;  %3162 = vrot.lane.b32.xlu1 %v6458_v37, %s6991_s7  ;;  %vm7039_vm11 = vmmov %vm7037_vm0  ;;  %v4062_v10 = vsel %vm957_vm5, %v4061_v41, %v4060_v7  ;;  %v3897_v30 = vsel %vm944_vm7, %v3896_v6, %v3895_v56  ;;  %v6576_v6 = vld [vmem:[#allocation2 + $0x12] sm:$0x1]  ;;  %v6588_v56 = vld [vmem:[#allocation2 + $0x5a] sm:$0x1] }
 0x650   : > { %v4064_v3 = vsel %vm960_vm8, %v4063_v60, %v4062_v10  ;;  %v3906_v36 = vsel %vm954_vm4, %v3905_v13, %v3904_v23  ;;  %v6563_v60 = vld [vmem:[#allocation2 + $0x59] sm:$0x1]  ;;  %v4140_v23 = vrot.slane %v6576_v6, 4 }
 0x651   : > { %v3666_v11 = vpop.permute.xlu0 %3665  ;;  %v3670_v58 = vpop.permute.xlu1 %3669  ;;  %v3908_v27 = vsel %vm957_vm5, %v3907_v50, %v3906_v36  ;;  %v4145_v50 = vrot.slane %v6588_v56, 1 }
 0x652   : > { %3668 = vst.msk [vmem:[#allocation3 + $0x38] sm:$0xf] %vm1980_vm1, %v3666_v11  ;;  %v4091_v11 = vld [vmem:[#allocation2 + $0x11] sm:$0x1] }
 0x653   : > { %3672 = vst.msk [vmem:[#allocation3 + $0x38] sm:$0xf0] %vm7036_vm10, %v3670_v58  ;;  %3173 = vrot.lane.b32.xlu0 %v3172_v35, %s6992_s10  ;;  %3177 = vrot.lane.b32.xlu1 %v6458_v37, %s6993_s8  ;;  %vm7040_vm10 = vmmov %vm7038_vm12  ;;  %s7101_s8 = sld [smem:[#allocation25_spill]] }
 0x655   : > { %v3059_v1 = vpop.permute.xlu0 %3058  ;;  %v3063_v19 = vpop.permute.xlu1 %3062 }
 0x656   : > { %3061 = vst.msk [vmem:[#allocation3 + $0x48] sm:$0xf] %vm7037_vm0, %v3059_v1  ;;  %vm7041_vm0 = vcmask 519552   ;;  %v6524_v1 = vld [vmem:[#allocation2 + $0x40] sm:$0x1] }
 0x657   : > { %3065 = vst.msk [vmem:[#allocation3 + $0x48] sm:$0xf0] %vm7038_vm12, %v3063_v19  ;;  %3181 = vrot.lane.b32.xlu0 %v3172_v35, %s6994_s17  ;;  %3367 = vrot.lane.b32.xlu1 %v3366_v44, %s6995_s11  ;;  %vm7042_vm12 = vcmask 523652   ;;  %v4101_v35 = vrot.slane %v4093_v31, 6  ;;  %v4109_v19 = vrot.slane %v4091_v11, 4  ;;  %v3743_v36 = vrot.slane %v6524_v1, 6 }
 0x658   : > { %s4805_s11 = smov [#allocation7]  }
 0x659   : > { %v3081_v20 = vpop.permute.xlu0 %3080  ;;  %v3092_v25 = vpop.permute.xlu1 %3091 }
 0x65a   : > { %3083 = vst.msk [vmem:[#allocation3 + $0x58] sm:$0xf] %vm7039_vm11, %v3081_v20  ;;  %vm7044_vm11 = vmmov %vm7041_vm0 }
 0x65b   : > { %3094 = vst.msk [vmem:[#allocation3 + $0x58] sm:$0xf0] %vm7040_vm10, %v3092_v25  ;;  %3378 = vrot.lane.b32.xlu0 %v3377_v57, %s6996_s26  ;;  %3382 = vrot.lane.b32.xlu1 %v3366_v44, %s6997_s0  ;;  %s7043_s0 = smov 112   ;;  %vm7045_vm10 = vmmov %vm7042_vm12 }
 0x65d   : > { %v3842_v17 = vpop.permute.xlu0 %3841  ;;  %v3861_v45 = vpop.permute.xlu1 %3860 }
 0x65e   : > { %3844 = vst.msk [vmem:[#allocation3 + $0x28] sm:$0xf] %vm2187_vm15, %v3842_v17  ;;  %v3733_v17 = vrot.slane %v6524_v1, 2 }
 0x65f   : > { %3863 = vst.msk [vmem:[#allocation3 + $0x28] sm:$0xf0] %vm2199_vm14, %v3861_v45  ;;  %3386 = vrot.lane.b32.xlu0 %v3377_v57, %s6998_s1  ;;  %2980 = vrot.lane.b32.xlu1 %v6439_v55, %s6990_s9  ;;  %v3889_v55 = vld [vmem:[#allocation2 + $0x58] sm:$0x1]  ;;  %s7046_s1 = smov 110   ;;  %v4112_v57 = vrot.slane %v4093_v31, 2 }
 0x660   : > { %v3898_v14 = vrot.slane %v3889_v55, 5  ;;  %v3909_v33 = vrot.slane %v3889_v55, 1  ;;  %v3936_v55 = vrot.slane %v6550_v43, 3 }
 0x661   : > { %v3871_v5 = vpop.permute.xlu0 %3870  ;;  %v3875_v62 = vpop.permute.xlu1 %3874 }
 0x662   : > { %3873 = vst.msk [vmem:[#allocation3 + $0x38] sm:$0xf] %vm2187_vm15, %v3871_v5  ;;  %v6510_v61 = vsel %vm947_vm9, %v3898_v14, %v3897_v30  ;;  %v3910_v59 = vsel %vm960_vm8, %v3909_v33, %v3908_v27  ;;  %v3734_v5 = vsel %vm957_vm5, %v3733_v17, %v3732_v48  ;;  %v6583_v14 = vld [vmem:[#allocation2 + $0x42] sm:$0x1]  ;;  %v4155_v17 = vrot.slane %v6588_v56, 5 }
 0x663   : > { %3877 = vst.msk [vmem:[#allocation3 + $0x38] sm:$0xf0] %vm2199_vm14, %v3875_v62  ;;  %3185 = vrot.lane.b32.xlu0 %v6458_v37, %s7007_s5  ;;  %3390 = vrot.lane.b32.xlu1 %v3366_v44, %s7010_s22  ;;  %v4092_v37 = vld [vmem:[#allocation2 + $0x29] sm:$0x1]  ;;  %s7047_s5 = smov 109   ;;  %v6556_v15 = vsel %vm960_vm8, %v3735_v4, %v3734_v5  ;;  %s7050_s22 = smov 94  }
 0x664   : > { %v4099_v58 = vrot.slane %v4092_v37, 7  ;;  %v4110_v44 = vrot.slane %v4092_v37, 3  ;;  %v6548_v62 = vld [vmem:[#allocation2 + $0x11] sm:$0x1]  ;;  %v4143_v30 = vrot.slane %v6583_v14, 2 }
 0x665   : > { %v3264_v26 = vpop.permute.xlu0 %3263  ;;  %v3268_v52 = vpop.permute.xlu1 %3267  ;;  %v3935_v18 = vrot.slane %v6548_v62, 4  ;;  %v3558_v48 = vld [vmem:[#allocation2 + $0x10] sm:$0x1]  ;;  %v3561_v5 = vld [vmem:[#allocation2 + $0x58] sm:$0x1] }
 0x666   : > { %3266 = vst.msk [vmem:[#allocation3 + $0x48] sm:$0xf] %vm7041_vm0, %v3264_v26  ;;  %v4100_v42 = vsel %vm941_vm6, %v4099_v58, %v4091_v11  ;;  %v4111_v34 = vsel %vm954_vm4, %v4110_v44, %v4109_v19  ;;  %vm7048_vm0 = vcmask 786052   ;;  %v3940_v26 = vrot.slane %v6563_v60, 1  ;;  %v3766_v56 = vld [vmem:[#allocation2 + $0x59] sm:$0x1] }
 0x667   : > { %3270 = vst.msk [vmem:[#allocation3 + $0x48] sm:$0xf0] %vm7042_vm12, %v3268_v52  ;;  %4075 = vrot.lane.b32.xlu0 %v4074_v24, %s6980_s28  ;;  %4065 = vrot.lane.b32.xlu1 %v4064_v3, %s7043_s0  ;;  %v4102_v21 = vsel %vm944_vm7, %v4101_v35, %v4100_v42  ;;  %v4113_v2 = vsel %vm957_vm5, %v4112_v57, %v4111_v34  ;;  %vm7049_vm12 = vmmov %vm7048_vm0  ;;  %v3745_v58 = vrot.slane %v6528_v46, 5  ;;  %v3950_v19 = vrot.slane %v6563_v60, 5 }
 0x668   : > { %v6538_v45 = vsel %vm947_vm9, %v4103_v16, %v4102_v21  ;;  %v4115_v41 = vsel %vm960_vm8, %v4114_v51, %v4113_v2  ;;  %v3937_v52 = vsel %vm954_vm4, %v3936_v55, %v3935_v18  ;;  %v4153_v57 = vrot.slane %v6583_v14, 6  ;;  %v3560_v2 = vld [vmem:[#allocation2 + $0x40] sm:$0x1]  ;;  %v3765_v14 = vld [vmem:[#allocation2 + $0x41] sm:$0x1] }
 0x669   : > { %v3286_v28 = vpop.permute.xlu0 %3285  ;;  %v3297_v29 = vpop.permute.xlu1 %3296  ;;  %v3939_v54 = vsel %vm957_vm5, %v3938_v22, %v3937_v52  ;;  %v3579_v60 = vrot.slane %v3560_v2, 2  ;;  %v3568_v18 = vrot.slane %v3560_v2, 6  ;;  %v3581_v55 = vrot.slane %v3561_v5, 1  ;;  %v4176_v2 = vld [vmem:[#allocation2 + $0x5b] sm:$0x1] }
 0x66a   : > { %3288 = vst.msk [vmem:[#allocation3 + $0x58] sm:$0xf] %vm7044_vm11, %v3286_v28  ;;  %vm7051_vm11 = vcmask 392452  }
 0x66b   : > { %3299 = vst.msk [vmem:[#allocation3 + $0x58] sm:$0xf0] %vm7045_vm10, %v3297_v29  ;;  %4079 = vrot.lane.b32.xlu1 %v4064_v3, %s7046_s1  ;;  %3900 = vrot.lane.b32.xlu0 %v6510_v61, %s7008_s30  ;;  %vm7052_vm10 = vcmask 388352  }
 0x66d   : > { %v4047_v49 = vpop.permute.xlu0 %4046  ;;  %v3473_v39 = vpop.permute.xlu1 %3472 }
 0x66e   : > { %4049 = vst.msk [vmem:[#allocation3 + $0x28] sm:$0xf] %vm2394_vm13, %v4047_v49 }
 0x66f   : > { %3475 = vst.msk [vmem:[#allocation3 + $0x48] sm:$0xf0] %vm1785_vm3, %v3473_v39  ;;  %3911 = vrot.lane.b32.xlu1 %v3910_v59, %s6978_s15  ;;  %4083 = vrot.lane.b32.xlu0 %v4074_v24, %s7047_s5  ;;  %v6578_v24 = vld [vmem:[#allocation2 + $0x2a] sm:$0x1] }
 0x670   : > { %v4141_v13 = vrot.slane %v6578_v24, 3 }
 0x671   : > { %v3469_v20 = vpop.permute.xlu0 %3468  ;;  %v3502_v25 = vpop.permute.xlu1 %3501 }
 0x672   : > { %3471 = vst.msk [vmem:[#allocation3 + $0x48] sm:$0xf] %vm1773_vm2, %v3469_v20  ;;  %v4142_v37 = vsel %vm954_vm4, %v4141_v13, %v4140_v23  ;;  %v4151_v20 = vrot.slane %v6578_v24, 7 }
 0x673   : > { %3504 = vst.msk [vmem:[#allocation3 + $0x58] sm:$0xf0] %vm1785_vm3, %v3502_v25  ;;  %4087 = vrot.lane.b32.xlu1 %v4064_v3, %s7018_s3  ;;  %4105 = vrot.lane.b32.xlu0 %v6538_v45, %s7043_s0  ;;  %v3941_v3 = vsel %vm960_vm8, %v3940_v26, %v3939_v54  ;;  %v4144_v8 = vsel %vm957_vm5, %v4143_v30, %v4142_v37  ;;  %v3763_v54 = vld [vmem:[#allocation2 + $0x11] sm:$0x1]  ;;  %v3773_v37 = vrot.slane %v3765_v14, 6 }
 0x674   : > { %v6606_v11 = vsel %vm960_vm8, %v4145_v50, %v4144_v8  ;;  %v3781_v23 = vrot.slane %v3763_v54, 4  ;;  %v3784_v50 = vrot.slane %v3765_v14, 2 }
 0x675   : > { %v3491_v32 = vpop.permute.xlu0 %3490  ;;  %v3678_v0 = vpop.permute.xlu1 %3677 }
 0x676   : > { %3493 = vst.msk [vmem:[#allocation3 + $0x58] sm:$0xf] %vm1773_vm2, %v3491_v32  ;;  %v3559_v32 = vld [vmem:[#allocation2 + $0x28] sm:$0x1] }
 0x677   : > { %3680 = vst.msk [vmem:[#allocation3 + $0x48] sm:$0xf0] %vm7048_vm0, %v3678_v0  ;;  %4116 = vrot.lane.b32.xlu1 %v4115_v41, %s6980_s28  ;;  %3737 = vrot.lane.b32.xlu0 %v6556_v15, %s7003_s24  ;;  %vm7053_vm0 = vmmov %vm7051_vm11 }
 0x679   : > { %v3674_v12 = vpop.permute.xlu0 %3673  ;;  %v3707_v7 = vpop.permute.xlu1 %3706 }
 0x67a   : > { %3676 = vst.msk [vmem:[#allocation3 + $0x48] sm:$0xf] %vm1980_vm1, %v3674_v12  ;;  %v3570_v12 = vrot.slane %v3561_v5, 5 }
 0x67b   : > { %3709 = vst.msk [vmem:[#allocation3 + $0x58] sm:$0xf0] %vm7049_vm12, %v3707_v7  ;;  %3915 = vrot.lane.b32.xlu1 %v6510_v61, %s7050_s22  ;;  %3919 = vrot.lane.b32.xlu0 %v3910_v59, %s6979_s13  ;;  %vm7054_vm12 = vmmov %vm7052_vm10  ;;  %v3946_v59 = vrot.slane %v6550_v43, 7  ;;  %v3577_v43 = vrot.slane %v3559_v32, 3 }
 0x67d   : > { %v3696_v9 = vpop.permute.xlu0 %3695  ;;  %v3100_v10 = vpop.permute.xlu1 %3099  ;;  %v3947_v46 = vsel %vm941_vm6, %v3946_v59, %v6548_v62  ;;  %v3576_v62 = vrot.slane %v3558_v48, 4  ;;  %v3970_v59 = vld [vmem:[#allocation2 + $0x42] sm:$0x1] }
 0x67e   : > { %3698 = vst.msk [vmem:[#allocation3 + $0x58] sm:$0xf] %vm1980_vm1, %v3696_v9 }
 0x67f   : > { %3102 = vst.msk [vmem:[#allocation3 + $0x68] sm:$0xf0] %vm7051_vm11, %v3100_v10  ;;  %3923 = vrot.lane.b32.xlu1 %v6510_v61, %s7017_s23  ;;  %3942 = vrot.lane.b32.xlu0 %v3941_v3, %s7008_s30  ;;  %v3741_v61 = vrot.slane %v6519_v40, 7  ;;  %vm7055_vm11 = vcmask 523652   ;;  %v3578_v7 = vsel %vm954_vm4, %v3577_v43, %v3576_v62 }
 0x680   : > { %v3580_v9 = vsel %vm957_vm5, %v3579_v60, %v3578_v7 }
 0x681   : > { %v3096_v28 = vpop.permute.xlu0 %3095  ;;  %v3123_v29 = vpop.permute.xlu1 %3122  ;;  %v3742_v49 = vsel %vm941_vm6, %v3741_v61, %v6517_v63  ;;  %v3948_v63 = vrot.slane %v6558_v38, 6  ;;  %v3582_v24 = vsel %vm960_vm8, %v3581_v55, %v3580_v9  ;;  %v3786_v61 = vrot.slane %v3766_v56, 1 }
 0x682   : > { %3098 = vst.msk [vmem:[#allocation3 + $0x68] sm:$0xf] %vm7052_vm10, %v3096_v28  ;;  %v3744_v35 = vsel %vm944_vm7, %v3743_v36, %v3742_v49  ;;  %vm7056_vm10 = vcmask 519552   ;;  %v4196_v55 = vrot.slane %v4176_v2, 1 }
 0x683   : > { %3125 = vst.msk [vmem:[#allocation3 + $0x78] sm:$0xf0] %vm7053_vm0, %v3123_v29  ;;  %4120 = vrot.lane.b32.xlu1 %v6538_v45, %s7046_s1  ;;  %4124 = vrot.lane.b32.xlu0 %v4115_v41, %s7047_s5  ;;  %v3746_v40 = vsel %vm947_vm9, %v3745_v58, %v3744_v35  ;;  %vm7057_vm0 = vmmov %vm7055_vm11  ;;  %v3949_v53 = vsel %vm944_vm7, %v3948_v63, %v3947_v46  ;;  %v3566_v41 = vrot.slane %v3559_v32, 7 }
 0x684   : > { %v3951_v47 = vsel %vm947_vm9, %v3950_v19, %v3949_v53  ;;  %v3978_v53 = vrot.slane %v3970_v59, 6 }
 0x685   : > { %v3104_v33 = vpop.permute.xlu0 %3103  ;;  %v3883_v31 = vpop.permute.xlu1 %3882  ;;  %v3567_v22 = vsel %vm941_vm6, %v3566_v41, %v3558_v48 }
 0x686   : > { %3106 = vst.msk [vmem:[#allocation3 + $0x78] sm:$0xf] %vm7054_vm12, %v3104_v33  ;;  %vm7058_vm12 = vmmov %vm7056_vm10  ;;  %v3569_v10 = vsel %vm944_vm7, %v3568_v18, %v3567_v22  ;;  %v3775_v33 = vrot.slane %v3766_v56, 5  ;;  %v4185_v18 = vrot.slane %v4176_v2, 5 }
 0x687   : > { %3885 = vst.msk [vmem:[#allocation3 + $0x48] sm:$0xf0] %vm2199_vm14, %v3883_v31  ;;  %4128 = vrot.lane.b32.xlu1 %v6538_v45, %s7018_s3  ;;  %4147 = vrot.lane.b32.xlu0 %v6606_v11, %s7043_s0  ;;  %v4152_v45 = vsel %vm941_vm6, %v4151_v20, %v6576_v6  ;;  %v3764_v6 = vld [vmem:[#allocation2 + $0x29] sm:$0x1] }
 0x688   : > { %v4154_v34 = vsel %vm944_vm7, %v4153_v57, %v4152_v45  ;;  %v3782_v13 = vrot.slane %v3764_v6, 3  ;;  %v3771_v28 = vrot.slane %v3764_v6, 7 }
 0x689   : > { %v3879_v39 = vpop.permute.xlu0 %3878  ;;  %v3305_v27 = vpop.permute.xlu1 %3304  ;;  %v4156_v0 = vsel %vm947_vm9, %v4155_v17, %v4154_v34  ;;  %v4174_v34 = vld [vmem:[#allocation2 + $0x2b] sm:$0x1] }
 0x68a   : > { %3881 = vst.msk [vmem:[#allocation3 + $0x48] sm:$0xf] %vm2187_vm15, %v3879_v39  ;;  %v3783_v31 = vsel %vm954_vm4, %v3782_v13, %v3781_v23  ;;  %v3772_v8 = vsel %vm941_vm6, %v3771_v28, %v3763_v54  ;;  %v3968_v39 = vld [vmem:[#allocation2 + $0x12] sm:$0x1]  ;;  %v4181_v5 = vrot.slane %v4174_v34, 7  ;;  %v4192_v43 = vrot.slane %v4174_v34, 3 }
 0x68b   : > { %3307 = vst.msk [vmem:[#allocation3 + $0x68] sm:$0xf0] %vm7055_vm11, %v3305_v27  ;;  %3747 = vrot.lane.b32.xlu1 %v3746_v40, %s7004_s21  ;;  %3751 = vrot.lane.b32.xlu0 %v6556_v15, %s7005_s6  ;;  %vm7059_vm11 = vcmask 261252   ;;  %v3785_v58 = vsel %vm957_vm5, %v3784_v50, %v3783_v31  ;;  %v3774_v49 = vsel %vm944_vm7, %v3773_v37, %v3772_v8  ;;  %v3969_v27 = vld [vmem:[#allocation2 + $0x2a] sm:$0x1]  ;;  %v4804_v28 = vmov 0  }
 0x68c   : > { %v3787_v35 = vsel %vm960_vm8, %v3786_v61, %v3785_v58  ;;  %v3987_v63 = vrot.slane %v3969_v27, 3  ;;  %v3976_v19 = vrot.slane %v3969_v27, 7  ;;  %4661 = vset.pattern.permute.xlu0 %v4804_v28 }
 0x68d   : > { %v3301_v16 = vpop.permute.xlu0 %3300  ;;  %v3328_v1 = vpop.permute.xlu1 %3327 }
 0x68e   : > { %3303 = vst.msk [vmem:[#allocation3 + $0x68] sm:$0xf] %vm7056_vm10, %v3301_v16  ;;  %vm7060_vm10 = vcmask 786052   ;;  %v3971_v16 = vld [vmem:[#allocation2 + $0x5a] sm:$0x1] }
 0x68f   : > { %3330 = vst.msk [vmem:[#allocation3 + $0x78] sm:$0xf0] %vm7057_vm0, %v3328_v1  ;;  %3755 = vrot.lane.b32.xlu1 %v3746_v40, %s7006_s18  ;;  %3759 = vrot.lane.b32.xlu0 %v6556_v15, %s7014_s4  ;;  %vm7061_vm0 = vcmask 388352   ;;  %v6685_v40 = vsel %vm947_vm9, %v3775_v33, %v3774_v49  ;;  %v3986_v1 = vrot.slane %v3968_v39, 4  ;;  %v3980_v20 = vrot.slane %v3971_v16, 5 }
 0x691   : > { %v3309_v42 = vpop.permute.xlu0 %3308  ;;  %v3510_v44 = vpop.permute.xlu1 %3509 }
 0x692   : > { %3311 = vst.msk [vmem:[#allocation3 + $0x78] sm:$0xf] %vm7058_vm12, %v3309_v42  ;;  %vm7062_vm12 = vcmask 392452  }
 0x693   : > { %3512 = vst.msk [vmem:[#allocation3 + $0x68] sm:$0xf0] %vm1785_vm3, %v3510_v44  ;;  %3952 = vrot.lane.b32.xlu1 %v3951_v47, %s6978_s15  ;;  %3956 = vrot.lane.b32.xlu0 %v3941_v3, %s7050_s22  ;;  %v3989_v44 = vrot.slane %v3970_v59, 2 }
 0x695   : > { %v3506_v25 = vpop.permute.xlu0 %3505  ;;  %v3533_v21 = vpop.permute.xlu1 %3532 }
 0x696   : > { %3508 = vst.msk [vmem:[#allocation3 + $0x68] sm:$0xf] %vm1773_vm2, %v3506_v25  ;;  %v3988_v25 = vsel %vm954_vm4, %v3987_v63, %v3986_v1 }
 0x697   : > { %3535 = vst.msk [vmem:[#allocation3 + $0x78] sm:$0xf0] %vm1785_vm3, %v3533_v21  ;;  %3960 = vrot.lane.b32.xlu1 %v3951_v47, %s6979_s13  ;;  %3964 = vrot.lane.b32.xlu0 %v3941_v3, %s7017_s23  ;;  %v6667_v3 = vsel %vm947_vm9, %v3570_v12, %v3569_v10  ;;  %v3991_v47 = vrot.slane %v3971_v16, 1  ;;  %v3977_v21 = vsel %vm941_vm6, %v3976_v19, %v3968_v39  ;;  %v4219_v19 = vld [vmem:[#allocation3 + $0x20] sm:$0xff] }
 0x698   : > { %v3990_v45 = vsel %vm957_vm5, %v3989_v44, %v3988_v25 }
 0x699   : > { %v3514_v51 = vpop.permute.xlu0 %3513  ;;  %v3711_v4 = vpop.permute.xlu1 %3710  ;;  %v3992_v48 = vsel %vm960_vm8, %v3991_v47, %v3990_v45 }
 0x69a   : > { %3516 = vst.msk [vmem:[#allocation3 + $0x78] sm:$0xf] %vm1773_vm2, %v3514_v51  ;;  %v3979_v51 = vsel %vm944_vm7, %v3978_v53, %v3977_v21 }
 0x69b   : > { %3713 = vst.msk [vmem:[#allocation3 + $0x68] sm:$0xf] %vm1980_vm1, %v3711_v4  ;;  %4157 = vrot.lane.b32.xlu1 %v4156_v0, %s6980_s28  ;;  %4161 = vrot.lane.b32.xlu0 %v6606_v11, %s7046_s1  ;;  %v4173_v4 = vld [vmem:[#allocation2 + $0x13] sm:$0x1]  ;;  %v3981_v32 = vsel %vm947_vm9, %v3980_v20, %v3979_v51  ;;  %v4223_v51 = vld [vmem:[#allocation3 + $0x40] sm:$0xff] }
 0x69c   : > { %v4191_v62 = vrot.slane %v4173_v4, 4  ;;  %v4182_v12 = vsel %vm941_vm6, %v4181_v5, %v4173_v4  ;;  %v4225_v20 = vld [vmem:[#allocation3 + $0x50] sm:$0xff] }
 0x69d   : > { %v2940_v15 = vpop.permute.xlu0 %2939  ;;  %v3719_v38 = vpop.permute.xlu1 %3718  ;;  %v4555_v4 = vpack.c.bf16 %v4225_v20, %v4223_v51  ;;  %v4239_v20 = vld [vmem:[#allocation3 + $0xc0] sm:$0xf] }
 0x69e   : > { %2942 = vst.msk [vmem:[#allocation3 + $0x98] sm:$0xf0] %vm7059_vm11, %v2940_v15  ;;  %vm7063_vm11 = vmmov %vm7061_vm0  ;;  %v4193_v7 = vsel %vm954_vm4, %v4192_v43, %v4191_v62  ;;  %vm7070_vm4 = vcmask 261252   ;;  %v4229_v62 = vld [vmem:[#allocation3 + $0x70] sm:$0xff] }
 0x69f   : > { %3721 = vst.msk [vmem:[#allocation3 + $0x78] sm:$0xf] %vm1980_vm1, %v3719_v38  ;;  %4165 = vrot.lane.b32.xlu1 %v4156_v0, %s7047_s5  ;;  %4169 = vrot.lane.b32.xlu0 %v6606_v11, %s7018_s3  ;;  %v4175_v0 = vld [vmem:[#allocation2 + $0x43] sm:$0x1] }
 0x6a0   : > { %v4183_v38 = vrot.slane %v4175_v0, 6  ;;  %v4194_v60 = vrot.slane %v4175_v0, 2 }
 0x6a1   : > { %v3715_v26 = vpop.permute.xlu0 %3714  ;;  %v3133_v52 = vpop.permute.xlu1 %3132 }
 0x6a2   : > { %3717 = vst.msk [vmem:[#allocation3 + $0x68] sm:$0xf0] %vm7060_vm10, %v3715_v26  ;;  %vm7064_vm10 = vmmov %vm7062_vm12  ;;  %v4195_v9 = vsel %vm957_vm5, %v4194_v60, %v4193_v7 }
 0x6a3   : > { %3135 = vst.msk [vmem:[#allocation3 + $0x88] sm:$0xf] %vm7061_vm0, %v3133_v52  ;;  %3583 = vrot.lane.b32.xlu0 %v3582_v24, %s7000_s27  ;;  %3572 = vrot.lane.b32.xlu1 %v6667_v3, %s6999_s2  ;;  %vm7065_vm0 = vcmask 519552   ;;  %v4184_v52 = vsel %vm944_vm7, %v4183_v38, %v4182_v12  ;;  %v4197_v54 = vsel %vm960_vm8, %v4196_v55, %v4195_v9  ;;  %vm7072_vm5 = vmmov %vm7070_vm4  ;;  %vm7073_vm7 = vcmask 388352  }
 0x6a4   : > { %v4186_v10 = vsel %vm947_vm9, %v4185_v18, %v4184_v52  ;;  %vm7074_vm8 = vcmask 392452   ;;  %vm7075_vm9 = vmmov %vm7073_vm7  ;;  %v4227_v18 = vld [vmem:[#allocation3 + $0x60] sm:$0xff] }
 0x6a5   : > { %v3137_v29 = vpop.permute.xlu0 %3136  ;;  %v3141_v30 = vpop.permute.xlu1 %3140  ;;  %v4559_v55 = vpack.c.bf16 %v4229_v62, %v4227_v18 }
 0x6a6   : > { %3139 = vst.msk [vmem:[#allocation3 + $0x88] sm:$0xf0] %vm7062_vm12, %v3137_v29  ;;  %vm7066_vm12 = vcmask 523652  }
 0x6a7   : > { %3143 = vst.msk [vmem:[#allocation3 + $0x98] sm:$0xf] %vm7063_vm11, %v3141_v30  ;;  %3591 = vrot.lane.b32.xlu0 %v3582_v24, %s7002_s19  ;;  %3587 = vrot.lane.b32.xlu1 %v6667_v3, %s7001_s20  ;;  %vm7067_vm11 = vmmov %vm7065_vm0  ;;  %s7076_s19 = sld [smem:[#allocation24_spill]] }
 0x6a9   : > { %v3145_v36 = vpop.permute.xlu0 %3144  ;;  %v3338_v11 = vpop.permute.xlu1 %3337 }
 0x6aa   : > { %3147 = vst.msk [vmem:[#allocation3 + $0x98] sm:$0xf0] %vm7064_vm10, %v3145_v36  ;;  %vm7068_vm10 = vmmov %vm7066_vm12 }
 0x6ab   : > { %3340 = vst.msk [vmem:[#allocation3 + $0x88] sm:$0xf] %vm7065_vm0, %v3338_v11  ;;  %3788 = vrot.lane.b32.xlu0 %v3787_v35, %s7004_s21  ;;  %3777 = vrot.lane.b32.xlu1 %v6685_v40, %s7003_s24  ;;  %vm7069_vm0 = vcmask 257152   ;;  %s7099_s24 = sld [smem:[#allocation23_spill]] }
 0x6ac   : > { %vm7071_vm6 = vmmov %vm7069_vm0 }
 0x6ad   : > { %v3342_v46 = vpop.permute.xlu0 %3341  ;;  %v3346_v42 = vpop.permute.xlu1 %3345  ;;  %v4241_v29 = vld [vmem:[%s7076_s19] sm:$0xf] }
 0x6ae   : > { %3344 = vst.msk [vmem:[#allocation3 + $0x88] sm:$0xf0] %vm7066_vm12, %v3342_v46  ;;  %vm7077_vm12 = vmmov %vm7074_vm8 }
 0x6af   : > { %3348 = vst.msk [vmem:[#allocation3 + $0x98] sm:$0xf] %vm7067_vm11, %v3346_v42  ;;  %3796 = vrot.lane.b32.xlu0 %v3787_v35, %s7006_s18  ;;  %3792 = vrot.lane.b32.xlu1 %v6685_v40, %s7005_s6  ;;  %v4221_v35 = vld [vmem:[#allocation3 + $0x30] sm:$0xff] }
 0x6b0   : > { %v4551_v46 = vpack.c.bf16 %v4221_v35, %v4219_v19 }
 0x6b1   : > { %v3350_v57 = vpop.permute.xlu0 %3349  ;;  %v3543_v17 = vpop.permute.xlu1 %3542 }
 0x6b2   : > { %3352 = vst.msk [vmem:[#allocation3 + $0x98] sm:$0xf0] %vm7068_vm10, %v3350_v57 }
 0x6b3   : > { %3545 = vst.msk [vmem:[#allocation3 + $0x88] sm:$0xf] %vm1773_vm2, %v3543_v17  ;;  %3993 = vrot.lane.b32.xlu0 %v3992_v48, %s6978_s15  ;;  %3982 = vrot.lane.b32.xlu1 %v3981_v32, %s7008_s30  ;;  %s7100_s30 = sld [smem:[#allocation17_spill]] }
 0x6b5   : > { %v3547_v41 = vpop.permute.xlu0 %3546  ;;  %v3551_v15 = vpop.permute.xlu1 %3550 }
 0x6b6   : > { %3549 = vst.msk [vmem:[#allocation3 + $0x88] sm:$0xf0] %vm1785_vm3, %v3547_v41 }
 0x6b7   : > { %3553 = vst.msk [vmem:[#allocation3 + $0x98] sm:$0xf] %vm1773_vm2, %v3551_v15  ;;  %4001 = vrot.lane.b32.xlu0 %v3992_v48, %s6979_s13  ;;  %3997 = vrot.lane.b32.xlu1 %v3981_v32, %s7050_s22  ;;  %s4696_s13 = sshll.u32 %s4805_s11, 4  ;;  %s4697_s13 = int_to_ptr.vmem [resolvable:$false] %s4696_s13 }
 0x6b8   : > { %s4698_s17 = scalar_lea.vmem %s4697_s13, 256 }
 0x6b9   : > { %v3555_v22 = vpop.permute.xlu0 %3554  ;;  %v2958_v26 = vpop.permute.xlu1 %2957  ;;  %p7102_p11 = scmp.ne.s32.totalorder %s7100_s30, 0 }
 0x6ba   : > { %3557 = vst.msk [vmem:[#allocation3 + $0x98] sm:$0xf0] %vm1785_vm3, %v3555_v22 }
 0x6bb   : > { %2960 = vst.msk [vmem:[#allocation3 + $0xa8] sm:$0xf] %vm7069_vm0, %v2958_v26  ;;  %4187 = vrot.lane.b32.xlu0 %v4186_v10, %s7043_s0  ;;  %4198 = vrot.lane.b32.xlu1 %v4197_v54, %s6980_s28  ;;  %vm7078_vm0 = vmmov %vm7067_vm11 }
 0x6bd   : > { %v2969_v6 = vpop.permute.xlu0 %2968  ;;  %v2973_v24 = vpop.permute.xlu1 %2972 }
 0x6be   : > { %2971 = vst.msk [vmem:[#allocation3 + $0xa8] sm:$0xf0] %vm7070_vm4, %v2969_v6  ;;  %vm7079_vm4 = vmmov %vm7068_vm10 }
 0x6bf   : > { %2975 = vst.msk [vmem:[#allocation3 + $0xb8] sm:$0xf] %vm7071_vm6, %v2973_v24  ;;  %4202 = vrot.lane.b32.xlu0 %v4186_v10, %s7046_s1  ;;  %4206 = vrot.lane.b32.xlu1 %v4197_v54, %s7047_s5 }
 0x6c1   : > { %v2977_v14 = vpop.permute.xlu0 %2976  ;;  %v3163_v56 = vpop.permute.xlu1 %3162 }
 0x6c2   : > { %2979 = vst.msk [vmem:[#allocation3 + $0xb8] sm:$0xf0] %vm7072_vm5, %v2977_v14  ;;  %vm7080_vm5 = vmmov %vm7073_vm7  ;;  %v4233_v14 = vld [vmem:[#allocation3 + $0x90] sm:$0xff] }
 0x6c3   : > { %3165 = vst.msk [vmem:[#allocation3 + $0xa8] sm:$0xf] %vm7073_vm7, %v3163_v56  ;;  %3595 = vrot.lane.b32.xlu0 %v6667_v3, %s7013_s14  ;;  %3800 = vrot.lane.b32.xlu1 %v6685_v40, %s7014_s4  ;;  %vm7081_vm7 = vmmov %vm7078_vm0  ;;  %s7098_s4 = sld [smem:[#allocation14_spill]] }
 0x6c5   : > { %v3174_v23 = vpop.permute.xlu0 %3173  ;;  %v3178_v13 = vpop.permute.xlu1 %3177 }
 0x6c6   : > { %3176 = vst.msk [vmem:[#allocation3 + $0xa8] sm:$0xf0] %vm7074_vm8, %v3174_v23  ;;  %vm7082_vm8 = vcmask 1048452  }
 0x6c7   : > { %3180 = vst.msk [vmem:[#allocation3 + $0xb8] sm:$0xf] %vm7075_vm9, %v3178_v13  ;;  %4005 = vrot.lane.b32.xlu0 %v3981_v32, %s7017_s23  ;;  %4210 = vrot.lane.b32.xlu1 %v4186_v10, %s7018_s3  ;;  %vm7083_vm9 = vmmov %vm7082_vm8  ;;  %s7097_s3 = sld [smem:[#allocation19_spill]] }
 0x6c9   : > { %v3182_v3 = vpop.permute.xlu0 %3181  ;;  %v3368_v30 = vpop.permute.xlu1 %3367  ;;  %s4456_s6 = sshll.u32 %s7098_s4, 7 }
 0x6ca   : > { %3184 = vst.msk [vmem:[#allocation3 + $0xb8] sm:$0xf0] %vm7077_vm12, %v3182_v3  ;;  %vm7084_vm12 = vmmov %vm7082_vm8  ;;  %v4231_v3 = vld [vmem:[#allocation3 + $0x80] sm:$0xff]  ;;  %s6802_s7 = scalar_lea.hbm %s7101_s8, %s4456_s6 }
 0x6cb   : > { %3370 = vst.msk [vmem:[#allocation3 + $0xa8] sm:$0xf] %vm7067_vm11, %v3368_v30  ;;  %4244 = vperm.xlu0 %4661, %v4241_v29   ;;  %vm7085_vm11 = vmmov %vm7082_vm8  ;;  %v4563_v30 = vpack.c.bf16 %v4233_v14, %v4231_v3 }
 0x6cd   : > { %v3379_v50 = vpop.permute.xlu0 %3378  ;;  %v3383_v37 = vpop.permute.xlu1 %3382  ;;  %s4427_s27 = sshll.u32 %s7097_s3, 3  ;;  %s4335_s9 = scalar_lea.sflag [#allocation6], %s7097_s3 }
 0x6ce   : > { %3381 = vst.msk [vmem:[#allocation3 + $0xa8] sm:$0xf0] %vm7068_vm10, %v3379_v50  ;;  %vm7086_vm10 = vcmask 786052   ;;  %s242_s23 = scalar_lea.vmem [#allocation7], %s4427_s27 }
 0x6cf   : > { %3385 = vst.msk [vmem:[#allocation3 + $0xb8] sm:$0xf] %vm7078_vm0, %v3383_v37  ;;  %vm7087_vm0 = vmmov %vm7082_vm8  ;;  %s4349_s28 = sshll.u32 %s242_s23, 4  ;;  %s6804_s28 = int_to_ptr.vmem [resolvable:$true] %s4349_s28 }
 0x6d0   : > { %s4692_s10 = scalar_lea.vmem %s6804_s28, 128  ;;  %p4699_p8 = scmp.lt.s32.totalorder %s6804_s28, %s4697_s13 }
 0x6d1   : > { %v3387_v61 = vpop.permute.xlu0 %3386  ;;  %v2981_v33 = vpop.permute.xlu1 %2980  ;;  %p4693_p6 = scmp.ne.s32.totalorder %s6804_s28, %s4692_s10  ;;  %p4700_p10 = scmp.lt.s32.totalorder %s4698_s17, %s4692_s10 }
 0x6d2   : > { %3389 = vst.msk [vmem:[#allocation3 + $0xb8] sm:$0xf0] %vm7079_vm4, %v3387_v61  ;;  %vm7088_vm4 = vmmov %vm7087_vm0 }
 0x6d3   : > { %2983 = vst.msk [vmem:[#allocation3 + $0xc8] sm:$0xf] %vm7071_vm6, %v2981_v33  ;;  %vm7089_vm6 = vmmov %vm7086_vm10  ;;  %p4694_p12 = pnand %p4693_p6, %p7102_p11  ;;  %p4701_p0 = por %p4700_p10, %p4699_p8 }
 0x6d5   : > { %v3186_v31 = vpop.permute.xlu0 %3185  ;;  %v3391_v8 = vpop.permute.xlu1 %3390  ;;  %p4695_p13 = pneg %p4694_p12 }
 0x6d6   : > { %3188 = vst.msk [vmem:[#allocation3 + $0xc8] sm:$0xf] %vm7080_vm5, %v3186_v31  ;;  %vm7090_vm5 = vmmov %vm7089_vm6 }
 0x6d7   : > { %3393 = vst.msk [vmem:[#allocation3 + $0xc8] sm:$0xf] %vm7081_vm7, %v3391_v8  ;;  %vm7091_vm7 = vmmov %vm7087_vm0  ;;  %p4702_p2 = pnand %p4701_p0, %p4695_p13 }
 0x6d9   : > { %v4076_v36 = vpop.permute.xlu0 %4075  ;;  %v4066_v11 = vpop.permute.xlu1 %4065 }
 0x6da   : > { %4078 = vst.msk [vmem:[#allocation3 + $0x38] sm:$0xf] %vm2394_vm13, %v4076_v36 }
 0x6db   : > { %4068 = vst.msk [vmem:[#allocation3 + $0x28] sm:$0xf0] %vm7082_vm8, %v4066_v11  ;;  %vm7092_vm8 = vmmov %vm7087_vm0 }
 0x6dd   : > { %v4080_v58 = vpop.permute.xlu1 %4079  ;;  %v3901_v49 = vpop.permute.xlu0 %3900 }
 0x6de   : > { %4082 = vst.msk [vmem:[#allocation3 + $0x38] sm:$0xf0] %vm7083_vm9, %v4080_v58  ;;  %vm7093_vm9 = vmmov %vm7090_vm5 }
 0x6df   : > { %3903 = vst.msk [vmem:[#allocation3 + $0x58] sm:$0xf] %vm2187_vm15, %v3901_v49 }
 0x6e1   : > { %v3912_v39 = vpop.permute.xlu1 %3911  ;;  %v4084_v27 = vpop.permute.xlu0 %4083 }
 0x6e2   : > { %3914 = vst.msk [vmem:[#allocation3 + $0x58] sm:$0xf0] %vm2199_vm14, %v3912_v39  ;;  %v4220_v16 = vld [vmem:[#allocation3 + $0x28] sm:$0xff] }
 0x6e3   : > { %4086 = vst.msk [vmem:[#allocation3 + $0x48] sm:$0xf] %vm2394_vm13, %v4084_v27 }
 0x6e5   : > { %v4088_v40 = vpop.permute.xlu1 %4087  ;;  %v4106_v59 = vpop.permute.xlu0 %4105  ;;  %v4222_v1 = vld [vmem:[#allocation3 + $0x38] sm:$0xff] }
 0x6e6   : > { %4090 = vst.msk [vmem:[#allocation3 + $0x48] sm:$0xf0] %vm7084_vm12, %v4088_v40  ;;  %v4549_v63 = vpack.c.bf16 %v4222_v1, %v4220_v16  ;;  %vm7094_vm12 = vmmov %vm7090_vm5 }
 0x6e7   : > { %4108 = vst.msk [vmem:[#allocation3 + $0x58] sm:$0xf] %vm2394_vm13, %v4106_v59  ;;  %v4237_v59 = vld [vmem:[#allocation3 + $0xb0] sm:$0xff] }
 0x6e8   : > { %4550 = vmatprep.subr.bf16.mxu1 %v4549_v63 }
 0x6e9   : > { %4552 = vmatpush1.bf16.msra.mxu1 %v4551_v46  ;;  %v4117_v42 = vpop.permute.xlu1 %4116  ;;  %v3738_v44 = vpop.permute.xlu0 %3737 }
 0x6ea   : > { %4119 = vst.msk [vmem:[#allocation3 + $0x58] sm:$0xf0] %vm7085_vm11, %v4117_v42  ;;  %vm7096_vm11 = vmmov %vm7087_vm0  ;;  %v4235_v42 = vld [vmem:[#allocation3 + $0xa0] sm:$0xff] }
 0x6eb   : > { %3740 = vst.msk [vmem:[#allocation3 + $0x78] sm:$0xf0] %vm7086_vm10, %v3738_v44  ;;  %v4567_v44 = vpack.c.bf16 %v4237_v59, %v4235_v42 }
 0x6ed   : > { %v3916_v53 = vpop.permute.xlu1 %3915  ;;  %v3920_v47 = vpop.permute.xlu0 %3919  ;;  %v4224_v57 = vld [vmem:[#allocation3 + $0x48] sm:$0xff] }
 0x6ee   : > { %3918 = vst.msk [vmem:[#allocation3 + $0x68] sm:$0xf] %vm2187_vm15, %v3916_v53 }
 0x6ef   : > { %3922 = vst.msk [vmem:[#allocation3 + $0x68] sm:$0xf0] %vm2199_vm14, %v3920_v47  ;;  %v4214_v47 = vld [vmem:[%s7099_s24] sm:$0xf] }
 0x6f1   : > { %v3924_v25 = vpop.permute.xlu1 %3923  ;;  %v3943_v21 = vpop.permute.xlu0 %3942  ;;  %v4226_v17 = vld [vmem:[#allocation3 + $0x58] sm:$0xff] }
 0x6f2   : > { %3926 = vst.msk [vmem:[#allocation3 + $0x78] sm:$0xf] %vm2187_vm15, %v3924_v25  ;;  %v4553_v45 = vpack.c.bf16 %v4226_v17, %v4224_v57 }
 0x6f3   : > { %3945 = vst.msk [vmem:[#allocation3 + $0x78] sm:$0xf0] %vm2199_vm14, %v3943_v21 }
 0x6f4   : > { %4554 = vmatprep.subr.bf16.mxu1 %v4553_v45 }
 0x6f5   : > { %v4121_v34 = vpop.permute.xlu1 %4120  ;;  %4556 = vmatpush1.bf16.msra.mxu1 %v4555_v4  ;;  %v4125_v48 = vpop.permute.xlu0 %4124 }
 0x6f6   : > { %4123 = vst.msk [vmem:[#allocation3 + $0x68] sm:$0xf] %vm2394_vm13, %v4121_v34 }
 0x6f7   : > { %4127 = vst.msk [vmem:[#allocation3 + $0x68] sm:$0xf0] %vm7087_vm0, %v4125_v48 }
 0x6f9   : > { %v4129_v32 = vpop.permute.xlu1 %4128  ;;  %v4148_v0 = vpop.permute.xlu0 %4147 }
 0x6fa   : > { %4131 = vst.msk [vmem:[#allocation3 + $0x78] sm:$0xf] %vm2394_vm13, %v4129_v32 }
 0x6fb   : > { %4150 = vst.msk [vmem:[#allocation3 + $0x78] sm:$0xf0] %vm7088_vm4, %v4148_v0 }
 0x6fd   : > { %v3748_v2 = vpop.permute.xlu1 %3747  ;;  %v3752_v5 = vpop.permute.xlu0 %3751 }
 0x6fe   : > { %3750 = vst.msk [vmem:[#allocation3 + $0x88] sm:$0xf] %vm1980_vm1, %v3748_v2  ;;  %v4228_v15 = vld [vmem:[#allocation3 + $0x68] sm:$0xff] }
 0x6ff   : > { %3754 = vst.msk [vmem:[#allocation3 + $0x88] sm:$0xf0] %vm7089_vm6, %v3752_v5 }
 0x701   : > { %v3756_v43 = vpop.permute.xlu1 %3755  ;;  %v3760_v41 = vpop.permute.xlu0 %3759 }
 0x702   : > { %v4230_v38 = vld [vmem:[#allocation3 + $0x78] sm:$0xff]  ;;  %3758 = vst.msk [vmem:[#allocation3 + $0x98] sm:$0xf] %vm1980_vm1, %v3756_v43 }
 0x703   : > { %3762 = vst.msk [vmem:[#allocation3 + $0x98] sm:$0xf0] %vm7090_vm5, %v3760_v41  ;;  %v4557_v60 = vpack.c.bf16 %v4230_v38, %v4228_v15 }
 0x705   : > { %4558 = vmatprep.subr.bf16.mxu1 %v4557_v60  ;;  %v3953_v12 = vpop.permute.xlu1 %3952  ;;  %v3957_v7 = vpop.permute.xlu0 %3956 }
 0x706   : > { %4560 = vmatpush1.bf16.msra.mxu1 %v4559_v55  ;;  %3955 = vst.msk [vmem:[#allocation3 + $0x88] sm:$0xf] %vm2187_vm15, %v3953_v12 }
 0x707   : > { %3959 = vst.msk [vmem:[#allocation3 + $0x88] sm:$0xf0] %vm2199_vm14, %v3957_v7 }
 0x709   : > { %v3961_v22 = vpop.permute.xlu1 %3960  ;;  %v3965_v26 = vpop.permute.xlu0 %3964 }
 0x70a   : > { %3963 = vst.msk [vmem:[#allocation3 + $0x98] sm:$0xf] %vm2187_vm15, %v3961_v22 }
 0x70b   : > { %3967 = vst.msk [vmem:[#allocation3 + $0x98] sm:$0xf0] %vm2199_vm14, %v3965_v26 }
 0x70d   : > { %v4158_v52 = vpop.permute.xlu1 %4157  ;;  %v4162_v9 = vpop.permute.xlu0 %4161 }
 0x70e   : > { %4160 = vst.msk [vmem:[#allocation3 + $0x88] sm:$0xf] %vm2394_vm13, %v4158_v52 }
 0x70f   : > { %4164 = vst.msk [vmem:[#allocation3 + $0x88] sm:$0xf0] %vm7091_vm7, %v4162_v9 }
 0x711   : > { %v4166_v10 = vpop.permute.xlu1 %4165  ;;  %v4170_v54 = vpop.permute.xlu0 %4169 }
 0x712   : > { %4168 = vst.msk [vmem:[#allocation3 + $0x98] sm:$0xf] %vm2394_vm13, %v4166_v10 }
 0x713   : > { %4172 = vst.msk [vmem:[#allocation3 + $0x98] sm:$0xf0] %vm7092_vm8, %v4170_v54 }
 0x715   : > { %v3584_v6 = vpop.permute.xlu0 %3583  ;;  %v3573_v24 = vpop.permute.xlu1 %3572 }
 0x716   : > { %3586 = vst.msk [vmem:[#allocation3 + $0xa8] sm:$0xf0] %vm1785_vm3, %v3584_v6  ;;  %v4232_v13 = vld [vmem:[#allocation3 + $0x88] sm:$0xff] }
 0x717   : > { %3575 = vst.msk [vmem:[#allocation3 + $0xa8] sm:$0xf] %vm1773_vm2, %v3573_v24 }
 0x719   : > { %v3592_v56 = vpop.permute.xlu0 %3591  ;;  %v3588_v23 = vpop.permute.xlu1 %3587 }
 0x71a   : > { %v4234_v28 = vld [vmem:[#allocation3 + $0x98] sm:$0xff]  ;;  %3594 = vst.msk [vmem:[#allocation3 + $0xb8] sm:$0xf0] %vm1785_vm3, %v3592_v56  ;;  %vm7095_vm3 = vmmov %vm7087_vm0 }
 0x71b   : > { %3590 = vst.msk [vmem:[#allocation3 + $0xb8] sm:$0xf] %vm1773_vm2, %v3588_v23  ;;  %v4561_v29 = vpack.c.bf16 %v4234_v28, %v4232_v13 }
 0x71d   : > { %4562 = vmatprep.subr.bf16.mxu1 %v4561_v29  ;;  %v3789_v50 = vpop.permute.xlu0 %3788  ;;  %v3778_v37 = vpop.permute.xlu1 %3777 }
 0x71e   : > { %4564 = vmatpush1.bf16.msra.mxu1 %v4563_v30  ;;  %3791 = vst.msk [vmem:[#allocation3 + $0xa8] sm:$0xf0] %vm7093_vm9, %v3789_v50 }
 0x71f   : > { %3780 = vst.msk [vmem:[#allocation3 + $0xa8] sm:$0xf] %vm1980_vm1, %v3778_v37 }
 0x721   : > { %v3797_v61 = vpop.permute.xlu0 %3796  ;;  %v3793_v33 = vpop.permute.xlu1 %3792 }
 0x722   : > { %3799 = vst.msk [vmem:[#allocation3 + $0xb8] sm:$0xf0] %vm7094_vm12, %v3797_v61 }
 0x723   : > { %3795 = vst.msk [vmem:[#allocation3 + $0xb8] sm:$0xf] %vm1980_vm1, %v3793_v33 }
 0x725   : > { %v3994_v31 = vpop.permute.xlu0 %3993  ;;  %v3983_v8 = vpop.permute.xlu1 %3982 }
 0x726   : > { %3996 = vst.msk [vmem:[#allocation3 + $0xa8] sm:$0xf0] %vm2199_vm14, %v3994_v31 }
 0x727   : > { %3985 = vst.msk [vmem:[#allocation3 + $0xa8] sm:$0xf] %vm2187_vm15, %v3983_v8 }
 0x729   : > { %v4002_v36 = vpop.permute.xlu0 %4001  ;;  %v3998_v11 = vpop.permute.xlu1 %3997 }
 0x72a   : > { %4004 = vst.msk [vmem:[#allocation3 + $0xb8] sm:$0xf0] %vm2199_vm14, %v4002_v36  ;;  %vm4251_vm14 = vcmask 1043456  }
 0x72b   : > { %4000 = vst.msk [vmem:[#allocation3 + $0xb8] sm:$0xf] %vm2187_vm15, %v3998_v11 }
 0x72d   : > { %v4188_v58 = vpop.permute.xlu0 %4187  ;;  %v4199_v49 = vpop.permute.xlu1 %4198 }
 0x72e   : > { %4190 = vst.msk [vmem:[#allocation3 + $0xa8] sm:$0xf] %vm2394_vm13, %v4188_v58 }
 0x72f   : > { %4201 = vst.msk [vmem:[#allocation3 + $0xa8] sm:$0xf0] %vm7095_vm3, %v4199_v49 }
 0x731   : > { %v4203_v39 = vpop.permute.xlu0 %4202  ;;  %v4207_v27 = vpop.permute.xlu1 %4206 }
 0x732   : > { %4205 = vst.msk [vmem:[#allocation3 + $0xb8] sm:$0xf] %vm2394_vm13, %v4203_v39 }
 0x733   : > { %4209 = vst.msk [vmem:[#allocation3 + $0xb8] sm:$0xf0] %vm7096_vm11, %v4207_v27 }
 0x735   : > { %v3596_v35 = vpop.permute.xlu0 %3595  ;;  %v3801_v40 = vpop.permute.xlu1 %3800 }
 0x736   : > { %3598 = vst.msk [vmem:[#allocation3 + $0xc8] sm:$0xf] %vm1773_vm2, %v3596_v35  ;;  %v4236_v63 = vld [vmem:[#allocation3 + $0xa8] sm:$0xff] }
 0x737   : > { %3803 = vst.msk [vmem:[#allocation3 + $0xc8] sm:$0xf] %vm1980_vm1, %v3801_v40  ;;  %vm4247_vm1 = vcmask 818176  }
 0x739   : > { %v4006_v16 = vpop.permute.xlu0 %4005  ;;  %v4211_v1 = vpop.permute.xlu1 %4210 }
 0x73a   : > { %v4238_v19 = vld [vmem:[#allocation3 + $0xb8] sm:$0xff]  ;;  %4008 = vst.msk [vmem:[#allocation3 + $0xc8] sm:$0xf] %vm2187_vm15, %v4006_v16 }
 0x73b   : > { %v4565_v46 = vpack.c.bf16 %v4238_v19, %v4236_v63  ;;  %4213 = vst.msk [vmem:[#allocation3 + $0xc8] sm:$0xf] %vm2394_vm13, %v4211_v1 }
 0x73d   : > { %4566 = vmatprep.subr.bf16.mxu1 %v4565_v46 }
 0x73e   : > { %4568 = vmatpush1.bf16.msra.mxu1 %v4567_v44 }
 0x742   : > { %v4240_v53 = vld [vmem:[#allocation3 + $0xc8] sm:$0xf] }
 0x743   : > { %4447 = vmatprep.subr.msk.mxu1 %vm4251_vm14, %v4240_v53 }
 0x744   : > { %4448 = vmatpush1.msk.msra.mxu1 %vm4251_vm14, %v4239_v20 }
 0x745   : > { %4449 = vmatmul.mubr.msk.f32.vlgmr.msra.gmra.mrb[12].mxu1 %vm4247_vm1, %v4214_v47 }
 0x74a   : > { %v4245_v25 = vpop.permute.xlu0 %4244 }
 0x818   : > { %v4324_v21 = vpop.f32.mrb[12].mxu1 }
 0x819   : > { %v4325_v57 = vadd.f32 %v4324_v21, %v4245_v25  ;;  %v4326_v17 = vpop.f32.mrb[13].mxu1 }
 0x81a   : > { %v4327_v45 = vadd.f32 %v4326_v17, %v4245_v25 }
 0x81c   : > { %v4331_v51 = vcombine.low %v4325_v57, %v4327_v45 }
 0x81e   : > { %4333 = vst [vmem:[%s242_s23] sm:$0xff] %v4331_v51 }
 0x81f   : > { %4705 = shalt.err (!%p4702_p2)
}
 0x820   : > { %s4706_s26 = scalar_lea.hbm %s6802_s7, 128  ;;  %s4710_s16 = scalar_lea.hbm %s7101_s8, 256 }
 0x821   : > { %p4707_p4 = scmp.ne.s32.totalorder %s6802_s7, %s4706_s26  ;;  %p4711_p9 = scmp.lt.u32.totalorder %s6802_s7, %s7101_s8 }
 0x822   : > { %p4712_p1 = scmp.lt.u32.totalorder %s4710_s16, %s4706_s26  ;;  %p4714_p6 = scmp.lt.u32.totalorder %s4706_s26, %s6802_s7 }
 0x823   : > { %p4708_p5 = pnand %p4707_p4, %p7102_p11 }
 0x824   : > { %p4713_p3 = por %p4712_p1, %p4711_p9 }
 0x825   : > { %p4709_p7 = pneg %p4708_p5 }
 0x826   : > { %p4715_p12 = por %p4714_p6, %p4713_p3 }
 0x828   : > { %p4716_p13 = pnand %p4715_p12, %p4709_p7 }
 0x82a   : > { %4719 = shalt.err (!%p4716_p13)
}
 0x82b   : > { %4573 = dma.vmem_to_hbm [thread:$0]  (%p7102_p11), %s6804_s28, 128, %s6802_s7, %s4335_s9  }
 0x82c PF: > { %s7103_s1 = sld [smem:[#allocation10_spill]]  ;;  %s7104_s5 = sld [smem:[#allocation18_spill]] }
 0x82d   : > { %s7105_s22 = sld [smem:[#allocation13_spill]] }
 0x832   : > { %s4361_s2 = sand.u32 1, %s7103_s1   ;;  %p7106_p8 = scmp.ne.s32.totalorder %s7104_s5, 0 }
 0x833   : > { %p7107_p10 = scmp.ge.s32.totalorder %s7105_s22, 2  ;;  %s4362_s18 = scalar_lea.sflag [#allocation6], %s4361_s2 }
 0x835   : > { %p4580_p0 = pnand %p7107_p10, %p7106_p8 }
 0x837   : > { %4741 = dma.done.wait (!%p4580_p0), %s4362_s18, 128  }
 0x838   : > { %4743 = vsyncadd (!%p4580_p0), %s4362_s18, 4294967168  ;;  %s7108_s21 = sld [smem:[#allocation15_spill]]  ;;  %s7109_s18 = sld [smem:[#allocation11_spill]] }
 0x839   : > { %s7110_s19 = sld [smem:[#allocation12_spill]]  ;;  %s7111_s20 = sld [smem:[#allocation16_spill]] }
 0x83e   : > { %p18_p2 = scmp.ge.s32.totalorder %s7108_s21, 4  }
 0x840   :  { %20 = sbr.rel (!%p18_p2) target bundleno = 12 (0xc), region = 91 }
 0x847   :  { %4367 = vsyncpa [#allocation5], 1 }
 0x848   :  { %4369 = vsyncpa [#allocation5 + $0x1], 1 }
 0x849   :  { %4370 = vsyncpa [#allocation6], 1 }
 0x84a   :  { %4372 = vsyncpa [#allocation6 + $0x1], 1 }

</bundles_post_ra>
